<compile_context>
chip_gen: v7x
topology: tpu7x:2x2x1
jax: 0.10.0
libtpu: 0.0.40
codegen_flags: <defaults>
</compile_context>

<pallas_src>
import jax
import jax.numpy as jnp
from jax.experimental import pallas as pl
from jax.experimental.pallas import tpu as pltpu


def basic_block_kernel(x_ref, w1_ref, b1_ref, w2_ref, b2_ref, o_ref,
                       xpad_ref, mid_ref, acc_ref):
    # x_ref   : (1, H, W, Cp)   f32  input image (channel-padded, no spatial pad)
    # w1_ref  : (9, Cp, Cp)     bf16 conv1 weights, BN1 scale folded, tap-major
    # b1_ref  : (1, Cp)         f32  folded BN1 bias
    # w2_ref  : (9, Cp, Cp)     bf16 conv2 weights, BN2 scale folded
    # b2_ref  : (1, Cp)         f32  folded BN2 bias
    # o_ref   : (1, H, W, Cp)   f32  output
    # xpad_ref, mid_ref : (H+2, W+2, Cp) bf16  spatially padded activations
    # acc_ref : (H*W, Cp)       f32  matmul accumulator (reused by both convs)
    H = o_ref.shape[1]
    W = o_ref.shape[2]
    Cp = o_ref.shape[3]
    Hp, Wp = H + 2, W + 2
    cdt = xpad_ref.dtype

    # Zero only the 1-pixel halo of the padded scratches.  Done every grid
    # step (a few KB) rather than once at program_id==0, so the kernel stays
    # correct when the "parallel" batch axis is sharded across TensorCores
    # (each core has its own scratch and may never see step 0).
    zrow = jnp.zeros((1, Wp, Cp), cdt)
    zcol = jnp.zeros((Hp, 1, Cp), cdt)
    for ref in (xpad_ref, mid_ref):
        ref[0:1, :, :] = zrow
        ref[Hp - 1:Hp, :, :] = zrow
        ref[:, 0:1, :] = zcol
        ref[:, Wp - 1:Wp, :] = zcol

    # Interior of the padded input (bf16 conv operand).
    xpad_ref[1:H + 1, 1:W + 1, :] = x_ref[0].astype(cdt)

    def conv3x3(src_ref, w_ref, b_ref):
        # Bias-initialized accumulation, then 9 shifted-tap matmuls, each
        # (H*W, Cp) @ (Cp, Cp) with f32 accumulation in VMEM scratch.  With Cp
        # lane-dense, the tap slices hide under each tap's MXU time.
        acc_ref[...] = jnp.broadcast_to(b_ref[...], (H * W, Cp))
        for t in range(9):
            ky, kx = divmod(t, 3)
            patch = src_ref[ky:ky + H, kx:kx + W, :]          # (H, W, Cp) bf16
            acc_ref[...] += jnp.dot(patch.reshape(H * W, Cp), w_ref[t],
                                    preferred_element_type=jnp.float32)

    # ---- conv1 (+ folded bn1 bias) + relu, re-padded into mid scratch ----
    conv3x3(xpad_ref, w1_ref, b1_ref)
    out1 = jnp.maximum(acc_ref[...], 0.0)                     # (H*W, Cp) f32
    mid_ref[1:H + 1, 1:W + 1, :] = out1.reshape(H, W, Cp).astype(cdt)

    # ---- conv2 (+ folded bn2 bias) + identity residual + relu ----
    conv3x3(mid_ref, w2_ref, b2_ref)
    out2 = acc_ref[...].reshape(H, W, Cp) + x_ref[0]          # f32 residual add
    o_ref[0] = jnp.maximum(out2, 0.0).astype(o_ref.dtype)


def basic_block_forward(x_nchw, w1_oihw, w2_oihw, scale1, bias1, scale2, bias2):
    """x_nchw: (N, C, H, W) float32.  Returns (N, C, H, W) float32."""
    N, Cin, H, W = x_nchw.shape
    C = w1_oihw.shape[0]
    assert w1_oihw.shape == (C, Cin, 3, 3) and w2_oihw.shape == (C, C, 3, 3)
    # Identity skip (downsample=None, stride=1) requires inplanes == planes.
    assert Cin == C, "identity residual requires inplanes == planes"

    f32, bf16 = jnp.float32, jnp.bfloat16
    Cp = ((C + 127) // 128) * 128          # lane-dense channel padding (>=128)
    Hp, Wp = H + 2, W + 2

    # NHWC, channel-padded input.  Kept f32 so the residual add stays exact.
    x = jnp.transpose(x_nchw, (0, 2, 3, 1)).astype(f32)
    x = jnp.pad(x, ((0, 0), (0, 0), (0, 0), (0, Cp - C)))

    def prep_w(w_oihw, scale, cin):
        # Fold the BN scale into the output-channel axis, relayout to
        # (ky, kx, in, out), zero-pad channels to Cp, flatten taps, cast bf16.
        w = w_oihw.astype(f32) * scale[:, None, None, None]
        w = jnp.transpose(w, (2, 3, 1, 0))                        # (3,3,I,O)
        w = jnp.pad(w, ((0, 0), (0, 0), (0, Cp - cin), (0, Cp - C)))
        return w.reshape(9, Cp, Cp).astype(bf16)

    w1 = prep_w(w1_oihw, scale1, Cin)
    w2 = prep_w(w2_oihw, scale2, C)
    b1 = jnp.pad(bias1.astype(f32).reshape(1, C), ((0, 0), (0, Cp - C)))
    b2 = jnp.pad(bias2.astype(f32).reshape(1, C), ((0, 0), (0, Cp - C)))

    out_nhwc = pl.pallas_call(
        basic_block_kernel,
        out_shape=jax.ShapeDtypeStruct((N, H, W, Cp), f32),
        grid_spec=pltpu.PrefetchScalarGridSpec(
            num_scalar_prefetch=0,
            grid=(N,),
            in_specs=[
                pl.BlockSpec((1, H, W, Cp), lambda n: (n, 0, 0, 0)),  # x
                pl.BlockSpec((9, Cp, Cp), lambda n: (0, 0, 0)),       # w1 slab
                pl.BlockSpec((1, Cp), lambda n: (0, 0)),              # b1
                pl.BlockSpec((9, Cp, Cp), lambda n: (0, 0, 0)),       # w2 slab
                pl.BlockSpec((1, Cp), lambda n: (0, 0)),              # b2
            ],
            out_specs=pl.BlockSpec((1, H, W, Cp), lambda n: (n, 0, 0, 0)),
            scratch_shapes=[
                pltpu.VMEM((Hp, Wp, Cp), bf16),     # padded input
                pltpu.VMEM((Hp, Wp, Cp), bf16),     # padded conv1 activations
                pltpu.VMEM((H * W, Cp), f32),       # matmul accumulator
            ],
        ),
        compiler_params=pltpu.CompilerParams(
            dimension_semantics=("parallel",)),     # batch images independent
    )(x, w1, b1, w2, b2)

    out_nhwc = out_nhwc[:, :, :, :C]                # drop channel padding
    return jnp.transpose(out_nhwc, (0, 3, 1, 2))    # back to NCHW


def _fold_bn(gamma, beta, mean, var, eps=1e-5):
    scale = gamma / jnp.sqrt(var + eps)
    bias = beta - mean * scale
    return scale, bias


def _reference_f32(x, w1, w2, s1, b1, s2, b2):
    """Plain-JAX f32 reference (matches the PyTorch module semantics)."""
    dn = jax.lax.conv_dimension_numbers(x.shape, w1.shape,
                                        ('NCHW', 'OIHW', 'NCHW'))
    y = jax.lax.conv_general_dilated(x, w1, (1, 1), ((1, 1), (1, 1)),
                                     dimension_numbers=dn)
    y = y * s1[None, :, None, None] + b1[None, :, None, None]
    y = jnp.maximum(y, 0.0)
    y = jax.lax.conv_general_dilated(y, w2, (1, 1), ((1, 1), (1, 1)),
                                     dimension_numbers=dn)
    y = y * s2[None, :, None, None] + b2[None, :, None, None]
    return jnp.maximum(y + x, 0.0)


def _reference_bf16_ops(x, w1, w2, s1, b1, s2, b2):
    """Mirrors the kernel's quantization points exactly: bf16 conv operands
    (BN scale folded into weights), f32 accumulation / bias / residual."""
    f32, bf16 = jnp.float32, jnp.bfloat16
    dn = jax.lax.conv_dimension_numbers(x.shape, w1.shape,
                                        ('NCHW', 'OIHW', 'NCHW'))
    q = lambda a: a.astype(bf16).astype(f32)
    w1q = q(w1 * s1[:, None, None, None])
    w2q = q(w2 * s2[:, None, None, None])
    y = jax.lax.conv_general_dilated(q(x), w1q, (1, 1), ((1, 1), (1, 1)),
                                     dimension_numbers=dn)
    y = jnp.maximum(y + b1[None, :, None, None], 0.0)
    y = jax.lax.conv_general_dilated(q(y), w2q, (1, 1), ((1, 1), (1, 1)),
                                     dimension_numbers=dn)
    y = y + b2[None, :, None, None]
    return jnp.maximum(y + x, 0.0)


if __name__ == "__main__":
    # BasicBlock(inplanes=4, planes=4, stride=1, downsample=None)
    N, C, H, W = 2, 4, 16, 16

    key = jax.random.PRNGKey(0)
    kx, kw1, kw2, kb1, kb2 = jax.random.split(key, 5)

    x = jax.random.normal(kx, (N, C, H, W), jnp.float32)

    fan_in = C * 3 * 3
    w1 = jax.random.normal(kw1, (C, C, 3, 3), jnp.float32) / jnp.sqrt(fan_in)
    w2 = jax.random.normal(kw2, (C, C, 3, 3), jnp.float32) / jnp.sqrt(fan_in)

    # Deterministic, non-trivial BN parameters (inference-mode, folded).
    g1, be1, m1, v1 = (1.0 + 0.1 * jax.random.normal(kb1, (4, C), jnp.float32))
    g2, be2, m2, v2 = (1.0 + 0.1 * jax.random.normal(kb2, (4, C), jnp.float32))
    v1 = jnp.abs(v1) + 0.5
    v2 = jnp.abs(v2) + 0.5
    s1, b1 = _fold_bn(g1, be1 - 1.0, m1 - 1.0, v1)
    s2, b2 = _fold_bn(g2, be2 - 1.0, m2 - 1.0, v2)

    out = basic_block_forward(x, w1, w2, s1, b1, s2, b2)
    out = jax.block_until_ready(out)
    assert out.shape == (N, C, H, W)

    # Tight check: same math as the kernel (bf16 operands, f32 accumulate).
    ref_q = _reference_bf16_ops(x, w1, w2, s1, b1, s2, b2)
    assert jnp.allclose(out, ref_q, atol=1e-2, rtol=1e-2), \
        "mismatch vs bf16-operand reference"

    # Semantic check vs the pure-f32 reference; tolerance reflects bf16
    # operand rounding (2^-8) through two chained 3x3 convolutions.
    ref = _reference_f32(x, w1, w2, s1, b1, s2, b2)
    assert jnp.allclose(out, ref, atol=5e-2, rtol=5e-2), \
        "mismatch vs f32 reference"

    print("KERNEL_OK")
</pallas_src>

<mosaic_0001>
module attributes {stable_mosaic.version = 11 : i64} {
  func.func @basic_block_kernel(%arg0: i32, %arg1: memref<1x16x16x128xf32, #tpu.memory_space<vmem>>, %arg2: memref<9x128x128xbf16, #tpu.memory_space<vmem>>, %arg3: memref<1x128xf32, #tpu.memory_space<vmem>>, %arg4: memref<9x128x128xbf16, #tpu.memory_space<vmem>>, %arg5: memref<1x128xf32, #tpu.memory_space<vmem>>, %arg6: memref<1x16x16x128xf32, #tpu.memory_space<vmem>>, %arg7: memref<18x18x128xbf16, #tpu.memory_space<vmem>>, %arg8: memref<18x18x128xbf16, #tpu.memory_space<vmem>>, %arg9: memref<256x128xf32, #tpu.memory_space<vmem>>) attributes {dimension_semantics = [#tpu.dimension_semantics<parallel>], iteration_bounds = array<i64: 2>, scalar_prefetch = 0 : i64, scratch_operands = 3 : i64, tpu.core_type = #tpu.core_type<tc>, window_params = [{transform_indices = @transform_0, window_bounds = array<i64: 1, 16, 16, 128>}, {pipeline_mode = #tpu.pipeline_mode<synchronous>, transform_indices = @transform_1, window_bounds = array<i64: 9, 128, 128>}, {pipeline_mode = #tpu.pipeline_mode<synchronous>, transform_indices = @transform_2, window_bounds = array<i64: 1, 128>}, {pipeline_mode = #tpu.pipeline_mode<synchronous>, transform_indices = @transform_3, window_bounds = array<i64: 9, 128, 128>}, {pipeline_mode = #tpu.pipeline_mode<synchronous>, transform_indices = @transform_4, window_bounds = array<i64: 1, 128>}, {transform_indices = @transform_5, window_bounds = array<i64: 1, 16, 16, 128>}]} {
    %cst = arith.constant 0.000000e+00 : bf16
    %0 = vector.broadcast %cst : bf16 to vector<1x18x128xbf16>
    %cst_0 = arith.constant 0.000000e+00 : bf16
    %1 = vector.broadcast %cst_0 : bf16 to vector<18x1x128xbf16>
    %c0 = arith.constant 0 : index
    %c0_1 = arith.constant 0 : index
    %c0_2 = arith.constant 0 : index
    %2 = vector.load %arg7[%c0, %c0_1, %c0_2] : memref<18x18x128xbf16, #tpu.memory_space<vmem>>, vector<1x18x128xbf16>
    tpu.vector_store %arg7[%c0, %c0_1, %c0_2], %0 {strides = array<i32>} : memref<18x18x128xbf16, #tpu.memory_space<vmem>>, vector<1x18x128xbf16>,
    %c17 = arith.constant 17 : index
    %c0_3 = arith.constant 0 : index
    %c0_4 = arith.constant 0 : index
    %3 = vector.load %arg7[%c17, %c0_3, %c0_4] : memref<18x18x128xbf16, #tpu.memory_space<vmem>>, vector<1x18x128xbf16>
    tpu.vector_store %arg7[%c17, %c0_3, %c0_4], %0 {strides = array<i32>} : memref<18x18x128xbf16, #tpu.memory_space<vmem>>, vector<1x18x128xbf16>,
    %c0_5 = arith.constant 0 : index
    %c0_6 = arith.constant 0 : index
    %c0_7 = arith.constant 0 : index
    %4 = vector.load %arg7[%c0_5, %c0_6, %c0_7] : memref<18x18x128xbf16, #tpu.memory_space<vmem>>, vector<18x1x128xbf16>
    tpu.vector_store %arg7[%c0_5, %c0_6, %c0_7], %1 {strides = array<i32>} : memref<18x18x128xbf16, #tpu.memory_space<vmem>>, vector<18x1x128xbf16>,
    %c0_8 = arith.constant 0 : index
    %c17_9 = arith.constant 17 : index
    %c0_10 = arith.constant 0 : index
    %5 = vector.load %arg7[%c0_8, %c17_9, %c0_10] : memref<18x18x128xbf16, #tpu.memory_space<vmem>>, vector<18x1x128xbf16>
    tpu.vector_store %arg7[%c0_8, %c17_9, %c0_10], %1 {strides = array<i32>} : memref<18x18x128xbf16, #tpu.memory_space<vmem>>, vector<18x1x128xbf16>,
    %c0_11 = arith.constant 0 : index
    %c0_12 = arith.constant 0 : index
    %c0_13 = arith.constant 0 : index
    %6 = vector.load %arg8[%c0_11, %c0_12, %c0_13] : memref<18x18x128xbf16, #tpu.memory_space<vmem>>, vector<1x18x128xbf16>
    tpu.vector_store %arg8[%c0_11, %c0_12, %c0_13], %0 {strides = array<i32>} : memref<18x18x128xbf16, #tpu.memory_space<vmem>>, vector<1x18x128xbf16>,
    %c17_14 = arith.constant 17 : index
    %c0_15 = arith.constant 0 : index
    %c0_16 = arith.constant 0 : index
    %7 = vector.load %arg8[%c17_14, %c0_15, %c0_16] : memref<18x18x128xbf16, #tpu.memory_space<vmem>>, vector<1x18x128xbf16>
    tpu.vector_store %arg8[%c17_14, %c0_15, %c0_16], %0 {strides = array<i32>} : memref<18x18x128xbf16, #tpu.memory_space<vmem>>, vector<1x18x128xbf16>,
    %c0_17 = arith.constant 0 : index
    %c0_18 = arith.constant 0 : index
    %c0_19 = arith.constant 0 : index
    %8 = vector.load %arg8[%c0_17, %c0_18, %c0_19] : memref<18x18x128xbf16, #tpu.memory_space<vmem>>, vector<18x1x128xbf16>
    tpu.vector_store %arg8[%c0_17, %c0_18, %c0_19], %1 {strides = array<i32>} : memref<18x18x128xbf16, #tpu.memory_space<vmem>>, vector<18x1x128xbf16>,
    %c0_20 = arith.constant 0 : index
    %c17_21 = arith.constant 17 : index
    %c0_22 = arith.constant 0 : index
    %9 = vector.load %arg8[%c0_20, %c17_21, %c0_22] : memref<18x18x128xbf16, #tpu.memory_space<vmem>>, vector<18x1x128xbf16>
    tpu.vector_store %arg8[%c0_20, %c17_21, %c0_22], %1 {strides = array<i32>} : memref<18x18x128xbf16, #tpu.memory_space<vmem>>, vector<18x1x128xbf16>,
    %c0_23 = arith.constant 0 : index
    %c0_24 = arith.constant 0 : index
    %c0_25 = arith.constant 0 : index
    %c0_26 = arith.constant 0 : index
    %10 = vector.load %arg1[%c0_23, %c0_24, %c0_25, %c0_26] : memref<1x16x16x128xf32, #tpu.memory_space<vmem>>, vector<1x16x16x128xf32>
    %11 = vector.shape_cast %10 : vector<1x16x16x128xf32> to vector<16x16x128xf32>
    %12 = arith.truncf %11 : vector<16x16x128xf32> to vector<16x16x128xbf16>
    %c1 = arith.constant 1 : index
    %c1_27 = arith.constant 1 : index
    %c0_28 = arith.constant 0 : index
    %13 = vector.load %arg7[%c1, %c1_27, %c0_28] : memref<18x18x128xbf16, #tpu.memory_space<vmem>>, vector<16x16x128xbf16>
    tpu.vector_store %arg7[%c1, %c1_27, %c0_28], %12 {strides = array<i32>} : memref<18x18x128xbf16, #tpu.memory_space<vmem>>, vector<16x16x128xbf16>,
    %c0_29 = arith.constant 0 : index
    %c0_30 = arith.constant 0 : index
    %14 = vector.load %arg3[%c0_29, %c0_30] : memref<1x128xf32, #tpu.memory_space<vmem>>, vector<1x128xf32>
    %15 = vector.shape_cast %14 : vector<1x128xf32> to vector<1x128xf32>
    %16 = vector.broadcast %15 : vector<1x128xf32> to vector<256x128xf32>
    %c0_31 = arith.constant 0 : index
    %c0_32 = arith.constant 0 : index
    %17 = vector.load %arg9[%c0_31, %c0_32] : memref<256x128xf32, #tpu.memory_space<vmem>>, vector<256x128xf32>
    tpu.vector_store %arg9[%c0_31, %c0_32], %16 {strides = array<i32>} : memref<256x128xf32, #tpu.memory_space<vmem>>, vector<256x128xf32>,
    %c0_33 = arith.constant 0 : index
    %c0_34 = arith.constant 0 : index
    %c0_35 = arith.constant 0 : index
    %18 = vector.load %arg7[%c0_33, %c0_34, %c0_35] : memref<18x18x128xbf16, #tpu.memory_space<vmem>>, vector<16x16x128xbf16>
    %c0_36 = arith.constant 0 : index
    %c0_37 = arith.constant 0 : index
    %19 = vector.load %arg9[%c0_36, %c0_37] : memref<256x128xf32, #tpu.memory_space<vmem>>, vector<256x128xf32>
    %20 = vector.shape_cast %18 : vector<16x16x128xbf16> to vector<256x128xbf16>
    %c0_38 = arith.constant 0 : index
    %c0_39 = arith.constant 0 : index
    %c0_40 = arith.constant 0 : index
    %21 = vector.load %arg2[%c0_38, %c0_39, %c0_40] : memref<9x128x128xbf16, #tpu.memory_space<vmem>>, vector<1x128x128xbf16>
    %22 = vector.shape_cast %21 : vector<1x128x128xbf16> to vector<128x128xbf16>
    %cst_41 = arith.constant dense<0.000000e+00> : vector<256x128xf32>
    %23 = tpu.matmul %20, %22, %cst_41 {dimension_numbers = #tpu.dot_dimension_numbers<[1], [0], [0], [1], [0, 0, 1, 1], [], []>} : vector<256x128xbf16>, vector<128x128xbf16>, vector<256x128xf32> -> vector<256x128xf32>
    %24 = arith.addf %19, %23 : vector<256x128xf32>
    %c0_42 = arith.constant 0 : index
    %c0_43 = arith.constant 0 : index
    %25 = vector.load %arg9[%c0_42, %c0_43] : memref<256x128xf32, #tpu.memory_space<vmem>>, vector<256x128xf32>
    tpu.vector_store %arg9[%c0_42, %c0_43], %24 {strides = array<i32>} : memref<256x128xf32, #tpu.memory_space<vmem>>, vector<256x128xf32>,
    %c0_44 = arith.constant 0 : index
    %c1_45 = arith.constant 1 : index
    %c0_46 = arith.constant 0 : index
    %26 = vector.load %arg7[%c0_44, %c1_45, %c0_46] : memref<18x18x128xbf16, #tpu.memory_space<vmem>>, vector<16x16x128xbf16>
    %c0_47 = arith.constant 0 : index
    %c0_48 = arith.constant 0 : index
    %27 = vector.load %arg9[%c0_47, %c0_48] : memref<256x128xf32, #tpu.memory_space<vmem>>, vector<256x128xf32>
    %28 = vector.shape_cast %26 : vector<16x16x128xbf16> to vector<256x128xbf16>
    %c1_49 = arith.constant 1 : index
    %c0_50 = arith.constant 0 : index
    %c0_51 = arith.constant 0 : index
    %29 = vector.load %arg2[%c1_49, %c0_50, %c0_51] : memref<9x128x128xbf16, #tpu.memory_space<vmem>>, vector<1x128x128xbf16>
    %30 = vector.shape_cast %29 : vector<1x128x128xbf16> to vector<128x128xbf16>
    %cst_52 = arith.constant dense<0.000000e+00> : vector<256x128xf32>
    %31 = tpu.matmul %28, %30, %cst_52 {dimension_numbers = #tpu.dot_dimension_numbers<[1], [0], [0], [1], [0, 0, 1, 1], [], []>} : vector<256x128xbf16>, vector<128x128xbf16>, vector<256x128xf32> -> vector<256x128xf32>
    %32 = arith.addf %27, %31 : vector<256x128xf32>
    %c0_53 = arith.constant 0 : index
    %c0_54 = arith.constant 0 : index
    %33 = vector.load %arg9[%c0_53, %c0_54] : memref<256x128xf32, #tpu.memory_space<vmem>>, vector<256x128xf32>
    tpu.vector_store %arg9[%c0_53, %c0_54], %32 {strides = array<i32>} : memref<256x128xf32, #tpu.memory_space<vmem>>, vector<256x128xf32>,
    %c0_55 = arith.constant 0 : index
    %c2 = arith.constant 2 : index
    %c0_56 = arith.constant 0 : index
    %34 = vector.load %arg7[%c0_55, %c2, %c0_56] : memref<18x18x128xbf16, #tpu.memory_space<vmem>>, vector<16x16x128xbf16>
    %c0_57 = arith.constant 0 : index
    %c0_58 = arith.constant 0 : index
    %35 = vector.load %arg9[%c0_57, %c0_58] : memref<256x128xf32, #tpu.memory_space<vmem>>, vector<256x128xf32>
    %36 = vector.shape_cast %34 : vector<16x16x128xbf16> to vector<256x128xbf16>
    %c2_59 = arith.constant 2 : index
    %c0_60 = arith.constant 0 : index
    %c0_61 = arith.constant 0 : index
    %37 = vector.load %arg2[%c2_59, %c0_60, %c0_61] : memref<9x128x128xbf16, #tpu.memory_space<vmem>>, vector<1x128x128xbf16>
    %38 = vector.shape_cast %37 : vector<1x128x128xbf16> to vector<128x128xbf16>
    %cst_62 = arith.constant dense<0.000000e+00> : vector<256x128xf32>
    %39 = tpu.matmul %36, %38, %cst_62 {dimension_numbers = #tpu.dot_dimension_numbers<[1], [0], [0], [1], [0, 0, 1, 1], [], []>} : vector<256x128xbf16>, vector<128x128xbf16>, vector<256x128xf32> -> vector<256x128xf32>
    %40 = arith.addf %35, %39 : vector<256x128xf32>
    %c0_63 = arith.constant 0 : index
    %c0_64 = arith.constant 0 : index
    %41 = vector.load %arg9[%c0_63, %c0_64] : memref<256x128xf32, #tpu.memory_space<vmem>>, vector<256x128xf32>
    tpu.vector_store %arg9[%c0_63, %c0_64], %40 {strides = array<i32>} : memref<256x128xf32, #tpu.memory_space<vmem>>, vector<256x128xf32>,
    %c1_65 = arith.constant 1 : index
    %c0_66 = arith.constant 0 : index
    %c0_67 = arith.constant 0 : index
    %42 = vector.load %arg7[%c1_65, %c0_66, %c0_67] : memref<18x18x128xbf16, #tpu.memory_space<vmem>>, vector<16x16x128xbf16>
    %c0_68 = arith.constant 0 : index
    %c0_69 = arith.constant 0 : index
    %43 = vector.load %arg9[%c0_68, %c0_69] : memref<256x128xf32, #tpu.memory_space<vmem>>, vector<256x128xf32>
    %44 = vector.shape_cast %42 : vector<16x16x128xbf16> to vector<256x128xbf16>
    %c3 = arith.constant 3 : index
    %c0_70 = arith.constant 0 : index
    %c0_71 = arith.constant 0 : index
    %45 = vector.load %arg2[%c3, %c0_70, %c0_71] : memref<9x128x128xbf16, #tpu.memory_space<vmem>>, vector<1x128x128xbf16>
    %46 = vector.shape_cast %45 : vector<1x128x128xbf16> to vector<128x128xbf16>
    %cst_72 = arith.constant dense<0.000000e+00> : vector<256x128xf32>
    %47 = tpu.matmul %44, %46, %cst_72 {dimension_numbers = #tpu.dot_dimension_numbers<[1], [0], [0], [1], [0, 0, 1, 1], [], []>} : vector<256x128xbf16>, vector<128x128xbf16>, vector<256x128xf32> -> vector<256x128xf32>
    %48 = arith.addf %43, %47 : vector<256x128xf32>
    %c0_73 = arith.constant 0 : index
    %c0_74 = arith.constant 0 : index
    %49 = vector.load %arg9[%c0_73, %c0_74] : memref<256x128xf32, #tpu.memory_space<vmem>>, vector<256x128xf32>
    tpu.vector_store %arg9[%c0_73, %c0_74], %48 {strides = array<i32>} : memref<256x128xf32, #tpu.memory_space<vmem>>, vector<256x128xf32>,
    %c1_75 = arith.constant 1 : index
    %c1_76 = arith.constant 1 : index
    %c0_77 = arith.constant 0 : index
    %50 = vector.load %arg7[%c1_75, %c1_76, %c0_77] : memref<18x18x128xbf16, #tpu.memory_space<vmem>>, vector<16x16x128xbf16>
    %c0_78 = arith.constant 0 : index
    %c0_79 = arith.constant 0 : index
    %51 = vector.load %arg9[%c0_78, %c0_79] : memref<256x128xf32, #tpu.memory_space<vmem>>, vector<256x128xf32>
    %52 = vector.shape_cast %50 : vector<16x16x128xbf16> to vector<256x128xbf16>
    %c4 = arith.constant 4 : index
    %c0_80 = arith.constant 0 : index
    %c0_81 = arith.constant 0 : index
    %53 = vector.load %arg2[%c4, %c0_80, %c0_81] : memref<9x128x128xbf16, #tpu.memory_space<vmem>>, vector<1x128x128xbf16>
    %54 = vector.shape_cast %53 : vector<1x128x128xbf16> to vector<128x128xbf16>
    %cst_82 = arith.constant dense<0.000000e+00> : vector<256x128xf32>
    %55 = tpu.matmul %52, %54, %cst_82 {dimension_numbers = #tpu.dot_dimension_numbers<[1], [0], [0], [1], [0, 0, 1, 1], [], []>} : vector<256x128xbf16>, vector<128x128xbf16>, vector<256x128xf32> -> vector<256x128xf32>
    %56 = arith.addf %51, %55 : vector<256x128xf32>
    %c0_83 = arith.constant 0 : index
    %c0_84 = arith.constant 0 : index
    %57 = vector.load %arg9[%c0_83, %c0_84] : memref<256x128xf32, #tpu.memory_space<vmem>>, vector<256x128xf32>
    tpu.vector_store %arg9[%c0_83, %c0_84], %56 {strides = array<i32>} : memref<256x128xf32, #tpu.memory_space<vmem>>, vector<256x128xf32>,
    %c1_85 = arith.constant 1 : index
    %c2_86 = arith.constant 2 : index
    %c0_87 = arith.constant 0 : index
    %58 = vector.load %arg7[%c1_85, %c2_86, %c0_87] : memref<18x18x128xbf16, #tpu.memory_space<vmem>>, vector<16x16x128xbf16>
    %c0_88 = arith.constant 0 : index
    %c0_89 = arith.constant 0 : index
    %59 = vector.load %arg9[%c0_88, %c0_89] : memref<256x128xf32, #tpu.memory_space<vmem>>, vector<256x128xf32>
    %60 = vector.shape_cast %58 : vector<16x16x128xbf16> to vector<256x128xbf16>
    %c5 = arith.constant 5 : index
    %c0_90 = arith.constant 0 : index
    %c0_91 = arith.constant 0 : index
    %61 = vector.load %arg2[%c5, %c0_90, %c0_91] : memref<9x128x128xbf16, #tpu.memory_space<vmem>>, vector<1x128x128xbf16>
    %62 = vector.shape_cast %61 : vector<1x128x128xbf16> to vector<128x128xbf16>
    %cst_92 = arith.constant dense<0.000000e+00> : vector<256x128xf32>
    %63 = tpu.matmul %60, %62, %cst_92 {dimension_numbers = #tpu.dot_dimension_numbers<[1], [0], [0], [1], [0, 0, 1, 1], [], []>} : vector<256x128xbf16>, vector<128x128xbf16>, vector<256x128xf32> -> vector<256x128xf32>
    %64 = arith.addf %59, %63 : vector<256x128xf32>
    %c0_93 = arith.constant 0 : index
    %c0_94 = arith.constant 0 : index
    %65 = vector.load %arg9[%c0_93, %c0_94] : memref<256x128xf32, #tpu.memory_space<vmem>>, vector<256x128xf32>
    tpu.vector_store %arg9[%c0_93, %c0_94], %64 {strides = array<i32>} : memref<256x128xf32, #tpu.memory_space<vmem>>, vector<256x128xf32>,
    %c2_95 = arith.constant 2 : index
    %c0_96 = arith.constant 0 : index
    %c0_97 = arith.constant 0 : index
    %66 = vector.load %arg7[%c2_95, %c0_96, %c0_97] : memref<18x18x128xbf16, #tpu.memory_space<vmem>>, vector<16x16x128xbf16>
    %c0_98 = arith.constant 0 : index
    %c0_99 = arith.constant 0 : index
    %67 = vector.load %arg9[%c0_98, %c0_99] : memref<256x128xf32, #tpu.memory_space<vmem>>, vector<256x128xf32>
    %68 = vector.shape_cast %66 : vector<16x16x128xbf16> to vector<256x128xbf16>
    %c6 = arith.constant 6 : index
    %c0_100 = arith.constant 0 : index
    %c0_101 = arith.constant 0 : index
    %69 = vector.load %arg2[%c6, %c0_100, %c0_101] : memref<9x128x128xbf16, #tpu.memory_space<vmem>>, vector<1x128x128xbf16>
    %70 = vector.shape_cast %69 : vector<1x128x128xbf16> to vector<128x128xbf16>
    %cst_102 = arith.constant dense<0.000000e+00> : vector<256x128xf32>
    %71 = tpu.matmul %68, %70, %cst_102 {dimension_numbers = #tpu.dot_dimension_numbers<[1], [0], [0], [1], [0, 0, 1, 1], [], []>} : vector<256x128xbf16>, vector<128x128xbf16>, vector<256x128xf32> -> vector<256x128xf32>
    %72 = arith.addf %67, %71 : vector<256x128xf32>
    %c0_103 = arith.constant 0 : index
    %c0_104 = arith.constant 0 : index
    %73 = vector.load %arg9[%c0_103, %c0_104] : memref<256x128xf32, #tpu.memory_space<vmem>>, vector<256x128xf32>
    tpu.vector_store %arg9[%c0_103, %c0_104], %72 {strides = array<i32>} : memref<256x128xf32, #tpu.memory_space<vmem>>, vector<256x128xf32>,
    %c2_105 = arith.constant 2 : index
    %c1_106 = arith.constant 1 : index
    %c0_107 = arith.constant 0 : index
    %74 = vector.load %arg7[%c2_105, %c1_106, %c0_107] : memref<18x18x128xbf16, #tpu.memory_space<vmem>>, vector<16x16x128xbf16>
    %c0_108 = arith.constant 0 : index
    %c0_109 = arith.constant 0 : index
    %75 = vector.load %arg9[%c0_108, %c0_109] : memref<256x128xf32, #tpu.memory_space<vmem>>, vector<256x128xf32>
    %76 = vector.shape_cast %74 : vector<16x16x128xbf16> to vector<256x128xbf16>
    %c7 = arith.constant 7 : index
    %c0_110 = arith.constant 0 : index
    %c0_111 = arith.constant 0 : index
    %77 = vector.load %arg2[%c7, %c0_110, %c0_111] : memref<9x128x128xbf16, #tpu.memory_space<vmem>>, vector<1x128x128xbf16>
    %78 = vector.shape_cast %77 : vector<1x128x128xbf16> to vector<128x128xbf16>
    %cst_112 = arith.constant dense<0.000000e+00> : vector<256x128xf32>
    %79 = tpu.matmul %76, %78, %cst_112 {dimension_numbers = #tpu.dot_dimension_numbers<[1], [0], [0], [1], [0, 0, 1, 1], [], []>} : vector<256x128xbf16>, vector<128x128xbf16>, vector<256x128xf32> -> vector<256x128xf32>
    %80 = arith.addf %75, %79 : vector<256x128xf32>
    %c0_113 = arith.constant 0 : index
    %c0_114 = arith.constant 0 : index
    %81 = vector.load %arg9[%c0_113, %c0_114] : memref<256x128xf32, #tpu.memory_space<vmem>>, vector<256x128xf32>
    tpu.vector_store %arg9[%c0_113, %c0_114], %80 {strides = array<i32>} : memref<256x128xf32, #tpu.memory_space<vmem>>, vector<256x128xf32>,
    %c2_115 = arith.constant 2 : index
    %c2_116 = arith.constant 2 : index
    %c0_117 = arith.constant 0 : index
    %82 = vector.load %arg7[%c2_115, %c2_116, %c0_117] : memref<18x18x128xbf16, #tpu.memory_space<vmem>>, vector<16x16x128xbf16>
    %c0_118 = arith.constant 0 : index
    %c0_119 = arith.constant 0 : index
    %83 = vector.load %arg9[%c0_118, %c0_119] : memref<256x128xf32, #tpu.memory_space<vmem>>, vector<256x128xf32>
    %84 = vector.shape_cast %82 : vector<16x16x128xbf16> to vector<256x128xbf16>
    %c8 = arith.constant 8 : index
    %c0_120 = arith.constant 0 : index
    %c0_121 = arith.constant 0 : index
    %85 = vector.load %arg2[%c8, %c0_120, %c0_121] : memref<9x128x128xbf16, #tpu.memory_space<vmem>>, vector<1x128x128xbf16>
    %86 = vector.shape_cast %85 : vector<1x128x128xbf16> to vector<128x128xbf16>
    %cst_122 = arith.constant dense<0.000000e+00> : vector<256x128xf32>
    %87 = tpu.matmul %84, %86, %cst_122 {dimension_numbers = #tpu.dot_dimension_numbers<[1], [0], [0], [1], [0, 0, 1, 1], [], []>} : vector<256x128xbf16>, vector<128x128xbf16>, vector<256x128xf32> -> vector<256x128xf32>
    %88 = arith.addf %83, %87 : vector<256x128xf32>
    %c0_123 = arith.constant 0 : index
    %c0_124 = arith.constant 0 : index
    %89 = vector.load %arg9[%c0_123, %c0_124] : memref<256x128xf32, #tpu.memory_space<vmem>>, vector<256x128xf32>
    tpu.vector_store %arg9[%c0_123, %c0_124], %88 {strides = array<i32>} : memref<256x128xf32, #tpu.memory_space<vmem>>, vector<256x128xf32>,
    %c0_125 = arith.constant 0 : index
    %c0_126 = arith.constant 0 : index
    %90 = vector.load %arg9[%c0_125, %c0_126] : memref<256x128xf32, #tpu.memory_space<vmem>>, vector<256x128xf32>
    %cst_127 = arith.constant 0.000000e+00 : f32
    %91 = vector.broadcast %cst_127 : f32 to vector<256x128xf32>
    %92 = arith.maximumf %90, %91 : vector<256x128xf32>
    %93 = vector.shape_cast %92 : vector<256x128xf32> to vector<16x16x128xf32>
    %94 = arith.truncf %93 : vector<16x16x128xf32> to vector<16x16x128xbf16>
    %c1_128 = arith.constant 1 : index
    %c1_129 = arith.constant 1 : index
    %c0_130 = arith.constant 0 : index
    %95 = vector.load %arg8[%c1_128, %c1_129, %c0_130] : memref<18x18x128xbf16, #tpu.memory_space<vmem>>, vector<16x16x128xbf16>
    tpu.vector_store %arg8[%c1_128, %c1_129, %c0_130], %94 {strides = array<i32>} : memref<18x18x128xbf16, #tpu.memory_space<vmem>>, vector<16x16x128xbf16>,
    %c0_131 = arith.constant 0 : index
    %c0_132 = arith.constant 0 : index
    %96 = vector.load %arg5[%c0_131, %c0_132] : memref<1x128xf32, #tpu.memory_space<vmem>>, vector<1x128xf32>
    %97 = vector.shape_cast %96 : vector<1x128xf32> to vector<1x128xf32>
    %98 = vector.broadcast %97 : vector<1x128xf32> to vector<256x128xf32>
    %c0_133 = arith.constant 0 : index
    %c0_134 = arith.constant 0 : index
    %99 = vector.load %arg9[%c0_133, %c0_134] : memref<256x128xf32, #tpu.memory_space<vmem>>, vector<256x128xf32>
    tpu.vector_store %arg9[%c0_133, %c0_134], %98 {strides = array<i32>} : memref<256x128xf32, #tpu.memory_space<vmem>>, vector<256x128xf32>,
    %c0_135 = arith.constant 0 : index
    %c0_136 = arith.constant 0 : index
    %c0_137 = arith.constant 0 : index
    %100 = vector.load %arg8[%c0_135, %c0_136, %c0_137] : memref<18x18x128xbf16, #tpu.memory_space<vmem>>, vector<16x16x128xbf16>
    %c0_138 = arith.constant 0 : index
    %c0_139 = arith.constant 0 : index
    %101 = vector.load %arg9[%c0_138, %c0_139] : memref<256x128xf32, #tpu.memory_space<vmem>>, vector<256x128xf32>
    %102 = vector.shape_cast %100 : vector<16x16x128xbf16> to vector<256x128xbf16>
    %c0_140 = arith.constant 0 : index
    %c0_141 = arith.constant 0 : index
    %c0_142 = arith.constant 0 : index
    %103 = vector.load %arg4[%c0_140, %c0_141, %c0_142] : memref<9x128x128xbf16, #tpu.memory_space<vmem>>, vector<1x128x128xbf16>
    %104 = vector.shape_cast %103 : vector<1x128x128xbf16> to vector<128x128xbf16>
    %cst_143 = arith.constant dense<0.000000e+00> : vector<256x128xf32>
    %105 = tpu.matmul %102, %104, %cst_143 {dimension_numbers = #tpu.dot_dimension_numbers<[1], [0], [0], [1], [0, 0, 1, 1], [], []>} : vector<256x128xbf16>, vector<128x128xbf16>, vector<256x128xf32> -> vector<256x128xf32>
    %106 = arith.addf %101, %105 : vector<256x128xf32>
    %c0_144 = arith.constant 0 : index
    %c0_145 = arith.constant 0 : index
    %107 = vector.load %arg9[%c0_144, %c0_145] : memref<256x128xf32, #tpu.memory_space<vmem>>, vector<256x128xf32>
    tpu.vector_store %arg9[%c0_144, %c0_145], %106 {strides = array<i32>} : memref<256x128xf32, #tpu.memory_space<vmem>>, vector<256x128xf32>,
    %c0_146 = arith.constant 0 : index
    %c1_147 = arith.constant 1 : index
    %c0_148 = arith.constant 0 : index
    %108 = vector.load %arg8[%c0_146, %c1_147, %c0_148] : memref<18x18x128xbf16, #tpu.memory_space<vmem>>, vector<16x16x128xbf16>
    %c0_149 = arith.constant 0 : index
    %c0_150 = arith.constant 0 : index
    %109 = vector.load %arg9[%c0_149, %c0_150] : memref<256x128xf32, #tpu.memory_space<vmem>>, vector<256x128xf32>
    %110 = vector.shape_cast %108 : vector<16x16x128xbf16> to vector<256x128xbf16>
    %c1_151 = arith.constant 1 : index
    %c0_152 = arith.constant 0 : index
    %c0_153 = arith.constant 0 : index
    %111 = vector.load %arg4[%c1_151, %c0_152, %c0_153] : memref<9x128x128xbf16, #tpu.memory_space<vmem>>, vector<1x128x128xbf16>
    %112 = vector.shape_cast %111 : vector<1x128x128xbf16> to vector<128x128xbf16>
    %cst_154 = arith.constant dense<0.000000e+00> : vector<256x128xf32>
    %113 = tpu.matmul %110, %112, %cst_154 {dimension_numbers = #tpu.dot_dimension_numbers<[1], [0], [0], [1], [0, 0, 1, 1], [], []>} : vector<256x128xbf16>, vector<128x128xbf16>, vector<256x128xf32> -> vector<256x128xf32>
    %114 = arith.addf %109, %113 : vector<256x128xf32>
    %c0_155 = arith.constant 0 : index
    %c0_156 = arith.constant 0 : index
    %115 = vector.load %arg9[%c0_155, %c0_156] : memref<256x128xf32, #tpu.memory_space<vmem>>, vector<256x128xf32>
    tpu.vector_store %arg9[%c0_155, %c0_156], %114 {strides = array<i32>} : memref<256x128xf32, #tpu.memory_space<vmem>>, vector<256x128xf32>,
    %c0_157 = arith.constant 0 : index
    %c2_158 = arith.constant 2 : index
    %c0_159 = arith.constant 0 : index
    %116 = vector.load %arg8[%c0_157, %c2_158, %c0_159] : memref<18x18x128xbf16, #tpu.memory_space<vmem>>, vector<16x16x128xbf16>
    %c0_160 = arith.constant 0 : index
    %c0_161 = arith.constant 0 : index
    %117 = vector.load %arg9[%c0_160, %c0_161] : memref<256x128xf32, #tpu.memory_space<vmem>>, vector<256x128xf32>
    %118 = vector.shape_cast %116 : vector<16x16x128xbf16> to vector<256x128xbf16>
    %c2_162 = arith.constant 2 : index
    %c0_163 = arith.constant 0 : index
    %c0_164 = arith.constant 0 : index
    %119 = vector.load %arg4[%c2_162, %c0_163, %c0_164] : memref<9x128x128xbf16, #tpu.memory_space<vmem>>, vector<1x128x128xbf16>
    %120 = vector.shape_cast %119 : vector<1x128x128xbf16> to vector<128x128xbf16>
    %cst_165 = arith.constant dense<0.000000e+00> : vector<256x128xf32>
    %121 = tpu.matmul %118, %120, %cst_165 {dimension_numbers = #tpu.dot_dimension_numbers<[1], [0], [0], [1], [0, 0, 1, 1], [], []>} : vector<256x128xbf16>, vector<128x128xbf16>, vector<256x128xf32> -> vector<256x128xf32>
    %122 = arith.addf %117, %121 : vector<256x128xf32>
    %c0_166 = arith.constant 0 : index
    %c0_167 = arith.constant 0 : index
    %123 = vector.load %arg9[%c0_166, %c0_167] : memref<256x128xf32, #tpu.memory_space<vmem>>, vector<256x128xf32>
    tpu.vector_store %arg9[%c0_166, %c0_167], %122 {strides = array<i32>} : memref<256x128xf32, #tpu.memory_space<vmem>>, vector<256x128xf32>,
    %c1_168 = arith.constant 1 : index
    %c0_169 = arith.constant 0 : index
    %c0_170 = arith.constant 0 : index
    %124 = vector.load %arg8[%c1_168, %c0_169, %c0_170] : memref<18x18x128xbf16, #tpu.memory_space<vmem>>, vector<16x16x128xbf16>
    %c0_171 = arith.constant 0 : index
    %c0_172 = arith.constant 0 : index
    %125 = vector.load %arg9[%c0_171, %c0_172] : memref<256x128xf32, #tpu.memory_space<vmem>>, vector<256x128xf32>
    %126 = vector.shape_cast %124 : vector<16x16x128xbf16> to vector<256x128xbf16>
    %c3_173 = arith.constant 3 : index
    %c0_174 = arith.constant 0 : index
    %c0_175 = arith.constant 0 : index
    %127 = vector.load %arg4[%c3_173, %c0_174, %c0_175] : memref<9x128x128xbf16, #tpu.memory_space<vmem>>, vector<1x128x128xbf16>
    %128 = vector.shape_cast %127 : vector<1x128x128xbf16> to vector<128x128xbf16>
    %cst_176 = arith.constant dense<0.000000e+00> : vector<256x128xf32>
    %129 = tpu.matmul %126, %128, %cst_176 {dimension_numbers = #tpu.dot_dimension_numbers<[1], [0], [0], [1], [0, 0, 1, 1], [], []>} : vector<256x128xbf16>, vector<128x128xbf16>, vector<256x128xf32> -> vector<256x128xf32>
    %130 = arith.addf %125, %129 : vector<256x128xf32>
    %c0_177 = arith.constant 0 : index
    %c0_178 = arith.constant 0 : index
    %131 = vector.load %arg9[%c0_177, %c0_178] : memref<256x128xf32, #tpu.memory_space<vmem>>, vector<256x128xf32>
    tpu.vector_store %arg9[%c0_177, %c0_178], %130 {strides = array<i32>} : memref<256x128xf32, #tpu.memory_space<vmem>>, vector<256x128xf32>,
    %c1_179 = arith.constant 1 : index
    %c1_180 = arith.constant 1 : index
    %c0_181 = arith.constant 0 : index
    %132 = vector.load %arg8[%c1_179, %c1_180, %c0_181] : memref<18x18x128xbf16, #tpu.memory_space<vmem>>, vector<16x16x128xbf16>
    %c0_182 = arith.constant 0 : index
    %c0_183 = arith.constant 0 : index
    %133 = vector.load %arg9[%c0_182, %c0_183] : memref<256x128xf32, #tpu.memory_space<vmem>>, vector<256x128xf32>
    %134 = vector.shape_cast %132 : vector<16x16x128xbf16> to vector<256x128xbf16>
    %c4_184 = arith.constant 4 : index
    %c0_185 = arith.constant 0 : index
    %c0_186 = arith.constant 0 : index
    %135 = vector.load %arg4[%c4_184, %c0_185, %c0_186] : memref<9x128x128xbf16, #tpu.memory_space<vmem>>, vector<1x128x128xbf16>
    %136 = vector.shape_cast %135 : vector<1x128x128xbf16> to vector<128x128xbf16>
    %cst_187 = arith.constant dense<0.000000e+00> : vector<256x128xf32>
    %137 = tpu.matmul %134, %136, %cst_187 {dimension_numbers = #tpu.dot_dimension_numbers<[1], [0], [0], [1], [0, 0, 1, 1], [], []>} : vector<256x128xbf16>, vector<128x128xbf16>, vector<256x128xf32> -> vector<256x128xf32>
    %138 = arith.addf %133, %137 : vector<256x128xf32>
    %c0_188 = arith.constant 0 : index
    %c0_189 = arith.constant 0 : index
    %139 = vector.load %arg9[%c0_188, %c0_189] : memref<256x128xf32, #tpu.memory_space<vmem>>, vector<256x128xf32>
    tpu.vector_store %arg9[%c0_188, %c0_189], %138 {strides = array<i32>} : memref<256x128xf32, #tpu.memory_space<vmem>>, vector<256x128xf32>,
    %c1_190 = arith.constant 1 : index
    %c2_191 = arith.constant 2 : index
    %c0_192 = arith.constant 0 : index
    %140 = vector.load %arg8[%c1_190, %c2_191, %c0_192] : memref<18x18x128xbf16, #tpu.memory_space<vmem>>, vector<16x16x128xbf16>
    %c0_193 = arith.constant 0 : index
    %c0_194 = arith.constant 0 : index
    %141 = vector.load %arg9[%c0_193, %c0_194] : memref<256x128xf32, #tpu.memory_space<vmem>>, vector<256x128xf32>
    %142 = vector.shape_cast %140 : vector<16x16x128xbf16> to vector<256x128xbf16>
    %c5_195 = arith.constant 5 : index
    %c0_196 = arith.constant 0 : index
    %c0_197 = arith.constant 0 : index
    %143 = vector.load %arg4[%c5_195, %c0_196, %c0_197] : memref<9x128x128xbf16, #tpu.memory_space<vmem>>, vector<1x128x128xbf16>
    %144 = vector.shape_cast %143 : vector<1x128x128xbf16> to vector<128x128xbf16>
    %cst_198 = arith.constant dense<0.000000e+00> : vector<256x128xf32>
    %145 = tpu.matmul %142, %144, %cst_198 {dimension_numbers = #tpu.dot_dimension_numbers<[1], [0], [0], [1], [0, 0, 1, 1], [], []>} : vector<256x128xbf16>, vector<128x128xbf16>, vector<256x128xf32> -> vector<256x128xf32>
    %146 = arith.addf %141, %145 : vector<256x128xf32>
    %c0_199 = arith.constant 0 : index
    %c0_200 = arith.constant 0 : index
    %147 = vector.load %arg9[%c0_199, %c0_200] : memref<256x128xf32, #tpu.memory_space<vmem>>, vector<256x128xf32>
    tpu.vector_store %arg9[%c0_199, %c0_200], %146 {strides = array<i32>} : memref<256x128xf32, #tpu.memory_space<vmem>>, vector<256x128xf32>,
    %c2_201 = arith.constant 2 : index
    %c0_202 = arith.constant 0 : index
    %c0_203 = arith.constant 0 : index
    %148 = vector.load %arg8[%c2_201, %c0_202, %c0_203] : memref<18x18x128xbf16, #tpu.memory_space<vmem>>, vector<16x16x128xbf16>
    %c0_204 = arith.constant 0 : index
    %c0_205 = arith.constant 0 : index
    %149 = vector.load %arg9[%c0_204, %c0_205] : memref<256x128xf32, #tpu.memory_space<vmem>>, vector<256x128xf32>
    %150 = vector.shape_cast %148 : vector<16x16x128xbf16> to vector<256x128xbf16>
    %c6_206 = arith.constant 6 : index
    %c0_207 = arith.constant 0 : index
    %c0_208 = arith.constant 0 : index
    %151 = vector.load %arg4[%c6_206, %c0_207, %c0_208] : memref<9x128x128xbf16, #tpu.memory_space<vmem>>, vector<1x128x128xbf16>
    %152 = vector.shape_cast %151 : vector<1x128x128xbf16> to vector<128x128xbf16>
    %cst_209 = arith.constant dense<0.000000e+00> : vector<256x128xf32>
    %153 = tpu.matmul %150, %152, %cst_209 {dimension_numbers = #tpu.dot_dimension_numbers<[1], [0], [0], [1], [0, 0, 1, 1], [], []>} : vector<256x128xbf16>, vector<128x128xbf16>, vector<256x128xf32> -> vector<256x128xf32>
    %154 = arith.addf %149, %153 : vector<256x128xf32>
    %c0_210 = arith.constant 0 : index
    %c0_211 = arith.constant 0 : index
    %155 = vector.load %arg9[%c0_210, %c0_211] : memref<256x128xf32, #tpu.memory_space<vmem>>, vector<256x128xf32>
    tpu.vector_store %arg9[%c0_210, %c0_211], %154 {strides = array<i32>} : memref<256x128xf32, #tpu.memory_space<vmem>>, vector<256x128xf32>,
    %c2_212 = arith.constant 2 : index
    %c1_213 = arith.constant 1 : index
    %c0_214 = arith.constant 0 : index
    %156 = vector.load %arg8[%c2_212, %c1_213, %c0_214] : memref<18x18x128xbf16, #tpu.memory_space<vmem>>, vector<16x16x128xbf16>
    %c0_215 = arith.constant 0 : index
    %c0_216 = arith.constant 0 : index
    %157 = vector.load %arg9[%c0_215, %c0_216] : memref<256x128xf32, #tpu.memory_space<vmem>>, vector<256x128xf32>
    %158 = vector.shape_cast %156 : vector<16x16x128xbf16> to vector<256x128xbf16>
    %c7_217 = arith.constant 7 : index
    %c0_218 = arith.constant 0 : index
    %c0_219 = arith.constant 0 : index
    %159 = vector.load %arg4[%c7_217, %c0_218, %c0_219] : memref<9x128x128xbf16, #tpu.memory_space<vmem>>, vector<1x128x128xbf16>
    %160 = vector.shape_cast %159 : vector<1x128x128xbf16> to vector<128x128xbf16>
    %cst_220 = arith.constant dense<0.000000e+00> : vector<256x128xf32>
    %161 = tpu.matmul %158, %160, %cst_220 {dimension_numbers = #tpu.dot_dimension_numbers<[1], [0], [0], [1], [0, 0, 1, 1], [], []>} : vector<256x128xbf16>, vector<128x128xbf16>, vector<256x128xf32> -> vector<256x128xf32>
    %162 = arith.addf %157, %161 : vector<256x128xf32>
    %c0_221 = arith.constant 0 : index
    %c0_222 = arith.constant 0 : index
    %163 = vector.load %arg9[%c0_221, %c0_222] : memref<256x128xf32, #tpu.memory_space<vmem>>, vector<256x128xf32>
    tpu.vector_store %arg9[%c0_221, %c0_222], %162 {strides = array<i32>} : memref<256x128xf32, #tpu.memory_space<vmem>>, vector<256x128xf32>,
    %c2_223 = arith.constant 2 : index
    %c2_224 = arith.constant 2 : index
    %c0_225 = arith.constant 0 : index
    %164 = vector.load %arg8[%c2_223, %c2_224, %c0_225] : memref<18x18x128xbf16, #tpu.memory_space<vmem>>, vector<16x16x128xbf16>
    %c0_226 = arith.constant 0 : index
    %c0_227 = arith.constant 0 : index
    %165 = vector.load %arg9[%c0_226, %c0_227] : memref<256x128xf32, #tpu.memory_space<vmem>>, vector<256x128xf32>
    %166 = vector.shape_cast %164 : vector<16x16x128xbf16> to vector<256x128xbf16>
    %c8_228 = arith.constant 8 : index
    %c0_229 = arith.constant 0 : index
    %c0_230 = arith.constant 0 : index
    %167 = vector.load %arg4[%c8_228, %c0_229, %c0_230] : memref<9x128x128xbf16, #tpu.memory_space<vmem>>, vector<1x128x128xbf16>
    %168 = vector.shape_cast %167 : vector<1x128x128xbf16> to vector<128x128xbf16>
    %cst_231 = arith.constant dense<0.000000e+00> : vector<256x128xf32>
    %169 = tpu.matmul %166, %168, %cst_231 {dimension_numbers = #tpu.dot_dimension_numbers<[1], [0], [0], [1], [0, 0, 1, 1], [], []>} : vector<256x128xbf16>, vector<128x128xbf16>, vector<256x128xf32> -> vector<256x128xf32>
    %170 = arith.addf %165, %169 : vector<256x128xf32>
    %c0_232 = arith.constant 0 : index
    %c0_233 = arith.constant 0 : index
    %171 = vector.load %arg9[%c0_232, %c0_233] : memref<256x128xf32, #tpu.memory_space<vmem>>, vector<256x128xf32>
    tpu.vector_store %arg9[%c0_232, %c0_233], %170 {strides = array<i32>} : memref<256x128xf32, #tpu.memory_space<vmem>>, vector<256x128xf32>,
    %c0_234 = arith.constant 0 : index
    %c0_235 = arith.constant 0 : index
    %172 = vector.load %arg9[%c0_234, %c0_235] : memref<256x128xf32, #tpu.memory_space<vmem>>, vector<256x128xf32>
    %173 = vector.shape_cast %172 : vector<256x128xf32> to vector<16x16x128xf32>
    %c0_236 = arith.constant 0 : index
    %c0_237 = arith.constant 0 : index
    %c0_238 = arith.constant 0 : index
    %c0_239 = arith.constant 0 : index
    %174 = vector.load %arg1[%c0_236, %c0_237, %c0_238, %c0_239] : memref<1x16x16x128xf32, #tpu.memory_space<vmem>>, vector<1x16x16x128xf32>
    %175 = vector.shape_cast %174 : vector<1x16x16x128xf32> to vector<16x16x128xf32>
    %176 = arith.addf %173, %175 : vector<16x16x128xf32>
    %cst_240 = arith.constant 0.000000e+00 : f32
    %177 = vector.broadcast %cst_240 : f32 to vector<16x16x128xf32>
    %178 = arith.maximumf %176, %177 : vector<16x16x128xf32>
    %c0_241 = arith.constant 0 : index
    %c0_242 = arith.constant 0 : index
    %c0_243 = arith.constant 0 : index
    %c0_244 = arith.constant 0 : index
    %179 = vector.load %arg6[%c0_241, %c0_242, %c0_243, %c0_244] : memref<1x16x16x128xf32, #tpu.memory_space<vmem>>, vector<1x16x16x128xf32>
    %180 = vector.shape_cast %179 : vector<1x16x16x128xf32> to vector<16x16x128xf32>
    %181 = vector.shape_cast %178 : vector<16x16x128xf32> to vector<1x16x16x128xf32>
    tpu.vector_store %arg6[%c0_241, %c0_242, %c0_243, %c0_244], %181 {strides = array<i32>} : memref<1x16x16x128xf32, #tpu.memory_space<vmem>>, vector<1x16x16x128xf32>,
    return
  }
  func.func @transform_0(%arg0: i32) -> (i32, i32, i32, i32) {
    %c0_i32 = arith.constant 0 : i32
    %c0_i32_0 = arith.constant 0 : i32
    %c0_i32_1 = arith.constant 0 : i32
    %c0_i32_2 = arith.constant 0 : i32
    return %arg0, %c0_i32, %c0_i32_0, %c0_i32_1 : i32, i32, i32, i32
  }
  func.func @transform_1(%arg0: i32) -> (i32, i32, i32) {
    %c0_i32 = arith.constant 0 : i32
    %c0_i32_0 = arith.constant 0 : i32
    %c0_i32_1 = arith.constant 0 : i32
    %c0_i32_2 = arith.constant 0 : i32
    return %c0_i32, %c0_i32_0, %c0_i32_1 : i32, i32, i32
  }
  func.func @transform_2(%arg0: i32) -> (i32, i32) {
    %c0_i32 = arith.constant 0 : i32
    %c0_i32_0 = arith.constant 0 : i32
    %c0_i32_1 = arith.constant 0 : i32
    return %c0_i32, %c0_i32_0 : i32, i32
  }
  func.func @transform_3(%arg0: i32) -> (i32, i32, i32) {
    %c0_i32 = arith.constant 0 : i32
    %c0_i32_0 = arith.constant 0 : i32
    %c0_i32_1 = arith.constant 0 : i32
    %c0_i32_2 = arith.constant 0 : i32
    return %c0_i32, %c0_i32_0, %c0_i32_1 : i32, i32, i32
  }
  func.func @transform_4(%arg0: i32) -> (i32, i32) {
    %c0_i32 = arith.constant 0 : i32
    %c0_i32_0 = arith.constant 0 : i32
    %c0_i32_1 = arith.constant 0 : i32
    return %c0_i32, %c0_i32_0 : i32, i32
  }
  func.func @transform_5(%arg0: i32) -> (i32, i32, i32, i32) {
    %c0_i32 = arith.constant 0 : i32
    %c0_i32_0 = arith.constant 0 : i32
    %c0_i32_1 = arith.constant 0 : i32
    %c0_i32_2 = arith.constant 0 : i32
    return %arg0, %c0_i32, %c0_i32_0, %c0_i32_1 : i32, i32, i32, i32
  }
}

</mosaic_0001>

<bundles_post_ra>
// kernel: tpu_custom_call.1
= control target key start
LH: loop header
LB: loop body
LE: loop exit
PB: predicated region body
PF: predicated region fallthrough
CT: control target
= control target key end

     0   :  { %10 = vsyncpa [#allocation6], 0  ;;  %s18632_s0 = inlined_call_operand.hbm [shape: f32[2,16,16,128], index: 0, kind: input, shape index: {}]   ;;  %s18633_s1 = inlined_call_operand.hbm [shape: bf16[9,128,128], index: 1, kind: input, shape index: {}]   ;;  %s18634_s2 = inlined_call_operand.vmem [shape: f32[1,128], index: 2, kind: input, shape index: {}]   ;;  %s18635_s3 = inlined_call_operand.hbm [shape: bf16[9,128,128], index: 3, kind: input, shape index: {}]   ;;  %s18636_s4 = inlined_call_operand.vmem [shape: f32[1,128], index: 4, kind: input, shape index: {}]   ;;  %s18637_s5 = inlined_call_operand.hbm [shape: f32[2,16,16,128], index: 5, kind: output, shape index: {}]  }
   0x1   :  { %12 = vsyncpa [#allocation6 + $0x1], 0 }
   0x2   :  { %13 = vsyncpa [#allocation9], 0 }
   0x3   :  { %14 = vsyncpa [#allocation7], 0 }
   0x4   :  { %16 = vsyncpa [#allocation7 + $0x1], 0  ;;  %s16251_s18 = smov 0   ;;  %s16253_s19 = smov 0  }
   0x5   :  { %s16255_s20 = smov 0   ;;  %s16257_s21 = smov 0  }
   0x6 LB: > { %s16272_s22 = sadd.s32 4294967295, %s16208_s21   ;;  %s13188_s23 = sadd.s32 4294967294, %s16208_s21   ;;  %s16208_s21 = sphi %s16257_s21, %s18705_s21   ;;  %s16204_s20 = sphi %s16255_s20, %s18704_s20   ;;  %s16200_s19 = sphi %s16253_s19, %s18703_s19   ;;  %s16196_s18 = sphi %s16251_s18, %s18702_s18  }
   0x7   : > { %p42_p0 = scmp.ne.s32.totalorder %s16200_s19, %s16196_s18  ;;  %p18638_p1 = scmp.eq.s32.totalorder %s16272_s22, 0 }
   0x8   : > { %p156_p3 = scmp.eq.s32.totalorder %s13188_s23, 1  ;;  %p13189_p5 = scmp.ge.s32.totalorder %s16208_s21, 1 }
   0x9   : > { %p16281_p4 = por %p18638_p1, %p42_p0  ;;  %p163_p7 = scmp.lt.s32.totalorder %s16208_s21, 3 }
   0xa   : > { %p16286_p6 = por %p156_p3, %p42_p0  ;;  %s16210_s27 = smov [#allocation8]  }
   0xb   : > { %s18653_s24 = scalar_select %p16281_p4, 1, 0 }
   0xc   : > { %s18654_s25 = scalar_select %p16286_p6, 1, 0 }
   0xd   : > { %p16291_p8 = pnand %p13189_p5, %p163_p7  ;;  %s175_s28 = sshll.u32 %s16210_s27, 4  ;;  %s16295_s28 = int_to_ptr.vmem [resolvable:$true] %s175_s28 }
   0xe   : > { %s16211_s30 = smov [#allocation10]   ;;  %s16052_s9 = scalar_lea.hbm %s18633_s1, 9216 }
   0xf   : > { %p15750_p9 = pneg %p16291_p8  ;;  %s191_s6 = sshll.u32 %s16211_s30, 4  ;;  %s16306_s6 = int_to_ptr.vmem [resolvable:$true] %s191_s6 }
  0x10   : > { %p16053_p12 = scmp.ne.s32.totalorder %s18633_s1, %s16052_s9  ;;  %p16059_p5 = scmp.lt.u32.totalorder %s16052_s9, %s18633_s1 }
  0x11   : > { %p16302_p11 = pnand %p15750_p9, %p18638_p1 }
  0x13   : > { %p16054_p13 = pneg %p16302_p11 }
  0x15   : > { %p16055_p0 = pnand %p16054_p13, %p16053_p12 }
  0x17   : > { %p16056_p3 = pneg %p16055_p0 }
  0x19   : > { %p16061_p7 = pnand %p16059_p5, %p16056_p3 }
  0x1b   : > { %16064 = shalt.err (!%p16061_p7)
}
  0x1c   : > { %s16065_s14 = scalar_lea.vmem %s16295_s28, 9216  ;;  %p16073_p2 = scmp.lt.s32.totalorder %s16295_s28, %s16295_s28 }
  0x1d   : > { %p16066_p9 = scmp.ne.s32.totalorder %s16295_s28, %s16065_s14  ;;  %p16074_p12 = scmp.lt.s32.totalorder %s16065_s14, %s16065_s14 }
  0x1f   : > { %p16068_p10 = pnand %p16066_p9, %p16054_p13  ;;  %p16075_p0 = por %p16074_p12, %p16073_p2 }
  0x21   : > { %p16069_p1 = pneg %p16068_p10 }
  0x23   : > { %p16076_p6 = pnand %p16075_p0, %p16069_p1 }
  0x25   : > { %16079 = shalt.err (!%p16076_p6)
}
  0x26   : > { %s16212_s15 = smov 64   ;;  %s16213_s16 = smov 4  }
  0x27   : > { %15753 = dma.hbm_to_vmem [thread:$0]  (!%p16302_p11), %s18633_s1, 9216, %s16295_s28, [#allocation9], %s16212_s15, %s16212_s15, %s16213_s16  }
  0x28   : > { %s16080_s7 = scalar_lea.hbm %s18635_s3, 9216 }
  0x29   : > { %p16081_p2 = scmp.ne.s32.totalorder %s18635_s3, %s16080_s7  ;;  %p16087_p10 = scmp.lt.u32.totalorder %s16080_s7, %s18635_s3 }
  0x2b   : > { %p16083_p1 = pnand %p16081_p2, %p16054_p13 }
  0x2d   : > { %p16084_p6 = pneg %p16083_p1 }
  0x2f   : > { %p16089_p3 = pnand %p16087_p10, %p16084_p6 }
  0x31   : > { %16092 = shalt.err (!%p16089_p3)
}
  0x32   : > { %s16093_s28 = scalar_lea.vmem %s16306_s6, 9216  ;;  %p16101_p12 = scmp.lt.s32.totalorder %s16306_s6, %s16306_s6 }
  0x33   : > { %p16094_p5 = scmp.ne.s32.totalorder %s16306_s6, %s16093_s28  ;;  %p16102_p0 = scmp.lt.s32.totalorder %s16093_s28, %s16093_s28 }
  0x35   : > { %p16096_p7 = pnand %p16094_p5, %p16054_p13  ;;  %p16103_p2 = por %p16102_p0, %p16101_p12 }
  0x37   : > { %p16097_p9 = pneg %p16096_p7 }
  0x39   : > { %p16104_p1 = pnand %p16103_p2, %p16097_p9 }
  0x3b   : > { %16107 = shalt.err (!%p16104_p1)
}
  0x3c   : > { %15756 = dma.hbm_to_vmem [thread:$0]  (!%p16302_p11), %s18635_s3, 9216, %s16306_s6, [#allocation9], %s16212_s15, %s16212_s15, %s16213_s16  }
  0x3d   : > { %s16361_s14 = sadd.s32 1, %s16208_s21   ;;  %s29_s29 = sadd.s32 1, %s16204_s20 }
  0x3e   : > { %s26_s17 = ssub.s32 %s16208_s21, %s16361_s14  ;;  %p36_p13 = scmp.ne.s32.totalorder %s16204_s20, %s16200_s19 }
  0x3f   : > { %p27_p6 = scmp.eq.s32.totalorder %s26_s17, 0  ;;  %p37_p10 = scmp.eq.s32.totalorder %s16208_s21, 0 }
  0x40   : > { %p18657_p3 = scmp.eq.s32.totalorder %s16272_s22, 1  ;;  %p15767_p7 = scmp.lt.s32.totalorder %s16208_s21, 2 }
  0x41   : > { %s16377_s27 = scalar_select %p27_p6, %s16204_s20, %s29_s29  }
  0x42   : > { %p16371_p5 = por %p18657_p3, %p36_p13  ;;  %p38_p9 = por %p37_p10, %p36_p13 }
  0x43   : > { %s208_s30 = sand.u32 1, %s16204_s20   ;;  %s13800_s6 = sshll.u32 %s16208_s21, 12 }
  0x44   : > { %s18658_s23 = scalar_select %p16371_p5, 1, 0 }
  0x45   : > { %s13193_s7 = sshll.u32 %s208_s30, 8  ;;  %s16384_s8 = scalar_lea.hbm %s18632_s0, %s13800_s6 }
  0x46   : > { %s212_s9 = scalar_lea.vmem [#allocation5], %s13193_s7  ;;  %p16388_p11 = pnand %p15767_p7, %p38_p9 }
  0x47   : > { %s219_s10 = sshll.u32 %s212_s9, 4  ;;  %s16392_s28 = scalar_lea.sflag [#allocation6], %s208_s30  ;;  %s16386_s10 = int_to_ptr.vmem [resolvable:$true] %s219_s10 }
  0x48   : > { %s16108_s12 = scalar_lea.hbm %s16384_s8, 4096  ;;  %p16110_p0 = pneg %p16388_p11 }
  0x49   : > { %p16109_p12 = scmp.ne.s32.totalorder %s16384_s8, %s16108_s12  ;;  %s16113_s17 = scalar_lea.hbm %s18632_s0, 8192 }
  0x4a   : > { %p16114_p13 = scmp.lt.u32.totalorder %s16384_s8, %s18632_s0  ;;  %p16115_p6 = scmp.lt.u32.totalorder %s16113_s17, %s16108_s12 }
  0x4b   : > { %p16111_p2 = pnand %p16110_p0, %p16109_p12  ;;  %p16117_p3 = scmp.lt.u32.totalorder %s16108_s12, %s16384_s8 }
  0x4c   : > { %p16116_p10 = por %p16115_p6, %p16114_p13 }
  0x4d   : > { %p16112_p1 = pneg %p16111_p2 }
  0x4e   : > { %p16118_p7 = por %p16117_p3, %p16116_p10 }
  0x50   : > { %p16119_p9 = pnand %p16118_p7, %p16112_p1 }
  0x52   : > { %16122 = shalt.err (!%p16119_p9)
}
  0x53   : > { %s16123_s30 = scalar_lea.vmem %s16386_s10, 4096  ;;  %s16214_s15 = smov [#allocation5]  }
  0x54   : > { %p16124_p12 = scmp.ne.s32.totalorder %s16386_s10, %s16123_s30  ;;  %s16128_s16 = sshll.u32 %s16214_s15, 4  ;;  %s16129_s16 = int_to_ptr.vmem [resolvable:$false] %s16128_s16 }
  0x55   : > { %s16130_s9 = scalar_lea.vmem %s16129_s16, 8192  ;;  %p16131_p4 = scmp.lt.s32.totalorder %s16386_s10, %s16129_s16 }
  0x56   : > { %p16126_p2 = pnand %p16124_p12, %p16110_p0  ;;  %p16132_p13 = scmp.lt.s32.totalorder %s16130_s9, %s16123_s30 }
  0x58   : > { %p16127_p5 = pneg %p16126_p2  ;;  %p16133_p6 = por %p16132_p13, %p16131_p4 }
  0x5a   : > { %p16134_p10 = pnand %p16133_p6, %p16127_p5 }
  0x5c   : > { %16137 = shalt.err (!%p16134_p10)
}
  0x5d   : > { %s16215_s12 = smov 128   ;;  %s16216_s13 = smov 8  }
  0x5e   : > { %15760 = dma.hbm_to_vmem [thread:$0]  (!%p16388_p11), %s16384_s8, 4096, %s16386_s10, %s16392_s28, %s16215_s12, %s16215_s12, %s16216_s13  }
  0x5f   : > { %231 = sbr.rel (%p16291_p8) target bundleno = 1715 (0x6b3), region = 40 }
  0x66   : > { %s16423_s29 = sand.u32 1, %s16200_s19   ;;  %p18660_p4 = scmp.ne.s32.totalorder %s18653_s24, 0 }
  0x67   : > { %s13197_s17 = sshll.u32 %s16423_s29, 8  ;;  %s234_s7 = scalar_lea.sflag [#allocation6], %s16423_s29 }
  0x68   : > { %s16429_s6 = scalar_lea.vmem [#allocation5], %s13197_s17 }
  0x69   : > { %16183 = dma.done.wait (%p18660_p4), %s234_s7, 4096  }
  0x6a   : > { %16185 = vsyncadd (%p18660_p4), %s234_s7, 4294963200  ;;  %p18661_p5 = scmp.eq.s32.totalorder %s16272_s22, 0 }
  0x6c   : > { %16187 = dma.done.wait (%p18661_p5), [#allocation9], 18432   ;;  %p18662_p8 = pmov %p18661_p5 }
  0x6d   : > { %v16217_v0 = vmov 0   ;;  %v15812_v1 = vld [vmem:[#allocation8] sm:$0xff]   ;;  %v15813_v2 = vld [vmem:[#allocation8 + $0x8] sm:$0xff]   ;;  %vm280_vm0 = vcmask 1040384   ;;  %vm281_vm1 = vsmask.f32 256 }
  0x6e   : > { %16189 = vsyncadd (%p18662_p8), [#allocation9], 4294948864  ;;  %273 = vst [vmem:[#allocation2] sm:$0xf] %v16217_v0  ;;  %14298 = vmatprep.subr.bf16.mxu0 %v15812_v1  ;;  %v15814_v3 = vld [vmem:[#allocation8 + $0x10] sm:$0xff]   ;;  %v18663_v4 = vmov 0 }
  0x6f   : > { %274 = vst [vmem:[#allocation2 + $0x4] sm:$0xf] %v16217_v0  ;;  %275 = vst [vmem:[#allocation2 + $0x8] sm:$0x1] %v16217_v0  ;;  %14299 = vmatpush3.bf16.msra.mxu0 %v15812_v1  ;;  %vm337_vm3 = vsmask.f32 7938 }
  0x70   : > { %277 = vst [vmem:[#allocation2 + $0xcc] sm:$0xf] %v16217_v0  ;;  %278 = vst [vmem:[#allocation2 + $0xd0] sm:$0xf] %v16217_v0  ;;  %14300 = vmatprep.subr.bf16.mxu0 %v15813_v2  ;;  %v18666_v5 = vmov 0  ;;  %v15815_v6 = vld [vmem:[#allocation8 + $0x18] sm:$0xff]  }
  0x71   : > { %279 = vst [vmem:[#allocation2 + $0xd4] sm:$0x1] %v16217_v0  ;;  %393 = vst [vmem:[#allocation3] sm:$0xf] %v16217_v0  ;;  %vm636_vm5 = vsmask.f32 4368 }
  0x72   : > { %394 = vst [vmem:[#allocation3 + $0x4] sm:$0xf] %v16217_v0  ;;  %395 = vst [vmem:[#allocation3 + $0x8] sm:$0x1] %v16217_v0  ;;  %v286_v8 = vld [vmem:[#allocation2 + $0xc] sm:$0x1] }
  0x73   : > { %397 = vst [vmem:[#allocation3 + $0xcc] sm:$0xf] %v16217_v0  ;;  %398 = vst [vmem:[#allocation3 + $0xd0] sm:$0xf] %v16217_v0  ;;  %14301 = vmatpush3.bf16.msra.mxu0 %v15813_v2  ;;  %v342_v11 = vld [vmem:[#allocation2 + $0x14] sm:$0x1] }
  0x74   : > { %399 = vst [vmem:[#allocation3 + $0xd4] sm:$0x1] %v16217_v0  ;;  %vm16440_vm2 = vmand %vm280_vm0, %vm281_vm1  ;;  %14302 = vmatprep.subr.bf16.mxu0 %v15814_v3  ;;  %v508_v12 = vld [vmem:[%s16429_s6] sm:$0xff]  ;;  %v509_v13 = vld [vmem:[%s16429_s6 + $0x8] sm:$0xff]  ;;  %vm959_vm6 = vcmask 1043456   ;;  %v18669_v32 = vmov 0 }
  0x75   : > { %v18664_v4 = vsel %vm16440_vm2, 4294967295, %v18663_v4  ;;  %vm16445_vm4 = vmand %vm280_vm0, %vm337_vm3  ;;  %v283_v7 = vld [vmem:[#allocation2] sm:$0x1]  ;;  %v287_v10 = vsel %vm16440_vm2, 0, %v286_v8  ;;  %v15816_v14 = vld [vmem:[#allocation8 + $0x20] sm:$0xff]   ;;  %v13801_v16 = vpack.c.bf16 %v508_v12, %v508_v12  ;;  %v13802_v17 = vpack.c.bf16 %v509_v13, %v509_v13  ;;  %s18491_s11 = scalar_lea.vmem [#allocation11], %s13197_s17 }
  0x76   : > { %18665 = vst [vmem:[#allocation15_spill] sm:$0xff] %v18664_v4  ;;  %v18667_v5 = vsel %vm16445_vm4, 4294967295, %v18666_v5  ;;  %v284_v9 = vsel %vm16440_vm2, 0, %v283_v7  ;;  %288 = vst [vmem:[#allocation2 + $0xc] sm:$0x1] %v287_v10  ;;  %v343_v15 = vsel %vm16445_vm4, 0, %v342_v11 }
  0x77   : > { %18668 = vst [vmem:[#allocation16_spill] sm:$0xff] %v18667_v5  ;;  %285 = vst [vmem:[#allocation2] sm:$0x1] %v284_v9  ;;  %14303 = vmatpush3.bf16.msra.mxu0 %v15814_v3  ;;  %v289_v18 = vld [vmem:[#allocation2 + $0x18] sm:$0x1]  ;;  %v510_v19 = vld [vmem:[%s16429_s6 + $0x10] sm:$0xff] }
  0x78   : > { %344 = vst [vmem:[#allocation2 + $0x14] sm:$0x1] %v343_v15  ;;  %v511_v20 = vld [vmem:[%s16429_s6 + $0x18] sm:$0xff]  ;;  %14304 = vmatprep.subr.bf16.mxu0 %v15815_v6  ;;  %v639_v21 = vshrl.u32 %v13801_v16, 16  ;;  %v642_v22 = vshll.u32 %v13801_v16, 16  ;;  %v647_v23 = vshrl.u32 %v13802_v17, 16  ;;  %v13803_v27 = vpack.c.bf16 %v510_v19, %v510_v19  ;;  %vm16467_vm7 = vmor %vm281_vm1, %vm636_vm5 }
  0x79   : > { %v650_v24 = vshll.u32 %v13802_v17, 16  ;;  %v292_v25 = vld [vmem:[#allocation2 + $0x24] sm:$0x1]  ;;  %v290_v26 = vsel %vm16440_vm2, 0, %v289_v18  ;;  %v13804_v28 = vpack.c.bf16 %v511_v20, %v511_v20  ;;  %v512_v30 = vld [vmem:[%s16429_s6 + $0x20] sm:$0xff]  ;;  %v513_v31 = vld [vmem:[%s16429_s6 + $0x28] sm:$0xff] }
  0x7a   : > { %v293_v29 = vsel %vm16440_vm2, 0, %v292_v25  ;;  %v18670_v32 = vsel %vm16467_vm7, 4294967295, %v18669_v32  ;;  %v641_v33 = vrot.slane %v639_v21, 7  ;;  %v649_v34 = vrot.slane %v647_v23, 7  ;;  %291 = vst [vmem:[#allocation2 + $0x18] sm:$0x1] %v290_v26  ;;  %vm16476_vm8 = vmand %vm959_vm6, %vm337_vm3 }
  0x7b   : > { %18671 = vst [vmem:[#allocation17_spill] sm:$0xff] %v18670_v32  ;;  %294 = vst [vmem:[#allocation2 + $0x24] sm:$0x1] %v293_v29  ;;  %v13805_v35 = vpack.c.bf16 %v512_v30, %v512_v30  ;;  %v16471_v36 = vpack.c.bf16 %v513_v31, %v513_v31  ;;  %v514_v37 = vld [vmem:[%s16429_s6 + $0x30] sm:$0xff]  ;;  %14305 = vmatpush3.bf16.msra.mxu0 %v15815_v6  ;;  %v15817_v38 = vld [vmem:[#allocation8 + $0x28] sm:$0xff]   ;;  %v18672_v39 = vmov 0 }
  0x7c   : > { %v18673_v39 = vsel %vm16476_vm8, 4294967295, %v18672_v39  ;;  %v656_v40 = vshrl.u32 %v13803_v27, 16  ;;  %v659_v41 = vshll.u32 %v13803_v27, 16  ;;  %v664_v42 = vshrl.u32 %v13804_v28, 16  ;;  %14306 = vmatprep.subr.bf16.mxu0 %v15816_v14  ;;  %v295_v48 = vld [vmem:[#allocation2 + $0x30] sm:$0x1] }
  0x7d   : > { %18674 = vst [vmem:[#allocation18_spill] sm:$0xff] %v18673_v39  ;;  %v667_v43 = vshll.u32 %v13804_v28, 16  ;;  %v644_v44 = vor.u32 %v642_v22, %v641_v33  ;;  %v645_v45 = vrot.slane %v641_v33, 4  ;;  %v652_v46 = vor.u32 %v650_v24, %v649_v34  ;;  %v515_v49 = vld [vmem:[%s16429_s6 + $0x38] sm:$0xff]  ;;  %v516_v50 = vld [vmem:[%s16429_s6 + $0x40] sm:$0xff]  ;;  %v517_v62 = vld [vmem:[%s16429_s6 + $0x48] sm:$0xff] }
  0x7e   : > { %v654_v47 = vrot.slane %v649_v34, 4  ;;  %v15820_v51 = vld [vmem:[#allocation2] sm:$0xff]   ;;  %v961_v52 = vld [vmem:[#allocation2 + $0xc] sm:$0xf]  ;;  %v658_v53 = vrot.slane %v656_v40, 7  ;;  %v16482_v54 = vpack.c.bf16 %v514_v37, %v514_v37  ;;  %v16484_v55 = vpack.c.bf16 %v515_v49, %v515_v49  ;;  %v520_v26 = vld [vmem:[%s16429_s6 + $0x60] sm:$0xff] }
  0x7f   : > { %v16486_v56 = vpack.c.bf16 %v516_v50, %v516_v50  ;;  %v653_v57 = vsel %vm16467_vm7, %v645_v45, %v652_v46  ;;  %v962_v58 = vsel %vm16476_vm8, %v644_v44, %v961_v52  ;;  %v965_v59 = vld [vmem:[#allocation2 + $0x14] sm:$0x1]  ;;  %v16492_v60 = vrot.slane %v664_v42, 7  ;;  %14307 = vmatpush3.bf16.msra.mxu0 %v15816_v14  ;;  %14314 = vmatprep.mubr.bf16.mxu0 %v15820_v51  ;;  %v15818_v3 = vld [vmem:[#allocation8 + $0x30] sm:$0xff]   ;;  %v298_v10 = vld [vmem:[#allocation2 + $0x3c] sm:$0x1] }
  0x80   : > { %v673_v61 = vshrl.u32 %v13805_v35, 16  ;;  %963 = vst [vmem:[#allocation2 + $0xc] sm:$0xf] %v962_v58  ;;  %964 = vst [vmem:[#allocation2 + $0x10] sm:$0xf] %v653_v57  ;;  %v966_v63 = vsel %vm16440_vm2, %v654_v47, %v965_v59  ;;  %v661_v0 = vor.u32 %v659_v41, %v658_v53  ;;  %v662_v1 = vrot.slane %v658_v53, 4  ;;  %14308 = vmatprep.subr.bf16.mxu0 %v15817_v38 }
  0x81   : > { %v676_v2 = vshll.u32 %v13805_v35, 16  ;;  %967 = vst [vmem:[#allocation2 + $0x14] sm:$0x1] %v966_v63  ;;  %v669_v6 = vor.u32 %v667_v43, %v16492_v60  ;;  %v671_v7 = vrot.slane %v16492_v60, 4  ;;  %v681_v9 = vshrl.u32 %v16471_v36, 16  ;;  %v518_v20 = vld [vmem:[%s16429_s6 + $0x50] sm:$0xff] }
  0x82   : > { %v675_v8 = vrot.slane %v673_v61, 7  ;;  %v968_v11 = vld [vmem:[#allocation2 + $0x18] sm:$0xf]  ;;  %v684_v12 = vshll.u32 %v16471_v36, 16  ;;  %v975_v13 = vld [vmem:[#allocation2 + $0x24] sm:$0xf]  ;;  %v16503_v15 = vpack.c.bf16 %v517_v62, %v517_v62  ;;  %v13811_v37 = vpack.c.bf16 %v518_v20, %v518_v20 }
  0x83   : > { %v296_v14 = vsel %vm16440_vm2, 0, %v295_v48  ;;  %v670_v16 = vsel %vm16467_vm7, %v662_v1, %v669_v6  ;;  %v969_v17 = vsel %vm16476_vm8, %v661_v0, %v968_v11  ;;  %14309 = vmatpush3.bf16.msra.mxu0 %v15817_v38  ;;  %v16510_v21 = vrot.slane %v681_v9, 7  ;;  %v519_v25 = vld [vmem:[%s16429_s6 + $0x58] sm:$0xff]  ;;  %v15822_v43 = vld [vmem:[#allocation8 + $0x40] sm:$0xff]   ;;  %v521_v49 = vld [vmem:[%s16429_s6 + $0x68] sm:$0xff]  ;;  %s13865_s28 = sshll.u32 %s16272_s22, 12 }
  0x84   : > { %v678_v18 = vor.u32 %v676_v2, %v675_v8  ;;  %v679_v19 = vrot.slane %v675_v8, 4  ;;  %297 = vst [vmem:[#allocation2 + $0x30] sm:$0x1] %v296_v14  ;;  %970 = vst [vmem:[#allocation2 + $0x18] sm:$0xf] %v969_v17  ;;  %v690_v22 = vshrl.u32 %v16482_v54, 16  ;;  %14310 = vmatprep.subr.bf16.mxu0 %v15818_v3  ;;  %v16527_v41 = vpack.c.bf16 %v519_v25, %v519_v25  ;;  %s18583_s9 = scalar_lea.hbm %s18637_s5, %s13865_s28 }
  0x85   : > { %971 = vst [vmem:[#allocation2 + $0x1c] sm:$0xf] %v670_v16  ;;  %v693_v23 = vshll.u32 %v16482_v54, 16  ;;  %v698_v24 = vshrl.u32 %v16484_v55, 16  ;;  %v15819_v27 = vld [vmem:[#allocation8 + $0x38] sm:$0xff]   ;;  %v701_v29 = vshll.u32 %v16484_v55, 16  ;;  %v686_v33 = vor.u32 %v684_v12, %v16510_v21 }
  0x86   : > { %v976_v28 = vsel %vm16476_vm8, %v678_v18, %v975_v13  ;;  %v299_v30 = vsel %vm16440_vm2, 0, %v298_v10  ;;  %v707_v31 = vshrl.u32 %v16486_v56, 16  ;;  %v692_v34 = vrot.slane %v690_v22, 7  ;;  %v301_v36 = vld [vmem:[#allocation2 + $0x48] sm:$0x1]  ;;  %v522_v54 = vld [vmem:[%s16429_s6 + $0x70] sm:$0xff] }
  0x87   : > { %977 = vst [vmem:[#allocation2 + $0x24] sm:$0xf] %v976_v28  ;;  %v16524_v35 = vrot.slane %v698_v24, 7  ;;  %300 = vst [vmem:[#allocation2 + $0x3c] sm:$0x1] %v299_v30  ;;  %v688_v38 = vrot.slane %v16510_v21, 4  ;;  %v16529_v42 = vpack.c.bf16 %v520_v26, %v520_v26  ;;  %14311 = vmatpush3.bf16.msra.mxu0 %v15818_v3  ;;  %v687_v44 = vsel %vm16467_vm7, %v679_v19, %v686_v33 }
  0x88   : > { %v709_v40 = vrot.slane %v707_v31, 7  ;;  %v695_v45 = vor.u32 %v693_v23, %v692_v34  ;;  %v696_v46 = vrot.slane %v692_v34, 4  ;;  %v304_v48 = vld [vmem:[#allocation2 + $0x54] sm:$0x1]  ;;  %14312 = vmatprep.subr.bf16.mxu0 %v15819_v27  ;;  %978 = vst [vmem:[#allocation2 + $0x28] sm:$0xf] %v687_v44  ;;  %v13814_v3 = vpack.c.bf16 %v521_v49, %v521_v49 }
  0x89   : > { %v703_v47 = vor.u32 %v701_v29, %v16524_v35  ;;  %v705_v50 = vrot.slane %v16524_v35, 4  ;;  %v710_v51 = vshll.u32 %v16486_v56, 16  ;;  %v715_v53 = vshrl.u32 %v16503_v15, 16  ;;  %v523_v55 = vld [vmem:[%s16429_s6 + $0x78] sm:$0xff]  ;;  %v307_v6 = vld [vmem:[#allocation2 + $0x60] sm:$0x1] }
  0x8a   : > { %v713_v52 = vrot.slane %v709_v40, 4  ;;  %v15821_v57 = vld [vmem:[#allocation2 + $0xc] sm:$0xff]   ;;  %v718_v61 = vshll.u32 %v16503_v15, 16  ;;  %v302_v62 = vsel %vm16440_vm2, 0, %v301_v36  ;;  %v724_v63 = vshrl.u32 %v13811_v37, 16  ;;  %v15825_v12 = vld [vmem:[#allocation8 + $0x48] sm:$0xff]  }
  0x8b   : > { %v704_v58 = vsel %vm16467_vm7, %v696_v46, %v703_v47  ;;  %v982_v59 = vld [vmem:[#allocation2 + $0x30] sm:$0xf]  ;;  %v712_v1 = vor.u32 %v710_v51, %v709_v40  ;;  %v16547_v2 = vrot.slane %v715_v53, 7  ;;  %303 = vst [vmem:[#allocation2 + $0x48] sm:$0x1] %v302_v62  ;;  %14313 = vmatpush3.bf16.msra.mxu0 %v15819_v27  ;;  %v727_v9 = vshll.u32 %v13811_v37, 16 }
  0x8c   : > { %v15823_v0 = vld [vmem:[#allocation2 + $0x18] sm:$0xff]   ;;  %v983_v56 = vsel %vm16476_vm8, %v695_v45, %v982_v59  ;;  %985 = vst [vmem:[#allocation2 + $0x34] sm:$0xf] %v704_v58  ;;  %v726_v8 = vrot.slane %v724_v63, 7  ;;  %v732_v10 = vshrl.u32 %v16527_v41, 16  ;;  %v735_v11 = vshll.u32 %v16527_v41, 16  ;;  %14346 = vmatprep.subr.bf16.mxu0 %v15822_v43 }
  0x8d   : > { %984 = vst [vmem:[#allocation2 + $0x30] sm:$0xf] %v983_v56  ;;  %v720_v13 = vor.u32 %v718_v61, %v16547_v2  ;;  %v305_v15 = vsel %vm16440_vm2, 0, %v304_v48  ;;  %v13815_v16 = vpack.c.bf16 %v522_v54, %v522_v54  ;;  %v13816_v17 = vpack.c.bf16 %v523_v55, %v523_v55  ;;  %v310_v27 = vld [vmem:[#allocation2 + $0x6c] sm:$0x1]  ;;  %v524_v28 = vld [vmem:[%s16429_s6 + $0x80] sm:$0xff] }
  0x8e   : > { %v989_v14 = vld [vmem:[#allocation2 + $0x3c] sm:$0xf]  ;;  %v729_v19 = vor.u32 %v727_v9, %v726_v8  ;;  %v730_v20 = vrot.slane %v726_v8, 4  ;;  %v16556_v22 = vrot.slane %v732_v10, 7  ;;  %306 = vst [vmem:[#allocation2 + $0x54] sm:$0x1] %v305_v15  ;;  %14315 = vmatmul.mubr.bf16.vlgmr.msra.gmra.mrb[0].mxu0 %v15821_v57  ;;  %v13817_v47 = vpack.c.bf16 %v524_v28, %v524_v28 }
  0x8f   : > { %v990_v18 = vsel %vm16476_vm8, %v712_v1, %v989_v14  ;;  %v721_v23 = vsel %vm16467_vm7, %v713_v52, %v720_v13  ;;  %v741_v24 = vshrl.u32 %v16529_v42, 16  ;;  %v744_v25 = vshll.u32 %v16529_v42, 16  ;;  %14347 = vmatpush3.bf16.msra.mxu0 %v15822_v43  ;;  %14318 = vmatprep.mubr.bf16.mxu0 %v15823_v0  ;;  %v15828_v34 = vld [vmem:[#allocation8 + $0x50] sm:$0xff]   ;;  %v525_v42 = vld [vmem:[%s16429_s6 + $0x88] sm:$0xff]  ;;  %v15831_v0 = vld [vmem:[#allocation8 + $0x58] sm:$0xff]   ;;  %s13096_s30 = sshll.u32 %s18491_s11, 4  ;;  %s18585_s30 = int_to_ptr.vmem [resolvable:$true] %s13096_s30 }
  0x90   : > { %991 = vst [vmem:[#allocation2 + $0x3c] sm:$0xf] %v990_v18  ;;  %v749_v26 = vshrl.u32 %v13814_v3, 16  ;;  %v722_v29 = vrot.slane %v16547_v2, 4  ;;  %992 = vst [vmem:[#allocation2 + $0x40] sm:$0xf] %v721_v23  ;;  %v737_v30 = vor.u32 %v735_v11, %v16556_v22  ;;  %14348 = vmatprep.subr.bf16.mxu0 %v15825_v12  ;;  %v13818_v56 = vpack.c.bf16 %v525_v42, %v525_v42 }
  0x91   : > { %v752_v31 = vshll.u32 %v13814_v3, 16  ;;  %v308_v33 = vsel %vm16440_vm2, 0, %v307_v6  ;;  %v743_v36 = vrot.slane %v741_v24, 7  ;;  %v758_v40 = vshrl.u32 %v13815_v16, 16  ;;  %v526_v48 = vld [vmem:[%s16429_s6 + $0x90] sm:$0xff]  ;;  %v527_v6 = vld [vmem:[%s16429_s6 + $0x98] sm:$0xff] }
  0x92   : > { %v16567_v37 = vrot.slane %v749_v26, 7  ;;  %309 = vst [vmem:[#allocation2 + $0x60] sm:$0x1] %v308_v33  ;;  %v761_v41 = vshll.u32 %v13815_v16, 16  ;;  %v738_v43 = vsel %vm16467_vm7, %v730_v20, %v737_v30  ;;  %v996_v44 = vld [vmem:[#allocation2 + $0x48] sm:$0xf] }
  0x93   : > { %v766_v45 = vshrl.u32 %v13816_v17, 16  ;;  %v769_v46 = vshll.u32 %v13816_v17, 16  ;;  %v15824_v49 = vld [vmem:[#allocation2 + $0x24] sm:$0xff]   ;;  %v997_v51 = vsel %vm16476_vm8, %v729_v19, %v996_v44  ;;  %999 = vst [vmem:[#allocation2 + $0x4c] sm:$0xf] %v738_v43  ;;  %v746_v52 = vor.u32 %v744_v25, %v743_v36  ;;  %14349 = vmatpush3.bf16.msra.mxu0 %v15825_v12  ;;  %v15834_v16 = vld [vmem:[#allocation8 + $0x60] sm:$0xff]  }
  0x94   : > { %v747_v53 = vrot.slane %v743_v36, 4  ;;  %v754_v54 = vor.u32 %v752_v31, %v16567_v37  ;;  %v313_v55 = vld [vmem:[#allocation2 + $0x78] sm:$0x1]  ;;  %v15826_v57 = vld [vmem:[#allocation2 + $0x30] sm:$0xff]   ;;  %998 = vst [vmem:[#allocation2 + $0x48] sm:$0xf] %v997_v51  ;;  %14350 = vmatprep.subr.bf16.mxu0 %v15828_v34  ;;  %v13819_v17 = vpack.c.bf16 %v526_v48, %v526_v48  ;;  %v13820_v25 = vpack.c.bf16 %v527_v6, %v527_v6 }
  0x95   : > { %v760_v58 = vrot.slane %v758_v40, 7  ;;  %v16576_v59 = vrot.slane %v766_v45, 7  ;;  %v311_v61 = vsel %vm16440_vm2, 0, %v310_v27  ;;  %v1003_v63 = vld [vmem:[#allocation2 + $0x54] sm:$0xf]  ;;  %v775_v1 = vshrl.u32 %v13817_v47, 16 }
  0x96   : > { %v755_v62 = vsel %vm16467_vm7, %v747_v53, %v754_v54  ;;  %312 = vst [vmem:[#allocation2 + $0x6c] sm:$0x1] %v311_v61  ;;  %v778_v3 = vshll.u32 %v13817_v47, 16  ;;  %v1004_v8 = vsel %vm16476_vm8, %v746_v52, %v1003_v63  ;;  %v316_v12 = vld [vmem:[#allocation2 + $0x84] sm:$0x1]  ;;  %14319 = vmatmul.mubr.bf16.gmra.mrb[4].mxu0 %v15824_v49  ;;  %v739_v13 = vrot.slane %v16556_v22, 4 }
  0x97   : > { %1006 = vst [vmem:[#allocation2 + $0x58] sm:$0xf] %v755_v62  ;;  %v763_v9 = vor.u32 %v761_v41, %v760_v58  ;;  %v764_v10 = vrot.slane %v760_v58, 4  ;;  %v771_v11 = vor.u32 %v769_v46, %v16576_v59  ;;  %1005 = vst [vmem:[#allocation2 + $0x54] sm:$0xf] %v1004_v8  ;;  %v777_v14 = vrot.slane %v775_v1, 7  ;;  %14322 = vmatprep.mubr.bf16.mxu0 %v15826_v57 }
  0x98   : > { %v783_v15 = vshrl.u32 %v13818_v56, 16  ;;  %v528_v18 = vld [vmem:[%s16429_s6 + $0xa0] sm:$0xff]  ;;  %14351 = vmatpush3.bf16.msra.mxu0 %v15828_v34  ;;  %v786_v23 = vshll.u32 %v13818_v56, 16  ;;  %v314_v24 = vsel %vm16440_vm2, 0, %v313_v55  ;;  %v15827_v27 = vld [vmem:[#allocation2 + $0x3c] sm:$0xff]   ;;  %v792_v36 = vshrl.u32 %v13819_v17, 16 }
  0x99   : > { %v772_v19 = vsel %vm16467_vm7, %v764_v10, %v771_v11  ;;  %v1010_v20 = vld [vmem:[#allocation2 + $0x60] sm:$0xf]  ;;  %v319_v26 = vld [vmem:[#allocation2 + $0x90] sm:$0x1]  ;;  %14352 = vmatprep.subr.bf16.mxu0 %v15831_v0  ;;  %v780_v30 = vor.u32 %v778_v3, %v777_v14  ;;  %v781_v31 = vrot.slane %v777_v14, 4  ;;  %v529_v34 = vld [vmem:[%s16429_s6 + $0xa8] sm:$0xff]  ;;  %v13821_v46 = vpack.c.bf16 %v528_v18, %v528_v18 }
  0x9a   : > { %v1011_v28 = vsel %vm16476_vm8, %v763_v9, %v1010_v20  ;;  %1013 = vst [vmem:[#allocation2 + $0x64] sm:$0xf] %v772_v19  ;;  %v16594_v33 = vrot.slane %v783_v15, 7  ;;  %315 = vst [vmem:[#allocation2 + $0x78] sm:$0x1] %v314_v24  ;;  %v795_v40 = vshll.u32 %v13819_v17, 16  ;;  %v13822_v57 = vpack.c.bf16 %v529_v34, %v529_v34 }
  0x9b   : > { %1012 = vst [vmem:[#allocation2 + $0x60] sm:$0xf] %v1011_v28  ;;  %v800_v41 = vshrl.u32 %v13820_v25, 16  ;;  %v803_v42 = vshll.u32 %v13820_v25, 16  ;;  %v530_v43 = vld [vmem:[%s16429_s6 + $0xb0] sm:$0xff]  ;;  %v317_v45 = vsel %vm16440_vm2, 0, %v316_v12 }
  0x9c   : > { %v788_v44 = vor.u32 %v786_v23, %v16594_v33  ;;  %v15837_v47 = vld [vmem:[#allocation8 + $0x68] sm:$0xff]   ;;  %v531_v48 = vld [vmem:[%s16429_s6 + $0xb8] sm:$0xff]  ;;  %v532_v51 = vld [vmem:[%s16429_s6 + $0xc0] sm:$0xff]  ;;  %14353 = vmatpush3.bf16.msra.mxu0 %v15831_v0  ;;  %v794_v54 = vrot.slane %v792_v36, 7  ;;  %318 = vst [vmem:[#allocation2 + $0x84] sm:$0x1] %v317_v45  ;;  %v13823_v11 = vpack.c.bf16 %v530_v43, %v530_v43 }
  0x9d   : > { %v322_v49 = vld [vmem:[#allocation2 + $0x9c] sm:$0x1]  ;;  %v15829_v52 = vld [vmem:[#allocation2 + $0x48] sm:$0xff]   ;;  %v16603_v55 = vrot.slane %v800_v41, 7  ;;  %v320_v58 = vsel %vm16440_vm2, 0, %v319_v26  ;;  %14354 = vmatprep.subr.bf16.mxu0 %v15834_v16  ;;  %v809_v63 = vshrl.u32 %v13821_v46, 16  ;;  %v13824_v15 = vpack.c.bf16 %v531_v48, %v531_v48 }
  0x9e   : > { %v1017_v53 = vld [vmem:[#allocation2 + $0x6c] sm:$0xf]  ;;  %v789_v61 = vsel %vm16467_vm7, %v781_v31, %v788_v44  ;;  %v812_v56 = vshll.u32 %v13821_v46, 16  ;;  %321 = vst [vmem:[#allocation2 + $0x90] sm:$0x1] %v320_v58  ;;  %v756_v0 = vrot.slane %v16567_v37, 4  ;;  %v797_v1 = vor.u32 %v795_v40, %v794_v54  ;;  %14323 = vmatmul.mubr.bf16.gmra.mrb[8].mxu0 %v15827_v27 }
  0x9f   : > { %v1018_v62 = vsel %vm16476_vm8, %v780_v30, %v1017_v53  ;;  %1020 = vst [vmem:[#allocation2 + $0x70] sm:$0xf] %v789_v61  ;;  %v798_v3 = vrot.slane %v794_v54, 4  ;;  %v805_v6 = vor.u32 %v803_v42, %v16603_v55  ;;  %v811_v8 = vrot.slane %v809_v63, 7  ;;  %14326 = vmatprep.mubr.bf16.mxu0 %v15829_v52  ;;  %v533_v18 = vld [vmem:[%s16429_s6 + $0xc8] sm:$0xff]  ;;  %v534_v31 = vld [vmem:[%s16429_s6 + $0xd0] sm:$0xff] }
  0xa0   : > { %1019 = vst [vmem:[#allocation2 + $0x6c] sm:$0xf] %v1018_v62  ;;  %v817_v9 = vshrl.u32 %v13822_v57, 16  ;;  %v820_v10 = vshll.u32 %v13822_v57, 16  ;;  %14355 = vmatpush3.bf16.msra.mxu0 %v15834_v16  ;;  %v323_v17 = vsel %vm16440_vm2, 0, %v322_v49  ;;  %v13825_v19 = vpack.c.bf16 %v532_v51, %v532_v51  ;;  %v15840_v16 = vld [vmem:[#allocation8 + $0x70] sm:$0xff]  }
  0xa1   : > { %v806_v12 = vsel %vm16467_vm7, %v798_v3, %v805_v6  ;;  %v1024_v14 = vld [vmem:[#allocation2 + $0x78] sm:$0xf]  ;;  %v814_v23 = vor.u32 %v812_v56, %v811_v8  ;;  %v815_v24 = vrot.slane %v811_v8, 4  ;;  %14356 = vmatprep.subr.bf16.mxu0 %v15837_v47  ;;  %324 = vst [vmem:[#allocation2 + $0x9c] sm:$0x1] %v323_v17  ;;  %v826_v26 = vshrl.u32 %v13823_v11, 16 }
  0xa2   : > { %v1025_v20 = vsel %vm16476_vm8, %v797_v1, %v1024_v14  ;;  %1027 = vst [vmem:[#allocation2 + $0x7c] sm:$0xf] %v806_v12  ;;  %v16620_v25 = vrot.slane %v817_v9, 7  ;;  %v829_v27 = vshll.u32 %v13823_v11, 16  ;;  %v834_v28 = vshrl.u32 %v13824_v15, 16  ;;  %v535_v34 = vld [vmem:[%s16429_s6 + $0xd8] sm:$0xff] }
  0xa3   : > { %1026 = vst [vmem:[#allocation2 + $0x78] sm:$0xf] %v1025_v20  ;;  %v837_v30 = vshll.u32 %v13824_v15, 16  ;;  %v15830_v36 = vld [vmem:[#allocation2 + $0x54] sm:$0xff]   ;;  %v1031_v41 = vld [vmem:[#allocation2 + $0x84] sm:$0xf]  ;;  %v13826_v42 = vpack.c.bf16 %v533_v18, %v533_v18  ;;  %v13827_v57 = vpack.c.bf16 %v534_v31, %v534_v31  ;;  %v13828_v58 = vpack.c.bf16 %v535_v34, %v535_v34 }
  0xa4   : > { %v822_v40 = vor.u32 %v820_v10, %v16620_v25  ;;  %v843_v43 = vshrl.u32 %v13825_v19, 16  ;;  %v325_v44 = vld [vmem:[#allocation2 + $0xa8] sm:$0x1]  ;;  %v15832_v45 = vld [vmem:[#allocation2 + $0x60] sm:$0xff]   ;;  %v1032_v46 = vsel %vm16476_vm8, %v814_v23, %v1031_v41  ;;  %14357 = vmatpush3.bf16.msra.mxu0 %v15837_v47  ;;  %v828_v48 = vrot.slane %v826_v26, 7  ;;  %v536_v1 = vld [vmem:[%s16429_s6 + $0xe0] sm:$0xff] }
  0xa5   : > { %v16627_v49 = vrot.slane %v834_v28, 7  ;;  %v1038_v51 = vld [vmem:[#allocation2 + $0x90] sm:$0xf]  ;;  %v846_v52 = vshll.u32 %v13825_v19, 16  ;;  %1033 = vst [vmem:[#allocation2 + $0x84] sm:$0xf] %v1032_v46  ;;  %14358 = vmatprep.subr.bf16.mxu0 %v15840_v16 }
  0xa6   : > { %v823_v53 = vsel %vm16467_vm7, %v815_v24, %v822_v40  ;;  %v845_v54 = vrot.slane %v843_v43, 7  ;;  %v15843_v61 = vld [vmem:[#allocation8 + $0x78] sm:$0xff]   ;;  %v773_v62 = vrot.slane %v16576_v59, 4  ;;  %v831_v47 = vor.u32 %v829_v27, %v828_v48  ;;  %14327 = vmatmul.mubr.bf16.gmra.mrb[12].mxu0 %v15830_v36  ;;  %v328_v10 = vld [vmem:[#allocation2 + $0xb4] sm:$0x1]  ;;  %v537_v11 = vld [vmem:[%s16429_s6 + $0xe8] sm:$0xff] }
  0xa7   : > { %1034 = vst [vmem:[#allocation2 + $0x88] sm:$0xf] %v823_v53  ;;  %v832_v63 = vrot.slane %v828_v48, 4  ;;  %v839_v56 = vor.u32 %v837_v30, %v16627_v49  ;;  %v851_v8 = vshrl.u32 %v13826_v42, 16  ;;  %v854_v9 = vshll.u32 %v13826_v42, 16  ;;  %14330 = vmatprep.mubr.bf16.mxu0 %v15832_v45  ;;  %v16645_v26 = vld [vmem:[#allocation8 + $0x80] sm:$0xff]  }
  0xa8   : > { %v848_v3 = vor.u32 %v846_v52, %v845_v54  ;;  %v849_v6 = vrot.slane %v845_v54, 4  ;;  %v1039_v14 = vsel %vm16476_vm8, %v831_v47, %v1038_v51  ;;  %v1045_v15 = vld [vmem:[#allocation2 + $0x9c] sm:$0xf]  ;;  %14359 = vmatpush3.bf16.msra.mxu0 %v15840_v16  ;;  %v326_v17 = vsel %vm16440_vm2, 0, %v325_v44  ;;  %v339_v31 = vld [vmem:[#allocation2 + $0x8] sm:$0x1] }
  0xa9   : > { %v840_v12 = vsel %vm16467_vm7, %v832_v63, %v839_v56  ;;  %v860_v18 = vshrl.u32 %v13827_v57, 16  ;;  %1040 = vst [vmem:[#allocation2 + $0x90] sm:$0xf] %v1039_v14  ;;  %v16641_v19 = vrot.slane %v851_v8, 7  ;;  %327 = vst [vmem:[#allocation2 + $0xa8] sm:$0x1] %v326_v17  ;;  %14360 = vmatprep.subr.bf16.mxu0 %v15843_v61  ;;  %v13829_v30 = vpack.c.bf16 %v536_v1, %v536_v1 }
  0xaa   : > { %1041 = vst [vmem:[#allocation2 + $0x94] sm:$0xf] %v840_v12  ;;  %v1046_v20 = vsel %vm16476_vm8, %v848_v3, %v1045_v15  ;;  %v863_v23 = vshll.u32 %v13827_v57, 16  ;;  %v868_v24 = vshrl.u32 %v13828_v58, 16  ;;  %v871_v16 = vshll.u32 %v13828_v58, 16  ;;  %v15833_v34 = vld [vmem:[#allocation2 + $0x6c] sm:$0xff]  }
  0xab   : > { %1047 = vst [vmem:[#allocation2 + $0x9c] sm:$0xf] %v1046_v20  ;;  %v862_v27 = vrot.slane %v860_v18, 7  ;;  %v329_v28 = vsel %vm16440_vm2, 0, %v328_v10  ;;  %v856_v36 = vor.u32 %v854_v9, %v16641_v19  ;;  %v13830_v41 = vpack.c.bf16 %v537_v11, %v537_v11  ;;  %v1561_v42 = vld [vmem:[#allocation2] sm:$0xf] }
  0xac   : > { %v16650_v40 = vrot.slane %v868_v24, 7  ;;  %330 = vst [vmem:[#allocation2 + $0xb4] sm:$0x1] %v329_v28  ;;  %v1562_v43 = vld [vmem:[#allocation2 + $0x4] sm:$0xf]  ;;  %v15835_v44 = vld [vmem:[#allocation2 + $0x78] sm:$0xff]   ;;  %14361 = vmatpush3.bf16.msra.mxu0 %v15843_v61 }
  0xad   : > { %v866_v45 = vrot.slane %v862_v27, 4  ;;  %v877_v46 = vshrl.u32 %v13829_v30, 16  ;;  %v880_v48 = vshll.u32 %v13829_v30, 16  ;;  %v857_v51 = vsel %vm16467_vm7, %v849_v6, %v856_v36  ;;  %14394 = vmatprep.subr.bf16.mxu0 %v16645_v26  ;;  %v1564_v56 = vld [vmem:[#allocation2 + $0xc] sm:$0xf]  ;;  %s13083_s22 = scalar_lea.sflag [#allocation7], %s16423_s29 }
  0xae   : > { %v865_v52 = vor.u32 %v863_v23, %v862_v27  ;;  %v873_v53 = vor.u32 %v871_v16, %v16650_v40  ;;  %v885_v54 = vshrl.u32 %v13830_v41, 16  ;;  %1048 = vst [vmem:[#allocation2 + $0xa0] sm:$0xf] %v857_v51  ;;  %v888_v58 = vshll.u32 %v13830_v41, 16  ;;  %14331 = vmatmul.mubr.bf16.gmra.mrb[16].mxu0 %v15833_v34  ;;  %v1565_v8 = vld [vmem:[#allocation2 + $0x10] sm:$0xf] }
  0xaf   : > { %v879_v57 = vrot.slane %v877_v46, 7  ;;  %v340_v47 = vsel %vm16445_vm4, 0, %v339_v31  ;;  %vm1641_vm9 = vsmask.f32 3328  ;;  %vm1642_vm10 = vsmask.f32 7440  ;;  %14334 = vmatprep.mubr.bf16.mxu0 %v15835_v44 }
  0xb0   : > { %v1645_v63 = vshrl.u32 %v1561_v42, 16  ;;  %v874_v61 = vsel %vm16467_vm7, %v866_v45, %v873_v53  ;;  %v16660_v1 = vrot.slane %v885_v54, 7  ;;  %341 = vst [vmem:[#allocation2 + $0x8] sm:$0x1] %v340_v47  ;;  %v1648_v3 = vshll.u32 %v1561_v42, 16  ;;  %v15836_v20 = vld [vmem:[#allocation2 + $0x84] sm:$0xff]   ;;  %vm16683_vm11 = vmor %vm1641_vm9, %vm1642_vm10 }
  0xb1   : > { %v1654_v6 = vshll.u32 %v1562_v43, 16  ;;  %v790_v9 = vrot.slane %v16594_v33, 4  ;;  %1055 = vst [vmem:[#allocation2 + $0xac] sm:$0xf] %v874_v61  ;;  %v882_v10 = vor.u32 %v880_v48, %v879_v57  ;;  %v883_v11 = vrot.slane %v879_v57, 4  ;;  %v15838_v42 = vld [vmem:[#allocation2 + $0x90] sm:$0xff]  }
  0xb2   : > { %v1566_v12 = vld [vmem:[#allocation2 + $0x14] sm:$0x1]  ;;  %v807_v14 = vrot.slane %v16603_v55, 4  ;;  %v1052_v15 = vld [vmem:[#allocation2 + $0xa8] sm:$0xf]  ;;  %v890_v17 = vor.u32 %v888_v58, %v16660_v1  ;;  %v1647_v18 = vrot.slane %v1645_v63, 4 }
  0xb3   : > { %v1053_v23 = vsel %vm16476_vm8, %v865_v52, %v1052_v15  ;;  %v1059_v24 = vld [vmem:[#allocation2 + $0xb4] sm:$0xf]  ;;  %v1650_v27 = vrot.slane %v1648_v3, 5  ;;  %v16667_v16 = vrot.slane %v1654_v6, 5  ;;  %v1658_v28 = vshrl.u32 %v1562_v43, 16  ;;  %s16138_s12 = scalar_lea.vmem %s18585_s30, 4096 }
  0xb4   : > { %1054 = vst [vmem:[#allocation2 + $0xa8] sm:$0xf] %v1053_v23  ;;  %v891_v30 = vsel %vm16467_vm7, %v883_v11, %v890_v17  ;;  %v1060_v31 = vsel %vm16476_vm8, %v882_v10, %v1059_v24  ;;  %v1669_v34 = vshrl.u32 %v1564_v56, 16  ;;  %v1672_v36 = vshll.u32 %v1564_v56, 16  ;;  %v345_v41 = vld [vmem:[#allocation2 + $0x20] sm:$0x1]  ;;  %p16139_p11 = scmp.ne.s32.totalorder %s18585_s30, %s16138_s12 }
  0xb5   : > { %1061 = vst [vmem:[#allocation2 + $0xb4] sm:$0xf] %v1060_v31  ;;  %1062 = vst [vmem:[#allocation2 + $0xb8] sm:$0xf] %v891_v30  ;;  %v1651_v44 = vor.u32 %v1650_v27, %v1647_v18  ;;  %v1660_v45 = vrot.slane %v1658_v28, 4  ;;  %v1678_v46 = vshll.u32 %v1565_v8, 16 }
  0xb6   : > { %v1682_v48 = vshrl.u32 %v1565_v8, 16  ;;  %v1567_v51 = vld [vmem:[#allocation2 + $0x18] sm:$0xf]  ;;  %v824_v43 = vrot.slane %v16620_v25, 4  ;;  %v1671_v52 = vrot.slane %v1669_v34, 4  ;;  %v1674_v53 = vrot.slane %v1672_v36, 5  ;;  %14335 = vmatmul.mubr.bf16.gmra.mrb[20].mxu0 %v15836_v20 }
  0xb7   : > { %v1688_v54 = vshll.u32 %v1566_v12, 16  ;;  %v841_v57 = vrot.slane %v16627_v49, 4  ;;  %v1563_v58 = vld [vmem:[#allocation2 + $0x8] sm:$0x1]  ;;  %v1661_v47 = vor.u32 %v1660_v45, %v16667_v16  ;;  %v16676_v63 = vrot.slane %v1678_v46, 5  ;;  %14338 = vmatprep.mubr.bf16.mxu0 %v15838_v42  ;;  %v15839_v18 = vld [vmem:[#allocation2 + $0x9c] sm:$0xff]  }
  0xb8   : > { %v1684_v56 = vrot.slane %v1682_v48, 4  ;;  %v1652_v61 = vrot.slane %v1651_v44, 4  ;;  %v1664_v3 = vshll.u32 %v1563_v58, 16  ;;  %v1675_v6 = vor.u32 %v1674_v53, %v1671_v52  ;;  %v1568_v12 = vld [vmem:[#allocation2 + $0x1c] sm:$0xf]  ;;  %p18699_p0 = scmp.ne.s32.totalorder %s18658_s23, 0 }
  0xb9   : > { %v346_v8 = vsel %vm16445_vm4, 0, %v345_v41  ;;  %v1662_v10 = vrot.slane %v1661_v47, 4  ;;  %v1693_v15 = vshrl.u32 %v1567_v51, 16  ;;  %v348_v17 = vld [vmem:[#allocation2 + $0x2c] sm:$0x1]  ;;  %v16687_v24 = vrot.slane %v1688_v54, 5 }
  0xba   : > { %v1685_v11 = vor.u32 %v1684_v56, %v16676_v63  ;;  %347 = vst [vmem:[#allocation2 + $0x20] sm:$0x1] %v346_v8  ;;  %v1666_v20 = vrot.slane %v1664_v3, 5  ;;  %v1696_v27 = vshll.u32 %v1567_v51, 16  ;;  %v1702_v28 = vshll.u32 %v1568_v12, 16  ;;  %p16140_p1 = pnand %p16139_p11, %p18699_p0  ;;  %s16218_s13 = smov [#allocation11]  }
  0xbb   : > { %v1570_v30 = vld [vmem:[#allocation2 + $0x24] sm:$0xf]  ;;  %v15841_v31 = vld [vmem:[#allocation2 + $0xa8] sm:$0xff]   ;;  %v1676_v34 = vrot.slane %v1675_v6, 4  ;;  %v1706_v41 = vshrl.u32 %v1568_v12, 16  ;;  %v1695_v42 = vrot.slane %v1693_v15, 4  ;;  %v1657_v45 = vsel %vm16683_vm11, %v1652_v61, %v16667_v16 }
  0xbc   : > { %v1686_v36 = vrot.slane %v1685_v11, 4  ;;  %v1698_v44 = vrot.slane %v1696_v27, 5  ;;  %v1667_v46 = vsel %vm16683_vm11, %v1662_v10, %v1666_v20  ;;  %v16694_v48 = vrot.slane %v1702_v28, 5  ;;  %v1571_v53 = vld [vmem:[#allocation2 + $0x28] sm:$0xf]  ;;  %v15842_v60 = vld [vmem:[#allocation2 + $0xb4] sm:$0xff]   ;;  %p16141_p3 = pneg %p16140_p1 }
  0xbd   : > { %v1708_v52 = vrot.slane %v1706_v41, 4  ;;  %v349_v51 = vsel %vm16445_vm4, 0, %v348_v17  ;;  %v1717_v54 = vshrl.u32 %v1570_v30, 16  ;;  %v351_v58 = vld [vmem:[#allocation2 + $0x38] sm:$0x1]  ;;  %v1681_v47 = vsel %vm16683_vm11, %v1676_v34, %v16676_v63  ;;  %s16142_s17 = sshll.u32 %s16218_s13, 4  ;;  %s16143_s17 = int_to_ptr.vmem [resolvable:$false] %s16142_s17 }
  0xbe   : > { %350 = vst [vmem:[#allocation2 + $0x2c] sm:$0x1] %v349_v51  ;;  %v1720_v56 = vshll.u32 %v1570_v30, 16  ;;  %v1726_v3 = vshll.u32 %v1571_v53, 16  ;;  %v1730_v16 = vshrl.u32 %v1571_v53, 16  ;;  %14339 = vmatmul.mubr.bf16.gmra.mrb[24].mxu0 %v15839_v18  ;;  %v13258_v6 = vcombine.low %v1657_v45, %v1667_v46  ;;  %s16144_s7 = scalar_lea.vmem %s16143_s17, 8192  ;;  %p16145_p7 = scmp.lt.s32.totalorder %s18585_s30, %s16143_s17 }
  0xbf   : > { %v1573_v61 = vld [vmem:[#allocation2 + $0x30] sm:$0xf]  ;;  %v1719_v10 = vrot.slane %v1717_v54, 4  ;;  %v352_v11 = vsel %vm16445_vm4, 0, %v351_v58  ;;  %14342 = vmatprep.mubr.bf16.mxu0 %v15841_v31  ;;  %v1699_v63 = vor.u32 %v1698_v44, %v1695_v42  ;;  %v1574_v27 = vld [vmem:[#allocation2 + $0x34] sm:$0xf]  ;;  %v1691_v18 = vsel %vm16683_vm11, %v1686_v36, %v16687_v24  ;;  %p16146_p9 = scmp.lt.s32.totalorder %s16144_s7, %s16138_s12 }
  0xc0   : > { %v1741_v12 = vshrl.u32 %v1573_v61, 16  ;;  %v1722_v17 = vrot.slane %v1720_v56, 5  ;;  %v16707_v20 = vrot.slane %v1726_v3, 5  ;;  %353 = vst [vmem:[#allocation2 + $0x38] sm:$0x1] %v352_v11  ;;  %v1709_v28 = vor.u32 %v1708_v52, %v16694_v48 }
  0xc1   : > { %v972_v8 = vld [vmem:[#allocation2 + $0x20] sm:$0x1]  ;;  %v1732_v30 = vrot.slane %v1730_v16, 4  ;;  %v1744_v31 = vshll.u32 %v1573_v61, 16  ;;  %v354_v34 = vld [vmem:[#allocation2 + $0x44] sm:$0x1]  ;;  %p16147_p12 = por %p16146_p9, %p16145_p7 }
  0xc2   : > { %v973_v15 = vsel %vm16440_vm2, %v671_v7, %v972_v8  ;;  %v1723_v41 = vor.u32 %v1722_v17, %v1719_v10  ;;  %v1750_v45 = vshll.u32 %v1574_v27, 16  ;;  %v1754_v7 = vshrl.u32 %v1574_v27, 16  ;;  %v1576_v44 = vld [vmem:[#allocation2 + $0x3c] sm:$0xf]  ;;  %v1577_v51 = vld [vmem:[#allocation2 + $0x40] sm:$0xf] }
  0xc3   : > { %974 = vst [vmem:[#allocation2 + $0x20] sm:$0x1] %v973_v15  ;;  %v355_v42 = vsel %vm16445_vm4, 0, %v354_v34  ;;  %v1743_v46 = vrot.slane %v1741_v12, 4  ;;  %v1746_v53 = vrot.slane %v1744_v31, 5  ;;  %v1765_v54 = vshrl.u32 %v1576_v44, 16  ;;  %p16148_p2 = pnand %p16147_p12, %p16141_p3 }
  0xc4   : > { %356 = vst [vmem:[#allocation2 + $0x44] sm:$0x1] %v355_v42  ;;  %v1768_v24 = vshll.u32 %v1576_v44, 16  ;;  %v1700_v36 = vrot.slane %v1699_v63, 4  ;;  %v16715_v58 = vrot.slane %v1723_v41, 4  ;;  %v1733_v52 = vor.u32 %v1732_v30, %v16707_v20 }
  0xc5   : > { %v1774_v56 = vshll.u32 %v1577_v51, 16  ;;  %v979_v3 = vld [vmem:[#allocation2 + $0x2c] sm:$0x1]  ;;  %v16718_v16 = vrot.slane %v1750_v45, 5  ;;  %v1756_v61 = vrot.slane %v1754_v7, 4  ;;  %v1767_v8 = vrot.slane %v1765_v54, 4 }
  0xc6   : > { %v1770_v10 = vrot.slane %v1768_v24, 5  ;;  %v858_v11 = vrot.slane %v16641_v19, 4  ;;  %v13259_v12 = vcombine.low %v1681_v47, %v1691_v18  ;;  %v1710_v15 = vrot.slane %v1709_v28, 4  ;;  %v357_v17 = vld [vmem:[#allocation2 + $0x50] sm:$0x1]  ;;  %14343 = vmatmul.mubr.bf16.gmra.mrb[28].mxu0 %v15842_v60 }
  0xc7   : > { %v980_v63 = vsel %vm16440_vm2, %v688_v38, %v979_v3  ;;  %v986_v27 = vld [vmem:[#allocation2 + $0x38] sm:$0x1]  ;;  %v1747_v30 = vor.u32 %v1746_v53, %v1743_v46  ;;  %v16725_v31 = vrot.slane %v1774_v56, 5  ;;  %v1778_v34 = vshrl.u32 %v1577_v51, 16  ;;  %14362 = vmatprep.mubr.bf16.mxu0 %v13258_v6  ;;  %v1579_v28 = vld [vmem:[#allocation2 + $0x48] sm:$0xf] }
  0xc8   : > { %981 = vst [vmem:[#allocation2 + $0x2c] sm:$0x1] %v980_v63  ;;  %v358_v41 = vsel %vm16445_vm4, 0, %v357_v17  ;;  %v1705_v21 = vsel %vm16683_vm11, %v1700_v36, %v16694_v48  ;;  %v1729_v38 = vsel %vm16683_vm11, %v16715_v58, %v16707_v20  ;;  %v16736_v47 = vrot.slane %v1733_v52, 4  ;;  %v1580_v42 = vld [vmem:[#allocation2 + $0x4c] sm:$0xf] }
  0xc9   : > { %v987_v18 = vsel %vm16440_vm2, %v705_v50, %v986_v27  ;;  %359 = vst [vmem:[#allocation2 + $0x50] sm:$0x1] %v358_v41  ;;  %v1757_v60 = vor.u32 %v1756_v61, %v16718_v16  ;;  %v1771_v7 = vor.u32 %v1770_v10, %v1767_v8  ;;  %v1780_v48 = vrot.slane %v1778_v34, 4  ;;  %v360_v52 = vld [vmem:[#allocation2 + $0x5c] sm:$0x1] }
  0xca   : > { %v1569_v45 = vld [vmem:[#allocation2 + $0x20] sm:$0x1]  ;;  %988 = vst [vmem:[#allocation2 + $0x38] sm:$0x1] %v987_v18  ;;  %v1789_v46 = vshrl.u32 %v1579_v28, 16  ;;  %v1792_v53 = vshll.u32 %v1579_v28, 16 }
  0xcb   : > { %v1712_v6 = vshll.u32 %v1569_v45, 16  ;;  %v993_v44 = vld [vmem:[#allocation2 + $0x44] sm:$0x1]  ;;  %v1798_v51 = vshll.u32 %v1580_v42, 16  ;;  %v1802_v54 = vshrl.u32 %v1580_v42, 16  ;;  %v16743_v36 = vrot.slane %v1747_v30, 4 }
  0xcc   : > { %v994_v35 = vsel %vm16440_vm2, %v722_v29, %v993_v44  ;;  %v1781_v50 = vor.u32 %v1780_v48, %v16725_v31  ;;  %v1582_v56 = vld [vmem:[#allocation2 + $0x54] sm:$0xf]  ;;  %v1791_v3 = vrot.slane %v1789_v46, 4  ;;  %v1794_v61 = vrot.slane %v1792_v53, 5  ;;  %v1583_v63 = vld [vmem:[#allocation2 + $0x58] sm:$0xf] }
  0xcd   : > { %v1714_v24 = vrot.slane %v1712_v6, 5  ;;  %995 = vst [vmem:[#allocation2 + $0x44] sm:$0x1] %v994_v35  ;;  %v16750_v8 = vrot.slane %v1798_v51, 5  ;;  %v1804_v10 = vrot.slane %v1802_v54, 4  ;;  %v15845_v27 = vld [vmem:[#allocation8 + $0x88] sm:$0xff]  }
  0xce   : > { %v1758_v30 = vrot.slane %v1757_v60, 4  ;;  %v361_v2 = vsel %vm16445_vm4, 0, %v360_v52  ;;  %v1813_v29 = vshrl.u32 %v1582_v56, 16  ;;  %v16756_v45 = vrot.slane %v1771_v7, 4  ;;  %14363 = vmatmul.mubr.bf16.vlgmr.msra.gmra.mrb[0].mxu0 %v13259_v12  ;;  %v15846_v53 = vld [vmem:[#allocation8 + $0x90] sm:$0xff]  }
  0xcf   : > { %v1715_v17 = vsel %vm16683_vm11, %v1710_v15, %v1714_v24  ;;  %v1572_v41 = vld [vmem:[#allocation2 + $0x2c] sm:$0x1]  ;;  %v1795_v18 = vor.u32 %v1794_v61, %v1791_v3  ;;  %362 = vst [vmem:[#allocation2 + $0x5c] sm:$0x1] %v361_v2  ;;  %v1816_v28 = vshll.u32 %v1582_v56, 16  ;;  %v1822_v44 = vshll.u32 %v1583_v63, 16  ;;  %14395 = vmatpush3.bf16.msra.mxu0 %v16645_v26 }
  0xd0   : > { %v13260_v34 = vcombine.low %v1705_v21, %v1715_v17  ;;  %v1736_v6 = vshll.u32 %v1572_v41, 16  ;;  %v1000_v48 = vld [vmem:[#allocation2 + $0x50] sm:$0x1]  ;;  %v1815_v42 = vrot.slane %v1813_v29, 4  ;;  %v1826_v46 = vshrl.u32 %v1583_v63, 16  ;;  %14396 = vmatprep.subr.bf16.mxu0 %v15845_v27 }
  0xd1   : > { %v1575_v15 = vld [vmem:[#allocation2 + $0x38] sm:$0x1]  ;;  %v16759_v60 = vrot.slane %v1781_v50, 4  ;;  %v1001_v21 = vsel %vm16440_vm2, %v739_v13, %v1000_v48  ;;  %v1805_v7 = vor.u32 %v1804_v10, %v16750_v8  ;;  %v1818_v12 = vrot.slane %v1816_v28, 5  ;;  %v363_v35 = vld [vmem:[#allocation2 + $0x68] sm:$0x1] }
  0xd2   : > { %14366 = vmatprep.mubr.bf16.mxu0 %v13260_v34  ;;  %v1738_v51 = vrot.slane %v1736_v6, 5  ;;  %v1760_v54 = vshll.u32 %v1575_v15, 16  ;;  %1002 = vst [vmem:[#allocation2 + $0x50] sm:$0x1] %v1001_v21  ;;  %v16766_v24 = vrot.slane %v1822_v44, 5  ;;  %v1828_v26 = vrot.slane %v1826_v46, 4 }
  0xd3   : > { %v1753_v50 = vsel %vm16683_vm11, %v16743_v36, %v16718_v16  ;;  %v16772_v22 = vrot.slane %v1795_v18, 4  ;;  %v1819_v52 = vor.u32 %v1818_v12, %v1815_v42  ;;  %v364_v13 = vsel %vm16445_vm4, 0, %v363_v35  ;;  %v1585_v56 = vld [vmem:[#allocation2 + $0x60] sm:$0xf]  ;;  %v1586_v3 = vld [vmem:[#allocation2 + $0x64] sm:$0xf]  ;;  %14397 = vmatpush3.bf16.msra.mxu0 %v15845_v27 }
  0xd4   : > { %v1739_v61 = vsel %vm16683_vm11, %v16736_v47, %v1738_v51  ;;  %v1762_v10 = vrot.slane %v1760_v54, 5  ;;  %v1578_v63 = vld [vmem:[#allocation2 + $0x44] sm:$0x1]  ;;  %v1829_v17 = vor.u32 %v1828_v26, %v16766_v24  ;;  %365 = vst [vmem:[#allocation2 + $0x68] sm:$0x1] %v364_v13  ;;  %v1837_v2 = vshrl.u32 %v1585_v56, 16  ;;  %14398 = vmatprep.subr.bf16.mxu0 %v15846_v53 }
  0xd5   : > { %v13261_v16 = vcombine.low %v1729_v38, %v1739_v61  ;;  %v1784_v36 = vshll.u32 %v1578_v63, 16  ;;  %v1806_v29 = vrot.slane %v1805_v7, 4  ;;  %v15847_v34 = vld [vmem:[#allocation8 + $0x98] sm:$0xff]   ;;  %v1840_v41 = vshll.u32 %v1585_v56, 16  ;;  %v366_v18 = vld [vmem:[#allocation2 + $0x74] sm:$0x1] }
  0xd6   : > { %v1763_v47 = vsel %vm16683_vm11, %v1758_v30, %v1762_v10  ;;  %v1777_v28 = vsel %vm16683_vm11, %v16756_v45, %v16725_v31  ;;  %v1007_v6 = vld [vmem:[#allocation2 + $0x5c] sm:$0x1]  ;;  %v1839_v48 = vrot.slane %v1837_v2, 4  ;;  %v1846_v42 = vshll.u32 %v1586_v3, 16  ;;  %v1588_v20 = vld [vmem:[#allocation2 + $0x6c] sm:$0xf] }
  0xd7   : > { %v13262_v58 = vcombine.low %v1753_v50, %v1763_v47  ;;  %v1786_v38 = vrot.slane %v1784_v36, 5  ;;  %v1008_v27 = vsel %vm16440_vm2, %v756_v0, %v1007_v6  ;;  %v16795_v44 = vrot.slane %v1819_v52, 4  ;;  %v1589_v30 = vld [vmem:[#allocation2 + $0x70] sm:$0xf]  ;;  %14367 = vmatmul.mubr.bf16.gmra.mrb[4].mxu0 %v13261_v16  ;;  %v369_v52 = vld [vmem:[#allocation2 + $0x80] sm:$0x1] }
  0xd8   : > { %1009 = vst [vmem:[#allocation2 + $0x5c] sm:$0x1] %v1008_v27  ;;  %v16797_v46 = vrot.slane %v1829_v17, 4  ;;  %v1842_v31 = vrot.slane %v1840_v41, 5  ;;  %v1850_v45 = vshrl.u32 %v1586_v3, 16  ;;  %v367_v15 = vsel %vm16445_vm4, 0, %v366_v18  ;;  %14399 = vmatpush3.bf16.msra.mxu0 %v15846_v53 }
  0xd9   : > { %14370 = vmatprep.mubr.bf16.mxu0 %v13262_v58  ;;  %v1787_v37 = vsel %vm16683_vm11, %v16759_v60, %v1786_v38  ;;  %v1581_v21 = vld [vmem:[#allocation2 + $0x50] sm:$0x1]  ;;  %v16804_v0 = vrot.slane %v1846_v42, 5  ;;  %368 = vst [vmem:[#allocation2 + $0x74] sm:$0x1] %v367_v15  ;;  %v1861_v7 = vshrl.u32 %v1588_v20, 16  ;;  %v1801_v54 = vsel %vm16683_vm11, %v16772_v22, %v16750_v8  ;;  %14400 = vmatprep.subr.bf16.mxu0 %v15847_v34 }
  0xda   : > { %v1864_v12 = vshll.u32 %v1588_v20, 16  ;;  %v15848_v51 = vld [vmem:[#allocation8 + $0xa0] sm:$0xff]   ;;  %v1808_v26 = vshll.u32 %v1581_v21, 16  ;;  %v1843_v35 = vor.u32 %v1842_v31, %v1839_v48  ;;  %v1870_v50 = vshll.u32 %v1589_v30, 16  ;;  %v1591_v13 = vld [vmem:[#allocation2 + $0x78] sm:$0xf] }
  0xdb   : > { %v13263_v60 = vcombine.low %v1777_v28, %v1787_v37  ;;  %v1014_v53 = vld [vmem:[#allocation2 + $0x68] sm:$0x1]  ;;  %v1852_v56 = vrot.slane %v1850_v45, 4  ;;  %v16810_v3 = vrot.slane %v1861_v7, 4  ;;  %v1874_v22 = vshrl.u32 %v1589_v30, 16  ;;  %v15849_v17 = vld [vmem:[#allocation8 + $0xa8] sm:$0xff]  }
  0xdc   : > { %v16812_v61 = vrot.slane %v1864_v12, 5  ;;  %v1810_v10 = vrot.slane %v1808_v26, 5  ;;  %v1015_v63 = vsel %vm16440_vm2, %v773_v62, %v1014_v53  ;;  %v16818_v8 = vrot.slane %v1843_v35, 4  ;;  %14401 = vmatpush3.bf16.msra.mxu0 %v15847_v34  ;;  %v1592_v16 = vld [vmem:[#allocation2 + $0x7c] sm:$0xf]  ;;  %v15850_v37 = vld [vmem:[#allocation8 + $0xb0] sm:$0xff]  }
  0xdd   : > { %1016 = vst [vmem:[#allocation2 + $0x68] sm:$0x1] %v1015_v63  ;;  %v370_v2 = vsel %vm16445_vm4, 0, %v369_v52  ;;  %v1885_v36 = vshrl.u32 %v1591_v13, 16  ;;  %v372_v41 = vld [vmem:[#allocation2 + $0x8c] sm:$0x1]  ;;  %14402 = vmatprep.subr.bf16.mxu0 %v15848_v51  ;;  %v1825_v34 = vsel %vm16683_vm11, %v16795_v44, %v16766_v24  ;;  %v1853_v48 = vor.u32 %v1852_v56, %v16804_v0 }
  0xde   : > { %v1811_v18 = vsel %vm16683_vm11, %v1806_v29, %v1810_v10  ;;  %v16824_v47 = vrot.slane %v1870_v50, 5  ;;  %371 = vst [vmem:[#allocation2 + $0x80] sm:$0x1] %v370_v2  ;;  %v1888_v59 = vshll.u32 %v1591_v13, 16  ;;  %v1594_v62 = vld [vmem:[#allocation2 + $0x84] sm:$0xf]  ;;  %v1867_v42 = vor.u32 %v16812_v61, %v16810_v3 }
  0xdf   : > { %v13264_v28 = vcombine.low %v1801_v54, %v1811_v18  ;;  %v1584_v6 = vld [vmem:[#allocation2 + $0x5c] sm:$0x1]  ;;  %v1595_v20 = vld [vmem:[#allocation2 + $0x88] sm:$0xf]  ;;  %14371 = vmatmul.mubr.bf16.gmra.mrb[8].mxu0 %v13263_v60  ;;  %v1876_v38 = vrot.slane %v1874_v22, 4  ;;  %v1894_v27 = vshll.u32 %v1592_v16, 16  ;;  %v1849_v31 = vsel %vm16683_vm11, %v16818_v8, %v16804_v0 }
  0xe0   : > { %v1832_v29 = vshll.u32 %v1584_v6, 16  ;;  %v1021_v58 = vld [vmem:[#allocation2 + $0x74] sm:$0x1]  ;;  %v1898_v30 = vshrl.u32 %v1592_v16, 16  ;;  %14403 = vmatpush3.bf16.msra.mxu0 %v15848_v51  ;;  %v16841_v44 = vrot.slane %v1885_v36, 4  ;;  %v373_v45 = vsel %vm16445_vm4, 0, %v372_v41 }
  0xe1   : > { %14374 = vmatprep.mubr.bf16.mxu0 %v13264_v28  ;;  %v1022_v24 = vsel %vm16440_vm2, %v790_v9, %v1021_v58  ;;  %v375_v15 = vld [vmem:[#allocation2 + $0x98] sm:$0x1]  ;;  %v1890_v7 = vrot.slane %v1888_v59, 5  ;;  %v16845_v12 = vrot.slane %v1894_v27, 5  ;;  %374 = vst [vmem:[#allocation2 + $0x8c] sm:$0x1] %v373_v45  ;;  %14404 = vmatprep.subr.bf16.mxu0 %v15849_v17  ;;  %v1877_v60 = vor.u32 %v1876_v38, %v16824_v47 }
  0xe2   : > { %v1834_v21 = vrot.slane %v1832_v29, 5  ;;  %1023 = vst [vmem:[#allocation2 + $0x74] sm:$0x1] %v1022_v24  ;;  %v1900_v54 = vrot.slane %v1898_v30, 4  ;;  %v1597_v33 = vld [vmem:[#allocation2 + $0x90] sm:$0xf] }
  0xe3   : > { %v1909_v0 = vshrl.u32 %v1594_v62, 16  ;;  %v1912_v26 = vshll.u32 %v1594_v62, 16  ;;  %v1918_v9 = vshll.u32 %v1595_v20, 16  ;;  %v1922_v51 = vshrl.u32 %v1595_v20, 16  ;;  %v1598_v35 = vld [vmem:[#allocation2 + $0x94] sm:$0xf] }
  0xe4   : > { %v1835_v50 = vsel %vm16683_vm11, %v16797_v46, %v1834_v21  ;;  %v1587_v52 = vld [vmem:[#allocation2 + $0x68] sm:$0x1]  ;;  %v1854_v13 = vrot.slane %v1853_v48, 4  ;;  %v376_v53 = vsel %vm16445_vm4, 0, %v375_v15  ;;  %v378_v56 = vld [vmem:[#allocation2 + $0xa4] sm:$0x1]  ;;  %14405 = vmatpush3.bf16.msra.mxu0 %v15849_v17  ;;  %v1891_v2 = vor.u32 %v1890_v7, %v16841_v44 }
  0xe5   : > { %v13265_v3 = vcombine.low %v1825_v34, %v1835_v50  ;;  %v1856_v61 = vshll.u32 %v1587_v52, 16  ;;  %v1028_v10 = vld [vmem:[#allocation2 + $0x80] sm:$0x1]  ;;  %v1911_v63 = vrot.slane %v1909_v0, 4  ;;  %v1914_v8 = vrot.slane %v1912_v26, 5  ;;  %14406 = vmatprep.subr.bf16.mxu0 %v15850_v37  ;;  %v15851_v36 = vld [vmem:[#allocation8 + $0xb8] sm:$0xff]  }
  0xe6   : > { %377 = vst [vmem:[#allocation2 + $0x98] sm:$0x1] %v376_v53  ;;  %v1868_v22 = vrot.slane %v1867_v42, 4  ;;  %v1029_v46 = vsel %vm16440_vm2, %v807_v14, %v1028_v10  ;;  %v1901_v16 = vor.u32 %v1900_v54, %v16845_v12  ;;  %v16859_v18 = vrot.slane %v1918_v9, 5  ;;  %v1600_v14 = vld [vmem:[#allocation2 + $0x9c] sm:$0xf] }
  0xe7   : > { %v1858_v41 = vrot.slane %v1856_v61, 5  ;;  %1030 = vst [vmem:[#allocation2 + $0x80] sm:$0x1] %v1029_v46  ;;  %v1924_v59 = vrot.slane %v1922_v51, 4  ;;  %v1933_v62 = vshrl.u32 %v1597_v33, 16  ;;  %14375 = vmatmul.mubr.bf16.gmra.mrb[12].mxu0 %v13265_v3  ;;  %v1878_v17 = vrot.slane %v1877_v60, 4 }
  0xe8   : > { %v1936_v28 = vshll.u32 %v1597_v33, 16  ;;  %v1942_v6 = vshll.u32 %v1598_v35, 16  ;;  %v379_v55 = vsel %vm16445_vm4, 0, %v378_v56  ;;  %v1035_v42 = vld [vmem:[#allocation2 + $0x8c] sm:$0x1]  ;;  %v1915_v20 = vor.u32 %v1914_v8, %v1911_v63  ;;  %14407 = vmatpush3.bf16.msra.mxu0 %v15850_v37  ;;  %v16869_v45 = vld [vmem:[#allocation8 + $0xc0] sm:$0xff]  }
  0xe9   : > { %v1859_v34 = vsel %vm16683_vm11, %v1854_v13, %v1858_v41  ;;  %v1590_v48 = vld [vmem:[#allocation2 + $0x74] sm:$0x1]  ;;  %v1935_v29 = vrot.slane %v1933_v62, 4  ;;  %v1946_v58 = vshrl.u32 %v1598_v35, 16  ;;  %380 = vst [vmem:[#allocation2 + $0xa4] sm:$0x1] %v379_v55  ;;  %v1036_v30 = vsel %vm16440_vm2, %v824_v43, %v1035_v42  ;;  %14408 = vmatprep.subr.bf16.mxu0 %v15851_v36 }
  0xea   : > { %v13266_v38 = vcombine.low %v1849_v31, %v1859_v34  ;;  %v1880_v27 = vshll.u32 %v1590_v48, 16  ;;  %v1938_v24 = vrot.slane %v1936_v28, 5  ;;  %v1601_v44 = vld [vmem:[#allocation2 + $0xa0] sm:$0xf]  ;;  %v1873_v15 = vsel %vm16683_vm11, %v1868_v22, %v16824_v47  ;;  %1037 = vst [vmem:[#allocation2 + $0x8c] sm:$0x1] %v1036_v30 }
  0xeb   : > { %v1892_v21 = vrot.slane %v1891_v2, 4  ;;  %v1902_v7 = vrot.slane %v1901_v16, 4  ;;  %v1925_v31 = vor.u32 %v1924_v59, %v16859_v18  ;;  %v16875_v54 = vrot.slane %v1942_v6, 5  ;;  %v381_v51 = vld [vmem:[#allocation2 + $0xb0] sm:$0x1] }
  0xec   : > { %14378 = vmatprep.mubr.bf16.mxu0 %v13266_v38  ;;  %v1882_v37 = vrot.slane %v1880_v27, 5  ;;  %v1957_v43 = vshrl.u32 %v1600_v14, 16  ;;  %v1960_v33 = vshll.u32 %v1600_v14, 16  ;;  %v1948_v26 = vrot.slane %v1946_v58, 4  ;;  %14409 = vmatpush3.bf16.msra.mxu0 %v15851_v36  ;;  %v1603_v53 = vld [vmem:[#allocation2 + $0xa8] sm:$0xf] }
  0xed   : > { %v1042_v25 = vld [vmem:[#allocation2 + $0x98] sm:$0x1]  ;;  %v1966_v9 = vshll.u32 %v1601_v44, 16  ;;  %v1970_v47 = vshrl.u32 %v1601_v44, 16  ;;  %v1916_v52 = vrot.slane %v1915_v20, 4  ;;  %v1939_v13 = vor.u32 %v1938_v24, %v1935_v29  ;;  %14442 = vmatprep.subr.bf16.mxu0 %v16869_v45 }
  0xee   : > { %v1043_v0 = vsel %vm16440_vm2, %v841_v57, %v1042_v25  ;;  %v1883_v35 = vsel %vm16683_vm11, %v1878_v17, %v1882_v37  ;;  %v1593_v50 = vld [vmem:[#allocation2 + $0x80] sm:$0x1]  ;;  %v1959_v60 = vrot.slane %v1957_v43, 4  ;;  %v1962_v3 = vrot.slane %v1960_v33, 5  ;;  %v1604_v36 = vld [vmem:[#allocation2 + $0xac] sm:$0xf] }
  0xef   : > { %1044 = vst [vmem:[#allocation2 + $0x98] sm:$0x1] %v1043_v0  ;;  %v13267_v49 = vcombine.low %v1873_v15, %v1883_v35  ;;  %v1904_v56 = vshll.u32 %v1593_v50, 16  ;;  %v16884_v57 = vrot.slane %v1966_v9, 5  ;;  %v1897_v61 = vsel %vm16683_vm11, %v1892_v21, %v16845_v12  ;;  %v384_v62 = vld [vmem:[#allocation2 + $0xbc] sm:$0x1] }
  0xf0   : > { %v1049_v10 = vld [vmem:[#allocation2 + $0xa4] sm:$0x1]  ;;  %v1972_v63 = vrot.slane %v1970_v47, 4  ;;  %v382_v8 = vsel %vm16445_vm4, 0, %v381_v51  ;;  %v1926_v46 = vrot.slane %v1925_v31, 4  ;;  %v1949_v2 = vor.u32 %v1948_v26, %v16875_v54 }
  0xf1   : > { %14379 = vmatmul.mubr.bf16.gmra.mrb[16].mxu0 %v13267_v49  ;;  %v1906_v22 = vrot.slane %v1904_v56, 5  ;;  %v1050_v16 = vsel %vm16440_vm2, %v858_v11, %v1049_v10  ;;  %383 = vst [vmem:[#allocation2 + $0xb0] sm:$0x1] %v382_v8  ;;  %v1596_v41 = vld [vmem:[#allocation2 + $0x8c] sm:$0x1]  ;;  %v1981_v12 = vshrl.u32 %v1603_v53, 16  ;;  %v1963_v55 = vor.u32 %v1962_v3, %v1959_v60 }
  0xf2   : > { %1051 = vst [vmem:[#allocation2 + $0xa4] sm:$0x1] %v1050_v16  ;;  %v1984_v59 = vshll.u32 %v1603_v53, 16  ;;  %v1928_v28 = vshll.u32 %v1596_v41, 16  ;;  %v1940_v6 = vrot.slane %v1939_v13, 4  ;;  %v875_v14 = vrot.slane %v16650_v40, 4 }
  0xf3   : > { %v1907_v17 = vsel %vm16683_vm11, %v1902_v7, %v1906_v22  ;;  %v1973_v19 = vor.u32 %v1972_v63, %v16884_v57  ;;  %v1990_v48 = vshll.u32 %v1604_v36, 16  ;;  %v1921_v11 = vsel %vm16683_vm11, %v1916_v52, %v16859_v18  ;;  %v1606_v40 = vld [vmem:[#allocation2 + $0xb4] sm:$0xf]  ;;  %v1607_v7 = vld [vmem:[#allocation2 + $0xb8] sm:$0xf] }
  0xf4   : > { %v13268_v34 = vcombine.low %v1897_v61, %v1907_v17  ;;  %v1930_v42 = vrot.slane %v1928_v28, 5  ;;  %v1950_v29 = vrot.slane %v1949_v2, 4  ;;  %v385_v58 = vsel %vm16445_vm4, 0, %v384_v62  ;;  %v2383_v61 = vld [vmem:[#allocation2 + $0x4] sm:$0xf] }
  0xf5   : > { %v1983_v27 = vrot.slane %v1981_v12, 4  ;;  %v1986_v30 = vrot.slane %v1984_v59, 5  ;;  %v1994_v24 = vshrl.u32 %v1604_v36, 16  ;;  %386 = vst [vmem:[#allocation2 + $0xbc] sm:$0x1] %v385_v58  ;;  %v892_v44 = vrot.slane %v16660_v1, 4 }
  0xf6   : > { %v1599_v20 = vld [vmem:[#allocation2 + $0x98] sm:$0x1]  ;;  %14382 = vmatprep.mubr.bf16.mxu0 %v13268_v34  ;;  %v1931_v15 = vsel %vm16683_vm11, %v1926_v46, %v1930_v42  ;;  %v1945_v18 = vsel %vm16683_vm11, %v1940_v6, %v16875_v54  ;;  %v1964_v21 = vrot.slane %v1963_v55, 4  ;;  %v1974_v25 = vrot.slane %v1973_v19, 4  ;;  %v2382_v12 = vld [vmem:[#allocation2] sm:$0xe] }
  0xf7   : > { %v1952_v38 = vshll.u32 %v1599_v20, 16  ;;  %v13269_v31 = vcombine.low %v1921_v11, %v1931_v15  ;;  %v1992_v33 = vrot.slane %v1990_v48, 5  ;;  %v2005_v9 = vshrl.u32 %v1606_v40, 16  ;;  %v2384_v59 = vld [vmem:[#allocation2 + $0x8] sm:$0x1] }
  0xf8   : > { %v1056_v43 = vld [vmem:[#allocation2 + $0xb0] sm:$0x1]  ;;  %v2008_v1 = vshll.u32 %v1606_v40, 16  ;;  %v1987_v54 = vor.u32 %v1986_v30, %v1983_v27  ;;  %v1996_v35 = vrot.slane %v1994_v24, 4  ;;  %v2014_v52 = vshll.u32 %v1607_v7, 16 }
  0xf9   : > { %v1954_v37 = vrot.slane %v1952_v38, 5  ;;  %v1602_v0 = vld [vmem:[#allocation2 + $0xa4] sm:$0x1]  ;;  %v1057_v26 = vsel %vm16440_vm2, %v875_v14, %v1056_v43  ;;  %14383 = vmatmul.mubr.bf16.gmra.mrb[20].mxu0 %v13269_v31  ;;  %v2018_v13 = vshrl.u32 %v1607_v7, 16  ;;  %v1969_v60 = vsel %vm16683_vm11, %v1964_v21, %v16884_v57  ;;  %v2386_v55 = vld [vmem:[#allocation2 + $0x10] sm:$0xf] }
  0xfa   : > { %v1976_v51 = vshll.u32 %v1602_v0, 16  ;;  %1058 = vst [vmem:[#allocation2 + $0xb0] sm:$0x1] %v1057_v26  ;;  %v2007_v56 = vrot.slane %v2005_v9, 4  ;;  %v2010_v3 = vrot.slane %v2008_v1, 5  ;;  %v1988_v63 = vrot.slane %v1987_v54, 4 }
  0xfb   : > { %v1955_v47 = vsel %vm16683_vm11, %v1950_v29, %v1954_v37  ;;  %v1997_v8 = vor.u32 %v1996_v35, %v1992_v33  ;;  %v2016_v2 = vrot.slane %v2014_v52, 5  ;;  %v2020_v16 = vrot.slane %v2018_v13, 4  ;;  %v2389_v11 = vld [vmem:[#allocation2 + $0x1c] sm:$0xf]  ;;  %v2385_v38 = vld [vmem:[#allocation2 + $0xc] sm:$0xe] }
  0xfc   : > { %v13270_v50 = vcombine.low %v1945_v18, %v1955_v47  ;;  %v1978_v53 = vrot.slane %v1976_v51, 5  ;;  %v1063_v49 = vld [vmem:[#allocation2 + $0xbc] sm:$0x1]  ;;  %v2515_v36 = vrot.slane %v2383_v61, 5  ;;  %v2011_v41 = vor.u32 %v2010_v3, %v2007_v56  ;;  %v2387_v40 = vld [vmem:[#allocation2 + $0x14] sm:$0x1] }
  0xfd   : > { %v1064_v22 = vsel %vm16440_vm2, %v892_v44, %v1063_v49  ;;  %v1998_v62 = vrot.slane %v1997_v8, 4  ;;  %vm2510_vm12 = vcmask 1042432   ;;  %vm2511_vm13 = vcmask 1046532   ;;  %v2388_v21 = vld [vmem:[#allocation2 + $0x18] sm:$0xe] }
  0xfe   : > { %14386 = vmatprep.mubr.bf16.mxu0 %v13270_v50  ;;  %v1979_v10 = vsel %vm16683_vm11, %v1974_v25, %v1978_v53  ;;  %1065 = vst [vmem:[#allocation2 + $0xbc] sm:$0x1] %v1064_v22  ;;  %v1993_v28 = vsel %vm16683_vm11, %v1988_v63, %v1992_v33  ;;  %v2021_v6 = vor.u32 %v2020_v16, %v2016_v2  ;;  %v13282_v34 = vrot.slane %v2382_v12, 9  ;;  %vm16924_vm14 = vmor %vm2510_vm12, %vm2511_vm13  ;;  %v2390_v25 = vld [vmem:[#allocation2 + $0x20] sm:$0x1] }
  0xff   : > { %v13271_v46 = vcombine.low %v1969_v60, %v1979_v10  ;;  %v2517_v19 = vrot.slane %v2515_v36, 4  ;;  %v2518_v48 = vrot.slane %v2384_v59, 5  ;;  %v2012_v42 = vrot.slane %v2011_v41, 4  ;;  %v2392_v43 = vld [vmem:[#allocation2 + $0x28] sm:$0xf] }
 0x100   : > { %v18677_v20 = vmov 0  ;;  %v2022_v30 = vrot.slane %v2021_v6, 4  ;;  %v2522_v44 = vrot.slane %v2386_v55, 5  ;;  %v2516_v15 = vsel %vm16924_vm14, %v13282_v34, %v2515_v36  ;;  %v2391_v51 = vld [vmem:[#allocation2 + $0x24] sm:$0xe]  ;;  %v15853_v6 = vld [vmem:[#allocation8 + $0xc8] sm:$0xff]  }
 0x101   : > { %v1605_v57 = vld [vmem:[#allocation2 + $0xb0] sm:$0x1]  ;;  %14387 = vmatmul.mubr.bf16.gmra.mrb[24].mxu0 %v13271_v46  ;;  %v18678_v20 = vsel %vm16924_vm14, 4294967295, %v18677_v20  ;;  %v2519_v18 = vsel %vm16924_vm14, %v2517_v19, %v2518_v48  ;;  %v2529_v7 = vrot.slane %v2389_v11, 5  ;;  %v2017_v31 = vsel %vm16683_vm11, %v2012_v42, %v2016_v2  ;;  %v2395_v54 = vld [vmem:[#allocation2 + $0x34] sm:$0xf] }
 0x102   : > { %v2000_v17 = vshll.u32 %v1605_v57, 16  ;;  %18679 = vst [vmem:[#allocation19_spill] sm:$0xff] %v18678_v20  ;;  %v13283_v33 = vrot.slane %v2385_v38, 9  ;;  %v2525_v0 = vrot.slane %v2387_v40, 5  ;;  %v13298_v9 = vcombine.low %v2516_v15, %v2519_v18  ;;  %v16938_v60 = vld [vmem:[#allocation2 + $0x40] sm:$0xf] }
 0x103   : > { %v2524_v1 = vrot.slane %v2522_v44, 4  ;;  %v13284_v47 = vrot.slane %v2388_v21, 9  ;;  %v2531_v50 = vrot.slane %v2529_v7, 4  ;;  %v2532_v52 = vrot.slane %v2390_v25, 5  ;;  %v2393_v53 = vld [vmem:[#allocation2 + $0x2c] sm:$0x1] }
 0x104   : > { %v2002_v14 = vrot.slane %v2000_v17, 5  ;;  %v2536_v13 = vrot.slane %v2392_v43, 5  ;;  %v2394_v49 = vld [vmem:[#allocation2 + $0x30] sm:$0xe]  ;;  %v2396_v56 = vld [vmem:[#allocation2 + $0x38] sm:$0x1]  ;;  %v2523_v61 = vsel %vm16924_vm14, %v13283_v33, %v2522_v44 }
 0x105   : > { %v1608_v58 = vld [vmem:[#allocation2 + $0xbc] sm:$0x1]  ;;  %v2543_v3 = vrot.slane %v2395_v54, 5  ;;  %v2526_v10 = vsel %vm16924_vm14, %v2524_v1, %v2525_v0  ;;  %v13285_v63 = vrot.slane %v2391_v51, 9  ;;  %v16944_v8 = vld [vmem:[#allocation2 + $0x3c] sm:$0xe]  ;;  %v2530_v2 = vsel %vm16924_vm14, %v13284_v47, %v2529_v7 }
 0x106   : > { %v2003_v29 = vsel %vm16683_vm11, %v1998_v62, %v2002_v14  ;;  %v2024_v24 = vshll.u32 %v1608_v58, 16  ;;  %v2550_v22 = vrot.slane %v16938_v60, 5  ;;  %v538_v46 = vld [vmem:[%s16429_s6 + $0xf0] sm:$0xff]  ;;  %v2533_v16 = vsel %vm16924_vm14, %v2531_v50, %v2532_v52  ;;  %v16954_v62 = vld [vmem:[#allocation2 + $0x48] sm:$0xe] }
 0x107   : > { %v13272_v27 = vcombine.low %v1993_v28, %v2003_v29  ;;  %v2538_v36 = vrot.slane %v2536_v13, 4  ;;  %v2539_v57 = vrot.slane %v2393_v53, 5  ;;  %v16952_v41 = vld [vmem:[#allocation2 + $0x44] sm:$0x1]  ;;  %v13286_v12 = vrot.slane %v2394_v49, 9 }
 0x108   : > { %v2026_v37 = vrot.slane %v2024_v24, 5  ;;  %v2546_v59 = vrot.slane %v2396_v56, 5  ;;  %v16956_v17 = vld [vmem:[#allocation2 + $0x4c] sm:$0xf]  ;;  %v13299_v28 = vcombine.low %v2523_v61, %v2526_v10  ;;  %v2545_v55 = vrot.slane %v2543_v3, 4  ;;  %v15858_v60 = vld [vmem:[#allocation8 + $0xf0] sm:$0xff]  }
 0x109   : > { %14390 = vmatprep.mubr.bf16.mxu0 %v13272_v27  ;;  %v13287_v14 = vrot.slane %v16944_v8, 9  ;;  %v16959_v34 = vld [vmem:[#allocation2 + $0x50] sm:$0x1]  ;;  %v16961_v19 = vpack.c.bf16 %v538_v46, %v538_v46  ;;  %v13300_v48 = vcombine.low %v2530_v2, %v2533_v16  ;;  %v2552_v11 = vrot.slane %v2550_v22, 4  ;;  %v16966_v29 = vld [vmem:[#allocation2 + $0x58] sm:$0xf] }
 0x10a   : > { %v2027_v26 = vsel %vm16683_vm11, %v2022_v30, %v2026_v37  ;;  %v2553_v42 = vrot.slane %v16952_v41, 5  ;;  %v13288_v58 = vrot.slane %v16954_v62, 9  ;;  %v2557_v38 = vrot.slane %v16956_v17, 5  ;;  %v16970_v27 = vld [vmem:[#allocation2 + $0x54] sm:$0xe]  ;;  %v539_v24 = vld [vmem:[%s16429_s6 + $0xf8] sm:$0xff] }
 0x10b   : > { %v13273_v35 = vcombine.low %v2017_v31, %v2027_v26  ;;  %v16972_v30 = vld [vmem:[#allocation2 + $0x64] sm:$0xf]  ;;  %v2537_v40 = vsel %vm16924_vm14, %v13285_v63, %v2536_v13  ;;  %v2540_v44 = vsel %vm16924_vm14, %v2538_v36, %v2539_v57  ;;  %v16979_v15 = vld [vmem:[#allocation2 + $0x5c] sm:$0x1]  ;;  %v16981_v18 = vld [vmem:[#allocation2 + $0x70] sm:$0xf]  ;;  %v2544_v7 = vsel %vm16924_vm14, %v13286_v12, %v2543_v3 }
 0x10c   : > { %v16983_v21 = vld [vmem:[#allocation2 + $0x7c] sm:$0xf]  ;;  %v2547_v31 = vsel %vm16924_vm14, %v2545_v55, %v2546_v59  ;;  %v15854_v37 = vld [vmem:[#allocation8 + $0xd0] sm:$0xff]   ;;  %v2564_v25 = vrot.slane %v16966_v29, 5  ;;  %v2408_v33 = vld [vmem:[#allocation2 + $0x68] sm:$0x1]  ;;  %v13301_v1 = vcombine.low %v2537_v40, %v2540_v44  ;;  %v13832_v49 = vpack.c.bf16 %v539_v24, %v539_v24 }
 0x10d   : > { %14391 = vmatmul.mubr.bf16.gmra.mrb[28].mxu0 %v13273_v35  ;;  %v2406_v43 = vld [vmem:[#allocation2 + $0x60] sm:$0xe]  ;;  %v894_v0 = vshrl.u32 %v16961_v19, 16  ;;  %v2560_v26 = vrot.slane %v16959_v34, 5  ;;  %v16994_v47 = vld [vmem:[#allocation2 + $0x6c] sm:$0xe]  ;;  %v13302_v50 = vcombine.low %v2544_v7, %v2547_v31  ;;  %v2558_v55 = vsel %vm16924_vm14, %v13288_v58, %v2557_v38 }
 0x10e   : > { %14410 = vmatprep.mubr.bf16.mxu0 %v13298_v9  ;;  %v2571_v9 = vrot.slane %v16972_v30, 5  ;;  %v16996_v51 = vld [vmem:[#allocation2 + $0x74] sm:$0x1]  ;;  %v2578_v54 = vrot.slane %v16981_v18, 5  ;;  %v2585_v35 = vrot.slane %v16983_v21, 5  ;;  %v13289_v52 = vrot.slane %v16970_v27, 9 }
 0x10f   : > { %v17002_v13 = vld [vmem:[#allocation2 + $0x78] sm:$0xe]  ;;  %v17004_v53 = vld [vmem:[#allocation2 + $0x80] sm:$0x1]  ;;  %v2559_v56 = vrot.slane %v2557_v38, 4  ;;  %v2566_v3 = vrot.slane %v2564_v25, 4 }
 0x110   : > { %v15855_v61 = vld [vmem:[#allocation8 + $0xd8] sm:$0xff]   ;;  %v13290_v10 = vrot.slane %v2406_v43, 9  ;;  %v17006_v63 = vrot.slane %v894_v0, 7  ;;  %v2573_v8 = vrot.slane %v2571_v9, 4  ;;  %v2574_v46 = vrot.slane %v2408_v33, 5  ;;  %v15856_v59 = vld [vmem:[#allocation8 + $0xe0] sm:$0xff]  }
 0x111   : > { %v13291_v2 = vrot.slane %v16994_v47, 9  ;;  %v2581_v16 = vrot.slane %v16996_v51, 5  ;;  %v2580_v36 = vrot.slane %v2578_v54, 4  ;;  %v13292_v57 = vrot.slane %v17002_v13, 9  ;;  %v15857_v29 = vld [vmem:[#allocation8 + $0xe8] sm:$0xff]   ;;  %v15859_v30 = vld [vmem:[#allocation8 + $0xf8] sm:$0xff]  }
 0x112   : > { %v2587_v41 = vrot.slane %v2585_v35, 4  ;;  %v2588_v12 = vrot.slane %v17004_v53, 5  ;;  %v900_v62 = vrot.slane %v17006_v63, 4  ;;  %v902_v17 = vshrl.u32 %v13832_v49, 16  ;;  %v2416_v38 = vld [vmem:[#allocation2 + $0x88] sm:$0xf] }
 0x113   : > { %v2561_v34 = vsel %vm16924_vm14, %v2559_v56, %v2560_v26  ;;  %v331_v40 = vld [vmem:[#allocation2 + $0xc0] sm:$0x1]  ;;  %v2419_v7 = vld [vmem:[#allocation2 + $0x94] sm:$0xf]  ;;  %v2579_v43 = vsel %vm16924_vm14, %v13291_v2, %v2578_v54  ;;  %v2582_v33 = vsel %vm16924_vm14, %v2580_v36, %v2581_v16  ;;  %v2592_v0 = vrot.slane %v2416_v38, 5 }
 0x114   : > { %v13304_v27 = vcombine.low %v2558_v55, %v2561_v34  ;;  %v17035_v44 = vrot.slane %v902_v17, 7  ;;  %v332_v31 = vsel %vm16440_vm2, 0, %v331_v40  ;;  %v2586_v26 = vsel %vm16924_vm14, %v13292_v57, %v2585_v35  ;;  %v17053_v18 = vld [vmem:[#allocation8 + $0x100] sm:$0xff]   ;;  %v2421_v16 = vld [vmem:[#allocation2 + $0x9c] sm:$0xe] }
 0x115   : > { %14411 = vmatmul.mubr.bf16.vlgmr.msra.gmra.mrb[0].mxu0 %v13299_v28  ;;  %v2551_v28 = vsel %vm16924_vm14, %v13287_v14, %v2550_v22  ;;  %v2565_v22 = vsel %vm16924_vm14, %v13289_v52, %v2564_v25  ;;  %333 = vst [vmem:[#allocation2 + $0xc0] sm:$0x1] %v332_v31  ;;  %v2599_v47 = vrot.slane %v2419_v7, 5  ;;  %v2418_v54 = vld [vmem:[#allocation2 + $0x90] sm:$0xe]  ;;  %v13307_v52 = vcombine.low %v2579_v43, %v2582_v33 }
 0x116   : > { %14443 = vmatpush3.bf16.msra.mxu0 %v16869_v45  ;;  %14414 = vmatprep.mubr.bf16.mxu0 %v13300_v48  ;;  %v2567_v45 = vrot.slane %v16979_v15, 5  ;;  %v905_v15 = vshll.u32 %v13832_v49, 16  ;;  %v2594_v13 = vrot.slane %v2592_v0, 4  ;;  %v13294_v49 = vrot.slane %v2418_v54, 9  ;;  %v2426_v17 = vld [vmem:[#allocation2 + $0xb0] sm:$0x1] }
 0x117   : > { %14444 = vmatprep.subr.bf16.mxu0 %v15853_v6  ;;  %v2601_v56 = vrot.slane %v2599_v47, 4  ;;  %v13295_v55 = vrot.slane %v2421_v16, 9  ;;  %v3430_v54 = vld [vmem:[#allocation2 + $0x10] sm:$0xf]  ;;  %v3458_v5 = vld [vmem:[#allocation2 + $0x80] sm:$0x1] }
 0x118   : > { %v2568_v14 = vsel %vm16924_vm14, %v2566_v3, %v2567_v45  ;;  %v907_v25 = vor.u32 %v905_v15, %v17035_v44  ;;  %v2600_v57 = vsel %vm16924_vm14, %v13294_v49, %v2599_v47  ;;  %v3431_v49 = vld [vmem:[#allocation2 + $0x14] sm:$0x1] }
 0x119   : > { %v13305_v58 = vcombine.low %v2565_v22, %v2568_v14  ;;  %v2428_v22 = vld [vmem:[#allocation2 + $0xb8] sm:$0xf] }
 0x11a   : > { %14445 = vmatpush3.bf16.msra.mxu0 %v15853_v6  ;;  %v2554_v6 = vsel %vm16924_vm14, %v2552_v11, %v2553_v42  ;;  %v2572_v11 = vsel %vm16924_vm14, %v13290_v10, %v2571_v9  ;;  %v2575_v42 = vsel %vm16924_vm14, %v2573_v8, %v2574_v46  ;;  %v2415_v9 = vld [vmem:[#allocation2 + $0x84] sm:$0xe]  ;;  %v908_v51 = vsel %vm16467_vm7, %v900_v62, %v907_v25  ;;  %v2425_v10 = vld [vmem:[#allocation2 + $0xac] sm:$0xf]  ;;  %v2424_v62 = vld [vmem:[#allocation2 + $0xa8] sm:$0xe] }
 0x11b   : > { %14446 = vmatprep.subr.bf16.mxu0 %v15854_v37  ;;  %v13303_v48 = vcombine.low %v2551_v28, %v2554_v6  ;;  %v13306_v24 = vcombine.low %v2572_v11, %v2575_v42  ;;  %1069 = vst [vmem:[#allocation2 + $0xc4] sm:$0xf] %v908_v51  ;;  %v13293_v35 = vrot.slane %v2415_v9, 9  ;;  %v2427_v42 = vld [vmem:[#allocation2 + $0xb4] sm:$0xe]  ;;  %v15865_v9 = vld [vmem:[#allocation8 + $0x108] sm:$0xff]  }
 0x11c   : > { %v1066_v8 = vld [vmem:[#allocation2 + $0xc0] sm:$0xf]  ;;  %v13297_v7 = vrot.slane %v2427_v42, 9 }
 0x11d   : > { %14415 = vmatmul.mubr.bf16.gmra.mrb[4].mxu0 %v13301_v1  ;;  %v2417_v1 = vld [vmem:[#allocation2 + $0x8c] sm:$0x1]  ;;  %v15868_v51 = vld [vmem:[#allocation8 + $0x110] sm:$0xff]  }
 0x11e   : > { %14418 = vmatprep.mubr.bf16.mxu0 %v13302_v50  ;;  %14447 = vmatpush3.bf16.msra.mxu0 %v15854_v37  ;;  %v897_v37 = vshll.u32 %v16961_v19, 16  ;;  %v2589_v19 = vsel %vm16924_vm14, %v2587_v41, %v2588_v12  ;;  %v2420_v50 = vld [vmem:[#allocation2 + $0x98] sm:$0x1]  ;;  %v2595_v53 = vrot.slane %v2417_v1, 5  ;;  %v2423_v12 = vld [vmem:[#allocation2 + $0xa4] sm:$0x1] }
 0x11f   : > { %14448 = vmatprep.subr.bf16.mxu0 %v15855_v61  ;;  %v13308_v45 = vcombine.low %v2586_v26, %v2589_v19  ;;  %v2602_v3 = vrot.slane %v2420_v50, 5  ;;  %v15861_v26 = vld [vmem:[#allocation2 + $0x18] sm:$0xff]   ;;  %v15863_v19 = vld [vmem:[#allocation2 + $0x24] sm:$0xff]   ;;  %v3429_v1 = vld [vmem:[#allocation2 + $0xc] sm:$0xf] }
 0x120   : > { %v899_v21 = vor.u32 %v897_v37, %v17006_v63  ;;  %v2593_v63 = vsel %vm16924_vm14, %v13293_v35, %v2592_v0  ;;  %v2596_v2 = vsel %vm16924_vm14, %v2594_v13, %v2595_v53  ;;  %v15860_v0 = vld [vmem:[#allocation2 + $0xc] sm:$0xff]   ;;  %v3510_v47 = vshrl.u32 %v3429_v1, 16  ;;  %v15866_v35 = vld [vmem:[#allocation2 + $0x3c] sm:$0xff]   ;;  %v3435_v53 = vld [vmem:[#allocation2 + $0x24] sm:$0xf] }
 0x121   : > { %v2603_v41 = vsel %vm16924_vm14, %v2601_v56, %v2602_v3  ;;  %v13309_v28 = vcombine.low %v2593_v63, %v2596_v2  ;;  %v3513_v50 = vshll.u32 %v3429_v1, 16  ;;  %v15871_v13 = vld [vmem:[#allocation8 + $0x118] sm:$0xff]   ;;  %v3519_v3 = vshll.u32 %v3430_v54, 16 }
 0x122   : > { %14449 = vmatpush3.bf16.msra.mxu0 %v15855_v61  ;;  %v2422_v61 = vld [vmem:[#allocation2 + $0xa0] sm:$0xf]  ;;  %v1067_v46 = vsel %vm16476_vm8, %v899_v21, %v1066_v8  ;;  %v13310_v6 = vcombine.low %v2600_v57, %v2603_v41  ;;  %v15864_v21 = vld [vmem:[#allocation2 + $0x30] sm:$0xff]   ;;  %v3512_v56 = vrot.slane %v3510_v47, 4  ;;  %v3436_v2 = vld [vmem:[#allocation2 + $0x28] sm:$0xf] }
 0x123   : > { %14450 = vmatprep.subr.bf16.mxu0 %v15856_v59  ;;  %v2606_v36 = vrot.slane %v2422_v61, 5  ;;  %1068 = vst [vmem:[#allocation2 + $0xc0] sm:$0xf] %v1067_v46  ;;  %v3523_v61 = vshrl.u32 %v3430_v54, 16  ;;  %v3558_v16 = vshrl.u32 %v3435_v53, 16  ;;  %v17082_v57 = vrot.slane %v3519_v3, 5 }
 0x124   : > { %v3442_v3 = vld [vmem:[#allocation2 + $0x40] sm:$0xf] }
 0x125   : > { %14419 = vmatmul.mubr.bf16.gmra.mrb[8].mxu0 %v13303_v48  ;;  %v2608_v34 = vrot.slane %v2606_v36, 4  ;;  %v2609_v48 = vrot.slane %v2423_v12, 5  ;;  %v2607_v14 = vsel %vm16924_vm14, %v13295_v55, %v2606_v36  ;;  %v3561_v36 = vshll.u32 %v3435_v53, 16 }
 0x126   : > { %14422 = vmatprep.mubr.bf16.mxu0 %v13304_v27  ;;  %14451 = vmatpush3.bf16.msra.mxu0 %v15856_v59  ;;  %v2613_v59 = vrot.slane %v2425_v10, 5  ;;  %v3525_v41 = vrot.slane %v3523_v61, 4  ;;  %v3529_v12 = vshll.u32 %v3431_v49, 16 }
 0x127   : > { %14452 = vmatprep.subr.bf16.mxu0 %v15857_v29  ;;  %v2610_v11 = vsel %vm16924_vm14, %v2608_v34, %v2609_v48  ;;  %v3567_v34 = vshll.u32 %v3436_v2, 16  ;;  %v3571_v48 = vshrl.u32 %v3436_v2, 16 }
 0x128   : > { %v2615_v27 = vrot.slane %v2613_v59, 4  ;;  %v13311_v40 = vcombine.low %v2607_v14, %v2610_v11  ;;  %v15867_v14 = vld [vmem:[#allocation2 + $0x48] sm:$0xff]   ;;  %v15869_v11 = vld [vmem:[#allocation2 + $0x54] sm:$0xff]  }
 0x12a   : > { %14453 = vmatpush3.bf16.msra.mxu0 %v15857_v29  ;;  %v13296_v29 = vrot.slane %v2424_v62, 9  ;;  %v3438_v62 = vld [vmem:[#allocation2 + $0x30] sm:$0xf] }
 0x12b   : > { %14454 = vmatprep.subr.bf16.mxu0 %v15858_v60  ;;  %v3582_v42 = vshrl.u32 %v3438_v62, 16 }
 0x12c   : > { %v2614_v38 = vsel %vm16924_vm14, %v13296_v29, %v2613_v59 }
 0x12d   : > { %14423 = vmatmul.mubr.bf16.gmra.mrb[12].mxu0 %v13305_v58  ;;  %v2620_v58 = vrot.slane %v2428_v22, 5  ;;  %v3563_v22 = vrot.slane %v3561_v36, 5  ;;  %v3584_v1 = vrot.slane %v3582_v42, 4  ;;  %v3444_v36 = vld [vmem:[#allocation2 + $0x48] sm:$0xf] }
 0x12e   : > { %14426 = vmatprep.mubr.bf16.mxu0 %v13306_v24  ;;  %14455 = vmatpush3.bf16.msra.mxu0 %v15858_v60  ;;  %v2616_v60 = vrot.slane %v2426_v17, 5  ;;  %v2429_v24 = vld [vmem:[#allocation2 + $0xbc] sm:$0x1]  ;;  %v15874_v17 = vld [vmem:[#allocation8 + $0x120] sm:$0xff]  }
 0x12f   : > { %14456 = vmatprep.subr.bf16.mxu0 %v15859_v30  ;;  %v2622_v31 = vrot.slane %v2620_v58, 4  ;;  %v2623_v37 = vrot.slane %v2429_v24, 5  ;;  %v2621_v25 = vsel %vm16924_vm14, %v13297_v7, %v2620_v58  ;;  %v3585_v58 = vshll.u32 %v3438_v62, 16 }
 0x130   : > { %v17088_v7 = vrot.slane %v3529_v12, 5  ;;  %v3619_v62 = vshrl.u32 %v3442_v3, 16 }
 0x131   : > { %v2624_v43 = vsel %vm16924_vm14, %v2622_v31, %v2623_v37  ;;  %v17090_v31 = vrot.slane %v3567_v34, 5  ;;  %v3573_v37 = vrot.slane %v3571_v48, 4  ;;  %v3587_v47 = vrot.slane %v3585_v58, 5  ;;  %v3446_v58 = vld [vmem:[#allocation2 + $0x50] sm:$0x1] }
 0x132   : > { %14457 = vmatpush3.bf16.msra.mxu0 %v15859_v30  ;;  %v2617_v30 = vsel %vm16924_vm14, %v2615_v27, %v2616_v60  ;;  %v13313_v33 = vcombine.low %v2621_v25, %v2624_v43  ;;  %v3560_v60 = vrot.slane %v3558_v16, 4  ;;  %v3441_v25 = vld [vmem:[#allocation2 + $0x3c] sm:$0xf] }
 0x133   : > { %14490 = vmatprep.subr.bf16.mxu0 %v17053_v18  ;;  %v13312_v15 = vcombine.low %v2614_v38, %v2617_v30  ;;  %v15877_v38 = vld [vmem:[#allocation8 + $0x128] sm:$0xff]   ;;  %v3526_v30 = vor.u32 %v3525_v41, %v17082_v57  ;;  %v3574_v53 = vor.u32 %v3573_v37, %v17090_v31 }
 0x135   : > { %14427 = vmatmul.mubr.bf16.gmra.mrb[16].mxu0 %v13307_v52  ;;  %v3432_v52 = vld [vmem:[#allocation2 + $0x18] sm:$0xf] }
 0x136   : > { %14430 = vmatprep.mubr.bf16.mxu0 %v13308_v45  ;;  %v3433_v45 = vld [vmem:[#allocation2 + $0x1c] sm:$0xf]  ;;  %v3534_v10 = vshrl.u32 %v3432_v52, 16  ;;  %v3537_v8 = vshll.u32 %v3432_v52, 16  ;;  %v17095_v52 = vrot.slane %v3526_v30, 4 }
 0x137   : > { %v3543_v46 = vshll.u32 %v3433_v45, 16  ;;  %v3547_v63 = vshrl.u32 %v3433_v45, 16  ;;  %v3606_v45 = vshrl.u32 %v3441_v25, 16 }
 0x138   : > { %v3536_v59 = vrot.slane %v3534_v10, 4  ;;  %v3539_v55 = vrot.slane %v3537_v8, 5  ;;  %v15872_v8 = vld [vmem:[#allocation2 + $0x6c] sm:$0xff]  }
 0x139   : > { %v17084_v29 = vrot.slane %v3543_v46, 5  ;;  %v3549_v27 = vrot.slane %v3547_v63, 4  ;;  %v3588_v63 = vor.u32 %v3587_v47, %v3584_v1  ;;  %v3608_v41 = vrot.slane %v3606_v45, 4  ;;  %v15873_v47 = vld [vmem:[#allocation2 + $0x78] sm:$0xff]  }
 0x13b   : > { %v17119_v37 = vrot.slane %v3588_v63, 4  ;;  %v3649_v63 = vshll.u32 %v3446_v58, 16  ;;  %v3454_v58 = vld [vmem:[#allocation2 + $0x70] sm:$0xf] }
 0x13d   : > { %14431 = vmatmul.mubr.bf16.gmra.mrb[20].mxu0 %v13309_v28 }
 0x13e   : > { %14434 = vmatprep.mubr.bf16.mxu0 %v13310_v6  ;;  %v3434_v6 = vld [vmem:[#allocation2 + $0x20] sm:$0x1] }
 0x13f   : > { %v3553_v24 = vshll.u32 %v3434_v6, 16  ;;  %v17108_v6 = vrot.slane %v3574_v53, 4 }
 0x145   : > { %14435 = vmatmul.mubr.bf16.gmra.mrb[24].mxu0 %v13311_v40  ;;  %v3439_v40 = vld [vmem:[#allocation2 + $0x34] sm:$0xf] }
 0x146   : > { %14438 = vmatprep.mubr.bf16.mxu0 %v13312_v15  ;;  %v909_v15 = vrot.slane %v17035_v44, 4  ;;  %v3595_v54 = vshrl.u32 %v3439_v40, 16 }
 0x148   : > { %v3597_v16 = vrot.slane %v3595_v54, 4 }
 0x14d   : > { %14439 = vmatmul.mubr.bf16.gmra.mrb[28].mxu0 %v13313_v33  ;;  %v3540_v33 = vor.u32 %v3539_v55, %v3536_v59  ;;  %v3615_v59 = vshll.u32 %v3442_v3, 16  ;;  %v3449_v3 = vld [vmem:[#allocation2 + $0x5c] sm:$0x1] }
 0x14e   : > { %14458 = vmatprep.mubr.bf16.mxu0 %v15860_v0  ;;  %v3550_v0 = vor.u32 %v3549_v27, %v17084_v29  ;;  %v3443_v27 = vld [vmem:[#allocation2 + $0x44] sm:$0x1] }
 0x14f   : > { %v17100_v61 = vrot.slane %v3540_v33, 4  ;;  %v17121_v33 = vrot.slane %v3615_v59, 5  ;;  %v3625_v53 = vshll.u32 %v3443_v27, 16 }
 0x150   : > { %v17102_v10 = vrot.slane %v3550_v0, 4  ;;  %v3621_v0 = vrot.slane %v3619_v62, 4 }
 0x155   : > { %14459 = vmatmul.mubr.bf16.vlgmr.msra.gmra.mrb[0].mxu0 %v15861_v26  ;;  %v3437_v26 = vld [vmem:[#allocation2 + $0x2c] sm:$0x1] }
 0x156   : > { %14491 = vmatpush3.bf16.msra.mxu0 %v17053_v18  ;;  %14462 = vmatprep.mubr.bf16.mxu0 %v15863_v19  ;;  %v3515_v18 = vrot.slane %v3513_v50, 5  ;;  %v3564_v19 = vor.u32 %v3563_v22, %v3560_v60  ;;  %v15880_v50 = vld [vmem:[#allocation8 + $0x130] sm:$0xff]   ;;  %v3577_v49 = vshll.u32 %v3437_v26, 16  ;;  %v3630_v60 = vshrl.u32 %v3444_v36, 16 }
 0x157   : > { %14492 = vmatprep.subr.bf16.mxu0 %v15865_v9  ;;  %v3633_v22 = vshll.u32 %v3444_v36, 16  ;;  %v3452_v36 = vld [vmem:[#allocation2 + $0x68] sm:$0x1] }
 0x158   : > { %v3516_v28 = vor.u32 %v3515_v18, %v3512_v56  ;;  %v387_v18 = vld [vmem:[#allocation2 + $0xc8] sm:$0x1]  ;;  %v17104_v46 = vrot.slane %v3564_v19, 4  ;;  %v17110_v55 = vrot.slane %v3577_v49, 5  ;;  %v3632_v54 = vrot.slane %v3630_v60, 4 }
 0x159   : > { %v388_v48 = vsel %vm16445_vm4, 0, %v387_v18  ;;  %v3635_v45 = vrot.slane %v3633_v22, 5  ;;  %v3453_v22 = vld [vmem:[#allocation2 + $0x6c] sm:$0xf] }
 0x15a   : > { %14493 = vmatpush3.bf16.msra.mxu0 %v15865_v9  ;;  %v17092_v43 = vrot.slane %v3516_v28, 4  ;;  %v3440_v9 = vld [vmem:[#allocation2 + $0x38] sm:$0x1]  ;;  %v15883_v28 = vld [vmem:[#allocation8 + $0x138] sm:$0xff]   ;;  %389 = vst [vmem:[#allocation2 + $0xc8] sm:$0x1] %v388_v48 }
 0x15b   : > { %14494 = vmatprep.subr.bf16.mxu0 %v15868_v51  ;;  %v3601_v56 = vshll.u32 %v3440_v9, 16  ;;  %v3636_v48 = vor.u32 %v3635_v45, %v3632_v54  ;;  %v3705_v54 = vshll.u32 %v3453_v22, 16  ;;  %v3711_v45 = vshll.u32 %v3454_v58, 16 }
 0x15d   : > { %14463 = vmatmul.mubr.bf16.gmra.mrb[4].mxu0 %v15864_v21  ;;  %v17097_v21 = vrot.slane %v3553_v24, 5  ;;  %v17112_v34 = vrot.slane %v3601_v56, 5  ;;  %v3450_v24 = vld [vmem:[#allocation2 + $0x60] sm:$0xf] }
 0x15e   : > { %14466 = vmatprep.mubr.bf16.mxu0 %v15866_v35  ;;  %14495 = vmatpush3.bf16.msra.mxu0 %v15868_v51  ;;  %v3591_v51 = vshll.u32 %v3439_v40, 16  ;;  %v3609_v35 = vshll.u32 %v3441_v25, 16  ;;  %v17117_v40 = vld [vmem:[#allocation8 + $0x140] sm:$0xff]  }
 0x15f   : > { %14496 = vmatprep.subr.bf16.mxu0 %v15871_v13 }
 0x160   : > { %v17106_v2 = vrot.slane %v3591_v51, 5  ;;  %v3611_v12 = vrot.slane %v3609_v35, 5  ;;  %v15875_v51 = vld [vmem:[#allocation2 + $0x84] sm:$0xff]   ;;  %v3678_v35 = vshrl.u32 %v3450_v24, 16 }
 0x162   : > { %14497 = vmatpush3.bf16.msra.mxu0 %v15871_v13  ;;  %v15870_v13 = vld [vmem:[#allocation2 + $0x60] sm:$0xff]   ;;  %v3598_v42 = vor.u32 %v3597_v16, %v17106_v2  ;;  %v3612_v25 = vor.u32 %v3611_v12, %v3608_v41  ;;  %v3680_v27 = vrot.slane %v3678_v35, 4  ;;  %v3456_v35 = vld [vmem:[#allocation2 + $0x78] sm:$0xf] }
 0x163   : > { %14498 = vmatprep.subr.bf16.mxu0 %v15874_v17  ;;  %v3451_v16 = vld [vmem:[#allocation2 + $0x64] sm:$0xf] }
 0x164   : > { %v17127_v18 = vrot.slane %v3612_v25, 4  ;;  %v3691_v25 = vshrl.u32 %v3451_v16, 16 }
 0x165   : > { %14467 = vmatmul.mubr.bf16.gmra.mrb[8].mxu0 %v15867_v14  ;;  %v3447_v14 = vld [vmem:[#allocation2 + $0x54] sm:$0xf] }
 0x166   : > { %14470 = vmatprep.mubr.bf16.mxu0 %v15869_v11  ;;  %14499 = vmatpush3.bf16.msra.mxu0 %v15874_v17  ;;  %v3445_v17 = vld [vmem:[#allocation2 + $0x4c] sm:$0xf]  ;;  %v3448_v11 = vld [vmem:[#allocation2 + $0x58] sm:$0xf]  ;;  %v3654_v26 = vshrl.u32 %v3447_v14, 16  ;;  %v3657_v19 = vshll.u32 %v3447_v14, 16 }
 0x167   : > { %14500 = vmatprep.subr.bf16.mxu0 %v15877_v38  ;;  %v3643_v30 = vshrl.u32 %v3445_v17, 16  ;;  %v3663_v9 = vshll.u32 %v3448_v11, 16  ;;  %v3667_v1 = vshrl.u32 %v3448_v11, 16  ;;  %v17137_v14 = vrot.slane %v3625_v53, 5  ;;  %v3455_v53 = vld [vmem:[#allocation2 + $0x74] sm:$0x1] }
 0x168   : > { %v3656_v41 = vrot.slane %v3654_v26, 4  ;;  %v3659_v12 = vrot.slane %v3657_v19, 5  ;;  %v3702_v19 = vshrl.u32 %v3453_v22, 16  ;;  %v3729_v22 = vshll.u32 %v3456_v35, 16 }
 0x169   : > { %v3645_v56 = vrot.slane %v3643_v30, 4  ;;  %v17131_v59 = vrot.slane %v3663_v9, 5  ;;  %v3669_v62 = vrot.slane %v3667_v1, 4  ;;  %v17142_v30 = vrot.slane %v3649_v63, 5  ;;  %v15878_v9 = vld [vmem:[#allocation2 + $0x9c] sm:$0xff]  }
 0x16a   : > { %14501 = vmatpush3.bf16.msra.mxu0 %v15877_v38  ;;  %v3639_v38 = vshll.u32 %v3445_v17, 16  ;;  %v1070_v17 = vld [vmem:[#allocation2 + $0xc8] sm:$0x1]  ;;  %v3660_v44 = vor.u32 %v3659_v12, %v3656_v41  ;;  %v17145_v1 = vrot.slane %v3636_v48, 4  ;;  %v3532_v63 = vsel %vm16683_vm11, %v17095_v52, %v17088_v7  ;;  %v3462_v7 = vld [vmem:[#allocation2 + $0x90] sm:$0xf] }
 0x16b   : > { %14502 = vmatprep.subr.bf16.mxu0 %v15880_v50  ;;  %v3670_v26 = vor.u32 %v3669_v62, %v17131_v59  ;;  %v3460_v48 = vld [vmem:[#allocation2 + $0x88] sm:$0xf]  ;;  %v3726_v52 = vshrl.u32 %v3456_v35, 16  ;;  %v3777_v32 = vshll.u32 %v3462_v7, 16  ;;  %v3731_v20 = vrot.slane %v3729_v22, 5 }
 0x16c   : > { %v17125_v49 = vrot.slane %v3639_v38, 5  ;;  %v17161_v41 = vrot.slane %v3660_v44, 4 }
 0x16d   : > { %14471 = vmatmul.mubr.bf16.gmra.mrb[12].mxu0 %v15870_v13  ;;  %v3681_v13 = vshll.u32 %v3450_v24, 16  ;;  %v3687_v24 = vshll.u32 %v3451_v16, 16  ;;  %v17163_v12 = vrot.slane %v3670_v26, 4 }
 0x16e   : > { %14474 = vmatprep.mubr.bf16.mxu0 %v15872_v8  ;;  %14503 = vmatpush3.bf16.msra.mxu0 %v15880_v50  ;;  %v17123_v50 = vrot.slane %v3598_v42, 4  ;;  %v3622_v8 = vor.u32 %v3621_v0, %v17121_v33  ;;  %v3646_v11 = vor.u32 %v3645_v56, %v17125_v49  ;;  %v3673_v42 = vshll.u32 %v3449_v3, 16  ;;  %v15876_v0 = vld [vmem:[#allocation2 + $0x90] sm:$0xff]   ;;  %v3457_v56 = vld [vmem:[#allocation2 + $0x7c] sm:$0xf] }
 0x16f   : > { %14504 = vmatprep.subr.bf16.mxu0 %v15883_v28  ;;  %v3683_v60 = vrot.slane %v3681_v13, 5  ;;  %v3459_v3 = vld [vmem:[#allocation2 + $0x84] sm:$0xf]  ;;  %v17159_v16 = vrot.slane %v3687_v24, 5  ;;  %18682 = vst [vmem:[#allocation22_spill] sm:$0xff] %v17163_v12 }
 0x170   : > { %v17140_v38 = vrot.slane %v3622_v8, 4  ;;  %v17149_v13 = vrot.slane %v3673_v42, 5  ;;  %v3522_v8 = vsel %vm16683_vm11, %v17092_v43, %v17082_v57  ;;  %v17171_v57 = vrot.slane %v3705_v54, 5  ;;  %v3463_v42 = vld [vmem:[#allocation2 + $0x94] sm:$0xf] }
 0x171   : > { %18681 = vst [vmem:[#allocation21_spill] sm:$0xff] %v17159_v16  ;;  %v17173_v43 = vrot.slane %v3711_v45, 5  ;;  %v3750_v44 = vshrl.u32 %v3459_v3, 16  ;;  %v3753_v26 = vshll.u32 %v3459_v3, 16  ;;  %v3763_v54 = vshrl.u32 %v3460_v48, 16 }
 0x172   : > { %14505 = vmatpush3.bf16.msra.mxu0 %v15883_v28  ;;  %v1071_v28 = vsel %vm16440_vm2, %v909_v15, %v1070_v17  ;;  %v3697_v15 = vshll.u32 %v3452_v36, 16  ;;  %18680 = vst [vmem:[#allocation20_spill] sm:$0xff] %v17149_v13  ;;  %v3693_v36 = vrot.slane %v3691_v25, 4  ;;  %v17167_v17 = vrot.slane %v3702_v19, 4  ;;  %v15879_v19 = vld [vmem:[#allocation2 + $0xa8] sm:$0xff]  }
 0x173   : > { %14538 = vmatprep.subr.bf16.mxu0 %v17117_v40  ;;  %1072 = vst [vmem:[#allocation2 + $0xc8] sm:$0x1] %v1071_v28  ;;  %18685 = vst [vmem:[#allocation25_spill] sm:$0xff] %v17173_v43  ;;  %v3735_v28 = vshll.u32 %v3457_v56, 16  ;;  %v3721_v25 = vshll.u32 %v3455_v53, 16  ;;  %v3774_v45 = vshrl.u32 %v3462_v7, 16 }
 0x174   : > { %v17165_v62 = vrot.slane %v3697_v15, 5  ;;  %v3694_v24 = vor.u32 %v3693_v36, %v17159_v16  ;;  %v3465_v15 = vld [vmem:[#allocation2 + $0x9c] sm:$0xf]  ;;  %v3783_v39 = vshll.u32 %v3463_v42, 16  ;;  %v3461_v3 = vld [vmem:[#allocation2 + $0x8c] sm:$0x1] }
 0x175   : > { %14475 = vmatmul.mubr.bf16.gmra.mrb[16].mxu0 %v15873_v47  ;;  %v3684_v47 = vor.u32 %v3683_v60, %v3680_v27  ;;  %v3715_v60 = vshrl.u32 %v3454_v58, 16  ;;  %v15881_v58 = vld [vmem:[#allocation2 + $0xb4] sm:$0xff]   ;;  %v17178_v36 = vrot.slane %v3735_v28, 5  ;;  %v3752_v4 = vrot.slane %v3750_v44, 4  ;;  %v3466_v28 = vld [vmem:[#allocation2 + $0xa0] sm:$0xf] }
 0x176   : > { %14478 = vmatprep.mubr.bf16.mxu0 %v15875_v51  ;;  %v17147_v51 = vrot.slane %v3646_v11, 4  ;;  %18683 = vst [vmem:[#allocation23_spill] sm:$0xff] %v17165_v62  ;;  %v3739_v11 = vshrl.u32 %v3457_v56, 16  ;;  %v3787_v56 = vshrl.u32 %v3463_v42, 16  ;;  %v3755_v62 = vrot.slane %v3753_v26, 5 }
 0x177   : > { %v17169_v27 = vrot.slane %v3684_v47, 4  ;;  %v3759_v47 = vshll.u32 %v3460_v48, 16  ;;  %v3717_v35 = vrot.slane %v3715_v60, 4  ;;  %v3801_v48 = vshll.u32 %v3465_v15, 16  ;;  %v3464_v12 = vld [vmem:[#allocation2 + $0x98] sm:$0x1] }
 0x178   : > { %v3741_v53 = vrot.slane %v3739_v11, 4  ;;  %v3765_v7 = vrot.slane %v3763_v54, 4  ;;  %v3776_v13 = vrot.slane %v3774_v45, 4  ;;  %v3789_v22 = vrot.slane %v3787_v56, 4  ;;  %v3467_v54 = vld [vmem:[#allocation2 + $0xa4] sm:$0x1] }
 0x179   : > { %18684 = vst [vmem:[#allocation24_spill] sm:$0xff] %v17169_v27  ;;  %v3798_v27 = vshrl.u32 %v3465_v15, 16  ;;  %v17180_v16 = vrot.slane %v3759_v47, 5  ;;  %v3718_v60 = vor.u32 %v3717_v35, %v17173_v43  ;;  %v13346_v11 = vcombine.low %v3522_v8, %v3532_v63  ;;  %v3468_v56 = vld [vmem:[#allocation2 + $0xa8] sm:$0xf] }
 0x17a   : > { %v17187_v42 = vrot.slane %v3721_v25, 5  ;;  %v3745_v26 = vshll.u32 %v3458_v5, 16  ;;  %v3742_v15 = vor.u32 %v3741_v53, %v17178_v36  ;;  %v3769_v47 = vshll.u32 %v3461_v3, 16 }
 0x17b   : > { %v3756_v45 = vor.u32 %v3755_v62, %v3752_v4  ;;  %v3766_v35 = vor.u32 %v3765_v7, %v17180_v16  ;;  %v3793_v43 = vshll.u32 %v3464_v12, 16  ;;  %v17193_v8 = vrot.slane %v3718_v60, 4  ;;  %v3469_v4 = vld [vmem:[#allocation2 + $0xac] sm:$0xf] }
 0x17c   : > { %v17198_v25 = vrot.slane %v3745_v26, 5  ;;  %v17200_v62 = vrot.slane %v3742_v15, 4  ;;  %v3546_v26 = vsel %vm16683_vm11, %v17100_v61, %v17084_v29  ;;  %v15885_v29 = vld [vmem:[#allocation8 + $0x148] sm:$0xff]   ;;  %v3470_v61 = vld [vmem:[#allocation2 + $0xb0] sm:$0x1] }
 0x17d   : > { %14479 = vmatmul.mubr.bf16.gmra.mrb[20].mxu0 %v15876_v0  ;;  %v3708_v0 = vor.u32 %v17171_v57, %v17167_v17  ;;  %v3779_v17 = vrot.slane %v3777_v32, 5  ;;  %v17182_v57 = vrot.slane %v3694_v24, 4  ;;  %v3800_v32 = vrot.slane %v3798_v27, 4 }
 0x17e   : > { %14482 = vmatprep.mubr.bf16.mxu0 %v15878_v9  ;;  %v3728_v9 = vrot.slane %v3726_v52, 4  ;;  %v17185_v52 = vrot.slane %v3783_v39, 5  ;;  %v3803_v24 = vrot.slane %v3801_v48, 5  ;;  %v3811_v27 = vshrl.u32 %v3466_v28, 16 }
 0x17f   : > { %18686 = vst [vmem:[#allocation26_spill] sm:$0xff] %v17182_v57  ;;  %v3780_v39 = vor.u32 %v3779_v17, %v3776_v13  ;;  %v15882_v57 = vld [vmem:[#allocation2 + $0xc0] sm:$0xff]   ;;  %v17202_v13 = vrot.slane %v3769_v47, 5  ;;  %v17206_v53 = vrot.slane %v3766_v35, 4  ;;  %v17210_v48 = vrot.slane %v3793_v43, 5 }
 0x180   : > { %v3732_v44 = vor.u32 %v3731_v20, %v3728_v9  ;;  %v3790_v5 = vor.u32 %v3789_v22, %v17185_v52  ;;  %v3807_v20 = vshll.u32 %v3466_v28, 16  ;;  %v3804_v12 = vor.u32 %v3803_v24, %v3800_v32  ;;  %v3471_v32 = vld [vmem:[#allocation2 + $0xb4] sm:$0xf] }
 0x181   : > { %v3822_v9 = vshrl.u32 %v3468_v56, 16  ;;  %v17208_v3 = vrot.slane %v3780_v39, 4  ;;  %v3813_v60 = vrot.slane %v3811_v27, 4  ;;  %v3825_v28 = vshll.u32 %v3468_v56, 16 }
 0x182   : > { %v17196_v63 = vrot.slane %v3732_v44, 4  ;;  %v17212_v7 = vrot.slane %v3790_v5, 4  ;;  %v17214_v17 = vrot.slane %v3807_v20, 5  ;;  %v3831_v44 = vshll.u32 %v3469_v4, 16  ;;  %v15888_v20 = vld [vmem:[#allocation8 + $0x160] sm:$0xff]  }
 0x183   : > { %v3556_v43 = vsel %vm16683_vm11, %v17102_v10, %v17097_v21  ;;  %v17226_v15 = vrot.slane %v3804_v12, 4  ;;  %v3824_v47 = vrot.slane %v3822_v9, 4  ;;  %v3594_v10 = vsel %vm16683_vm11, %v17119_v37, %v17106_v2  ;;  %v3472_v37 = vld [vmem:[#allocation2 + $0xb8] sm:$0xf] }
 0x184   : > { %v3814_v21 = vor.u32 %v3813_v60, %v17214_v17  ;;  %v3835_v35 = vshrl.u32 %v3469_v4, 16  ;;  %v3841_v39 = vshll.u32 %v3470_v61, 16  ;;  %v3846_v56 = vshrl.u32 %v3471_v32, 16  ;;  %v18687_v60 = vld [vmem:[#allocation20_spill] sm:$0xff] }
 0x185   : > { %14483 = vmatmul.mubr.bf16.gmra.mrb[24].mxu0 %v15879_v19  ;;  %v17191_v19 = vrot.slane %v3708_v0, 4  ;;  %v17204_v0 = vrot.slane %v3756_v45, 4  ;;  %v3618_v2 = vsel %vm16683_vm11, %v17127_v18, %v17121_v33  ;;  %v3849_v4 = vshll.u32 %v3471_v32, 16  ;;  %v18690_v61 = vld [vmem:[#allocation24_spill] sm:$0xff]  ;;  %v18691_v32 = vld [vmem:[#allocation23_spill] sm:$0xff] }
 0x186   : > { %14486 = vmatprep.mubr.bf16.mxu0 %v15881_v58  ;;  %v3817_v58 = vshll.u32 %v3467_v54, 16  ;;  %v13347_v54 = vcombine.low %v3546_v26, %v3556_v43  ;;  %v17248_v45 = vrot.slane %v3814_v21, 4  ;;  %v3837_v27 = vrot.slane %v3835_v35, 4  ;;  %v3473_v43 = vld [vmem:[#allocation2 + $0xbc] sm:$0x1] }
 0x187   : > { %v3855_v12 = vshll.u32 %v3472_v37, 16  ;;  %v3642_v33 = vsel %vm16683_vm11, %v17145_v1, %v17125_v49  ;;  %v3652_v18 = vsel %vm16683_vm11, %v17147_v51, %v17142_v30  ;;  %v3666_v9 = vsel %vm16683_vm11, %v17161_v41, %v17131_v59  ;;  %v15889_v1 = vld [vmem:[#allocation8 + $0x168] sm:$0xff]  }
 0x188   : > { %v17216_v22 = vrot.slane %v3817_v58, 5  ;;  %v17258_v58 = vrot.slane %v3841_v39, 5  ;;  %v13351_v49 = vcombine.low %v3642_v33, %v3652_v18  ;;  %v3851_v59 = vrot.slane %v3849_v4, 5  ;;  %v3474_v39 = vld [vmem:[#allocation2 + $0xc0] sm:$0xf] }
 0x189   : > { %v17279_v41 = vrot.slane %v3855_v12, 5  ;;  %v3724_v35 = vsel %vm16683_vm11, %v17193_v8, %v17187_v42  ;;  %v3738_v42 = vsel %vm16683_vm11, %v17196_v63, %v17178_v36  ;;  %v3748_v8 = vsel %vm16683_vm11, %v17200_v62, %v17198_v25 }
 0x18a   : > { %v3762_v33 = vsel %vm16683_vm11, %v17204_v0, %v17180_v16  ;;  %v3772_v18 = vsel %vm16683_vm11, %v17206_v53, %v17202_v13  ;;  %v13355_v36 = vcombine.low %v3738_v42, %v3748_v8  ;;  %v3786_v16 = vsel %vm16683_vm11, %v17208_v3, %v17185_v52  ;;  %v4249_v52 = vld [vmem:[#allocation2 + $0x14] sm:$0x1] }
 0x18b   : > { %v3796_v13 = vsel %vm16683_vm11, %v17212_v7, %v17210_v48 }
 0x18c   : > { %v13357_v3 = vcombine.low %v3786_v16, %v3796_v13  ;;  %v4263_v13 = vld [vmem:[#allocation2 + $0x4c] sm:$0xf] }
 0x18d   : > { %14487 = vmatmul.mubr.bf16.gmra.mrb[28].mxu0 %v15882_v57  ;;  %v3570_v57 = vsel %vm16683_vm11, %v17104_v46, %v17090_v31  ;;  %v3604_v31 = vsel %vm16683_vm11, %v17123_v50, %v17112_v34  ;;  %v15886_v46 = vld [vmem:[#allocation8 + $0x150] sm:$0xff]   ;;  %v3628_v34 = vsel %vm16683_vm11, %v17140_v38, %v17137_v14  ;;  %v3848_v14 = vrot.slane %v3846_v56, 4 }
 0x18e   : > { %14506 = vmatprep.mubr.bf16.mxu0 %v13346_v11  ;;  %v3580_v11 = vsel %vm16683_vm11, %v17108_v6, %v17110_v55  ;;  %v3827_v6 = vrot.slane %v3825_v28, 5  ;;  %v17245_v55 = vrot.slane %v3831_v44, 5  ;;  %v13349_v50 = vcombine.low %v3594_v10, %v3604_v31  ;;  %v18688_v28 = vld [vmem:[#allocation22_spill] sm:$0xff] }
 0x18f   : > { %v13348_v24 = vcombine.low %v3570_v57, %v3580_v11  ;;  %v13350_v5 = vcombine.low %v3618_v2, %v3628_v34  ;;  %v3859_v38 = vshrl.u32 %v3472_v37, 16  ;;  %v3676_v44 = vsel %vm16683_vm11, %v18688_v28, %v18687_v60  ;;  %v15890_v11 = vld [vmem:[#allocation8 + $0x170] sm:$0xff]   ;;  %v15891_v37 = vld [vmem:[#allocation8 + $0x178] sm:$0xff]  }
 0x190   : > { %v3828_v26 = vor.u32 %v3827_v6, %v3824_v47  ;;  %v13352_v57 = vcombine.low %v3666_v9, %v3676_v44  ;;  %v3838_v30 = vor.u32 %v3837_v27, %v17245_v55  ;;  %v3865_v31 = vshll.u32 %v3473_v43, 16  ;;  %v3475_v34 = vld [vmem:[#allocation2 + $0xc4] sm:$0xf] }
 0x191   : > { %v3852_v2 = vor.u32 %v3851_v59, %v3848_v14  ;;  %v3873_v27 = vshll.u32 %v3474_v39, 16  ;;  %v3879_v4 = vshll.u32 %v3475_v34, 16  ;;  %v3883_v12 = vshrl.u32 %v3475_v34, 16  ;;  %v3476_v14 = vld [vmem:[#allocation2 + $0xc8] sm:$0x1] }
 0x192   : > { %v17277_v51 = vrot.slane %v3828_v26, 4  ;;  %v17289_v10 = vrot.slane %v3838_v30, 4  ;;  %v3889_v53 = vshll.u32 %v3476_v14, 16  ;;  %v3810_v28 = vsel %vm16683_vm11, %v17226_v15, %v17214_v17  ;;  %v4255_v34 = vld [vmem:[#allocation2 + $0x2c] sm:$0x1] }
 0x193   : > { %v3875_v9 = vrot.slane %v3873_v27, 5  ;;  %v3881_v60 = vrot.slane %v3879_v4, 5  ;;  %v3885_v0 = vrot.slane %v3883_v12, 4  ;;  %v3820_v44 = vsel %vm16683_vm11, %v17248_v45, %v17216_v22  ;;  %v4260_v12 = vld [vmem:[#allocation2 + $0x40] sm:$0xf] }
 0x194   : > { %v13358_v43 = vcombine.low %v3810_v28, %v3820_v44  ;;  %v3834_v17 = vsel %vm16683_vm11, %v17277_v51, %v17245_v55  ;;  %v3844_v22 = vsel %vm16683_vm11, %v17289_v10, %v17258_v58  ;;  %v3891_v45 = vrot.slane %v3889_v53, 5  ;;  %v4250_v58 = vld [vmem:[#allocation2 + $0x18] sm:$0xe]  ;;  %v4252_v10 = vld [vmem:[#allocation2 + $0x20] sm:$0x1] }
 0x195   : > { %14507 = vmatmul.mubr.bf16.vlgmr.msra.gmra.mrb[0].mxu0 %v13347_v54  ;;  %v3861_v54 = vrot.slane %v3859_v38, 4  ;;  %v13356_v38 = vcombine.low %v3762_v33, %v3772_v18  ;;  %v4387_v27 = vrot.slane %v4252_v10, 5  ;;  %v4394_v4 = vrot.slane %v4255_v34, 5  ;;  %v4256_v33 = vld [vmem:[#allocation2 + $0x30] sm:$0xe] }
 0x196   : > { %14539 = vmatpush3.bf16.msra.mxu0 %v17117_v40  ;;  %14510 = vmatprep.mubr.bf16.mxu0 %v13348_v24  ;;  %v15887_v40 = vld [vmem:[#allocation8 + $0x158] sm:$0xff]   ;;  %v13373_v53 = vrot.slane %v4256_v33, 9  ;;  %v4272_v10 = vld [vmem:[#allocation2 + $0x70] sm:$0xf] }
 0x197   : > { %14540 = vmatprep.subr.bf16.mxu0 %v15885_v29  ;;  %v18692_v24 = vld [vmem:[#allocation26_spill] sm:$0xff]  ;;  %v3862_v63 = vor.u32 %v3861_v54, %v17279_v41  ;;  %v4433_v34 = vrot.slane %v4272_v10, 5 }
 0x198   : > { %v3700_v21 = vsel %vm16683_vm11, %v18692_v24, %v18691_v32  ;;  %v334_v24 = vld [vmem:[#allocation2 + $0xcc] sm:$0x1] }
 0x199   : > { %v3863_v25 = vrot.slane %v3862_v63, 4  ;;  %v4435_v33 = vrot.slane %v4433_v34, 4  ;;  %v4287_v10 = vld [vmem:[#allocation2 + $0xac] sm:$0xf] }
 0x19a   : > { %14541 = vmatpush3.bf16.msra.mxu0 %v15885_v29  ;;  %v18689_v29 = vld [vmem:[#allocation21_spill] sm:$0xff] }
 0x19b   : > { %14542 = vmatprep.subr.bf16.mxu0 %v15886_v46  ;;  %v3690_v47 = vsel %vm16683_vm11, %v18690_v61, %v18689_v29  ;;  %v4251_v29 = vld [vmem:[#allocation2 + $0x1c] sm:$0xf]  ;;  %v4254_v61 = vld [vmem:[#allocation2 + $0x28] sm:$0xf] }
 0x19c   : > { %v13353_v56 = vcombine.low %v3690_v47, %v3700_v21  ;;  %v13359_v47 = vcombine.low %v3834_v17, %v3844_v22  ;;  %v335_v21 = vsel %vm16440_vm2, 0, %v334_v24  ;;  %v15894_v22 = vld [vmem:[#allocation8 + $0x190] sm:$0xff]  }
 0x19d   : > { %14511 = vmatmul.mubr.bf16.gmra.mrb[4].mxu0 %v13349_v50  ;;  %336 = vst [vmem:[#allocation2 + $0xcc] sm:$0x1] %v335_v21  ;;  %v4269_v24 = vld [vmem:[#allocation2 + $0x64] sm:$0xf] }
 0x19e   : > { %14514 = vmatprep.mubr.bf16.mxu0 %v13350_v5  ;;  %14543 = vmatpush3.bf16.msra.mxu0 %v15886_v46  ;;  %v18693_v46 = vld [vmem:[#allocation25_spill] sm:$0xff]  ;;  %v3867_v5 = vrot.slane %v3865_v31, 5  ;;  %v4384_v31 = vrot.slane %v4251_v29, 5 }
 0x19f   : > { %14544 = vmatprep.subr.bf16.mxu0 %v15887_v40  ;;  %v3714_v6 = vsel %vm16683_vm11, %v17191_v19, %v18693_v46  ;;  %v17299_v19 = vld [vmem:[#allocation8 + $0x180] sm:$0xff]   ;;  %v4391_v46 = vrot.slane %v4254_v61, 5 }
 0x1a0   : > { %v13354_v50 = vcombine.low %v3714_v6, %v3724_v35  ;;  %v3868_v54 = vsel %vm16683_vm11, %v3863_v25, %v3867_v5  ;;  %v13371_v5 = vrot.slane %v4250_v58, 9  ;;  %v4258_v25 = vld [vmem:[#allocation2 + $0x38] sm:$0x1]  ;;  %v12957_v35 = vld [vmem:[%s16429_s6 + $0x18] sm:$0xff] }
 0x1a1   : > { %v4393_v8 = vrot.slane %v4391_v46, 4  ;;  %v4401_v44 = vrot.slane %v4258_v25, 5 }
 0x1a2   : > { %14545 = vmatpush3.bf16.msra.mxu0 %v15887_v40  ;;  %v3853_v40 = vrot.slane %v3852_v2, 4  ;;  %v4253_v2 = vld [vmem:[#allocation2 + $0x24] sm:$0xe]  ;;  %v4385_v18 = vsel %vm16924_vm14, %v13371_v5, %v4384_v31 }
 0x1a3   : > { %14546 = vmatprep.subr.bf16.mxu0 %v15888_v20  ;;  %v13372_v42 = vrot.slane %v4253_v2, 9  ;;  %v4270_v2 = vld [vmem:[#allocation2 + $0x68] sm:$0x1] }
 0x1a4   : > { %v3858_v59 = vsel %vm16683_vm11, %v3853_v40, %v17279_v41 }
 0x1a5   : > { %14515 = vmatmul.mubr.bf16.gmra.mrb[8].mxu0 %v13351_v49  ;;  %v4247_v49 = vld [vmem:[#allocation2 + $0xc] sm:$0xe]  ;;  %v13360_v32 = vcombine.low %v3858_v59, %v3868_v54  ;;  %v4392_v14 = vsel %vm16924_vm14, %v13372_v42, %v4391_v46  ;;  %v4267_v59 = vld [vmem:[#allocation2 + $0x5c] sm:$0x1] }
 0x1a6   : > { %14518 = vmatprep.mubr.bf16.mxu0 %v13352_v57  ;;  %14547 = vmatpush3.bf16.msra.mxu0 %v15888_v20  ;;  %v3870_v20 = vshrl.u32 %v3474_v39, 16  ;;  %v3886_v57 = vor.u32 %v3885_v0, %v3881_v60  ;;  %v13370_v7 = vrot.slane %v4247_v49, 9  ;;  %v15893_v49 = vld [vmem:[#allocation8 + $0x188] sm:$0xff]   ;;  %v4422_v58 = vrot.slane %v4267_v59, 5 }
 0x1a7   : > { %14548 = vmatprep.subr.bf16.mxu0 %v15889_v1 }
 0x1a8   : > { %v3872_v62 = vrot.slane %v3870_v20, 4  ;;  %v3887_v15 = vrot.slane %v3886_v57, 4  ;;  %v4386_v20 = vrot.slane %v4384_v31, 4  ;;  %v4264_v57 = vld [vmem:[#allocation2 + $0x50] sm:$0x1] }
 0x1aa   : > { %14549 = vmatpush3.bf16.msra.mxu0 %v15889_v1  ;;  %v4248_v1 = vld [vmem:[#allocation2 + $0x10] sm:$0xf]  ;;  %v3876_v26 = vor.u32 %v3875_v9, %v3872_v62  ;;  %v3892_v6 = vsel %vm16683_vm11, %v3887_v15, %v3891_v45  ;;  %v4405_v62 = vrot.slane %v4260_v12, 5  ;;  %v4259_v9 = vld [vmem:[#allocation2 + $0x3c] sm:$0xe] }
 0x1ab   : > { %14550 = vmatprep.subr.bf16.mxu0 %v15890_v11  ;;  %v4377_v30 = vrot.slane %v4248_v1, 5  ;;  %v13374_v1 = vrot.slane %v4259_v9, 9  ;;  %v4265_v15 = vld [vmem:[#allocation2 + $0x54] sm:$0xe] }
 0x1ac   : > { %v3877_v48 = vrot.slane %v3876_v26, 4  ;;  %v4266_v26 = vld [vmem:[#allocation2 + $0x58] sm:$0xf] }
 0x1ad   : > { %14519 = vmatmul.mubr.bf16.gmra.mrb[12].mxu0 %v13353_v56  ;;  %v4379_v55 = vrot.slane %v4377_v30, 4  ;;  %v4378_v39 = vsel %vm16924_vm14, %v13370_v7, %v4377_v30  ;;  %v4412_v30 = vrot.slane %v4263_v13, 5  ;;  %v4419_v45 = vrot.slane %v4266_v26, 5  ;;  %v4281_v26 = vld [vmem:[#allocation2 + $0x94] sm:$0xf] }
 0x1ae   : > { %14522 = vmatprep.mubr.bf16.mxu0 %v13354_v50  ;;  %14551 = vmatpush3.bf16.msra.mxu0 %v15890_v11  ;;  %v4380_v11 = vrot.slane %v4249_v52, 5  ;;  %v3882_v41 = vsel %vm16683_vm11, %v3877_v48, %v3881_v60  ;;  %v4257_v50 = vld [vmem:[#allocation2 + $0x34] sm:$0xf]  ;;  %v4261_v60 = vld [vmem:[#allocation2 + $0x44] sm:$0x1]  ;;  %v4407_v52 = vrot.slane %v4405_v62, 4 }
 0x1af   : > { %14552 = vmatprep.subr.bf16.mxu0 %v15891_v37  ;;  %v4398_v63 = vrot.slane %v4257_v50, 5  ;;  %v4414_v61 = vrot.slane %v4412_v30, 4  ;;  %v4421_v21 = vrot.slane %v4419_v45, 4  ;;  %v4271_v50 = vld [vmem:[#allocation2 + $0x6c] sm:$0xe] }
 0x1b0   : > { %v4381_v56 = vsel %vm16924_vm14, %v4379_v55, %v4380_v11  ;;  %v4406_v11 = vsel %vm16924_vm14, %v13374_v1, %v4405_v62  ;;  %v15895_v55 = vld [vmem:[#allocation8 + $0x198] sm:$0xff]   ;;  %v13378_v12 = vrot.slane %v4271_v50, 9  ;;  %v4289_v50 = vld [vmem:[#allocation2 + $0xb4] sm:$0xe] }
 0x1b1   : > { %v13386_v40 = vcombine.low %v4378_v39, %v4381_v56  ;;  %v4400_v28 = vrot.slane %v4398_v63, 4  ;;  %v4399_v48 = vsel %vm16924_vm14, %v13373_v53, %v4398_v63  ;;  %v4423_v56 = vsel %vm16924_vm14, %v4421_v21, %v4422_v58  ;;  %v4278_v63 = vld [vmem:[#allocation2 + $0x88] sm:$0xf]  ;;  %v4277_v53 = vld [vmem:[#allocation2 + $0x84] sm:$0xe] }
 0x1b2   : > { %14553 = vmatpush3.bf16.msra.mxu0 %v15891_v37  ;;  %v13361_v37 = vcombine.low %v3882_v41, %v3892_v6  ;;  %v4268_v41 = vld [vmem:[#allocation2 + $0x60] sm:$0xe]  ;;  %v4426_v6 = vrot.slane %v4269_v24, 5  ;;  %v4447_v13 = vrot.slane %v4278_v63, 5 }
 0x1b3   : > { %14586 = vmatprep.subr.bf16.mxu0 %v17299_v19  ;;  %v4402_v7 = vsel %vm16924_vm14, %v4400_v28, %v4401_v44  ;;  %v13377_v42 = vrot.slane %v4268_v41, 9  ;;  %v4279_v28 = vld [vmem:[#allocation2 + $0x8c] sm:$0x1] }
 0x1b5   : > { %14523 = vmatmul.mubr.bf16.gmra.mrb[16].mxu0 %v13355_v36  ;;  %v4388_v36 = vsel %vm16924_vm14, %v4386_v20, %v4387_v27  ;;  %v4275_v20 = vld [vmem:[#allocation2 + $0x7c] sm:$0xf]  ;;  %v4427_v25 = vsel %vm16924_vm14, %v13377_v42, %v4426_v6 }
 0x1b6   : > { %14526 = vmatprep.mubr.bf16.mxu0 %v13356_v38  ;;  %v4395_v38 = vsel %vm16924_vm14, %v4393_v8, %v4394_v4  ;;  %v13387_v16 = vcombine.low %v4385_v18, %v4388_v36  ;;  %v4428_v8 = vrot.slane %v4426_v6, 4  ;;  %v4429_v4 = vrot.slane %v4270_v2, 5  ;;  %v15897_v36 = vld [vmem:[#allocation8 + $0x1a8] sm:$0xff]  }
 0x1b7   : > { %v13388_v0 = vcombine.low %v4392_v14, %v4395_v38  ;;  %v4274_v14 = vld [vmem:[#allocation2 + $0x78] sm:$0xe]  ;;  %v4276_v38 = vld [vmem:[#allocation2 + $0x80] sm:$0x1]  ;;  %v4440_v9 = vrot.slane %v4275_v20, 5 }
 0x1b8   : > { %v4430_v62 = vsel %vm16924_vm14, %v4428_v8, %v4429_v4  ;;  %v13379_v1 = vrot.slane %v4274_v14, 9  ;;  %v4290_v6 = vld [vmem:[#allocation2 + $0xb8] sm:$0xf] }
 0x1b9   : > { %v13393_v44 = vcombine.low %v4427_v25, %v4430_v62  ;;  %v4475_v20 = vrot.slane %v4290_v6, 5  ;;  %v4292_v62 = vld [vmem:[#allocation2 + $0xc0] sm:$0xe]  ;;  %v15915_v6 = vld [vmem:[#allocation2 + $0x90] sm:$0xff]  }
 0x1bb   : > { %v4477_v63 = vrot.slane %v4475_v20, 4 }
 0x1bd   : > { %14527 = vmatmul.mubr.bf16.gmra.mrb[20].mxu0 %v13357_v3  ;;  %v4408_v3 = vrot.slane %v4261_v60, 5  ;;  %v4434_v60 = vsel %vm16924_vm14, %v13378_v12, %v4433_v34 }
 0x1be   : > { %14530 = vmatprep.mubr.bf16.mxu0 %v13358_v43  ;;  %v4262_v43 = vld [vmem:[#allocation2 + $0x48] sm:$0xe] }
 0x1bf   : > { %v4409_v17 = vsel %vm16924_vm14, %v4407_v52, %v4408_v3  ;;  %v13375_v54 = vrot.slane %v4262_v43, 9  ;;  %v4442_v52 = vrot.slane %v4440_v9, 4  ;;  %v4443_v3 = vrot.slane %v4276_v38, 5 }
 0x1c0   : > { %v13390_v29 = vcombine.low %v4406_v11, %v4409_v17  ;;  %v13380_v43 = vrot.slane %v4277_v53, 9  ;;  %v4280_v11 = vld [vmem:[#allocation2 + $0x90] sm:$0xe]  ;;  %v4441_v17 = vsel %vm16924_vm14, %v13379_v1, %v4440_v9  ;;  %v390_v1 = vld [vmem:[#allocation2 + $0xd4] sm:$0x1] }
 0x1c1   : > { %v4413_v31 = vsel %vm16924_vm14, %v13375_v54, %v4412_v30  ;;  %v4284_v30 = vld [vmem:[#allocation2 + $0xa0] sm:$0xf] }
 0x1c2   : > { %v4461_v54 = vrot.slane %v4284_v30, 5  ;;  %v15903_v30 = vld [vmem:[#allocation2 + $0x30] sm:$0xff]  }
 0x1c5   : > { %14531 = vmatmul.mubr.bf16.gmra.mrb[24].mxu0 %v13359_v47  ;;  %v4415_v47 = vrot.slane %v4264_v57, 5  ;;  %v4449_v57 = vrot.slane %v4447_v13, 4 }
 0x1c6   : > { %14534 = vmatprep.mubr.bf16.mxu0 %v13360_v32  ;;  %v13376_v32 = vrot.slane %v4265_v15, 9  ;;  %v4454_v15 = vrot.slane %v4281_v26, 5  ;;  %v16028_v26 = vld [vmem:[#allocation10 + $0x1d0] sm:$0xff]  }
 0x1c7   : > { %v4416_v46 = vsel %vm16924_vm14, %v4414_v61, %v4415_v47  ;;  %v4283_v61 = vld [vmem:[#allocation2 + $0x9c] sm:$0xe]  ;;  %v4285_v47 = vld [vmem:[#allocation2 + $0xa4] sm:$0x1] }
 0x1c8   : > { %v4420_v39 = vsel %vm16924_vm14, %v13376_v32, %v4419_v45  ;;  %v13391_v5 = vcombine.low %v4413_v31, %v4416_v46  ;;  %v4448_v45 = vsel %vm16924_vm14, %v13380_v43, %v4447_v13  ;;  %v4456_v21 = vrot.slane %v4454_v15, 4  ;;  %v4294_v13 = vld [vmem:[#allocation2 + $0xc8] sm:$0x1] }
 0x1c9   : > { %v13392_v27 = vcombine.low %v4420_v39, %v4423_v56  ;;  %v13382_v31 = vrot.slane %v4283_v61, 9  ;;  %v4463_v46 = vrot.slane %v4461_v54, 4  ;;  %v4464_v41 = vrot.slane %v4285_v47, 5  ;;  %v4286_v39 = vld [vmem:[#allocation2 + $0xa8] sm:$0xe]  ;;  %v15917_v61 = vld [vmem:[#allocation8 + $0x1e8] sm:$0xff]  }
 0x1ca   : > { %v4288_v56 = vld [vmem:[#allocation2 + $0xb0] sm:$0x1]  ;;  %v13383_v8 = vrot.slane %v4286_v39, 9  ;;  %v391_v43 = vsel %vm16445_vm4, 0, %v390_v1 }
 0x1cb   : > { %392 = vst [vmem:[#allocation2 + $0xd4] sm:$0x1] %v391_v43  ;;  %v15910_v47 = vld [vmem:[#allocation2 + $0x6c] sm:$0xff]  }
 0x1cd   : > { %14535 = vmatmul.mubr.bf16.gmra.mrb[28].mxu0 %v13361_v37  ;;  %v15896_v37 = vld [vmem:[#allocation8 + $0x1a0] sm:$0xff]  }
 0x1ce   : > { %14554 = vmatprep.mubr.bf16.mxu0 %v13386_v40  ;;  %v4273_v40 = vld [vmem:[#allocation2 + $0x74] sm:$0x1] }
 0x1cf   : > { %v4436_v18 = vrot.slane %v4273_v40, 5  ;;  %v4462_v40 = vsel %vm16924_vm14, %v13382_v31, %v4461_v54  ;;  %v15909_v54 = vld [vmem:[#allocation2 + $0x60] sm:$0xff]  }
 0x1d0   : > { %v15913_v31 = vld [vmem:[#allocation2 + $0x84] sm:$0xff]  }
 0x1d5   : > { %14555 = vmatmul.mubr.bf16.vlgmr.msra.gmra.mrb[0].mxu0 %v13387_v16  ;;  %v4437_v16 = vsel %vm16924_vm14, %v4435_v33, %v4436_v18  ;;  %v4471_v33 = vrot.slane %v4288_v56, 5  ;;  %v13384_v18 = vrot.slane %v4289_v50, 9 }
 0x1d6   : > { %14587 = vmatpush3.bf16.msra.mxu0 %v17299_v19  ;;  %14558 = vmatprep.mubr.bf16.mxu0 %v13388_v0  ;;  %v13389_v19 = vcombine.low %v4399_v48, %v4402_v7  ;;  %v15898_v0 = vld [vmem:[#allocation8 + $0x1b0] sm:$0xff]   ;;  %v4450_v48 = vrot.slane %v4279_v28, 5  ;;  %v15899_v7 = vld [vmem:[#allocation8 + $0x1b8] sm:$0xff]   ;;  %v13385_v28 = vrot.slane %v4292_v62, 9 }
 0x1d7   : > { %14588 = vmatprep.subr.bf16.mxu0 %v15893_v49 }
 0x1d8   : > { %v4451_v59 = vsel %vm16924_vm14, %v4449_v57, %v4450_v48  ;;  %v15900_v48 = vld [vmem:[#allocation2 + $0x18] sm:$0xff]  }
 0x1d9   : > { %v13396_v24 = vcombine.low %v4448_v45, %v4451_v59  ;;  %v15911_v45 = vld [vmem:[#allocation8 + $0x1d8] sm:$0xff]   ;;  %v15914_v59 = vld [vmem:[#allocation8 + $0x1e0] sm:$0xff]  }
 0x1da   : > { %14589 = vmatpush3.bf16.msra.mxu0 %v15893_v49  ;;  %v13394_v49 = vcombine.low %v4434_v60, %v4437_v16  ;;  %v4476_v60 = vsel %vm16924_vm14, %v13384_v18, %v4475_v20  ;;  %v5301_v18 = vld [vmem:[#allocation2 + $0x3c] sm:$0xf] }
 0x1db   : > { %14590 = vmatprep.subr.bf16.mxu0 %v15894_v22 }
 0x1dd   : > { %14559 = vmatmul.mubr.bf16.gmra.mrb[4].mxu0 %v13389_v19  ;;  %v4282_v19 = vld [vmem:[#allocation2 + $0x98] sm:$0x1] }
 0x1de   : > { %14562 = vmatprep.mubr.bf16.mxu0 %v13390_v29  ;;  %14591 = vmatpush3.bf16.msra.mxu0 %v15894_v22  ;;  %v4444_v22 = vsel %vm16924_vm14, %v4442_v52, %v4443_v3  ;;  %v17399_v29 = vld [vmem:[#allocation8 + $0x1c0] sm:$0xff]   ;;  %v4457_v58 = vrot.slane %v4282_v19, 5 }
 0x1df   : > { %14592 = vmatprep.subr.bf16.mxu0 %v15895_v55  ;;  %v13395_v32 = vcombine.low %v4441_v17, %v4444_v22  ;;  %v15908_v17 = vld [vmem:[#allocation8 + $0x1d0] sm:$0xff]   ;;  %v15907_v19 = vld [vmem:[#allocation2 + $0x54] sm:$0xff]  }
 0x1e0   : > { %v4458_v34 = vsel %vm16924_vm14, %v4456_v21, %v4457_v58  ;;  %v15904_v22 = vld [vmem:[#allocation2 + $0x3c] sm:$0xff]   ;;  %v17425_v58 = vld [vmem:[#allocation8 + $0x200] sm:$0xff]  }
 0x1e1   : > { %v5293_v21 = vld [vmem:[#allocation2 + $0x1c] sm:$0xf] }
 0x1e2   : > { %14593 = vmatpush3.bf16.msra.mxu0 %v15895_v55  ;;  %v13381_v55 = vrot.slane %v4280_v11, 9  ;;  %v15905_v11 = vld [vmem:[#allocation8 + $0x1c8] sm:$0xff]   ;;  %v5382_v39 = vshll.u32 %v5293_v21, 16  ;;  %v5386_v56 = vshrl.u32 %v5293_v21, 16  ;;  %v5305_v21 = vld [vmem:[#allocation2 + $0x4c] sm:$0xf] }
 0x1e3   : > { %14594 = vmatprep.subr.bf16.mxu0 %v15896_v37 }
 0x1e4   : > { %v4455_v2 = vsel %vm16924_vm14, %v13381_v55, %v4454_v15  ;;  %v15906_v15 = vld [vmem:[#allocation2 + $0x48] sm:$0xff]   ;;  %v5292_v55 = vld [vmem:[#allocation2 + $0x18] sm:$0xf]  ;;  %v17428_v20 = vrot.slane %v5382_v39, 5 }
 0x1e5   : > { %14563 = vmatmul.mubr.bf16.gmra.mrb[8].mxu0 %v13391_v5  ;;  %v4465_v5 = vsel %vm16924_vm14, %v4463_v46, %v4464_v41  ;;  %v13397_v42 = vcombine.low %v4455_v2, %v4458_v34  ;;  %v5373_v46 = vshrl.u32 %v5292_v55, 16  ;;  %v5376_v41 = vshll.u32 %v5292_v55, 16 }
 0x1e6   : > { %14566 = vmatprep.mubr.bf16.mxu0 %v13392_v27  ;;  %14595 = vmatpush3.bf16.msra.mxu0 %v15896_v37  ;;  %v4468_v37 = vrot.slane %v4287_v10, 5  ;;  %v4291_v27 = vld [vmem:[#allocation2 + $0xbc] sm:$0x1]  ;;  %v13398_v4 = vcombine.low %v4462_v40, %v4465_v5  ;;  %v5295_v10 = vld [vmem:[#allocation2 + $0x24] sm:$0xf] }
 0x1e7   : > { %14596 = vmatprep.subr.bf16.mxu0 %v15897_v36  ;;  %v4478_v14 = vrot.slane %v4291_v27, 5  ;;  %v5397_v2 = vshrl.u32 %v5295_v10, 16  ;;  %v5400_v34 = vshll.u32 %v5295_v10, 16  ;;  %v5378_v50 = vrot.slane %v5376_v41, 5  ;;  %v5296_v40 = vld [vmem:[#allocation2 + $0x28] sm:$0xf] }
 0x1e8   : > { %v4470_v12 = vrot.slane %v4468_v37, 4  ;;  %v4469_v38 = vsel %vm16924_vm14, %v13383_v8, %v4468_v37  ;;  %v5375_v37 = vrot.slane %v5373_v46, 4  ;;  %v5294_v5 = vld [vmem:[#allocation2 + $0x20] sm:$0x1]  ;;  %v5388_v27 = vrot.slane %v5386_v56, 4 }
 0x1e9   : > { %v4479_v16 = vsel %vm16924_vm14, %v4477_v63, %v4478_v14  ;;  %v5298_v8 = vld [vmem:[#allocation2 + $0x30] sm:$0xf]  ;;  %v5392_v14 = vshll.u32 %v5294_v5, 16  ;;  %v5410_v62 = vshrl.u32 %v5296_v40, 16  ;;  %v15921_v10 = vld [vmem:[#allocation2 + $0xc0] sm:$0xff]   ;;  %v5482_v5 = vshrl.u32 %v5305_v21, 16 }
 0x1ea   : > { %14597 = vmatpush3.bf16.msra.mxu0 %v15897_v36  ;;  %v4293_v36 = vld [vmem:[#allocation2 + $0xc4] sm:$0xf]  ;;  %v4472_v25 = vsel %vm16924_vm14, %v4470_v12, %v4471_v33  ;;  %v13400_v53 = vcombine.low %v4476_v60, %v4479_v16  ;;  %v5406_v12 = vshll.u32 %v5296_v40, 16  ;;  %v5299_v33 = vld [vmem:[#allocation2 + $0x34] sm:$0xf]  ;;  %v5379_v63 = vor.u32 %v5378_v50, %v5375_v37 }
 0x1eb   : > { %14598 = vmatprep.subr.bf16.mxu0 %v15898_v0  ;;  %v4482_v9 = vrot.slane %v4293_v36, 5  ;;  %v15916_v36 = vld [vmem:[#allocation2 + $0x9c] sm:$0xff]   ;;  %v5424_v60 = vshll.u32 %v5298_v8, 16  ;;  %v5478_v40 = vshll.u32 %v5305_v21, 16 }
 0x1ec   : > { %v5302_v16 = vld [vmem:[#allocation2 + $0x40] sm:$0xf]  ;;  %v5380_v1 = vrot.slane %v5379_v63, 4 }
 0x1ed   : > { %14567 = vmatmul.mubr.bf16.gmra.mrb[12].mxu0 %v13393_v44  ;;  %v4484_v44 = vrot.slane %v4482_v9, 4  ;;  %v4483_v52 = vsel %vm16924_vm14, %v13385_v28, %v4482_v9  ;;  %v5421_v9 = vshrl.u32 %v5298_v8, 16  ;;  %v5448_v28 = vshll.u32 %v5301_v18, 16 }
 0x1ee   : > { %14570 = vmatprep.mubr.bf16.mxu0 %v13394_v49  ;;  %14599 = vmatpush3.bf16.msra.mxu0 %v15898_v0  ;;  %v13399_v0 = vcombine.low %v4469_v38, %v4472_v25  ;;  %v4485_v49 = vrot.slane %v4294_v13, 5  ;;  %v15918_v38 = vld [vmem:[#allocation2 + $0xa8] sm:$0xff]   ;;  %v5389_v25 = vor.u32 %v5388_v27, %v17428_v20  ;;  %v5430_v13 = vshll.u32 %v5299_v33, 16  ;;  %v5307_v27 = vld [vmem:[#allocation2 + $0x54] sm:$0xf] }
 0x1ef   : > { %14600 = vmatprep.subr.bf16.mxu0 %v15899_v7  ;;  %v5458_v43 = vshrl.u32 %v5302_v16, 16  ;;  %v5385_v39 = vsel %vm16683_vm11, %v5380_v1, %v17428_v20 }
 0x1f0   : > { %v4486_v3 = vsel %vm16924_vm14, %v4484_v44, %v4485_v49  ;;  %v17431_v49 = vrot.slane %v5406_v12, 5  ;;  %v5308_v12 = vld [vmem:[#allocation2 + $0x58] sm:$0xf] }
 0x1f1   : > { %v13401_v57 = vcombine.low %v4483_v52, %v4486_v3  ;;  %v5394_v52 = vrot.slane %v5392_v14, 5  ;;  %v5454_v3 = vshll.u32 %v5302_v16, 16  ;;  %v5460_v55 = vrot.slane %v5458_v43, 4  ;;  %v5310_v14 = vld [vmem:[#allocation2 + $0x60] sm:$0xf] }
 0x1f2   : > { %14601 = vmatpush3.bf16.msra.mxu0 %v15899_v7  ;;  %v15901_v7 = vld [vmem:[#allocation2 + $0x24] sm:$0xff]   ;;  %v5306_v16 = vld [vmem:[#allocation2 + $0x50] sm:$0x1]  ;;  %v5517_v43 = vshrl.u32 %v5310_v14, 16 }
 0x1f3   : > { %14634 = vmatprep.subr.bf16.mxu0 %v17399_v29 }
 0x1f5   : > { %14571 = vmatmul.mubr.bf16.gmra.mrb[16].mxu0 %v13395_v32  ;;  %v15912_v32 = vld [vmem:[#allocation2 + $0x78] sm:$0xff]  }
 0x1f6   : > { %14574 = vmatprep.mubr.bf16.mxu0 %v13396_v24  ;;  %v15923_v24 = vld [vmem:[#allocation8 + $0x1f8] sm:$0xff]  }
 0x1fd   : > { %14575 = vmatmul.mubr.bf16.gmra.mrb[20].mxu0 %v13397_v42  ;;  %v5399_v42 = vrot.slane %v5397_v2, 4 }
 0x1fe   : > { %14578 = vmatprep.mubr.bf16.mxu0 %v13398_v4  ;;  %v5402_v4 = vrot.slane %v5400_v34, 5 }
 0x200   : > { %v5403_v44 = vor.u32 %v5402_v4, %v5399_v42 }
 0x205   : > { %14579 = vmatmul.mubr.bf16.gmra.mrb[24].mxu0 %v13399_v0  ;;  %v5434_v0 = vshrl.u32 %v5299_v33, 16 }
 0x206   : > { %14582 = vmatprep.mubr.bf16.mxu0 %v13400_v53  ;;  %v5445_v53 = vshrl.u32 %v5301_v18, 16 }
 0x20d   : > { %14583 = vmatmul.mubr.bf16.gmra.mrb[28].mxu0 %v13401_v57  ;;  %v5304_v57 = vld [vmem:[#allocation2 + $0x48] sm:$0xf] }
 0x20e   : > { %14602 = vmatprep.mubr.bf16.mxu0 %v15900_v48  ;;  %v5390_v48 = vrot.slane %v5389_v25, 4 }
 0x210   : > { %v5395_v56 = vsel %vm16683_vm11, %v5390_v48, %v5394_v52  ;;  %v5520_v48 = vshll.u32 %v5310_v14, 16 }
 0x211   : > { %v13434_v33 = vcombine.low %v5385_v39, %v5395_v56 }
 0x212   : > { %v5522_v39 = vrot.slane %v5520_v48, 5 }
 0x215   : > { %14603 = vmatmul.mubr.bf16.vlgmr.msra.gmra.mrb[0].mxu0 %v15901_v7  ;;  %v5297_v7 = vld [vmem:[#allocation2 + $0x2c] sm:$0x1] }
 0x216   : > { %14635 = vmatpush3.bf16.msra.mxu0 %v17399_v29  ;;  %14606 = vmatprep.mubr.bf16.mxu0 %v15903_v30  ;;  %v15920_v29 = vld [vmem:[#allocation8 + $0x1f0] sm:$0xff]   ;;  %v5412_v30 = vrot.slane %v5410_v62, 4  ;;  %v5493_v62 = vshrl.u32 %v5307_v27, 16 }
 0x217   : > { %14636 = vmatprep.subr.bf16.mxu0 %v15905_v11 }
 0x21a   : > { %14637 = vmatpush3.bf16.msra.mxu0 %v15905_v11  ;;  %v5423_v11 = vrot.slane %v5421_v9, 4  ;;  %v5496_v9 = vshll.u32 %v5307_v27, 16 }
 0x21b   : > { %14638 = vmatprep.subr.bf16.mxu0 %v15908_v17 }
 0x21d   : > { %14607 = vmatmul.mubr.bf16.gmra.mrb[4].mxu0 %v15904_v22  ;;  %v5300_v22 = vld [vmem:[#allocation2 + $0x38] sm:$0x1] }
 0x21e   : > { %14610 = vmatprep.mubr.bf16.mxu0 %v15906_v15  ;;  %14639 = vmatpush3.bf16.msra.mxu0 %v15908_v17  ;;  %v5426_v17 = vrot.slane %v5424_v60, 5  ;;  %v17433_v15 = vrot.slane %v5430_v13, 5  ;;  %v5440_v41 = vshll.u32 %v5300_v22, 16  ;;  %v5311_v60 = vld [vmem:[#allocation2 + $0x64] sm:$0xf] }
 0x21f   : > { %14640 = vmatprep.subr.bf16.mxu0 %v15911_v45  ;;  %v5309_v22 = vld [vmem:[#allocation2 + $0x5c] sm:$0x1] }
 0x220   : > { %v5427_v46 = vor.u32 %v5426_v17, %v5423_v11  ;;  %v5442_v63 = vrot.slane %v5440_v41, 5  ;;  %v5488_v17 = vshll.u32 %v5306_v16, 16  ;;  %v15933_v41 = vld [vmem:[#allocation10 + $0x8] sm:$0xff]  }
 0x222   : > { %14641 = vmatpush3.bf16.msra.mxu0 %v15911_v45  ;;  %v5436_v45 = vrot.slane %v5434_v0, 4  ;;  %v17453_v0 = vrot.slane %v5478_v40, 5  ;;  %v5312_v40 = vld [vmem:[#allocation2 + $0x68] sm:$0x1] }
 0x223   : > { %14642 = vmatprep.subr.bf16.mxu0 %v15914_v59 }
 0x224   : > { %v5437_v2 = vor.u32 %v5436_v45, %v17433_v15  ;;  %v5495_v45 = vrot.slane %v5493_v62, 4  ;;  %v5317_v62 = vld [vmem:[#allocation2 + $0x7c] sm:$0xf] }
 0x225   : > { %14611 = vmatmul.mubr.bf16.gmra.mrb[8].mxu0 %v15907_v19  ;;  %v5450_v19 = vrot.slane %v5448_v28, 5  ;;  %v5502_v28 = vshll.u32 %v5308_v12, 16  ;;  %v5578_v48 = vshrl.u32 %v5317_v62, 16 }
 0x226   : > { %14614 = vmatprep.mubr.bf16.mxu0 %v15909_v54  ;;  %14643 = vmatpush3.bf16.msra.mxu0 %v15914_v59  ;;  %v5447_v59 = vrot.slane %v5445_v53, 4  ;;  %v15919_v54 = vld [vmem:[#allocation2 + $0xb4] sm:$0xff]   ;;  %v5484_v53 = vrot.slane %v5482_v5, 4 }
 0x227   : > { %14644 = vmatprep.subr.bf16.mxu0 %v15917_v61 }
 0x228   : > { %v5451_v34 = vor.u32 %v5450_v19, %v5447_v59  ;;  %v5498_v59 = vrot.slane %v5496_v9, 5  ;;  %v15925_v9 = vld [vmem:[#allocation8 + $0x208] sm:$0xff]  }
 0x22a   : > { %14645 = vmatpush3.bf16.msra.mxu0 %v15917_v61  ;;  %v5469_v61 = vshrl.u32 %v5304_v57, 16  ;;  %v5452_v25 = vrot.slane %v5451_v34, 4 }
 0x22b   : > { %14646 = vmatprep.subr.bf16.mxu0 %v15920_v29 }
 0x22c   : > { %v5471_v37 = vrot.slane %v5469_v61, 4  ;;  %v5485_v61 = vor.u32 %v5484_v53, %v17453_v0 }
 0x22d   : > { %14615 = vmatmul.mubr.bf16.gmra.mrb[12].mxu0 %v15910_v47  ;;  %v17435_v47 = vrot.slane %v5403_v44, 4  ;;  %v15922_v44 = vld [vmem:[#allocation2 + $0xcc] sm:$0xff]  }
 0x22e   : > { %14618 = vmatprep.mubr.bf16.mxu0 %v15912_v32  ;;  %14647 = vmatpush3.bf16.msra.mxu0 %v15920_v29  ;;  %v5472_v29 = vshll.u32 %v5304_v57, 16  ;;  %v5416_v32 = vshll.u32 %v5297_v7, 16  ;;  %v5526_v7 = vshll.u32 %v5311_v60, 16  ;;  %v5486_v27 = vrot.slane %v5485_v61, 4 }
 0x22f   : > { %14648 = vmatprep.subr.bf16.mxu0 %v15923_v24  ;;  %v5409_v42 = vsel %vm16683_vm11, %v17435_v47, %v17431_v49 }
 0x230   : > { %v5474_v50 = vrot.slane %v5472_v29, 5  ;;  %v17450_v8 = vrot.slane %v5416_v32, 5  ;;  %v17466_v29 = vrot.slane %v5502_v28, 5  ;;  %v5313_v32 = vld [vmem:[#allocation2 + $0x6c] sm:$0xf]  ;;  %v17473_v56 = vrot.slane %v5526_v7, 5 }
 0x231   : > { %v5544_v5 = vshll.u32 %v5313_v32, 16 }
 0x232   : > { %14649 = vmatpush3.bf16.msra.mxu0 %v15923_v24  ;;  %v17437_v24 = vrot.slane %v5454_v3, 5  ;;  %v5475_v13 = vor.u32 %v5474_v50, %v5471_v37  ;;  %v5506_v3 = vshrl.u32 %v5308_v12, 16  ;;  %v5499_v37 = vor.u32 %v5498_v59, %v5495_v45 }
 0x233   : > { %14682 = vmatprep.subr.bf16.mxu0 %v17425_v58  ;;  %v5512_v50 = vshll.u32 %v5309_v22, 16 }
 0x234   : > { %v5461_v20 = vor.u32 %v5460_v55, %v17437_v24  ;;  %v5314_v55 = vld [vmem:[#allocation2 + $0x70] sm:$0xf] }
 0x235   : > { %14619 = vmatmul.mubr.bf16.gmra.mrb[16].mxu0 %v15913_v31  ;;  %v5413_v31 = vor.u32 %v5412_v30, %v17431_v49  ;;  %v5530_v30 = vshrl.u32 %v5311_v60, 16  ;;  %v17486_v60 = vrot.slane %v5499_v37, 4  ;;  %v17488_v16 = vrot.slane %v5512_v50, 5 }
 0x236   : > { %14622 = vmatprep.mubr.bf16.mxu0 %v15915_v6  ;;  %v5303_v6 = vld [vmem:[#allocation2 + $0x44] sm:$0x1]  ;;  %v5462_v1 = vrot.slane %v5461_v20, 4  ;;  %v5550_v20 = vshll.u32 %v5314_v55, 16  ;;  %v5546_v49 = vrot.slane %v5544_v5, 5 }
 0x237   : > { %v5464_v4 = vshll.u32 %v5303_v6, 16  ;;  %v5414_v18 = vrot.slane %v5413_v31, 4  ;;  %v5519_v31 = vrot.slane %v5517_v43, 4  ;;  %v406_v6 = vld [vmem:[#allocation3 + $0x18] sm:$0x1] }
 0x238   : > { %v407_v34 = vsel %vm16440_vm2, 0, %v406_v6  ;;  %v17496_v53 = vrot.slane %v5550_v20, 5 }
 0x239   : > { %v5466_v52 = vrot.slane %v5464_v4, 5  ;;  %v5419_v57 = vsel %vm16683_vm11, %v5414_v18, %v17450_v8  ;;  %408 = vst [vmem:[#allocation3 + $0x18] sm:$0x1] %v407_v34  ;;  %v5490_v8 = vrot.slane %v5488_v17, 5  ;;  %v5554_v4 = vshrl.u32 %v5314_v55, 16  ;;  %v15926_v17 = vld [vmem:[#allocation8 + $0x210] sm:$0xff]  }
 0x23a   : > { %v13435_v12 = vcombine.low %v5409_v42, %v5419_v57  ;;  %v5574_v57 = vshll.u32 %v5317_v62, 16  ;;  %v5322_v34 = vld [vmem:[#allocation2 + $0x90] sm:$0xf] }
 0x23b   : > { %v5467_v21 = vsel %vm16683_vm11, %v5462_v1, %v5466_v52  ;;  %v5491_v42 = vsel %vm16683_vm11, %v5486_v27, %v5490_v8  ;;  %v5556_v28 = vrot.slane %v5554_v4, 4  ;;  %v5320_v1 = vld [vmem:[#allocation2 + $0x88] sm:$0xf]  ;;  %v5315_v52 = vld [vmem:[#allocation2 + $0x74] sm:$0x1] }
 0x23c   : > { %v5598_v59 = vshll.u32 %v5320_v1, 16  ;;  %v5560_v55 = vshll.u32 %v5315_v52, 16 }
 0x23d   : > { %14623 = vmatmul.mubr.bf16.gmra.mrb[20].mxu0 %v15916_v36  ;;  %v5428_v36 = vrot.slane %v5427_v46, 4  ;;  %v15932_v46 = vld [vmem:[#allocation10] sm:$0xff]  }
 0x23e   : > { %14626 = vmatprep.mubr.bf16.mxu0 %v15918_v38  ;;  %v5438_v38 = vrot.slane %v5437_v2, 4  ;;  %v5532_v2 = vrot.slane %v5530_v30, 4  ;;  %14730 = vmatprep.subr.bf16.mxu1 %v15932_v46  ;;  %v17520_v8 = vrot.slane %v5560_v55, 5 }
 0x23f   : > { %v5433_v11 = vsel %vm16683_vm11, %v5428_v36, %v17433_v15  ;;  %v5457_v15 = vsel %vm16683_vm11, %v5452_v25, %v17437_v24  ;;  %v5541_v24 = vshrl.u32 %v5313_v32, 16  ;;  %14731 = vmatpush3.bf16.msra.mxu1 %v15932_v46  ;;  %v5316_v25 = vld [vmem:[#allocation2 + $0x78] sm:$0xf]  ;;  %v5557_v32 = vor.u32 %v5556_v28, %v17496_v53  ;;  %v5326_v28 = vld [vmem:[#allocation2 + $0xa0] sm:$0xf] }
 0x240   : > { %v5443_v19 = vsel %vm16683_vm11, %v5438_v38, %v5442_v63  ;;  %v17482_v18 = vcombine.low %v5457_v15, %v5467_v21  ;;  %14732 = vmatprep.subr.bf16.mxu1 %v15933_v41  ;;  %v5523_v63 = vor.u32 %v5522_v39, %v5519_v31  ;;  %v5533_v14 = vor.u32 %v5532_v2, %v17473_v56  ;;  %v5318_v15 = vld [vmem:[#allocation2 + $0x80] sm:$0x1]  ;;  %v15927_v2 = vld [vmem:[#allocation8 + $0x218] sm:$0xff]  }
 0x241   : > { %v5536_v38 = vshll.u32 %v5312_v40, 16  ;;  %v5568_v43 = vshll.u32 %v5316_v25, 16  ;;  %v5580_v31 = vrot.slane %v5578_v48, 4  ;;  %v5505_v46 = vsel %vm16683_vm11, %v17486_v60, %v17466_v29  ;;  %v15928_v60 = vld [vmem:[#allocation8 + $0x220] sm:$0xff]  }
 0x242   : > { %v5534_v30 = vrot.slane %v5533_v14, 4  ;;  %v17514_v40 = vrot.slane %v5598_v59, 5  ;;  %v17518_v27 = vrot.slane %v5557_v32, 4  ;;  %v5584_v20 = vshll.u32 %v5318_v15, 16 }
 0x243   : > { %14733 = vmatpush3.bf16.msra.mxu1 %v15933_v41  ;;  %v5646_v59 = vshll.u32 %v5326_v28, 16 }
 0x245   : > { %14627 = vmatmul.mubr.bf16.gmra.mrb[24].mxu0 %v15919_v54  ;;  %v17463_v54 = vrot.slane %v5475_v13, 4  ;;  %v5543_v13 = vrot.slane %v5541_v24, 4 }
 0x246   : > { %14630 = vmatprep.mubr.bf16.mxu0 %v15921_v10  ;;  %v5508_v10 = vrot.slane %v5506_v3, 4  ;;  %v5565_v3 = vshrl.u32 %v5316_v25, 16 }
 0x247   : > { %v5481_v47 = vsel %vm16683_vm11, %v17463_v54, %v17453_v0  ;;  %v5524_v0 = vrot.slane %v5523_v63, 4  ;;  %v5547_v61 = vor.u32 %v5546_v49, %v5543_v13  ;;  %v5563_v49 = vsel %vm16683_vm11, %v17518_v27, %v17520_v8  ;;  %v5330_v8 = vld [vmem:[#allocation2 + $0xb0] sm:$0x1] }
 0x248   : > { %v5509_v36 = vor.u32 %v5508_v10, %v17466_v29  ;;  %v13438_v54 = vcombine.low %v5481_v47, %v5491_v42  ;;  %v5567_v21 = vrot.slane %v5565_v3, 4  ;;  %v5570_v10 = vrot.slane %v5568_v43, 5  ;;  %v5323_v29 = vld [vmem:[#allocation2 + $0x94] sm:$0xf]  ;;  %v5324_v42 = vld [vmem:[#allocation2 + $0x98] sm:$0x1] }
 0x249   : > { %v5529_v6 = vsel %vm16683_vm11, %v5524_v0, %v17473_v56  ;;  %v17516_v5 = vrot.slane %v5547_v61, 4  ;;  %v5321_v56 = vld [vmem:[#allocation2 + $0x8c] sm:$0x1]  ;;  %v5622_v63 = vshll.u32 %v5323_v29, 16  ;;  %v5626_v14 = vshrl.u32 %v5323_v29, 16 }
 0x24a   : > { %v5510_v7 = vrot.slane %v5509_v36, 4  ;;  %v5571_v4 = vor.u32 %v5570_v10, %v5567_v21  ;;  %v5616_v36 = vshll.u32 %v5322_v34, 16  ;;  %v5586_v47 = vrot.slane %v5584_v20, 5  ;;  %v5328_v43 = vld [vmem:[#allocation2 + $0xa8] sm:$0xf] }
 0x24b   : > { %v5628_v48 = vrot.slane %v5626_v14, 4  ;;  %v5664_v61 = vshll.u32 %v5328_v43, 16 }
 0x24c   : > { %v5515_v41 = vsel %vm16683_vm11, %v5510_v7, %v17488_v16  ;;  %v5325_v16 = vld [vmem:[#allocation2 + $0x9c] sm:$0xf]  ;;  %v5618_v3 = vrot.slane %v5616_v36, 5 }
 0x24d   : > { %14631 = vmatmul.mubr.bf16.gmra.mrb[28].mxu0 %v15922_v44  ;;  %v5319_v44 = vld [vmem:[#allocation2 + $0x84] sm:$0xf]  ;;  %v5637_v7 = vshrl.u32 %v5325_v16, 16  ;;  %v5640_v0 = vshll.u32 %v5325_v16, 16  ;;  %v5666_v29 = vrot.slane %v5664_v61, 5 }
 0x24e   : > { %14650 = vmatprep.mubr.bf16.mxu0 %v13434_v33  ;;  %v13436_v33 = vcombine.low %v5433_v11, %v5443_v19  ;;  %v5538_v11 = vrot.slane %v5536_v38, 5  ;;  %v5589_v22 = vshrl.u32 %v5319_v44, 16  ;;  %v5592_v45 = vshll.u32 %v5319_v44, 16  ;;  %v5334_v16 = vld [vmem:[#allocation2 + $0xc0] sm:$0xf] }
 0x24f   : > { %v5602_v19 = vshrl.u32 %v5320_v1, 16  ;;  %v13439_v38 = vcombine.low %v5505_v46, %v5515_v41  ;;  %v5572_v44 = vrot.slane %v5571_v4, 4  ;;  %v5639_v46 = vrot.slane %v5637_v7, 4  ;;  %v5331_v4 = vld [vmem:[#allocation2 + $0xb4] sm:$0xf] }
 0x250   : > { %v5539_v39 = vsel %vm16683_vm11, %v5534_v30, %v5538_v11  ;;  %v5591_v37 = vrot.slane %v5589_v22, 4  ;;  %v5594_v50 = vrot.slane %v5592_v45, 5  ;;  %v5632_v22 = vshll.u32 %v5324_v42, 16  ;;  %v15929_v45 = vld [vmem:[#allocation8 + $0x228] sm:$0xff]  }
 0x251   : > { %v5604_v24 = vrot.slane %v5602_v19, 4  ;;  %v13440_v13 = vcombine.low %v5529_v6, %v5539_v39  ;;  %v5650_v19 = vshrl.u32 %v5326_v28, 16  ;;  %v5642_v41 = vrot.slane %v5640_v0, 5 }
 0x252   : > { %v5595_v25 = vor.u32 %v5594_v50, %v5591_v37  ;;  %v17546_v37 = vrot.slane %v5646_v59, 5 }
 0x253   : > { %v5605_v62 = vor.u32 %v5604_v24, %v17514_v40  ;;  %v5652_v50 = vrot.slane %v5650_v19, 4 }
 0x254   : > { %v5596_v30 = vrot.slane %v5595_v25, 4 }
 0x255   : > { %14651 = vmatmul.mubr.bf16.vlgmr.msra.gmra.mrb[0].mxu0 %v13435_v12  ;;  %v5606_v11 = vrot.slane %v5605_v62, 4  ;;  %v5653_v25 = vor.u32 %v5652_v50, %v17546_v37 }
 0x256   : > { %14683 = vmatpush3.bf16.msra.mxu0 %v17425_v58  ;;  %14654 = vmatprep.mubr.bf16.mxu0 %v13436_v33  ;;  %v17500_v58 = vrot.slane %v5574_v57, 5  ;;  %v5613_v33 = vshrl.u32 %v5322_v34, 16  ;;  %v17533_v57 = vrot.slane %v5622_v63, 5  ;;  %v5601_v6 = vsel %vm16683_vm11, %v5596_v30, %v17514_v40  ;;  %v15930_v34 = vld [vmem:[#allocation8 + $0x230] sm:$0xff]   ;;  %v5332_v63 = vld [vmem:[#allocation2 + $0xb8] sm:$0xf] }
 0x257   : > { %14684 = vmatprep.subr.bf16.mxu0 %v15925_v9  ;;  %v5698_v42 = vshrl.u32 %v5332_v63, 16  ;;  %v5654_v0 = vrot.slane %v5653_v25, 4 }
 0x258   : > { %v5581_v12 = vor.u32 %v5580_v31, %v17500_v58  ;;  %v5615_v52 = vrot.slane %v5613_v33, 4  ;;  %v5577_v32 = vsel %vm16683_vm11, %v5572_v44, %v17500_v58  ;;  %v5629_v31 = vor.u32 %v5628_v48, %v17533_v57 }
 0x259   : > { %v5634_v58 = vrot.slane %v5632_v22, 5  ;;  %v5643_v33 = vor.u32 %v5642_v41, %v5639_v46  ;;  %v5333_v22 = vld [vmem:[#allocation2 + $0xbc] sm:$0x1]  ;;  %v5336_v41 = vld [vmem:[#allocation2 + $0xc8] sm:$0x1] }
 0x25a   : > { %14685 = vmatpush3.bf16.msra.mxu0 %v15925_v9  ;;  %v5608_v9 = vshll.u32 %v5321_v56, 16  ;;  %v5582_v1 = vrot.slane %v5581_v12, 4  ;;  %v5619_v10 = vor.u32 %v5618_v3, %v5615_v52  ;;  %v5630_v12 = vrot.slane %v5629_v31, 4 }
 0x25b   : > { %14686 = vmatprep.subr.bf16.mxu0 %v15926_v17  ;;  %v5709_v3 = vshrl.u32 %v5334_v16, 16  ;;  %v5704_v46 = vshll.u32 %v5333_v22, 16 }
 0x25c   : > { %v5587_v55 = vsel %vm16683_vm11, %v5582_v1, %v5586_v47  ;;  %v5620_v40 = vrot.slane %v5619_v10, 4  ;;  %v5694_v47 = vshll.u32 %v5332_v63, 16  ;;  %v5635_v44 = vsel %vm16683_vm11, %v5630_v12, %v5634_v58 }
 0x25d   : > { %14655 = vmatmul.mubr.bf16.gmra.mrb[4].mxu0 %v17482_v18  ;;  %v5553_v18 = vsel %vm16683_vm11, %v17516_v5, %v17496_v53  ;;  %v5329_v53 = vld [vmem:[#allocation2 + $0xac] sm:$0xf]  ;;  %v13442_v27 = vcombine.low %v5577_v32, %v5587_v55  ;;  %v5644_v1 = vrot.slane %v5643_v33, 4  ;;  %v5711_v61 = vrot.slane %v5709_v3, 4 }
 0x25e   : > { %14658 = vmatprep.mubr.bf16.mxu0 %v13438_v54  ;;  %14687 = vmatpush3.bf16.msra.mxu0 %v15926_v17  ;;  %v5610_v17 = vrot.slane %v5608_v9, 5  ;;  %v5661_v54 = vshrl.u32 %v5328_v43, 16  ;;  %v5670_v15 = vshll.u32 %v5329_v53, 16  ;;  %v5674_v21 = vshrl.u32 %v5329_v53, 16 }
 0x25f   : > { %14688 = vmatprep.subr.bf16.mxu0 %v15927_v2  ;;  %v13441_v5 = vcombine.low %v5553_v18, %v5563_v49  ;;  %v5680_v9 = vshll.u32 %v5330_v8, 16  ;;  %v5688_v49 = vshll.u32 %v5331_v4, 16  ;;  %v5625_v28 = vsel %vm16683_vm11, %v5620_v40, %v17533_v57 }
 0x260   : > { %v5611_v39 = vsel %vm16683_vm11, %v5606_v11, %v5610_v17  ;;  %v5663_v24 = vrot.slane %v5661_v54, 4  ;;  %v17548_v20 = vrot.slane %v5670_v15, 5  ;;  %v5676_v56 = vrot.slane %v5674_v21, 4  ;;  %v5337_v54 = vld [vmem:[#allocation2 + $0xcc] sm:$0xf] }
 0x261   : > { %v13443_v14 = vcombine.low %v5601_v6, %v5611_v39  ;;  %v5712_v43 = vshll.u32 %v5334_v16, 16  ;;  %v5682_v30 = vrot.slane %v5680_v9, 5  ;;  %v5696_v59 = vrot.slane %v5694_v47, 5  ;;  %v5338_v21 = vld [vmem:[#allocation2 + $0xd0] sm:$0xf] }
 0x262   : > { %14689 = vmatpush3.bf16.msra.mxu0 %v15927_v2  ;;  %v5327_v2 = vld [vmem:[#allocation2 + $0xa4] sm:$0x1]  ;;  %v5667_v62 = vor.u32 %v5666_v29, %v5663_v24  ;;  %v5677_v18 = vor.u32 %v5676_v56, %v17548_v20  ;;  %v5700_v57 = vrot.slane %v5698_v42, 4  ;;  %v13444_v19 = vcombine.low %v5625_v28, %v5635_v44  ;;  %v6111_v9 = vld [vmem:[#allocation2 + $0x1c] sm:$0xf] }
 0x263   : > { %14690 = vmatprep.subr.bf16.mxu0 %v15928_v60  ;;  %v5656_v36 = vshll.u32 %v5327_v2, 16  ;;  %v5714_v32 = vrot.slane %v5712_v43, 5  ;;  %v5649_v10 = vsel %vm16683_vm11, %v5644_v1, %v17546_v37  ;;  %v5736_v50 = vshll.u32 %v5337_v54, 16  ;;  %v6110_v44 = vld [vmem:[#allocation2 + $0x18] sm:$0xe] }
 0x264   : > { %v5668_v53 = vrot.slane %v5667_v62, 4  ;;  %v5678_v17 = vrot.slane %v5677_v18, 4  ;;  %v5701_v2 = vor.u32 %v5700_v57, %v5696_v59  ;;  %v5742_v24 = vshll.u32 %v5338_v21, 16  ;;  %v5339_v62 = vld [vmem:[#allocation2 + $0xd4] sm:$0x1] }
 0x265   : > { %14659 = vmatmul.mubr.bf16.gmra.mrb[8].mxu0 %v13439_v38  ;;  %v15931_v38 = vld [vmem:[#allocation8 + $0x238] sm:$0xff]   ;;  %v5658_v52 = vrot.slane %v5656_v36, 5  ;;  %v5746_v37 = vshrl.u32 %v5338_v21, 16  ;;  %v5715_v29 = vor.u32 %v5714_v32, %v5711_v61  ;;  %v5706_v12 = vrot.slane %v5704_v46, 5  ;;  %v6112_v1 = vld [vmem:[#allocation2 + $0x20] sm:$0x1] }
 0x266   : > { %14662 = vmatprep.mubr.bf16.mxu0 %v13440_v13  ;;  %14691 = vmatpush3.bf16.msra.mxu0 %v15928_v60  ;;  %v5685_v60 = vshrl.u32 %v5331_v4, 16  ;;  %v5335_v13 = vld [vmem:[#allocation2 + $0xc4] sm:$0xf]  ;;  %v5673_v6 = vsel %vm16683_vm11, %v5668_v53, %v17548_v20  ;;  %v5683_v39 = vsel %vm16683_vm11, %v5678_v17, %v5682_v30  ;;  %v5702_v40 = vrot.slane %v5701_v2, 4  ;;  %v6117_v17 = vld [vmem:[#allocation2 + $0x34] sm:$0xf] }
 0x267   : > { %14692 = vmatprep.subr.bf16.mxu0 %v15929_v45  ;;  %v5718_v48 = vshll.u32 %v5335_v13, 16  ;;  %v5722_v7 = vshrl.u32 %v5335_v13, 16  ;;  %v5659_v31 = vsel %vm16683_vm11, %v5654_v0, %v5658_v52  ;;  %v13446_v56 = vcombine.low %v5673_v6, %v5683_v39  ;;  %v6115_v61 = vld [vmem:[#allocation2 + $0x2c] sm:$0x1]  ;;  %v6120_v2 = vld [vmem:[#allocation2 + $0x40] sm:$0xf] }
 0x268   : > { %v5687_v11 = vrot.slane %v5685_v60, 4  ;;  %v13445_v8 = vcombine.low %v5649_v10, %v5659_v31  ;;  %v5738_v20 = vrot.slane %v5736_v50, 5  ;;  %v5744_v36 = vrot.slane %v5742_v24, 5 }
 0x269   : > { %v5720_v55 = vrot.slane %v5718_v48, 5  ;;  %v5724_v15 = vrot.slane %v5722_v7, 4  ;;  %v5748_v63 = vrot.slane %v5746_v37, 4  ;;  %v5707_v16 = vsel %vm16683_vm11, %v5702_v40, %v5706_v12  ;;  %v6124_v40 = vld [vmem:[#allocation2 + $0x50] sm:$0x1] }
 0x26a   : > { %14693 = vmatpush3.bf16.msra.mxu0 %v15929_v45  ;;  %v5690_v45 = vrot.slane %v5688_v49, 5  ;;  %v5752_v49 = vshll.u32 %v5339_v62, 16  ;;  %v6240_v28 = vrot.slane %v6111_v9, 5  ;;  %v13458_v0 = vrot.slane %v6110_v44, 9  ;;  %v6126_v62 = vld [vmem:[#allocation2 + $0x58] sm:$0xf] }
 0x26b   : > { %14694 = vmatprep.subr.bf16.mxu0 %v15930_v34  ;;  %v5749_v18 = vor.u32 %v5748_v63, %v5744_v36  ;;  %v6243_v30 = vrot.slane %v6112_v1, 5  ;;  %v6254_v32 = vrot.slane %v6117_v17, 5  ;;  %v6261_v37 = vrot.slane %v6120_v2, 5  ;;  %v6129_v9 = vld [vmem:[#allocation2 + $0x64] sm:$0xf] }
 0x26c   : > { %v5691_v58 = vor.u32 %v5690_v45, %v5687_v11  ;;  %v5754_v7 = vrot.slane %v5752_v49, 5  ;;  %v6242_v53 = vrot.slane %v6240_v28, 4  ;;  %v6114_v11 = vld [vmem:[#allocation2 + $0x28] sm:$0xf]  ;;  %v6241_v57 = vsel %vm16924_vm14, %v13458_v0, %v6240_v28  ;;  %v6128_v44 = vld [vmem:[#allocation2 + $0x60] sm:$0xe] }
 0x26d   : > { %14663 = vmatmul.mubr.bf16.gmra.mrb[12].mxu0 %v13441_v5  ;;  %v5725_v5 = vor.u32 %v5724_v15, %v5720_v55  ;;  %v5750_v48 = vrot.slane %v5749_v18, 4  ;;  %v6118_v15 = vld [vmem:[#allocation2 + $0x38] sm:$0x1]  ;;  %v6256_v39 = vrot.slane %v6254_v32, 4  ;;  %v6282_v28 = vrot.slane %v6129_v9, 5 }
 0x26e   : > { %14666 = vmatprep.mubr.bf16.mxu0 %v13442_v27  ;;  %14695 = vmatpush3.bf16.msra.mxu0 %v15930_v34  ;;  %v5733_v34 = vshrl.u32 %v5337_v54, 16  ;;  %v5728_v27 = vshll.u32 %v5336_v41, 16  ;;  %v5692_v4 = vrot.slane %v5691_v58, 4  ;;  %v6113_v54 = vld [vmem:[#allocation2 + $0x24] sm:$0xe]  ;;  %v6250_v41 = vrot.slane %v6115_v61, 5 }
 0x26f   : > { %14696 = vmatprep.subr.bf16.mxu0 %v15931_v38  ;;  %v5755_v45 = vsel %vm16683_vm11, %v5750_v48, %v5754_v7  ;;  %v13459_v31 = vrot.slane %v6113_v54, 9  ;;  %v6257_v58 = vrot.slane %v6118_v15, 5  ;;  %v6130_v1 = vld [vmem:[#allocation2 + $0x68] sm:$0x1]  ;;  %v13464_v0 = vrot.slane %v6128_v44, 9 }
 0x270   : > { %v5735_v33 = vrot.slane %v5733_v34, 4  ;;  %v5730_v25 = vrot.slane %v5728_v27, 5  ;;  %v5697_v60 = vsel %vm16683_vm11, %v5692_v4, %v5696_v59  ;;  %v6247_v59 = vrot.slane %v6114_v11, 5  ;;  %v6123_v34 = vld [vmem:[#allocation2 + $0x4c] sm:$0xf] }
 0x271   : > { %v13447_v52 = vcombine.low %v5697_v60, %v5707_v16  ;;  %v6119_v27 = vld [vmem:[#allocation2 + $0x3c] sm:$0xe]  ;;  %v6122_v4 = vld [vmem:[#allocation2 + $0x48] sm:$0xe]  ;;  %v6132_v11 = vld [vmem:[#allocation2 + $0x70] sm:$0xf] }
 0x272   : > { %14697 = vmatpush3.bf16.msra.mxu0 %v15931_v38  ;;  %v5726_v38 = vrot.slane %v5725_v5, 4  ;;  %v5739_v13 = vor.u32 %v5738_v20, %v5735_v33  ;;  %v6249_v46 = vrot.slane %v6247_v59, 4  ;;  %v6248_v50 = vsel %vm16924_vm14, %v13459_v31, %v6247_v59  ;;  %v6135_v17 = vld [vmem:[#allocation2 + $0x7c] sm:$0xf]  ;;  %v6131_v54 = vld [vmem:[#allocation2 + $0x6c] sm:$0xe] }
 0x273   : > { %v6258_v5 = vsel %vm16924_vm14, %v6256_v39, %v6257_v58  ;;  %v13461_v20 = vrot.slane %v6119_v27, 9  ;;  %v6289_v59 = vrot.slane %v6132_v11, 5  ;;  %v6133_v61 = vld [vmem:[#allocation2 + $0x74] sm:$0x1]  ;;  %v6136_v15 = vld [vmem:[#allocation2 + $0x80] sm:$0x1] }
 0x274   : > { %v5731_v42 = vsel %vm16683_vm11, %v5726_v38, %v5730_v25  ;;  %v5740_v43 = vrot.slane %v5739_v13, 4  ;;  %v6251_v24 = vsel %vm16924_vm14, %v6249_v46, %v6250_v41  ;;  %v6271_v25 = vrot.slane %v6124_v40, 5  ;;  %v6138_v2 = vld [vmem:[#allocation2 + $0x88] sm:$0xf]  ;;  %v6137_v27 = vld [vmem:[#allocation2 + $0x84] sm:$0xe] }
 0x275   : > { %14667 = vmatmul.mubr.bf16.gmra.mrb[16].mxu0 %v13443_v14  ;;  %v5716_v14 = vrot.slane %v5715_v29, 4  ;;  %v13475_v12 = vcombine.low %v6248_v50, %v6251_v24  ;;  %v6262_v60 = vsel %vm16924_vm14, %v13461_v20, %v6261_v37  ;;  %v6275_v13 = vrot.slane %v6126_v62, 5  ;;  %v6142_v40 = vld [vmem:[#allocation2 + $0x98] sm:$0x1]  ;;  %v6144_v62 = vld [vmem:[#allocation2 + $0xa0] sm:$0xf] }
 0x276   : > { %14670 = vmatprep.mubr.bf16.mxu0 %v13444_v19  ;;  %v5745_v22 = vsel %vm16683_vm11, %v5740_v43, %v5744_v36  ;;  %v6244_v19 = vsel %vm16924_vm14, %v6242_v53, %v6243_v30  ;;  %v6263_v36 = vrot.slane %v6261_v37, 4  ;;  %v6284_v53 = vrot.slane %v6282_v28, 4  ;;  %v6147_v9 = vld [vmem:[#allocation2 + $0xac] sm:$0xf]  ;;  %v6146_v44 = vld [vmem:[#allocation2 + $0xa8] sm:$0xe] }
 0x277   : > { %v5721_v47 = vsel %vm16683_vm11, %v5716_v14, %v5720_v55  ;;  %v6116_v55 = vld [vmem:[#allocation2 + $0x30] sm:$0xe]  ;;  %v13449_v21 = vcombine.low %v5745_v22, %v5755_v45  ;;  %v13474_v10 = vcombine.low %v6241_v57, %v6244_v19  ;;  %v13462_v14 = vrot.slane %v6122_v4, 9  ;;  %v6150_v11 = vld [vmem:[#allocation2 + $0xb8] sm:$0xf] }
 0x278   : > { %v13448_v3 = vcombine.low %v5721_v47, %v5731_v42  ;;  %v13460_v6 = vrot.slane %v6116_v55, 9  ;;  %v6125_v47 = vld [vmem:[#allocation2 + $0x54] sm:$0xe]  ;;  %v6127_v42 = vld [vmem:[#allocation2 + $0x5c] sm:$0x1]  ;;  %v6277_v48 = vrot.slane %v6275_v13, 4  ;;  %v6283_v57 = vsel %vm16924_vm14, %v13464_v0, %v6282_v28 }
 0x279   : > { %v13463_v43 = vrot.slane %v6125_v47, 9  ;;  %v6278_v7 = vrot.slane %v6127_v42, 5  ;;  %v6285_v30 = vrot.slane %v6130_v1, 5  ;;  %v6134_v55 = vld [vmem:[#allocation2 + $0x78] sm:$0xe]  ;;  %v13465_v31 = vrot.slane %v6131_v54, 9 }
 0x27a   : > { %v6255_v29 = vsel %vm16924_vm14, %v13460_v6, %v6254_v32  ;;  %v6296_v32 = vrot.slane %v6135_v17, 5  ;;  %v6291_v46 = vrot.slane %v6289_v59, 4  ;;  %v6292_v41 = vrot.slane %v6133_v61, 5  ;;  %v6140_v4 = vld [vmem:[#allocation2 + $0x90] sm:$0xe] }
 0x27b   : > { %v13476_v33 = vcombine.low %v6255_v29, %v6258_v5  ;;  %v6276_v22 = vsel %vm16924_vm14, %v13463_v43, %v6275_v13  ;;  %v6279_v45 = vsel %vm16924_vm14, %v6277_v48, %v6278_v7  ;;  %v6286_v19 = vsel %vm16924_vm14, %v6284_v53, %v6285_v30  ;;  %v6143_v47 = vld [vmem:[#allocation2 + $0x9c] sm:$0xe]  ;;  %v6145_v42 = vld [vmem:[#allocation2 + $0xa4] sm:$0x1]  ;;  %v6148_v1 = vld [vmem:[#allocation2 + $0xb0] sm:$0x1] }
 0x27c   : > { %v13466_v6 = vrot.slane %v6134_v55, 9  ;;  %v6298_v39 = vrot.slane %v6296_v32, 4  ;;  %v6299_v58 = vrot.slane %v6136_v15, 5  ;;  %v6290_v50 = vsel %vm16924_vm14, %v13465_v31, %v6289_v59  ;;  %v6153_v17 = vld [vmem:[#allocation2 + $0xc4] sm:$0xf] }
 0x27d   : > { %14671 = vmatmul.mubr.bf16.gmra.mrb[20].mxu0 %v13445_v8  ;;  %v6121_v8 = vld [vmem:[#allocation2 + $0x44] sm:$0x1]  ;;  %v6293_v24 = vsel %vm16924_vm14, %v6291_v46, %v6292_v41  ;;  %v6303_v37 = vrot.slane %v6138_v2, 5  ;;  %v13467_v20 = vrot.slane %v6137_v27, 9  ;;  %v6317_v13 = vrot.slane %v6144_v62, 5 }
 0x27e   : > { %14674 = vmatprep.mubr.bf16.mxu0 %v13446_v56  ;;  %v6268_v56 = vrot.slane %v6123_v34, 5  ;;  %v6264_v63 = vrot.slane %v6121_v8, 5  ;;  %v6141_v34 = vld [vmem:[#allocation2 + $0x94] sm:$0xf]  ;;  %v6297_v29 = vsel %vm16924_vm14, %v13466_v6, %v6296_v32  ;;  %v6300_v5 = vsel %vm16924_vm14, %v6298_v39, %v6299_v58  ;;  %v6139_v8 = vld [vmem:[#allocation2 + $0x8c] sm:$0x1] }
 0x27f   : > { %v6324_v28 = vrot.slane %v6147_v9, 5  ;;  %v13469_v43 = vrot.slane %v6143_v47, 9  ;;  %v6319_v48 = vrot.slane %v6317_v13, 4  ;;  %v6320_v7 = vrot.slane %v6145_v42, 5  ;;  %v6149_v54 = vld [vmem:[#allocation2 + $0xb4] sm:$0xe] }
 0x280   : > { %v6270_v38 = vrot.slane %v6268_v56, 4  ;;  %v6265_v16 = vsel %vm16924_vm14, %v6263_v36, %v6264_v63  ;;  %v6269_v18 = vsel %vm16924_vm14, %v13462_v14, %v6268_v56  ;;  %v6310_v56 = vrot.slane %v6141_v34, 5  ;;  %v6151_v61 = vld [vmem:[#allocation2 + $0xbc] sm:$0x1]  ;;  %v6152_v55 = vld [vmem:[#allocation2 + $0xc0] sm:$0xe] }
 0x281   : > { %v6305_v36 = vrot.slane %v6303_v37, 4  ;;  %v6306_v63 = vrot.slane %v6139_v8, 5  ;;  %v13468_v14 = vrot.slane %v6140_v4, 9  ;;  %v13470_v0 = vrot.slane %v6146_v44, 9  ;;  %v6154_v15 = vld [vmem:[#allocation2 + $0xc8] sm:$0x1] }
 0x282   : > { %v6272_v49 = vsel %vm16924_vm14, %v6270_v38, %v6271_v25  ;;  %v6312_v38 = vrot.slane %v6310_v56, 4  ;;  %v6313_v25 = vrot.slane %v6142_v40, 5  ;;  %v6326_v53 = vrot.slane %v6324_v28, 4  ;;  %v6156_v2 = vld [vmem:[#allocation2 + $0xd0] sm:$0xf] }
 0x283   : > { %v6327_v30 = vrot.slane %v6148_v1, 5  ;;  %v6331_v59 = vrot.slane %v6150_v11, 5  ;;  %v6338_v32 = vrot.slane %v6153_v17, 5  ;;  %v13471_v31 = vrot.slane %v6149_v54, 9  ;;  %v6157_v27 = vld [vmem:[#allocation2 + $0xd4] sm:$0x1] }
 0x284   : > { %v6334_v41 = vrot.slane %v6151_v61, 5  ;;  %v13472_v6 = vrot.slane %v6152_v55, 9  ;;  %v6341_v58 = vrot.slane %v6154_v15, 5  ;;  %v460_v62 = vld [vmem:[#allocation3 + $0x20] sm:$0x1]  ;;  %v15936_v44 = vld [vmem:[#allocation10 + $0x20] sm:$0xff]  }
 0x285   : > { %14675 = vmatmul.mubr.bf16.gmra.mrb[24].mxu0 %v13447_v52  ;;  %v13477_v52 = vcombine.low %v6262_v60, %v6265_v16  ;;  %v6304_v60 = vsel %vm16924_vm14, %v13467_v20, %v6303_v37  ;;  %v6307_v16 = vsel %vm16924_vm14, %v6305_v36, %v6306_v63  ;;  %v6333_v46 = vrot.slane %v6331_v59, 4  ;;  %v15934_v63 = vld [vmem:[#allocation10 + $0x10] sm:$0xff]   ;;  %v466_v42 = vld [vmem:[#allocation3 + $0x38] sm:$0x1]  ;;  %v15937_v1 = vld [vmem:[#allocation10 + $0x28] sm:$0xff]  }
 0x286   : > { %14678 = vmatprep.mubr.bf16.mxu0 %v13448_v3  ;;  %v13478_v3 = vcombine.low %v6269_v18, %v6272_v49  ;;  %v6311_v18 = vsel %vm16924_vm14, %v13468_v14, %v6310_v56  ;;  %v6314_v49 = vsel %vm16924_vm14, %v6312_v38, %v6313_v25  ;;  %v6340_v39 = vrot.slane %v6338_v32, 4  ;;  %14734 = vmatprep.subr.bf16.mxu1 %v15934_v63  ;;  %v403_v14 = vld [vmem:[#allocation3 + $0xc] sm:$0x1]  ;;  %v15935_v38 = vld [vmem:[#allocation10 + $0x18] sm:$0xff]   ;;  %v424_v54 = vld [vmem:[#allocation3 + $0x60] sm:$0x1] }
 0x287   : > { %v6332_v34 = vsel %vm16924_vm14, %v13471_v31, %v6331_v59  ;;  %v6339_v37 = vsel %vm16924_vm14, %v13472_v6, %v6338_v32  ;;  %14735 = vmatpush3.bf16.msra.mxu1 %v15934_v63  ;;  %v404_v25 = vsel %vm16440_vm2, 0, %v403_v14  ;;  %v461_v9 = vsel %vm16445_vm4, 0, %v460_v62  ;;  %v472_v17 = vld [vmem:[#allocation3 + $0x50] sm:$0x1]  ;;  %v469_v59 = vld [vmem:[#allocation3 + $0x44] sm:$0x1] }
 0x288   : > { %405 = vst [vmem:[#allocation3 + $0xc] sm:$0x1] %v404_v25  ;;  %14736 = vmatprep.subr.bf16.mxu1 %v15935_v38  ;;  %462 = vst [vmem:[#allocation3 + $0x20] sm:$0x1] %v461_v9  ;;  %v425_v61 = vsel %vm16440_vm2, 0, %v424_v54 }
 0x289   : > { %v421_v32 = vld [vmem:[#allocation3 + $0x54] sm:$0x1]  ;;  %426 = vst [vmem:[#allocation3 + $0x60] sm:$0x1] %v425_v61  ;;  %v478_v15 = vld [vmem:[#allocation3 + $0x68] sm:$0x1] }
 0x28a   : > { %v422_v55 = vsel %vm16440_vm2, 0, %v421_v32  ;;  %v427_v6 = vld [vmem:[#allocation3 + $0x6c] sm:$0x1]  ;;  %v496_v63 = vld [vmem:[#allocation3 + $0xb0] sm:$0x1] }
 0x28b   : > { %14737 = vmatpush3.bf16.msra.mxu1 %v15935_v38  ;;  %423 = vst [vmem:[#allocation3 + $0x54] sm:$0x1] %v422_v55  ;;  %v497_v14 = vsel %vm16445_vm4, 0, %v496_v63  ;;  %v493_v38 = vld [vmem:[#allocation3 + $0xa4] sm:$0x1] }
 0x28c   : > { %14738 = vmatprep.subr.bf16.mxu1 %v15936_v44  ;;  %498 = vst [vmem:[#allocation3 + $0xb0] sm:$0x1] %v497_v14  ;;  %v494_v25 = vsel %vm16445_vm4, 0, %v493_v38  ;;  %v448_v62 = vld [vmem:[#allocation3 + $0xc0] sm:$0x1] }
 0x28d   : > { %14679 = vmatmul.mubr.bf16.gmra.mrb[28].mxu0 %v13449_v21  ;;  %v13479_v21 = vcombine.low %v6276_v22, %v6279_v45  ;;  %v6318_v22 = vsel %vm16924_vm14, %v13469_v43, %v6317_v13  ;;  %v6321_v45 = vsel %vm16924_vm14, %v6319_v48, %v6320_v7  ;;  %v412_v13 = vld [vmem:[#allocation3 + $0x30] sm:$0x1]  ;;  %v400_v43 = vld [vmem:[#allocation3] sm:$0x1]  ;;  %v15938_v7 = vld [vmem:[#allocation10 + $0x30] sm:$0xff]   ;;  %v449_v9 = vsel %vm16440_vm2, 0, %v448_v62 }
 0x28e   : > { %14698 = vmatprep.mubr.bf16.mxu0 %v13474_v10  ;;  %v13480_v10 = vcombine.low %v6283_v57, %v6286_v19  ;;  %v6325_v57 = vsel %vm16924_vm14, %v13470_v0, %v6324_v28  ;;  %v6328_v19 = vsel %vm16924_vm14, %v6326_v53, %v6327_v30  ;;  %v467_v28 = vsel %vm16445_vm4, 0, %v466_v42  ;;  %v418_v0 = vld [vmem:[#allocation3 + $0x48] sm:$0x1]  ;;  %v415_v30 = vld [vmem:[#allocation3 + $0x3c] sm:$0x1] }
 0x28f   : > { %468 = vst [vmem:[#allocation3 + $0x38] sm:$0x1] %v467_v28  ;;  %14739 = vmatpush3.bf16.msra.mxu1 %v15936_v44  ;;  %v401_v48 = vsel %vm16440_vm2, 0, %v400_v43  ;;  %v419_v53 = vsel %vm16440_vm2, 0, %v418_v0  ;;  %v416_v11 = vsel %vm16440_vm2, 0, %v415_v30 }
 0x290   : > { %14740 = vmatprep.subr.bf16.mxu1 %v15937_v1  ;;  %402 = vst [vmem:[#allocation3] sm:$0x1] %v401_v48  ;;  %420 = vst [vmem:[#allocation3 + $0x48] sm:$0x1] %v419_v53  ;;  %v454_v42 = vld [vmem:[#allocation3 + $0x8] sm:$0x1] }
 0x291   : > { %417 = vst [vmem:[#allocation3 + $0x3c] sm:$0x1] %v416_v11  ;;  %495 = vst [vmem:[#allocation3 + $0xa4] sm:$0x1] %v494_v25  ;;  %v455_v28 = vsel %vm16445_vm4, 0, %v454_v42 }
 0x292   : > { %450 = vst [vmem:[#allocation3 + $0xc0] sm:$0x1] %v449_v9  ;;  %456 = vst [vmem:[#allocation3 + $0x8] sm:$0x1] %v455_v28  ;;  %v7185_v14 = vld [vmem:[#allocation3 + $0xc] sm:$0xf] }
 0x293   : > { %14741 = vmatpush3.bf16.msra.mxu1 %v15937_v1  ;;  %v17715_v1 = vld [vmem:[%s18634_s2] ss:$0 sm:$0xff] }
 0x294   : > { %14742 = vmatprep.subr.bf16.mxu1 %v15938_v7 }
 0x295   : > { %14699 = vmatmul.mubr.bf16.vlgmr.msra.gmra.mrb[0].mxu0 %v13475_v12  ;;  %v13481_v12 = vcombine.low %v6290_v50, %v6293_v24  ;;  %v6335_v50 = vsel %vm16924_vm14, %v6333_v46, %v6334_v41  ;;  %v6345_v24 = vrot.slane %v6156_v2, 5  ;;  %v430_v46 = vld [vmem:[#allocation3 + $0x78] sm:$0x1] }
 0x296   : > { %14702 = vmatprep.mubr.bf16.mxu0 %v13476_v33  ;;  %v13482_v33 = vcombine.low %v6297_v29, %v6300_v5  ;;  %v6342_v29 = vsel %vm16924_vm14, %v6340_v39, %v6341_v58  ;;  %v6155_v5 = vld [vmem:[#allocation2 + $0xcc] sm:$0xe]  ;;  %v13487_v8 = vcombine.low %v6332_v34, %v6335_v50  ;;  %v431_v41 = vsel %vm16440_vm2, 0, %v430_v46  ;;  %v484_v58 = vld [vmem:[#allocation3 + $0x80] sm:$0x1]  ;;  %v17681_v34 = vld [vmem:[#allocation10 + $0x40] sm:$0xff]  }
 0x297   : > { %v13488_v56 = vcombine.low %v6339_v37, %v6342_v29  ;;  %v13473_v4 = vrot.slane %v6155_v5, 9  ;;  %v6347_v40 = vrot.slane %v6345_v24, 4  ;;  %14743 = vmatpush3.bf16.msra.mxu1 %v15938_v7  ;;  %432 = vst [vmem:[#allocation3 + $0x78] sm:$0x1] %v431_v41  ;;  %v428_v39 = vsel %vm16440_vm2, 0, %v427_v6 }
 0x298   : > { %429 = vst [vmem:[#allocation3 + $0x6c] sm:$0x1] %v428_v39  ;;  %v485_v2 = vsel %vm16445_vm4, 0, %v484_v58  ;;  %v481_v50 = vld [vmem:[#allocation3 + $0x74] sm:$0x1] }
 0x299   : > { %486 = vst [vmem:[#allocation3 + $0x80] sm:$0x1] %v485_v2  ;;  %v436_v37 = vld [vmem:[#allocation3 + $0x90] sm:$0x1]  ;;  %v433_v5 = vld [vmem:[#allocation3 + $0x84] sm:$0x1] }
 0x29a   : > { %v437_v29 = vsel %vm16440_vm2, 0, %v436_v37  ;;  %v7785_v44 = vld [vmem:[#allocation3] sm:$0xf] }
 0x29b   : > { %438 = vst [vmem:[#allocation3 + $0x90] sm:$0x1] %v437_v29  ;;  %v7869_v43 = vshll.u32 %v7785_v44, 16 }
 0x29d   : > { %14703 = vmatmul.mubr.bf16.gmra.mrb[4].mxu0 %v13477_v52  ;;  %v13483_v52 = vcombine.low %v6304_v60, %v6307_v16  ;;  %v457_v60 = vld [vmem:[#allocation3 + $0x14] sm:$0x1] }
 0x29e   : > { %14706 = vmatprep.mubr.bf16.mxu0 %v13478_v3  ;;  %v13484_v3 = vcombine.low %v6311_v18, %v6314_v49  ;;  %v458_v16 = vsel %vm16445_vm4, 0, %v457_v60  ;;  %v413_v18 = vsel %vm16440_vm2, 0, %v412_v13  ;;  %v409_v49 = vld [vmem:[#allocation3 + $0x24] sm:$0x1]  ;;  %v445_v60 = vld [vmem:[#allocation3 + $0xb4] sm:$0x1] }
 0x29f   : > { %459 = vst [vmem:[#allocation3 + $0x14] sm:$0x1] %v458_v16  ;;  %414 = vst [vmem:[#allocation3 + $0x30] sm:$0x1] %v413_v18  ;;  %v410_v47 = vsel %vm16440_vm2, 0, %v409_v49  ;;  %v446_v16 = vsel %vm16440_vm2, 0, %v445_v60 }
 0x2a0   : > { %411 = vst [vmem:[#allocation3 + $0x24] sm:$0x1] %v410_v47  ;;  %v502_v13 = vld [vmem:[#allocation3 + $0xc8] sm:$0x1]  ;;  %447 = vst [vmem:[#allocation3 + $0xb4] sm:$0x1] %v446_v16 }
 0x2a1   : > { %v503_v18 = vsel %vm16445_vm4, 0, %v502_v13  ;;  %v499_v49 = vld [vmem:[#allocation3 + $0xbc] sm:$0x1]  ;;  %v7196_v16 = vld [vmem:[#allocation3 + $0x20] sm:$0x1] }
 0x2a2   : > { %504 = vst [vmem:[#allocation3 + $0xc8] sm:$0x1] %v503_v18  ;;  %v500_v47 = vsel %vm16445_vm4, 0, %v499_v49 }
 0x2a3   : > { %501 = vst [vmem:[#allocation3 + $0xbc] sm:$0x1] %v500_v47 }
 0x2a5   : > { %14707 = vmatmul.mubr.bf16.gmra.mrb[8].mxu0 %v13479_v21  ;;  %v13485_v21 = vcombine.low %v6318_v22, %v6321_v45  ;;  %v15939_v22 = vld [vmem:[#allocation10 + $0x38] sm:$0xff]   ;;  %v473_v45 = vsel %vm16445_vm4, 0, %v472_v17 }
 0x2a6   : > { %14710 = vmatprep.mubr.bf16.mxu0 %v13480_v10  ;;  %v13486_v10 = vcombine.low %v6325_v57, %v6328_v19  ;;  %474 = vst [vmem:[#allocation3 + $0x50] sm:$0x1] %v473_v45  ;;  %14744 = vmatprep.subr.bf16.mxu1 %v15939_v22  ;;  %v470_v57 = vsel %vm16445_vm4, 0, %v469_v59  ;;  %v15940_v19 = vld [vmem:[#allocation3] sm:$0xff]  }
 0x2a7   : > { %14745 = vmatpush3.bf16.msra.mxu1 %v15939_v22  ;;  %471 = vst [vmem:[#allocation3 + $0x44] sm:$0x1] %v470_v57  ;;  %14746 = vmatprep.mubr.bf16.mxu1 %v15940_v19  ;;  %v17722_v19 = vrot.slane %v7869_v43, 5 }
 0x2a8   : > { %14778 = vmatprep.subr.bf16.mxu1 %v17681_v34 }
 0x2ad   : > { %14711 = vmatmul.mubr.bf16.gmra.mrb[12].mxu0 %v13481_v12  ;;  %v6348_v12 = vrot.slane %v6157_v27, 5  ;;  %v434_v27 = vsel %vm16440_vm2, 0, %v433_v5 }
 0x2ae   : > { %14714 = vmatprep.mubr.bf16.mxu0 %v13482_v33  ;;  %v6346_v33 = vsel %vm16924_vm14, %v13473_v4, %v6345_v24  ;;  %v482_v24 = vsel %vm16445_vm4, 0, %v481_v50  ;;  %435 = vst [vmem:[#allocation3 + $0x84] sm:$0x1] %v434_v27  ;;  %v487_v4 = vld [vmem:[#allocation3 + $0x8c] sm:$0x1] }
 0x2af   : > { %v6349_v20 = vsel %vm16924_vm14, %v6347_v40, %v6348_v12  ;;  %483 = vst [vmem:[#allocation3 + $0x74] sm:$0x1] %v482_v24  ;;  %v488_v40 = vsel %vm16445_vm4, 0, %v487_v4  ;;  %v442_v12 = vld [vmem:[#allocation3 + $0xa8] sm:$0x1] }
 0x2b0   : > { %v13489_v36 = vcombine.low %v6346_v33, %v6349_v20  ;;  %489 = vst [vmem:[#allocation3 + $0x8c] sm:$0x1] %v488_v40  ;;  %v443_v33 = vsel %vm16440_vm2, 0, %v442_v12  ;;  %v439_v20 = vld [vmem:[#allocation3 + $0x9c] sm:$0x1] }
 0x2b1   : > { %444 = vst [vmem:[#allocation3 + $0xa8] sm:$0x1] %v443_v33 }
 0x2b5   : > { %14715 = vmatmul.mubr.bf16.gmra.mrb[16].mxu0 %v13483_v52  ;;  %v463_v52 = vld [vmem:[#allocation3 + $0x2c] sm:$0x1] }
 0x2b6   : > { %14718 = vmatprep.mubr.bf16.mxu0 %v13484_v3  ;;  %v464_v3 = vsel %vm16445_vm4, 0, %v463_v52  ;;  %v7786_v52 = vld [vmem:[#allocation3 + $0x4] sm:$0xf] }
 0x2b7   : > { %465 = vst [vmem:[#allocation3 + $0x2c] sm:$0x1] %v464_v3  ;;  %v7866_v3 = vshrl.u32 %v7785_v44, 16  ;;  %v7875_v11 = vshll.u32 %v7786_v52, 16  ;;  %v7879_v17 = vshrl.u32 %v7786_v52, 16 }
 0x2b8   : > { %v7189_v44 = vld [vmem:[#allocation3 + $0x14] sm:$0x1] }
 0x2b9   : > { %v17720_v57 = vrot.slane %v7866_v3, 4  ;;  %v17729_v6 = vrot.slane %v7879_v17, 4  ;;  %v17741_v17 = vld [vmem:[#allocation3 + $0x8] sm:$0x1] }
 0x2bb   : > { %v7872_v41 = vor.u32 %v17722_v19, %v17720_v57 }
 0x2bd   : > { %14719 = vmatmul.mubr.bf16.gmra.mrb[20].mxu0 %v13485_v21  ;;  %v479_v21 = vsel %vm16445_vm4, 0, %v478_v15 }
 0x2be   : > { %14722 = vmatprep.mubr.bf16.mxu0 %v13486_v10  ;;  %v475_v10 = vld [vmem:[#allocation3 + $0x5c] sm:$0x1]  ;;  %480 = vst [vmem:[#allocation3 + $0x68] sm:$0x1] %v479_v21 }
 0x2bf   : > { %v476_v31 = vsel %vm16445_vm4, 0, %v475_v10  ;;  %v17725_v10 = vrot.slane %v7875_v11, 5 }
 0x2c0   : > { %477 = vst [vmem:[#allocation3 + $0x5c] sm:$0x1] %v476_v31 }
 0x2c5   : > { %14723 = vmatmul.mubr.bf16.gmra.mrb[24].mxu0 %v13487_v8  ;;  %v490_v8 = vld [vmem:[#allocation3 + $0x98] sm:$0x1] }
 0x2c6   : > { %14726 = vmatprep.mubr.bf16.mxu0 %v13488_v56  ;;  %v491_v56 = vsel %vm16445_vm4, 0, %v490_v8 }
 0x2c7   : > { %492 = vst [vmem:[#allocation3 + $0x98] sm:$0x1] %v491_v56  ;;  %v7192_v56 = vld [vmem:[#allocation3 + $0x18] sm:$0xf] }
 0x2cd   : > { %14727 = vmatmul.mubr.bf16.gmra.mrb[28].mxu0 %v13489_v36  ;;  %v440_v36 = vsel %vm16440_vm2, 0, %v439_v20 }
 0x2ce   : > { %441 = vst [vmem:[#allocation3 + $0x9c] sm:$0x1] %v440_v36 }
 0x368   : > { %v14700_v48 = vpop.f32.mrb[0].mxu0 }
 0x369   : > { %v15162_v7 = vadd.f32 %v14700_v48, %v17715_v1  ;;  %v6513_v0 = vpop.f32.mrb[1].mxu0 }
 0x36a   : > { %v15163_v53 = vadd.f32 %v17715_v1, %v6513_v0  ;;  %v14701_v30 = vpop.f32.mrb[2].mxu0 }
 0x36b   : > { %v6738_v22 = vmax.f32 %v15162_v7, 0.0  ;;  %v15164_v45 = vadd.f32 %v14701_v30, %v17715_v1  ;;  %v6516_v59 = vpop.f32.mrb[3].mxu0 }
 0x36c   : > { %v6736_v54 = vmax.f32 %v15163_v53, 0.0  ;;  %v15165_v61 = vadd.f32 %v17715_v1, %v6516_v59 }
 0x36d   : > { %v13835_v32 = vpack.c.bf16 %v6738_v22, %v6738_v22  ;;  %v6739_v55 = vmax.f32 %v15164_v45, 0.0  ;;  %v7882_v22 = vor.u32 %v17729_v6, %v17725_v10 }
 0x36e   : > { %v13833_v15 = vpack.c.bf16 %v6736_v54, %v6736_v54  ;;  %v6737_v21 = vmax.f32 %v15165_v61, 0.0 }
 0x36f   : > { %v6882_v31 = vshrl.u32 %v13835_v32, 16  ;;  %v13836_v46 = vpack.c.bf16 %v6739_v55, %v6739_v55  ;;  %v6885_v39 = vshll.u32 %v13835_v32, 16 }
 0x370   : > { %v6865_v58 = vshrl.u32 %v13833_v15, 16  ;;  %v6868_v2 = vshll.u32 %v13833_v15, 16  ;;  %v13834_v50 = vpack.c.bf16 %v6737_v21, %v6737_v21  ;;  %v14704_v24 = vpop.f32.mrb[4].mxu0 }
 0x371   : > { %v6884_v37 = vrot.slane %v6882_v31, 7  ;;  %v6890_v29 = vshrl.u32 %v13836_v46, 16  ;;  %v6893_v5 = vshll.u32 %v13836_v46, 16  ;;  %v15166_v27 = vadd.f32 %v14704_v24, %v17715_v1  ;;  %v6529_v8 = vpop.f32.mrb[5].mxu0 }
 0x372   : > { %v6867_v4 = vrot.slane %v6865_v58, 7  ;;  %v6873_v40 = vshrl.u32 %v13834_v50, 16  ;;  %v6876_v12 = vshll.u32 %v13834_v50, 16  ;;  %v15167_v33 = vadd.f32 %v17715_v1, %v6529_v8  ;;  %v14705_v20 = vpop.f32.mrb[6].mxu0 }
 0x373   : > { %v6887_v36 = vor.u32 %v6885_v39, %v6884_v37  ;;  %v6888_v63 = vrot.slane %v6884_v37, 4  ;;  %v6892_v38 = vrot.slane %v6890_v29, 7  ;;  %v6742_v25 = vmax.f32 %v15166_v27, 0.0  ;;  %v6532_v62 = vpop.f32.mrb[7].mxu0  ;;  %v7206_v39 = vld [vmem:[#allocation3 + $0x30] sm:$0xf] }
 0x374   : > { %v6870_v9 = vor.u32 %v6868_v2, %v6867_v4  ;;  %v6871_v60 = vrot.slane %v6867_v4, 4  ;;  %v6875_v13 = vrot.slane %v6873_v40, 7  ;;  %v6740_v18 = vmax.f32 %v15167_v33, 0.0  ;;  %v7199_v27 = vld [vmem:[#allocation3 + $0x24] sm:$0xf] }
 0x375   : > { %v7193_v47 = vsel %vm16476_vm8, %v6887_v36, %v7192_v56  ;;  %v6895_v42 = vor.u32 %v6893_v5, %v6892_v38  ;;  %v6897_v28 = vrot.slane %v6892_v38, 4  ;;  %v13839_v52 = vpack.c.bf16 %v6742_v25, %v6742_v25 }
 0x376   : > { %7194 = vst [vmem:[#allocation3 + $0x18] sm:$0xf] %v7193_v47  ;;  %v7186_v3 = vsel %vm16476_vm8, %v6870_v9, %v7185_v14  ;;  %v6878_v43 = vor.u32 %v6876_v12, %v6875_v13  ;;  %v6880_v48 = vrot.slane %v6875_v13, 4  ;;  %v13837_v7 = vpack.c.bf16 %v6740_v18, %v6740_v18 }
 0x377   : > { %7187 = vst [vmem:[#allocation3 + $0xc] sm:$0xf] %v7186_v3  ;;  %v6896_v53 = vsel %vm16467_vm7, %v6888_v63, %v6895_v42  ;;  %v7197_v30 = vsel %vm16440_vm2, %v6897_v28, %v7196_v16  ;;  %v6916_v11 = vshrl.u32 %v13839_v52, 16  ;;  %v6919_v54 = vshll.u32 %v13839_v52, 16  ;;  %v15945_v16 = vld [vmem:[#allocation10 + $0x48] sm:$0xff]  }
 0x378   : > { %7195 = vst [vmem:[#allocation3 + $0x1c] sm:$0xf] %v6896_v53  ;;  %7198 = vst [vmem:[#allocation3 + $0x20] sm:$0x1] %v7197_v30  ;;  %v6879_v45 = vsel %vm16467_vm7, %v6871_v60, %v6878_v43  ;;  %v7190_v59 = vsel %vm16440_vm2, %v6880_v48, %v7189_v44  ;;  %v6899_v61 = vshrl.u32 %v13837_v7, 16  ;;  %v14708_v32 = vpop.f32.mrb[8].mxu0  ;;  %v15168_v15 = vadd.f32 %v14705_v20, %v17715_v1 }
 0x379   : > { %7188 = vst [vmem:[#allocation3 + $0x10] sm:$0xf] %v6879_v45  ;;  %7191 = vst [vmem:[#allocation3 + $0x14] sm:$0x1] %v7190_v59  ;;  %v17749_v55 = vrot.slane %v6916_v11, 7  ;;  %v15169_v21 = vadd.f32 %v17715_v1, %v6532_v62  ;;  %v15170_v31 = vadd.f32 %v14708_v32, %v17715_v1  ;;  %v6545_v46 = vpop.f32.mrb[9].mxu0 }
 0x37a   : > { %v17754_v58 = vrot.slane %v6899_v61, 7  ;;  %v6902_v2 = vshll.u32 %v13837_v7, 16  ;;  %v15171_v50 = vadd.f32 %v17715_v1, %v6545_v46  ;;  %v14709_v24 = vpop.f32.mrb[10].mxu0  ;;  %v7885_v37 = vshll.u32 %v17741_v17, 16  ;;  %v7210_v28 = vld [vmem:[#allocation3 + $0x38] sm:$0x1] }
 0x37b   : > { %v6921_v29 = vor.u32 %v6919_v54, %v17749_v55  ;;  %v6922_v5 = vrot.slane %v17749_v55, 4  ;;  %v6743_v8 = vmax.f32 %v15168_v15, 0.0  ;;  %v6741_v56 = vmax.f32 %v15169_v21, 0.0  ;;  %v6548_v4 = vpop.f32.mrb[11].mxu0  ;;  %v7203_v44 = vld [vmem:[#allocation3 + $0x2c] sm:$0x1] }
 0x37c   : > { %v6904_v40 = vor.u32 %v6902_v2, %v17754_v58  ;;  %v6905_v12 = vrot.slane %v17754_v58, 4  ;;  %v6746_v33 = vmax.f32 %v15170_v31, 0.0  ;;  %v6744_v20 = vmax.f32 %v15171_v50, 0.0  ;;  %v7220_v45 = vld [vmem:[#allocation3 + $0x48] sm:$0xf] }
 0x37d   : > { %v7207_v36 = vsel %vm16476_vm8, %v6921_v29, %v7206_v39  ;;  %v13840_v63 = vpack.c.bf16 %v6743_v8, %v6743_v8  ;;  %v13838_v14 = vpack.c.bf16 %v6741_v56, %v6741_v56  ;;  %v15172_v38 = vadd.f32 %v14709_v24, %v17715_v1  ;;  %v7213_v24 = vld [vmem:[#allocation3 + $0x3c] sm:$0xf]  ;;  %v7791_v19 = vld [vmem:[#allocation3 + $0x18] sm:$0xf] }
 0x37e   : > { %7208 = vst [vmem:[#allocation3 + $0x30] sm:$0xf] %v7207_v36  ;;  %v7200_v25 = vsel %vm16476_vm8, %v6904_v40, %v7199_v27  ;;  %v13843_v62 = vpack.c.bf16 %v6746_v33, %v6746_v33  ;;  %v13841_v9 = vpack.c.bf16 %v6744_v20, %v6744_v20  ;;  %v15173_v60 = vadd.f32 %v17715_v1, %v6548_v4  ;;  %v15948_v40 = vld [vmem:[#allocation10 + $0x50] sm:$0xff]  }
 0x37f   : > { %7201 = vst [vmem:[#allocation3 + $0x24] sm:$0xf] %v7200_v25  ;;  %v6924_v13 = vshrl.u32 %v13840_v63, 16  ;;  %v6927_v18 = vshll.u32 %v13840_v63, 16  ;;  %v6907_v47 = vshrl.u32 %v13838_v14, 16  ;;  %v6910_v42 = vshll.u32 %v13838_v14, 16 }
 0x380   : > { %v6950_v52 = vshrl.u32 %v13843_v62, 16  ;;  %v6953_v3 = vshll.u32 %v13843_v62, 16  ;;  %v6933_v43 = vshrl.u32 %v13841_v9, 16  ;;  %v6936_v48 = vshll.u32 %v13841_v9, 16  ;;  %v14712_v7 = vpop.f32.mrb[12].mxu0  ;;  %v15941_v53 = vld [vmem:[#allocation3 + $0xc] sm:$0xff]  }
 0x381   : > { %v6926_v30 = vrot.slane %v6924_v13, 7  ;;  %v6909_v11 = vrot.slane %v6907_v47, 7  ;;  %v6747_v59 = vmax.f32 %v15172_v38, 0.0  ;;  %v6745_v54 = vmax.f32 %v15173_v60, 0.0  ;;  %v6561_v61 = vpop.f32.mrb[13].mxu0  ;;  %v15943_v32 = vld [vmem:[#allocation3 + $0x18] sm:$0xff]   ;;  %14747 = vmatmul.mubr.bf16.vlgmr.msra.gmra.mrb[0].mxu1 %v15941_v53 }
 0x382   : > { %v17768_v55 = vrot.slane %v6950_v52, 7  ;;  %v17770_v15 = vrot.slane %v6933_v43, 7  ;;  %v15174_v21 = vadd.f32 %v14712_v7, %v17715_v1  ;;  %v15175_v31 = vadd.f32 %v17715_v1, %v6561_v61  ;;  %v14713_v46 = vpop.f32.mrb[14].mxu0  ;;  %14750 = vmatprep.mubr.bf16.mxu1 %v15943_v32  ;;  %14779 = vmatpush3.bf16.msra.mxu1 %v17681_v34 }
 0x383   : > { %v6929_v39 = vor.u32 %v6927_v18, %v6926_v30  ;;  %v6931_v58 = vrot.slane %v6926_v30, 4  ;;  %v6912_v2 = vor.u32 %v6910_v42, %v6909_v11  ;;  %v6914_v50 = vrot.slane %v6909_v11, 4  ;;  %v6564_v29 = vpop.f32.mrb[15].mxu0  ;;  %14780 = vmatprep.subr.bf16.mxu1 %v15945_v16  ;;  %v7217_v11 = vld [vmem:[#allocation3 + $0x44] sm:$0x1] }
 0x384   : > { %v6955_v27 = vor.u32 %v6953_v3, %v17768_v55  ;;  %v6956_v8 = vrot.slane %v17768_v55, 4  ;;  %v6938_v56 = vor.u32 %v6936_v48, %v17770_v15  ;;  %v6939_v4 = vrot.slane %v17770_v15, 4 }
 0x385   : > { %v6930_v33 = vsel %vm16467_vm7, %v6922_v5, %v6929_v39  ;;  %v7211_v20 = vsel %vm16440_vm2, %v6931_v58, %v7210_v28  ;;  %v6913_v36 = vsel %vm16467_vm7, %v6905_v12, %v6912_v2  ;;  %v7204_v34 = vsel %vm16440_vm2, %v6914_v50, %v7203_v44  ;;  %v15951_v28 = vld [vmem:[#allocation10 + $0x58] sm:$0xff]   ;;  %v7234_v50 = vld [vmem:[#allocation3 + $0x60] sm:$0xf] }
 0x386   : > { %7209 = vst [vmem:[#allocation3 + $0x34] sm:$0xf] %v6930_v33  ;;  %7212 = vst [vmem:[#allocation3 + $0x38] sm:$0x1] %v7211_v20  ;;  %v7221_v63 = vsel %vm16476_vm8, %v6955_v27, %v7220_v45  ;;  %v7214_v14 = vsel %vm16476_vm8, %v6938_v56, %v7213_v24  ;;  %v13844_v5 = vpack.c.bf16 %v6747_v59, %v6747_v59  ;;  %v6750_v25 = vmax.f32 %v15174_v21, 0.0 }
 0x387   : > { %7202 = vst [vmem:[#allocation3 + $0x28] sm:$0xf] %v6913_v36  ;;  %7205 = vst [vmem:[#allocation3 + $0x2c] sm:$0x1] %v7204_v34  ;;  %v13842_v38 = vpack.c.bf16 %v6745_v54, %v6745_v54  ;;  %v6748_v62 = vmax.f32 %v15175_v31, 0.0  ;;  %v15176_v12 = vadd.f32 %v14713_v46, %v17715_v1  ;;  %v15177_v9 = vadd.f32 %v17715_v1, %v6564_v29  ;;  %v15954_v29 = vld [vmem:[#allocation10 + $0x60] sm:$0xff]  }
 0x388   : > { %7222 = vst [vmem:[#allocation3 + $0x48] sm:$0xf] %v7221_v63  ;;  %7215 = vst [vmem:[#allocation3 + $0x3c] sm:$0xf] %v7214_v14  ;;  %14781 = vmatpush3.bf16.msra.mxu1 %v15945_v16  ;;  %v6958_v60 = vshrl.u32 %v13844_v5, 16  ;;  %v6961_v13 = vshll.u32 %v13844_v5, 16  ;;  %v13847_v52 = vpack.c.bf16 %v6750_v25, %v6750_v25 }
 0x389   : > { %v6941_v18 = vshrl.u32 %v13842_v38, 16  ;;  %v6944_v47 = vshll.u32 %v13842_v38, 16  ;;  %v14716_v42 = vpop.f32.mrb[16].mxu0  ;;  %14782 = vmatprep.subr.bf16.mxu1 %v15948_v40  ;;  %v7224_v44 = vld [vmem:[#allocation3 + $0x50] sm:$0x1]  ;;  %v13845_v3 = vpack.c.bf16 %v6748_v62, %v6748_v62  ;;  %v6751_v43 = vmax.f32 %v15176_v12, 0.0 }
 0x38a   : > { %v6749_v48 = vmax.f32 %v15177_v9, 0.0  ;;  %v6577_v7 = vpop.f32.mrb[17].mxu0  ;;  %v6960_v53 = vrot.slane %v6958_v60, 7  ;;  %v15178_v45 = vadd.f32 %v14716_v42, %v17715_v1  ;;  %v6984_v54 = vshrl.u32 %v13847_v52, 16  ;;  %v7227_v24 = vld [vmem:[#allocation3 + $0x54] sm:$0xf] }
 0x38b   : > { %v6943_v30 = vrot.slane %v6941_v18, 7  ;;  %v15179_v16 = vadd.f32 %v17715_v1, %v6577_v7  ;;  %v14717_v59 = vpop.f32.mrb[18].mxu0  ;;  %v6987_v61 = vshll.u32 %v13847_v52, 16  ;;  %v6967_v32 = vshrl.u32 %v13845_v3, 16  ;;  %v7238_v7 = vld [vmem:[#allocation3 + $0x68] sm:$0x1] }
 0x38c   : > { %v6970_v21 = vshll.u32 %v13845_v3, 16  ;;  %v6580_v31 = vpop.f32.mrb[19].mxu0  ;;  %14783 = vmatpush3.bf16.msra.mxu1 %v15948_v40  ;;  %v6963_v46 = vor.u32 %v6961_v13, %v6960_v53  ;;  %v6965_v39 = vrot.slane %v6960_v53, 4  ;;  %v6986_v27 = vrot.slane %v6984_v54, 7  ;;  %v7231_v53 = vld [vmem:[#allocation3 + $0x5c] sm:$0x1] }
 0x38d   : > { %v6946_v58 = vor.u32 %v6944_v47, %v6943_v30  ;;  %v6948_v2 = vrot.slane %v6943_v30, 4  ;;  %14784 = vmatprep.subr.bf16.mxu1 %v15951_v28  ;;  %v6969_v56 = vrot.slane %v6967_v32, 7  ;;  %v13848_v33 = vpack.c.bf16 %v6751_v43, %v6751_v43  ;;  %v15946_v34 = vld [vmem:[#allocation3 + $0x30] sm:$0xff]   ;;  %v12331_v23 = vld [vmem:[#allocation3 + $0x24] sm:$0xe] }
 0x38e   : > { %v13846_v20 = vpack.c.bf16 %v6749_v48, %v6749_v48  ;;  %v15944_v36 = vld [vmem:[#allocation3 + $0x24] sm:$0xff]   ;;  %v6964_v63 = vsel %vm16467_vm7, %v6956_v8, %v6963_v46  ;;  %v7225_v40 = vsel %vm16440_vm2, %v6965_v39, %v7224_v44  ;;  %v6989_v38 = vor.u32 %v6987_v61, %v6986_v27 }
 0x38f   : > { %v6947_v14 = vsel %vm16467_vm7, %v6939_v4, %v6946_v58  ;;  %v7218_v5 = vsel %vm16440_vm2, %v6948_v2, %v7217_v11  ;;  %7223 = vst [vmem:[#allocation3 + $0x4c] sm:$0xf] %v6964_v63  ;;  %7226 = vst [vmem:[#allocation3 + $0x50] sm:$0x1] %v7225_v40  ;;  %v6990_v55 = vrot.slane %v6986_v27, 4  ;;  %v6972_v25 = vor.u32 %v6970_v21, %v6969_v56  ;;  %v15957_v44 = vld [vmem:[#allocation10 + $0x68] sm:$0xff]  }
 0x390   : > { %7216 = vst [vmem:[#allocation3 + $0x40] sm:$0xf] %v6947_v14  ;;  %7219 = vst [vmem:[#allocation3 + $0x44] sm:$0x1] %v7218_v5  ;;  %v6973_v62 = vrot.slane %v6969_v56, 4  ;;  %14751 = vmatmul.mubr.bf16.gmra.mrb[4].mxu1 %v15944_v36  ;;  %v6992_v8 = vshrl.u32 %v13848_v33, 16  ;;  %v7235_v4 = vsel %vm16476_vm8, %v6989_v38, %v7234_v50  ;;  %v15180_v43 = vadd.f32 %v14717_v59, %v17715_v1 }
 0x391   : > { %v6995_v12 = vshll.u32 %v13848_v33, 16  ;;  %v6975_v9 = vshrl.u32 %v13846_v20, 16  ;;  %v6978_v60 = vshll.u32 %v13846_v20, 16  ;;  %14754 = vmatprep.mubr.bf16.mxu1 %v15946_v34  ;;  %v14720_v15 = vpop.f32.mrb[20].mxu0  ;;  %14785 = vmatpush3.bf16.msra.mxu1 %v15951_v28  ;;  %v7228_v13 = vsel %vm16476_vm8, %v6972_v25, %v7227_v24  ;;  %7236 = vst [vmem:[#allocation3 + $0x60] sm:$0xf] %v7235_v4 }
 0x392   : > { %v6754_v18 = vmax.f32 %v15178_v45, 0.0  ;;  %v6752_v47 = vmax.f32 %v15179_v16, 0.0  ;;  %v6593_v42 = vpop.f32.mrb[21].mxu0  ;;  %14786 = vmatprep.subr.bf16.mxu1 %v15954_v29  ;;  %7229 = vst [vmem:[#allocation3 + $0x54] sm:$0xf] %v7228_v13  ;;  %v6994_v52 = vrot.slane %v6992_v8, 7  ;;  %v15181_v48 = vadd.f32 %v17715_v1, %v6580_v31 }
 0x393   : > { %v6977_v3 = vrot.slane %v6975_v9, 7  ;;  %v14721_v28 = vpop.f32.mrb[22].mxu0  ;;  %v15182_v54 = vadd.f32 %v14720_v15, %v17715_v1  ;;  %v15183_v45 = vadd.f32 %v17715_v1, %v6593_v42  ;;  %v15960_v31 = vld [vmem:[#allocation10 + $0x70] sm:$0xff]   ;;  %v7248_v33 = vld [vmem:[#allocation3 + $0x78] sm:$0xf]  ;;  %v6755_v34 = vmax.f32 %v15180_v43, 0.0 }
 0x394   : > { %v13851_v30 = vpack.c.bf16 %v6754_v18, %v6754_v18  ;;  %v13849_v11 = vpack.c.bf16 %v6752_v47, %v6752_v47  ;;  %v6596_v16 = vpop.f32.mrb[23].mxu0  ;;  %v6997_v61 = vor.u32 %v6995_v12, %v6994_v52  ;;  %v6999_v32 = vrot.slane %v6994_v52, 4  ;;  %v7241_v14 = vld [vmem:[#allocation3 + $0x6c] sm:$0xf]  ;;  %v15963_v52 = vld [vmem:[#allocation10 + $0x78] sm:$0xff]  }
 0x395   : > { %v6980_v21 = vor.u32 %v6978_v60, %v6977_v3  ;;  %v6982_v46 = vrot.slane %v6977_v3, 4  ;;  %14787 = vmatpush3.bf16.msra.mxu1 %v15954_v29  ;;  %v6753_v63 = vmax.f32 %v15181_v48, 0.0  ;;  %v6758_v5 = vmax.f32 %v15182_v54, 0.0  ;;  %v7252_v54 = vld [vmem:[#allocation3 + $0x80] sm:$0x1] }
 0x396   : > { %v7018_v39 = vshrl.u32 %v13851_v30, 16  ;;  %v7021_v58 = vshll.u32 %v13851_v30, 16  ;;  %v7001_v59 = vshrl.u32 %v13849_v11, 16  ;;  %v7004_v2 = vshll.u32 %v13849_v11, 16  ;;  %14788 = vmatprep.subr.bf16.mxu1 %v15957_v44  ;;  %v15949_v40 = vld [vmem:[#allocation3 + $0x48] sm:$0xff]  }
 0x397   : > { %v6998_v50 = vsel %vm16467_vm7, %v6990_v55, %v6997_v61  ;;  %v7239_v24 = vsel %vm16440_vm2, %v6999_v32, %v7238_v7  ;;  %v6981_v27 = vsel %vm16467_vm7, %v6973_v62, %v6980_v21  ;;  %v7232_v56 = vsel %vm16440_vm2, %v6982_v46, %v7231_v53  ;;  %v15947_v29 = vld [vmem:[#allocation3 + $0x3c] sm:$0xff]  }
 0x398   : > { %7237 = vst [vmem:[#allocation3 + $0x64] sm:$0xf] %v6998_v50  ;;  %7240 = vst [vmem:[#allocation3 + $0x68] sm:$0x1] %v7239_v24  ;;  %v17823_v20 = vrot.slane %v7018_v39, 7  ;;  %v17825_v36 = vrot.slane %v7001_v59, 7  ;;  %v15184_v55 = vadd.f32 %v14721_v28, %v17715_v1  ;;  %v15185_v25 = vadd.f32 %v17715_v1, %v6596_v16  ;;  %14755 = vmatmul.mubr.bf16.gmra.mrb[8].mxu1 %v15947_v29 }
 0x399   : > { %7230 = vst [vmem:[#allocation3 + $0x58] sm:$0xf] %v6981_v27  ;;  %7233 = vst [vmem:[#allocation3 + $0x5c] sm:$0x1] %v7232_v56  ;;  %v6756_v38 = vmax.f32 %v15183_v45, 0.0  ;;  %v14724_v62 = vpop.f32.mrb[24].mxu0  ;;  %14758 = vmatprep.mubr.bf16.mxu1 %v15949_v40  ;;  %14789 = vmatpush3.bf16.msra.mxu1 %v15957_v44  ;;  %v13852_v4 = vpack.c.bf16 %v6755_v34, %v6755_v34  ;;  %v13850_v13 = vpack.c.bf16 %v6753_v63, %v6753_v63 }
 0x39a   : > { %v7023_v8 = vor.u32 %v7021_v58, %v17823_v20  ;;  %v7024_v12 = vrot.slane %v17823_v20, 4  ;;  %v7006_v9 = vor.u32 %v7004_v2, %v17825_v36  ;;  %v7007_v60 = vrot.slane %v17825_v36, 4  ;;  %v6609_v15 = vpop.f32.mrb[25].mxu0  ;;  %14790 = vmatprep.subr.bf16.mxu1 %v15960_v31  ;;  %v7245_v45 = vld [vmem:[#allocation3 + $0x74] sm:$0x1]  ;;  %v17841_v24 = vld [vmem:[#allocation10 + $0x80] sm:$0xff]  }
 0x39b   : > { %v13855_v18 = vpack.c.bf16 %v6758_v5, %v6758_v5  ;;  %v13853_v47 = vpack.c.bf16 %v6756_v38, %v6756_v38  ;;  %v17833_v42 = vpop.f32.mrb[26].mxu0  ;;  %v6759_v48 = vmax.f32 %v15184_v55, 0.0  ;;  %v6757_v28 = vmax.f32 %v15185_v25, 0.0  ;;  %v7262_v58 = vld [vmem:[#allocation3 + $0x90] sm:$0xf] }
 0x39c   : > { %v7249_v3 = vsel %vm16476_vm8, %v7023_v8, %v7248_v33  ;;  %v7242_v43 = vsel %vm16476_vm8, %v7006_v9, %v7241_v14  ;;  %v17839_v7 = vpop.f32.mrb[27].mxu0  ;;  %v7026_v44 = vshrl.u32 %v13852_v4, 16  ;;  %v7029_v53 = vshll.u32 %v13852_v4, 16  ;;  %v7255_v40 = vld [vmem:[#allocation3 + $0x84] sm:$0xf] }
 0x39d   : > { %7250 = vst [vmem:[#allocation3 + $0x78] sm:$0xf] %v7249_v3  ;;  %7243 = vst [vmem:[#allocation3 + $0x6c] sm:$0xf] %v7242_v43  ;;  %v7009_v30 = vshrl.u32 %v13850_v13, 16  ;;  %v7012_v11 = vshll.u32 %v13850_v13, 16  ;;  %14791 = vmatpush3.bf16.msra.mxu1 %v15960_v31  ;;  %v13856_v59 = vpack.c.bf16 %v6759_v48, %v6759_v48  ;;  %v13854_v2 = vpack.c.bf16 %v6757_v28, %v6757_v28 }
 0x39e   : > { %v7052_v16 = vshrl.u32 %v13855_v18, 16  ;;  %v7055_v61 = vshll.u32 %v13855_v18, 16  ;;  %v7035_v32 = vshrl.u32 %v13853_v47, 16  ;;  %v7038_v21 = vshll.u32 %v13853_v47, 16  ;;  %14792 = vmatprep.subr.bf16.mxu1 %v15963_v52 }
 0x39f   : > { %v7028_v46 = vrot.slane %v7026_v44, 7  ;;  %v7011_v39 = vrot.slane %v7009_v30, 7  ;;  %v15186_v33 = vadd.f32 %v14724_v62, %v17715_v1  ;;  %v15187_v29 = vadd.f32 %v17715_v1, %v6609_v15  ;;  %v15952_v20 = vld [vmem:[#allocation3 + $0x60] sm:$0xff]  }
 0x3a0   : > { %v15950_v50 = vld [vmem:[#allocation3 + $0x54] sm:$0xff]   ;;  %v7054_v27 = vrot.slane %v7052_v16, 7  ;;  %v17843_v56 = vrot.slane %v7035_v32, 7  ;;  %v14728_v14 = vpop.f32.mrb[28].mxu0  ;;  %v7060_v47 = vshrl.u32 %v13856_v59, 16  ;;  %v7043_v3 = vshrl.u32 %v13854_v2, 16 }
 0x3a1   : > { %v7031_v36 = vor.u32 %v7029_v53, %v7028_v46  ;;  %v7033_v34 = vrot.slane %v7028_v46, 4  ;;  %v7014_v31 = vor.u32 %v7012_v11, %v7011_v39  ;;  %v7016_v63 = vrot.slane %v7011_v39, 4  ;;  %14759 = vmatmul.mubr.bf16.gmra.mrb[12].mxu1 %v15950_v50  ;;  %v6625_v8 = vpop.f32.mrb[29].mxu0  ;;  %v7259_v39 = vld [vmem:[#allocation3 + $0x8c] sm:$0x1] }
 0x3a2   : > { %v7057_v5 = vor.u32 %v7055_v61, %v7054_v27  ;;  %v7058_v38 = vrot.slane %v7054_v27, 4  ;;  %v7040_v55 = vor.u32 %v7038_v21, %v17843_v56  ;;  %v7041_v25 = vrot.slane %v17843_v56, 4  ;;  %14762 = vmatprep.mubr.bf16.mxu1 %v15952_v20  ;;  %14793 = vmatpush3.bf16.msra.mxu1 %v15963_v52  ;;  %v17857_v13 = vpop.f32.mrb[30].mxu0 }
 0x3a3   : > { %v7032_v62 = vsel %vm16467_vm7, %v7024_v12, %v7031_v36  ;;  %v7253_v9 = vsel %vm16440_vm2, %v7033_v34, %v7252_v54  ;;  %v7015_v15 = vsel %vm16467_vm7, %v7007_v60, %v7014_v31  ;;  %v7246_v4 = vsel %vm16440_vm2, %v7016_v63, %v7245_v45  ;;  %14826 = vmatprep.subr.bf16.mxu1 %v17841_v24  ;;  %v17864_v60 = vpop.f32.mrb[31].mxu0  ;;  %v7266_v54 = vld [vmem:[#allocation3 + $0x98] sm:$0x1]  ;;  %v7269_v63 = vld [vmem:[#allocation3 + $0x9c] sm:$0xf] }
 0x3a4   : > { %7251 = vst [vmem:[#allocation3 + $0x7c] sm:$0xf] %v7032_v62  ;;  %7254 = vst [vmem:[#allocation3 + $0x80] sm:$0x1] %v7253_v9  ;;  %v7263_v12 = vsel %vm16476_vm8, %v7057_v5, %v7262_v58  ;;  %v7256_v18 = vsel %vm16476_vm8, %v7040_v55, %v7255_v40  ;;  %v7063_v52 = vshll.u32 %v13856_v59, 16  ;;  %v7046_v43 = vshll.u32 %v13854_v2, 16 }
 0x3a5   : > { %7244 = vst [vmem:[#allocation3 + $0x70] sm:$0xf] %v7015_v15  ;;  %7247 = vst [vmem:[#allocation3 + $0x74] sm:$0x1] %v7246_v4  ;;  %v6762_v48 = vmax.f32 %v15186_v33, 0.0  ;;  %v6760_v28 = vmax.f32 %v15187_v29, 0.0  ;;  %v15188_v53 = vadd.f32 %v17833_v42, %v17715_v1  ;;  %v15189_v30 = vadd.f32 %v17715_v1, %v17839_v7 }
 0x3a6   : > { %7264 = vst [vmem:[#allocation3 + $0x90] sm:$0xf] %v7263_v12  ;;  %7257 = vst [vmem:[#allocation3 + $0x84] sm:$0xf] %v7256_v18  ;;  %v7062_v44 = vrot.slane %v7060_v47, 7  ;;  %v15190_v11 = vadd.f32 %v14728_v14, %v17715_v1  ;;  %v7045_v45 = vrot.slane %v7043_v3, 7  ;;  %v15191_v32 = vadd.f32 %v17715_v1, %v6625_v8 }
 0x3a7   : > { %v13859_v16 = vpack.c.bf16 %v6762_v48, %v6762_v48  ;;  %v13857_v61 = vpack.c.bf16 %v6760_v28, %v6760_v28  ;;  %v6763_v58 = vmax.f32 %v15188_v53, 0.0  ;;  %v6761_v59 = vmax.f32 %v15189_v30, 0.0  ;;  %v7276_v33 = vld [vmem:[#allocation3 + $0xa8] sm:$0xf]  ;;  %v7280_v53 = vld [vmem:[#allocation3 + $0xb0] sm:$0x1] }
 0x3a8   : > { %v7065_v21 = vor.u32 %v7063_v52, %v7062_v44  ;;  %v7067_v46 = vrot.slane %v7062_v44, 4  ;;  %v7048_v2 = vor.u32 %v7046_v43, %v7045_v45  ;;  %v7050_v50 = vrot.slane %v7045_v45, 4 }
 0x3a9   : > { %v7086_v27 = vshrl.u32 %v13859_v16, 16  ;;  %v7089_v42 = vshll.u32 %v13859_v16, 16  ;;  %v7069_v29 = vshrl.u32 %v13857_v61, 16  ;;  %v7072_v20 = vshll.u32 %v13857_v61, 16 }
 0x3aa   : > { %v7066_v7 = vsel %vm16467_vm7, %v7058_v38, %v7065_v21  ;;  %v7267_v56 = vsel %vm16440_vm2, %v7067_v46, %v7266_v54  ;;  %v7049_v36 = vsel %vm16467_vm7, %v7041_v25, %v7048_v2  ;;  %v7260_v34 = vsel %vm16440_vm2, %v7050_v50, %v7259_v39  ;;  %v7788_v46 = vld [vmem:[#allocation3 + $0xc] sm:$0xf] }
 0x3ab   : > { %7265 = vst [vmem:[#allocation3 + $0x94] sm:$0xf] %v7066_v7  ;;  %7268 = vst [vmem:[#allocation3 + $0x98] sm:$0x1] %v7267_v56  ;;  %v7088_v31 = vrot.slane %v7086_v27, 7  ;;  %v13860_v40 = vpack.c.bf16 %v6763_v58, %v6763_v58  ;;  %v7071_v5 = vrot.slane %v7069_v29, 7  ;;  %v13858_v38 = vpack.c.bf16 %v6761_v59, %v6761_v59 }
 0x3ac   : > { %v15953_v14 = vld [vmem:[#allocation3 + $0x6c] sm:$0xff]   ;;  %7258 = vst [vmem:[#allocation3 + $0x88] sm:$0xf] %v7049_v36  ;;  %7261 = vst [vmem:[#allocation3 + $0x8c] sm:$0x1] %v7260_v34  ;;  %v6766_v55 = vmax.f32 %v15190_v11, 0.0  ;;  %v15192_v54 = vadd.f32 %v17857_v13, %v17715_v1  ;;  %v15193_v45 = vadd.f32 %v17715_v1, %v17864_v60 }
 0x3ad   : > { %v6764_v8 = vmax.f32 %v15191_v32, 0.0  ;;  %v15955_v62 = vld [vmem:[#allocation3 + $0x78] sm:$0xff]   ;;  %v7091_v9 = vor.u32 %v7089_v42, %v7088_v31  ;;  %v7092_v15 = vrot.slane %v7088_v31, 4  ;;  %v7094_v4 = vshrl.u32 %v13860_v40, 16  ;;  %14763 = vmatmul.mubr.bf16.gmra.mrb[16].mxu1 %v15953_v14  ;;  %v7273_v11 = vld [vmem:[#allocation3 + $0xa4] sm:$0x1] }
 0x3ae   : > { %v7097_v12 = vshll.u32 %v13860_v40, 16  ;;  %v7074_v25 = vor.u32 %v7072_v20, %v7071_v5  ;;  %v7075_v18 = vrot.slane %v7071_v5, 4  ;;  %v7077_v47 = vshrl.u32 %v13858_v38, 16  ;;  %14766 = vmatprep.mubr.bf16.mxu1 %v15955_v62  ;;  %v7290_v56 = vld [vmem:[#allocation3 + $0xc0] sm:$0xf] }
 0x3af   : > { %v7080_v52 = vshll.u32 %v13858_v38, 16  ;;  %v7277_v3 = vsel %vm16476_vm8, %v7091_v9, %v7276_v33  ;;  %v7096_v43 = vrot.slane %v7094_v4, 7  ;;  %v13863_v48 = vpack.c.bf16 %v6766_v55, %v6766_v55  ;;  %v7283_v34 = vld [vmem:[#allocation3 + $0xb4] sm:$0xf]  ;;  %v7789_v55 = vld [vmem:[#allocation3 + $0x10] sm:$0xf] }
 0x3b0   : > { %v13861_v28 = vpack.c.bf16 %v6764_v8, %v6764_v8  ;;  %7278 = vst [vmem:[#allocation3 + $0xa8] sm:$0xf] %v7277_v3  ;;  %v7270_v44 = vsel %vm16476_vm8, %v7074_v25, %v7269_v63  ;;  %v7079_v30 = vrot.slane %v7077_v47, 7  ;;  %v6767_v42 = vmax.f32 %v15192_v54, 0.0  ;;  %v7287_v25 = vld [vmem:[#allocation3 + $0xbc] sm:$0x1] }
 0x3b1   : > { %7271 = vst [vmem:[#allocation3 + $0x9c] sm:$0xf] %v7270_v44  ;;  %v7099_v16 = vor.u32 %v7097_v12, %v7096_v43  ;;  %v7101_v61 = vrot.slane %v7096_v43, 4  ;;  %v7120_v32 = vshrl.u32 %v13863_v48, 16  ;;  %v7123_v21 = vshll.u32 %v13863_v48, 16 }
 0x3b2   : > { %v7082_v39 = vor.u32 %v7080_v52, %v7079_v30  ;;  %v7084_v58 = vrot.slane %v7079_v30, 4  ;;  %v7103_v59 = vshrl.u32 %v13861_v28, 16  ;;  %v7106_v2 = vshll.u32 %v13861_v28, 16  ;;  %v15958_v20 = vld [vmem:[#allocation3 + $0x90] sm:$0xff]   ;;  %v7294_v12 = vld [vmem:[#allocation3 + $0xc8] sm:$0x1] }
 0x3b3   : > { %v7100_v50 = vsel %vm16467_vm7, %v7092_v15, %v7099_v16  ;;  %v7281_v27 = vsel %vm16440_vm2, %v7101_v61, %v7280_v53  ;;  %v7122_v13 = vrot.slane %v7120_v32, 7  ;;  %v15956_v7 = vld [vmem:[#allocation3 + $0x84] sm:$0xff]   ;;  %v6765_v29 = vmax.f32 %v15193_v45, 0.0 }
 0x3b4   : > { %7279 = vst [vmem:[#allocation3 + $0xac] sm:$0xf] %v7100_v50  ;;  %7282 = vst [vmem:[#allocation3 + $0xb0] sm:$0x1] %v7281_v27  ;;  %v7083_v1 = vsel %vm16467_vm7, %v7075_v18, %v7082_v39  ;;  %v7274_v60 = vsel %vm16440_vm2, %v7084_v58, %v7273_v11  ;;  %v7105_v33 = vrot.slane %v7103_v59, 7  ;;  %v13864_v31 = vpack.c.bf16 %v6767_v42, %v6767_v42 }
 0x3b5   : > { %7272 = vst [vmem:[#allocation3 + $0xa0] sm:$0xf] %v7083_v1  ;;  %7275 = vst [vmem:[#allocation3 + $0xa4] sm:$0x1] %v7274_v60  ;;  %v7125_v36 = vor.u32 %v7123_v21, %v7122_v13  ;;  %14767 = vmatmul.mubr.bf16.gmra.mrb[20].mxu1 %v15956_v7  ;;  %v17899_v63 = vrot.slane %v7872_v41, 4  ;;  %v7890_v40 = vshrl.u32 %v7788_v46, 16  ;;  %v13862_v5 = vpack.c.bf16 %v6765_v29, %v6765_v29 }
 0x3b6   : > { %v7108_v14 = vor.u32 %v7106_v2, %v7105_v33  ;;  %14770 = vmatprep.mubr.bf16.mxu1 %v15958_v20  ;;  %v17904_v38 = vrot.slane %v7882_v22, 4  ;;  %v7893_v8 = vshll.u32 %v7788_v46, 16  ;;  %v7128_v9 = vshrl.u32 %v13864_v31, 16  ;;  %v7790_v18 = vld [vmem:[#allocation3 + $0x14] sm:$0x1] }
 0x3b7   : > { %v7291_v62 = vsel %vm16476_vm8, %v7125_v36, %v7290_v56  ;;  %v7887_v57 = vrot.slane %v7885_v37, 5  ;;  %v7126_v41 = vrot.slane %v7122_v13, 4  ;;  %v7131_v4 = vshll.u32 %v13864_v31, 16  ;;  %v7792_v37 = vld [vmem:[#allocation3 + $0x1c] sm:$0xf] }
 0x3b8   : > { %7292 = vst [vmem:[#allocation3 + $0xc0] sm:$0xf] %v7291_v62  ;;  %v7284_v15 = vsel %vm16476_vm8, %v7108_v14, %v7283_v34  ;;  %v7111_v6 = vshrl.u32 %v13862_v5, 16  ;;  %v7130_v22 = vrot.slane %v7128_v9, 7  ;;  %v7892_v47 = vrot.slane %v7890_v40, 4 }
 0x3b9   : > { %7285 = vst [vmem:[#allocation3 + $0xb4] sm:$0xf] %v7284_v15  ;;  %v7899_v52 = vshll.u32 %v7789_v55, 16  ;;  %v7903_v3 = vshrl.u32 %v7789_v55, 16  ;;  %v7114_v48 = vshll.u32 %v13862_v5, 16  ;;  %v7895_v17 = vrot.slane %v7893_v8, 5 }
 0x3ba   : > { %v7113_v43 = vrot.slane %v7111_v6, 7  ;;  %v7914_v28 = vshrl.u32 %v7791_v19, 16  ;;  %v7133_v44 = vor.u32 %v7131_v4, %v7130_v22  ;;  %v7135_v53 = vrot.slane %v7130_v22, 4  ;;  %v7794_v59 = vld [vmem:[#allocation3 + $0x24] sm:$0xf] }
 0x3bb   : > { %v17912_v30 = vrot.slane %v7899_v52, 5  ;;  %v7905_v49 = vrot.slane %v7903_v3, 4  ;;  %v7109_v11 = vrot.slane %v7105_v33, 4  ;;  %v7917_v61 = vshll.u32 %v7791_v19, 16  ;;  %v15961_v46 = vld [vmem:[#allocation3 + $0xa8] sm:$0xff]  }
 0x3bc   : > { %v7116_v54 = vor.u32 %v7114_v48, %v7113_v43  ;;  %v7118_v45 = vrot.slane %v7113_v43, 4  ;;  %v15959_v16 = vld [vmem:[#allocation3 + $0x9c] sm:$0xff]   ;;  %v7134_v32 = vsel %vm16467_vm7, %v7126_v41, %v7133_v44  ;;  %v7295_v21 = vsel %vm16440_vm2, %v7135_v53, %v7294_v12  ;;  %v7795_v2 = vld [vmem:[#allocation3 + $0x28] sm:$0xf]  ;;  %v7797_v33 = vld [vmem:[#allocation3 + $0x30] sm:$0xf] }
 0x3bd   : > { %v7878_v39 = vsel %vm16683_vm11, %v17899_v63, %v17725_v10  ;;  %v7906_v58 = vor.u32 %v7905_v49, %v17912_v30  ;;  %7293 = vst [vmem:[#allocation3 + $0xc4] sm:$0xf] %v7134_v32  ;;  %7296 = vst [vmem:[#allocation3 + $0xc8] sm:$0x1] %v7295_v21  ;;  %14771 = vmatmul.mubr.bf16.gmra.mrb[24].mxu1 %v15959_v16  ;;  %v7896_v13 = vor.u32 %v7895_v17, %v7892_v47  ;;  %v7793_v7 = vld [vmem:[#allocation3 + $0x20] sm:$0x1] }
 0x3be   : > { %v7117_v50 = vsel %vm16467_vm7, %v7109_v11, %v7116_v54  ;;  %v7288_v27 = vsel %vm16440_vm2, %v7118_v45, %v7287_v25  ;;  %v7909_v42 = vshll.u32 %v7790_v18, 16  ;;  %14774 = vmatprep.mubr.bf16.mxu1 %v15961_v46  ;;  %v7888_v10 = vsel %vm16683_vm11, %v17904_v38, %v7887_v57  ;;  %v7796_v40 = vld [vmem:[#allocation3 + $0x2c] sm:$0x1]  ;;  %v7798_v62 = vld [vmem:[#allocation3 + $0x34] sm:$0xf] }
 0x3bf   : > { %7286 = vst [vmem:[#allocation3 + $0xb8] sm:$0xf] %v7117_v50  ;;  %7289 = vst [vmem:[#allocation3 + $0xbc] sm:$0x1] %v7288_v27  ;;  %v7916_v1 = vrot.slane %v7914_v28, 4  ;;  %v7923_v60 = vshll.u32 %v7792_v37, 16  ;;  %v13555_v14 = vcombine.low %v7878_v39, %v7888_v10 }
 0x3c0   : > { %v7927_v56 = vshrl.u32 %v7792_v37, 16  ;;  %v7919_v0 = vrot.slane %v7917_v61, 5  ;;  %v7938_v29 = vshrl.u32 %v7794_v59, 16  ;;  %v7941_v20 = vshll.u32 %v7794_v59, 16  ;;  %v7800_v47 = vld [vmem:[#allocation3 + $0x3c] sm:$0xf] }
 0x3c1   : > { %v7947_v36 = vshll.u32 %v7795_v2, 16  ;;  %v7907_v34 = vrot.slane %v7906_v58, 4  ;;  %v7925_v31 = vrot.slane %v7923_v60, 5  ;;  %v7897_v5 = vrot.slane %v7896_v13, 4  ;;  %v7801_v49 = vld [vmem:[#allocation3 + $0x40] sm:$0xf] }
 0x3c2   : > { %v7929_v63 = vrot.slane %v7927_v56, 4  ;;  %v7911_v55 = vrot.slane %v7909_v42, 5  ;;  %v7940_v8 = vrot.slane %v7938_v29, 4  ;;  %v7943_v38 = vrot.slane %v7941_v20, 5  ;;  %v7799_v32 = vld [vmem:[#allocation3 + $0x38] sm:$0x1] }
 0x3c3   : > { %v17930_v57 = vrot.slane %v7947_v36, 5  ;;  %v7951_v19 = vshrl.u32 %v7795_v2, 16  ;;  %v7920_v41 = vor.u32 %v7919_v0, %v7916_v1  ;;  %v7933_v15 = vshll.u32 %v7793_v7, 16  ;;  %v7803_v50 = vld [vmem:[#allocation3 + $0x48] sm:$0xf]  ;;  %v15965_v20 = vld [vmem:[#allocation10 + $0x88] sm:$0xff]  }
 0x3c4   : > { %v7930_v9 = vor.u32 %v7929_v63, %v7925_v31  ;;  %v7962_v4 = vshrl.u32 %v7797_v33, 16  ;;  %v7965_v12 = vshll.u32 %v7797_v33, 16  ;;  %v7912_v6 = vsel %vm16683_vm11, %v7907_v34, %v7911_v55  ;;  %v7804_v7 = vld [vmem:[#allocation3 + $0x4c] sm:$0xf]  ;;  %v7802_v34 = vld [vmem:[#allocation3 + $0x44] sm:$0x1] }
 0x3c5   : > { %v7953_v22 = vrot.slane %v7951_v19, 4  ;;  %v7957_v25 = vshll.u32 %v7796_v40, 16  ;;  %v7971_v18 = vshll.u32 %v7798_v62, 16  ;;  %v7902_v3 = vsel %vm16683_vm11, %v7897_v5, %v17912_v30  ;;  %v7807_v19 = vld [vmem:[#allocation3 + $0x58] sm:$0xf] }
 0x3c6   : > { %v15962_v52 = vld [vmem:[#allocation3 + $0xb4] sm:$0xff]   ;;  %v7931_v43 = vrot.slane %v7930_v9, 4  ;;  %v7964_v48 = vrot.slane %v7962_v4, 4  ;;  %v7967_v17 = vrot.slane %v7965_v12, 5  ;;  %v7944_v37 = vor.u32 %v7943_v38, %v7940_v8 }
 0x3c7   : > { %v7954_v28 = vor.u32 %v7953_v22, %v17930_v57  ;;  %v17938_v44 = vrot.slane %v7971_v18, 5  ;;  %v7975_v53 = vshrl.u32 %v7798_v62, 16  ;;  %14775 = vmatmul.mubr.bf16.gmra.mrb[28].mxu1 %v15962_v52  ;;  %v13556_v11 = vcombine.low %v7902_v3, %v7912_v6  ;;  %v7806_v8 = vld [vmem:[#allocation3 + $0x54] sm:$0xf]  ;;  %v15966_v52 = vld [vmem:[#allocation10 + $0x90] sm:$0xff]  }
 0x3c8   : > { %v7921_v54 = vrot.slane %v7920_v41, 4  ;;  %v7935_v45 = vrot.slane %v7933_v15, 5  ;;  %v7968_v16 = vor.u32 %v7967_v17, %v7964_v48  ;;  %14794 = vmatprep.mubr.bf16.mxu1 %v13555_v14  ;;  %v7986_v30 = vshrl.u32 %v7800_v47, 16  ;;  %v7809_v17 = vld [vmem:[#allocation3 + $0x60] sm:$0xf] }
 0x3c9   : > { %v7955_v61 = vrot.slane %v7954_v28, 4  ;;  %v7977_v21 = vrot.slane %v7975_v53, 4  ;;  %v7989_v46 = vshll.u32 %v7800_v47, 16  ;;  %v7959_v58 = vrot.slane %v7957_v25, 5 }
 0x3ca   : > { %v7936_v39 = vsel %vm16683_vm11, %v7931_v43, %v7935_v45  ;;  %v7995_v59 = vshll.u32 %v7801_v49, 16  ;;  %v7999_v2 = vshrl.u32 %v7801_v49, 16  ;;  %v7945_v27 = vrot.slane %v7944_v37, 4  ;;  %v7810_v49 = vld [vmem:[#allocation3 + $0x64] sm:$0xf] }
 0x3cb   : > { %v7978_v13 = vor.u32 %v7977_v21, %v17938_v44  ;;  %v7988_v42 = vrot.slane %v7986_v30, 4  ;;  %v7991_v10 = vrot.slane %v7989_v46, 5  ;;  %v7926_v1 = vsel %vm16683_vm11, %v7921_v54, %v7925_v31 }
 0x3cc   : > { %v7981_v60 = vshll.u32 %v7799_v32, 16  ;;  %v17945_v56 = vrot.slane %v7995_v59, 5  ;;  %v8001_v33 = vrot.slane %v7999_v2, 4  ;;  %v13557_v0 = vcombine.low %v7926_v1, %v7936_v39  ;;  %v7808_v32 = vld [vmem:[#allocation3 + $0x5c] sm:$0x1]  ;;  %v15967_v59 = vld [vmem:[#allocation10 + $0x98] sm:$0xff]  }
 0x3cd   : > { %v7960_v29 = vsel %vm16683_vm11, %v7955_v61, %v7959_v58  ;;  %v7969_v36 = vrot.slane %v7968_v16, 4  ;;  %v8010_v63 = vshrl.u32 %v7803_v50, 16  ;;  %v7979_v40 = vrot.slane %v7978_v13, 4 }
 0x3ce   : > { %v8013_v14 = vshll.u32 %v7803_v50, 16  ;;  %v8019_v5 = vshll.u32 %v7804_v7, 16  ;;  %v8023_v55 = vshrl.u32 %v7804_v7, 16  ;;  %v7950_v31 = vsel %vm16683_vm11, %v7945_v27, %v17930_v57  ;;  %v7805_v57 = vld [vmem:[#allocation3 + $0x50] sm:$0x1] }
 0x3cf   : > { %v7992_v62 = vor.u32 %v7991_v10, %v7988_v42  ;;  %v8002_v9 = vor.u32 %v8001_v33, %v17945_v56  ;;  %v8012_v38 = vrot.slane %v8010_v63, 4  ;;  %14795 = vmatmul.mubr.bf16.vlgmr.msra.gmra.mrb[0].mxu1 %v13556_v11  ;;  %v13558_v41 = vcombine.low %v7950_v31, %v7960_v29  ;;  %v7812_v50 = vld [vmem:[#allocation3 + $0x6c] sm:$0xf]  ;;  %v7813_v7 = vld [vmem:[#allocation3 + $0x70] sm:$0xf] }
 0x3d0   : > { %v7983_v15 = vrot.slane %v7981_v60, 5  ;;  %v8015_v4 = vrot.slane %v8013_v14, 5  ;;  %v17953_v12 = vrot.slane %v8019_v5, 5  ;;  %14798 = vmatprep.mubr.bf16.mxu1 %v13557_v0  ;;  %14827 = vmatpush3.bf16.msra.mxu1 %v17841_v24  ;;  %v7974_v6 = vsel %vm16683_vm11, %v7969_v36, %v17938_v44  ;;  %v7811_v29 = vld [vmem:[#allocation3 + $0x68] sm:$0x1] }
 0x3d1   : > { %v8005_v22 = vshll.u32 %v7802_v34, 16  ;;  %v8025_v25 = vrot.slane %v8023_v55, 4  ;;  %v8034_v18 = vshrl.u32 %v7806_v8, 16  ;;  %14828 = vmatprep.subr.bf16.mxu1 %v15965_v20  ;;  %v8037_v43 = vshll.u32 %v7806_v8, 16  ;;  %v7815_v63 = vld [vmem:[#allocation3 + $0x78] sm:$0xf] }
 0x3d2   : > { %v7984_v47 = vsel %vm16683_vm11, %v7979_v40, %v7983_v15  ;;  %v8016_v3 = vor.u32 %v8015_v4, %v8012_v38  ;;  %v8043_v48 = vshll.u32 %v7807_v19, 16  ;;  %v7993_v37 = vrot.slane %v7992_v62, 4  ;;  %v15968_v8 = vld [vmem:[#allocation10 + $0xa0] sm:$0xff]   ;;  %v7814_v15 = vld [vmem:[#allocation3 + $0x74] sm:$0x1] }
 0x3d3   : > { %v8003_v28 = vrot.slane %v8002_v9, 4  ;;  %v8026_v24 = vor.u32 %v8025_v25, %v17953_v12  ;;  %v8036_v53 = vrot.slane %v8034_v18, 4  ;;  %v8029_v44 = vshll.u32 %v7805_v57, 16  ;;  %v7816_v31 = vld [vmem:[#allocation3 + $0x7c] sm:$0xf] }
 0x3d4   : > { %v8039_v11 = vrot.slane %v8037_v43, 5  ;;  %v17962_v54 = vrot.slane %v8043_v48, 5  ;;  %v8047_v45 = vshrl.u32 %v7807_v19, 16  ;;  %14829 = vmatpush3.bf16.msra.mxu1 %v15965_v20  ;;  %v8007_v16 = vrot.slane %v8005_v22, 5  ;;  %v7818_v48 = vld [vmem:[#allocation3 + $0x84] sm:$0xf] }
 0x3d5   : > { %v8017_v61 = vrot.slane %v8016_v3, 4  ;;  %v8058_v21 = vshrl.u32 %v7809_v17, 16  ;;  %v8061_v30 = vshll.u32 %v7809_v17, 16  ;;  %14830 = vmatprep.subr.bf16.mxu1 %v15966_v52  ;;  %v8027_v46 = vrot.slane %v8026_v24, 4  ;;  %v15969_v17 = vld [vmem:[#allocation10 + $0xa8] sm:$0xff]  }
 0x3d6   : > { %v8040_v39 = vor.u32 %v8039_v11, %v8036_v53  ;;  %v8049_v58 = vrot.slane %v8047_v45, 4  ;;  %v8067_v2 = vshll.u32 %v7810_v49, 16  ;;  %v13559_v27 = vcombine.low %v7974_v6, %v7984_v47 }
 0x3d7   : > { %v7998_v13 = vsel %vm16683_vm11, %v7993_v37, %v17945_v56  ;;  %v8060_v42 = vrot.slane %v8058_v21, 4  ;;  %v8063_v10 = vrot.slane %v8061_v30, 5  ;;  %14799 = vmatmul.mubr.bf16.gmra.mrb[4].mxu1 %v13558_v41  ;;  %v8008_v1 = vsel %vm16683_vm11, %v8003_v28, %v8007_v16  ;;  %v7817_v16 = vld [vmem:[#allocation3 + $0x80] sm:$0x1] }
 0x3d8   : > { %v8031_v60 = vrot.slane %v8029_v44, 5  ;;  %v8050_v33 = vor.u32 %v8049_v58, %v17962_v54  ;;  %v8053_v0 = vshll.u32 %v7808_v32, 16  ;;  %14802 = vmatprep.mubr.bf16.mxu1 %v13559_v27  ;;  %v8022_v20 = vsel %vm16683_vm11, %v8017_v61, %v17953_v12  ;;  %14831 = vmatpush3.bf16.msra.mxu1 %v15966_v52  ;;  %v7819_v61 = vld [vmem:[#allocation3 + $0x88] sm:$0xf] }
 0x3d9   : > { %v17973_v36 = vrot.slane %v8067_v2, 5  ;;  %v8071_v56 = vshrl.u32 %v7810_v49, 16  ;;  %v8082_v34 = vshrl.u32 %v7812_v50, 16  ;;  %v8041_v14 = vrot.slane %v8040_v39, 4  ;;  %14832 = vmatprep.subr.bf16.mxu1 %v15967_v59  ;;  %v15970_v32 = vld [vmem:[#allocation10 + $0xb0] sm:$0xff]  }
 0x3da   : > { %v8032_v40 = vsel %vm16683_vm11, %v8027_v46, %v8031_v60  ;;  %v8085_v5 = vshll.u32 %v7812_v50, 16  ;;  %v8091_v55 = vshll.u32 %v7813_v7, 16  ;;  %v8051_v62 = vrot.slane %v8050_v33, 4  ;;  %v7821_v50 = vld [vmem:[#allocation3 + $0x90] sm:$0xf] }
 0x3db   : > { %v8064_v9 = vor.u32 %v8063_v10, %v8060_v42  ;;  %v8073_v38 = vrot.slane %v8071_v56, 4  ;;  %v8084_v19 = vrot.slane %v8082_v34, 4  ;;  %v8077_v41 = vshll.u32 %v7811_v29, 16  ;;  %v15971_v29 = vld [vmem:[#allocation10 + $0xb8] sm:$0xff]  }
 0x3dc   : > { %v8087_v4 = vrot.slane %v8085_v5, 5  ;;  %v17977_v12 = vrot.slane %v8091_v55, 5  ;;  %v8095_v6 = vshrl.u32 %v7813_v7, 16  ;;  %v13560_v22 = vcombine.low %v7998_v13, %v8008_v1  ;;  %14833 = vmatpush3.bf16.msra.mxu1 %v15967_v59  ;;  %v7820_v13 = vld [vmem:[#allocation3 + $0x8c] sm:$0x1] }
 0x3dd   : > { %v13561_v57 = vcombine.low %v8022_v20, %v8032_v40  ;;  %v8055_v25 = vrot.slane %v8053_v0, 5  ;;  %v8074_v18 = vor.u32 %v8073_v38, %v17973_v36  ;;  %14834 = vmatprep.subr.bf16.mxu1 %v15968_v8  ;;  %v8106_v3 = vshrl.u32 %v7815_v63, 16  ;;  %v7822_v0 = vld [vmem:[#allocation3 + $0x94] sm:$0xf]  ;;  %v7825_v38 = vld [vmem:[#allocation3 + $0xa0] sm:$0xf] }
 0x3de   : > { %v8088_v47 = vor.u32 %v8087_v4, %v8084_v19  ;;  %v8097_v52 = vrot.slane %v8095_v6, 4  ;;  %v8109_v43 = vshll.u32 %v7815_v63, 16  ;;  %v8115_v24 = vshll.u32 %v7816_v31, 16  ;;  %v7823_v4 = vld [vmem:[#allocation3 + $0x98] sm:$0x1] }
 0x3df   : > { %v8056_v37 = vsel %vm16683_vm11, %v8051_v62, %v8055_v25  ;;  %v8075_v28 = vrot.slane %v8074_v18, 4  ;;  %v8119_v53 = vshrl.u32 %v7816_v31, 16  ;;  %14803 = vmatmul.mubr.bf16.gmra.mrb[8].mxu1 %v13560_v22  ;;  %v8046_v49 = vsel %vm16683_vm11, %v8041_v14, %v17962_v54 }
 0x3e0   : > { %v8065_v44 = vrot.slane %v8064_v9, 4  ;;  %v8079_v11 = vrot.slane %v8077_v41, 5  ;;  %v8098_v45 = vor.u32 %v8097_v52, %v17977_v12  ;;  %14806 = vmatprep.mubr.bf16.mxu1 %v13561_v57  ;;  %v8089_v21 = vrot.slane %v8088_v47, 4  ;;  %14835 = vmatpush3.bf16.msra.mxu1 %v15968_v8  ;;  %v7824_v8 = vld [vmem:[#allocation3 + $0x9c] sm:$0xf] }
 0x3e1   : > { %v8101_v30 = vshll.u32 %v7814_v15, 16  ;;  %v17986_v46 = vrot.slane %v8115_v24, 5  ;;  %v8121_v39 = vrot.slane %v8119_v53, 4  ;;  %v13562_v58 = vcombine.low %v8046_v49, %v8056_v37  ;;  %14836 = vmatprep.subr.bf16.mxu1 %v15969_v17  ;;  %v7827_v47 = vld [vmem:[#allocation3 + $0xa8] sm:$0xf] }
 0x3e2   : > { %v8108_v59 = vrot.slane %v8106_v3, 4  ;;  %v8111_v2 = vrot.slane %v8109_v43, 5  ;;  %v8080_v54 = vsel %vm16683_vm11, %v8075_v28, %v8079_v11  ;;  %v8099_v27 = vrot.slane %v8098_v45, 4  ;;  %v7828_v24 = vld [vmem:[#allocation3 + $0xac] sm:$0xf] }
 0x3e3   : > { %v8130_v42 = vshrl.u32 %v7818_v48, 16  ;;  %v8133_v10 = vshll.u32 %v7818_v48, 16  ;;  %v8070_v7 = vsel %vm16683_vm11, %v8065_v44, %v17973_v36  ;;  %v8122_v1 = vor.u32 %v8121_v39, %v17986_v46 }
 0x3e4   : > { %v8139_v60 = vshll.u32 %v7819_v61, 16  ;;  %v8143_v33 = vshrl.u32 %v7819_v61, 16  ;;  %v8103_v20 = vrot.slane %v8101_v30, 5  ;;  %v8125_v56 = vshll.u32 %v7817_v16, 16  ;;  %14837 = vmatpush3.bf16.msra.mxu1 %v15969_v17 }
 0x3e5   : > { %v8132_v34 = vrot.slane %v8130_v42, 4  ;;  %v8135_v63 = vrot.slane %v8133_v10, 5  ;;  %v13563_v40 = vcombine.low %v8070_v7, %v8080_v54  ;;  %v8112_v14 = vor.u32 %v8111_v2, %v8108_v59  ;;  %14838 = vmatprep.subr.bf16.mxu1 %v15970_v32 }
 0x3e6   : > { %v17994_v5 = vrot.slane %v8139_v60, 5  ;;  %v8145_v55 = vrot.slane %v8143_v33, 4  ;;  %v8094_v36 = vsel %vm16683_vm11, %v8089_v21, %v17977_v12  ;;  %v8104_v31 = vsel %vm16683_vm11, %v8099_v27, %v8103_v20  ;;  %v18002_v12 = vld [vmem:[#allocation10 + $0xc0] sm:$0xff]  }
 0x3e7   : > { %v8154_v62 = vshrl.u32 %v7821_v50, 16  ;;  %v8157_v9 = vshll.u32 %v7821_v50, 16  ;;  %14807 = vmatmul.mubr.bf16.gmra.mrb[12].mxu1 %v13562_v58  ;;  %v8123_v19 = vrot.slane %v8122_v1, 4  ;;  %v8149_v15 = vshll.u32 %v7820_v13, 16  ;;  %v7826_v50 = vld [vmem:[#allocation3 + $0xa4] sm:$0x1] }
 0x3e8   : > { %v8146_v41 = vor.u32 %v8145_v55, %v17994_v5  ;;  %v8163_v6 = vshll.u32 %v7822_v0, 16  ;;  %14810 = vmatprep.mubr.bf16.mxu1 %v13563_v40  ;;  %v8136_v22 = vor.u32 %v8135_v63, %v8132_v34  ;;  %v8167_v18 = vshrl.u32 %v7822_v0, 16  ;;  %14839 = vmatpush3.bf16.msra.mxu1 %v15970_v32  ;;  %v7830_v1 = vld [vmem:[#allocation3 + $0xb4] sm:$0xf]  ;;  %v7831_v60 = vld [vmem:[#allocation3 + $0xb8] sm:$0xf] }
 0x3e9   : > { %v8156_v57 = vrot.slane %v8154_v62, 4  ;;  %v8159_v25 = vrot.slane %v8157_v9, 5  ;;  %v8113_v52 = vrot.slane %v8112_v14, 4  ;;  %v8127_v3 = vrot.slane %v8125_v56, 5  ;;  %14840 = vmatprep.subr.bf16.mxu1 %v15971_v29  ;;  %v7829_v14 = vld [vmem:[#allocation3 + $0xb0] sm:$0x1] }
 0x3ea   : > { %v8147_v43 = vrot.slane %v8146_v41, 4  ;;  %v8165_v48 = vrot.slane %v8163_v6, 5  ;;  %v13564_v17 = vcombine.low %v8094_v36, %v8104_v31  ;;  %v8169_v37 = vrot.slane %v8167_v18, 4  ;;  %v8604_v18 = vld [vmem:[#allocation3 + $0x4] sm:$0xf] }
 0x3eb   : > { %v8178_v28 = vshrl.u32 %v7824_v8, 16  ;;  %v8128_v53 = vsel %vm16683_vm11, %v8123_v19, %v8127_v3  ;;  %v8151_v49 = vrot.slane %v8149_v15, 5  ;;  %v8181_v44 = vshll.u32 %v7824_v8, 16 }
 0x3ec   : > { %v8187_v11 = vshll.u32 %v7825_v38, 16  ;;  %v8137_v45 = vrot.slane %v8136_v22, 4  ;;  %v8160_v16 = vor.u32 %v8159_v25, %v8156_v57  ;;  %v8170_v61 = vor.u32 %v8169_v37, %v8165_v48  ;;  %14841 = vmatpush3.bf16.msra.mxu1 %v15971_v29 }
 0x3ed   : > { %v8173_v32 = vshll.u32 %v7823_v4, 16  ;;  %v8118_v21 = vsel %vm16683_vm11, %v8113_v52, %v17986_v46  ;;  %v8191_v39 = vshrl.u32 %v7825_v38, 16  ;;  %v8202_v58 = vshrl.u32 %v7827_v47, 16  ;;  %14874 = vmatprep.subr.bf16.mxu1 %v18002_v12 }
 0x3ee   : > { %v8189_v30 = vrot.slane %v8187_v11, 5  ;;  %v13565_v59 = vcombine.low %v8118_v21, %v8128_v53  ;;  %v8152_v2 = vsel %vm16683_vm11, %v8147_v43, %v8151_v49  ;;  %v8180_v54 = vrot.slane %v8178_v28, 4  ;;  %v8605_v11 = vld [vmem:[#allocation3 + $0x8] sm:$0x1] }
 0x3ef   : > { %v8205_v27 = vshll.u32 %v7827_v47, 16  ;;  %14811 = vmatmul.mubr.bf16.gmra.mrb[16].mxu1 %v13564_v17  ;;  %v8171_v13 = vrot.slane %v8170_v61, 4  ;;  %v8183_v42 = vrot.slane %v8181_v44, 5  ;;  %v8193_v10 = vrot.slane %v8191_v39, 4  ;;  %v8603_v44 = vld [vmem:[#allocation3] sm:$0xe] }
 0x3f0   : > { %v8211_v7 = vshll.u32 %v7828_v24, 16  ;;  %14814 = vmatprep.mubr.bf16.mxu1 %v13565_v59  ;;  %v8142_v46 = vsel %vm16683_vm11, %v8137_v45, %v17994_v5  ;;  %v8161_v33 = vrot.slane %v8160_v16, 4  ;;  %v8175_v0 = vrot.slane %v8173_v32, 5 }
 0x3f1   : > { %v8215_v29 = vshrl.u32 %v7828_v24, 16  ;;  %v8194_v20 = vor.u32 %v8193_v10, %v8189_v30  ;;  %v8204_v56 = vrot.slane %v8202_v58, 4  ;;  %v8207_v34 = vrot.slane %v8205_v27, 5  ;;  %v8607_v27 = vld [vmem:[#allocation3 + $0x10] sm:$0xf] }
 0x3f2   : > { %v8213_v63 = vrot.slane %v8211_v7, 5  ;;  %v13566_v40 = vcombine.low %v8142_v46, %v8152_v2  ;;  %v8176_v8 = vsel %vm16683_vm11, %v8171_v13, %v8175_v0  ;;  %v8184_v36 = vor.u32 %v8183_v42, %v8180_v54 }
 0x3f3   : > { %v8217_v55 = vrot.slane %v8215_v29, 4  ;;  %v8197_v31 = vshll.u32 %v7826_v50, 16  ;;  %v8235_v62 = vshll.u32 %v7831_v60, 16  ;;  %v8226_v38 = vshrl.u32 %v7830_v1, 16 }
 0x3f4   : > { %v8229_v19 = vshll.u32 %v7830_v1, 16  ;;  %v8239_v5 = vshrl.u32 %v7831_v60, 16  ;;  %v8166_v41 = vsel %vm16683_vm11, %v8161_v33, %v8165_v48  ;;  %v8195_v15 = vrot.slane %v8194_v20, 4  ;;  %v7832_v48 = vld [vmem:[#allocation3 + $0xbc] sm:$0x1] }
 0x3f5   : > { %v8218_v9 = vor.u32 %v8217_v55, %v8213_v63  ;;  %v8208_v4 = vor.u32 %v8207_v34, %v8204_v56  ;;  %v8221_v6 = vshll.u32 %v7829_v14, 16  ;;  %v13567_v22 = vcombine.low %v8166_v41, %v8176_v8  ;;  %v8608_v20 = vld [vmem:[#allocation3 + $0x14] sm:$0x1]  ;;  %v8611_v34 = vld [vmem:[#allocation3 + $0x20] sm:$0x1] }
 0x3f6   : > { %v8237_v57 = vrot.slane %v8235_v62, 5  ;;  %v8241_v25 = vrot.slane %v8239_v5, 4  ;;  %v8185_v47 = vrot.slane %v8184_v36, 4  ;;  %v8199_v52 = vrot.slane %v8197_v31, 5  ;;  %v8613_v14 = vld [vmem:[#allocation3 + $0x28] sm:$0xf] }
 0x3f7   : > { %14815 = vmatmul.mubr.bf16.gmra.mrb[20].mxu1 %v13566_v40  ;;  %v8219_v3 = vrot.slane %v8218_v9, 4  ;;  %v8228_v43 = vrot.slane %v8226_v38, 4  ;;  %v8231_v17 = vrot.slane %v8229_v19, 5  ;;  %v8209_v28 = vrot.slane %v8208_v4, 4  ;;  %v8609_v8 = vld [vmem:[#allocation3 + $0x18] sm:$0xe] }
 0x3f8   : > { %14818 = vmatprep.mubr.bf16.mxu1 %v13567_v22  ;;  %v8200_v37 = vsel %vm16683_vm11, %v8195_v15, %v8199_v52  ;;  %v8223_v24 = vrot.slane %v8221_v6, 5  ;;  %v8733_v53 = vrot.slane %v8604_v18, 5  ;;  %v8242_v49 = vor.u32 %v8241_v25, %v8237_v57  ;;  %v8616_v36 = vld [vmem:[#allocation3 + $0x34] sm:$0xf]  ;;  %v8614_v22 = vld [vmem:[#allocation3 + $0x2c] sm:$0x1] }
 0x3f9   : > { %v8190_v45 = vsel %vm16683_vm11, %v8185_v47, %v8189_v30  ;;  %v8232_v32 = vor.u32 %v8231_v17, %v8228_v43  ;;  %v8245_v21 = vshll.u32 %v7832_v48, 16  ;;  %v8214_v39 = vsel %vm16683_vm11, %v8209_v28, %v8213_v63  ;;  %v8610_v30 = vld [vmem:[#allocation3 + $0x1c] sm:$0xf]  ;;  %v8606_v63 = vld [vmem:[#allocation3 + $0xc] sm:$0xe] }
 0x3fa   : > { %v8224_v16 = vsel %vm16683_vm11, %v8219_v3, %v8223_v24  ;;  %v13568_v61 = vcombine.low %v8190_v45, %v8200_v37  ;;  %v13579_v58 = vrot.slane %v8603_v44, 9  ;;  %v8735_v59 = vrot.slane %v8733_v53, 4  ;;  %v8617_v47 = vld [vmem:[#allocation3 + $0x38] sm:$0x1]  ;;  %v8612_v52 = vld [vmem:[#allocation3 + $0x24] sm:$0xe] }
 0x3fb   : > { %v8736_v2 = vrot.slane %v8605_v11, 5  ;;  %v13569_v50 = vcombine.low %v8214_v39, %v8224_v16  ;;  %v8243_v54 = vrot.slane %v8242_v49, 4  ;;  %v8233_v13 = vrot.slane %v8232_v32, 4  ;;  %v8619_v43 = vld [vmem:[#allocation3 + $0x40] sm:$0xf]  ;;  %v15974_v48 = vld [vmem:[#allocation10 + $0xd0] sm:$0xff]  }
 0x3fc   : > { %v8247_v42 = vrot.slane %v8245_v21, 5  ;;  %v8734_v10 = vsel %vm16924_vm14, %v13579_v58, %v8733_v53  ;;  %v8740_v60 = vrot.slane %v8607_v27, 5  ;;  %v8747_v46 = vrot.slane %v8610_v30, 5  ;;  %v8615_v37 = vld [vmem:[#allocation3 + $0x30] sm:$0xe] }
 0x3fd   : > { %v8737_v7 = vsel %vm16924_vm14, %v8735_v59, %v8736_v2  ;;  %v8238_v33 = vsel %vm16683_vm11, %v8233_v13, %v8237_v57  ;;  %v8743_v55 = vrot.slane %v8608_v20, 5  ;;  %v8750_v31 = vrot.slane %v8611_v34, 5  ;;  %v15973_v57 = vld [vmem:[#allocation10 + $0xc8] sm:$0xff]   ;;  %v8622_v28 = vld [vmem:[#allocation3 + $0x4c] sm:$0xf]  ;;  %v15975_v39 = vld [vmem:[#allocation10 + $0xd8] sm:$0xff]  }
 0x3fe   : > { %v8248_v1 = vsel %vm16683_vm11, %v8243_v54, %v8247_v42  ;;  %v13595_v0 = vcombine.low %v8734_v10, %v8737_v7  ;;  %v8742_v56 = vrot.slane %v8740_v60, 4  ;;  %v8749_v40 = vrot.slane %v8747_v46, 4  ;;  %v8620_v21 = vld [vmem:[#allocation3 + $0x44] sm:$0x1]  ;;  %v8623_v2 = vld [vmem:[#allocation3 + $0x50] sm:$0x1] }
 0x3ff   : > { %14819 = vmatmul.mubr.bf16.gmra.mrb[24].mxu1 %v13568_v61  ;;  %v13570_v29 = vcombine.low %v8238_v33, %v8248_v1  ;;  %v13580_v62 = vrot.slane %v8606_v63, 9  ;;  %v8754_v38 = vrot.slane %v8613_v14, 5  ;;  %v13581_v19 = vrot.slane %v8609_v8, 9  ;;  %v8625_v27 = vld [vmem:[#allocation3 + $0x58] sm:$0xf] }
 0x400   : > { %14822 = vmatprep.mubr.bf16.mxu1 %v13569_v50  ;;  %v8744_v9 = vsel %vm16924_vm14, %v8742_v56, %v8743_v55  ;;  %v8751_v5 = vsel %vm16924_vm14, %v8749_v40, %v8750_v31  ;;  %v8761_v41 = vrot.slane %v8616_v36, 5  ;;  %v8757_v17 = vrot.slane %v8614_v22, 5  ;;  %v8618_v50 = vld [vmem:[#allocation3 + $0x3c] sm:$0xe]  ;;  %v8621_v42 = vld [vmem:[#allocation3 + $0x48] sm:$0xe] }
 0x401   : > { %v8741_v15 = vsel %vm16924_vm14, %v13580_v62, %v8740_v60  ;;  %v8748_v6 = vsel %vm16924_vm14, %v13581_v19, %v8747_v46  ;;  %v8756_v18 = vrot.slane %v8754_v38, 4  ;;  %v8764_v24 = vrot.slane %v8617_v47, 5  ;;  %v8628_v30 = vld [vmem:[#allocation3 + $0x64] sm:$0xf]  ;;  %v15976_v7 = vld [vmem:[#allocation10 + $0xe0] sm:$0xff]  }
 0x402   : > { %v13596_v4 = vcombine.low %v8741_v15, %v8744_v9  ;;  %v13597_v25 = vcombine.low %v8748_v6, %v8751_v5  ;;  %v8763_v3 = vrot.slane %v8761_v41, 4  ;;  %v13582_v53 = vrot.slane %v8612_v52, 9  ;;  %v8626_v63 = vld [vmem:[#allocation3 + $0x5c] sm:$0x1]  ;;  %v15977_v40 = vld [vmem:[#allocation10 + $0xe8] sm:$0xff]  }
 0x403   : > { %v8758_v49 = vsel %vm16924_vm14, %v8756_v18, %v8757_v17  ;;  %v8768_v44 = vrot.slane %v8619_v43, 5  ;;  %v13583_v11 = vrot.slane %v8615_v37, 9  ;;  %v8775_v16 = vrot.slane %v8622_v28, 5  ;;  %v8629_v8 = vld [vmem:[#allocation3 + $0x68] sm:$0x1]  ;;  %v15979_v43 = vld [vmem:[#allocation10 + $0xf8] sm:$0xff]  }
 0x404   : > { %v8765_v45 = vsel %vm16924_vm14, %v8763_v3, %v8764_v24  ;;  %v8755_v61 = vsel %vm16924_vm14, %v13582_v53, %v8754_v38  ;;  %v8771_v13 = vrot.slane %v8620_v21, 5  ;;  %v8778_v10 = vrot.slane %v8623_v2, 5  ;;  %v8624_v36 = vld [vmem:[#allocation3 + $0x54] sm:$0xe]  ;;  %v8631_v62 = vld [vmem:[#allocation3 + $0x70] sm:$0xf] }
 0x405   : > { %v8762_v32 = vsel %vm16924_vm14, %v13583_v11, %v8761_v41  ;;  %v8770_v59 = vrot.slane %v8768_v44, 4  ;;  %v8777_v54 = vrot.slane %v8775_v16, 4  ;;  %v13584_v1 = vrot.slane %v8618_v50, 9  ;;  %v8627_v38 = vld [vmem:[#allocation3 + $0x60] sm:$0xe]  ;;  %v15978_v41 = vld [vmem:[#allocation10 + $0xf0] sm:$0xff]  }
 0x406   : > { %v13599_v58 = vcombine.low %v8762_v32, %v8765_v45  ;;  %v8782_v46 = vrot.slane %v8625_v27, 5  ;;  %v13585_v33 = vrot.slane %v8621_v42, 9  ;;  %v8785_v9 = vrot.slane %v8626_v63, 5  ;;  %v8634_v19 = vld [vmem:[#allocation3 + $0x7c] sm:$0xf] }
 0x407   : > { %14823 = vmatmul.mubr.bf16.gmra.mrb[28].mxu1 %v13570_v29  ;;  %v8772_v60 = vsel %vm16924_vm14, %v8770_v59, %v8771_v13  ;;  %v8789_v29 = vrot.slane %v8628_v30, 5  ;;  %v8769_v20 = vsel %vm16924_vm14, %v13584_v1, %v8768_v44  ;;  %v8792_v5 = vrot.slane %v8629_v8, 5  ;;  %v8632_v3 = vld [vmem:[#allocation3 + $0x74] sm:$0x1]  ;;  %v8635_v28 = vld [vmem:[#allocation3 + $0x80] sm:$0x1] }
 0x408   : > { %14842 = vmatprep.mubr.bf16.mxu1 %v13595_v0  ;;  %v8779_v0 = vsel %vm16924_vm14, %v8777_v54, %v8778_v10  ;;  %v13600_v56 = vcombine.low %v8769_v20, %v8772_v60  ;;  %v8776_v34 = vsel %vm16924_vm14, %v13585_v33, %v8775_v16  ;;  %v8784_v55 = vrot.slane %v8782_v46, 4  ;;  %v8630_v24 = vld [vmem:[#allocation3 + $0x6c] sm:$0xe]  ;;  %v8637_v53 = vld [vmem:[#allocation3 + $0x88] sm:$0xf]  ;;  %v18068_v16 = vld [vmem:[#allocation10 + $0x100] sm:$0xff]  }
 0x409   : > { %v13601_v14 = vcombine.low %v8776_v34, %v8779_v0  ;;  %v8791_v31 = vrot.slane %v8789_v29, 4  ;;  %v13586_v15 = vrot.slane %v8624_v36, 9  ;;  %v8796_v6 = vrot.slane %v8631_v62, 5  ;;  %v8633_v44 = vld [vmem:[#allocation3 + $0x78] sm:$0xe] }
 0x40a   : > { %v13587_v22 = vrot.slane %v8627_v38, 9  ;;  %v8640_v11 = vld [vmem:[#allocation3 + $0x94] sm:$0xf]  ;;  %v8806_v45 = vrot.slane %v8635_v28, 5  ;;  %v8810_v32 = vrot.slane %v8637_v53, 5  ;;  %v13589_v21 = vrot.slane %v8633_v44, 9 }
 0x40b   : > { %v8783_v18 = vsel %vm16924_vm14, %v13586_v15, %v8782_v46  ;;  %v8798_v37 = vrot.slane %v8796_v6, 4  ;;  %v8638_v54 = vld [vmem:[#allocation3 + $0x8c] sm:$0x1]  ;;  %v8641_v42 = vld [vmem:[#allocation3 + $0x98] sm:$0x1] }
 0x40c   : > { %v8790_v52 = vsel %vm16924_vm14, %v13587_v22, %v8789_v29  ;;  %v8812_v13 = vrot.slane %v8810_v32, 4  ;;  %v8636_v30 = vld [vmem:[#allocation3 + $0x84] sm:$0xe]  ;;  %v8813_v1 = vrot.slane %v8638_v54, 5  ;;  %v8639_v60 = vld [vmem:[#allocation3 + $0x90] sm:$0xe] }
 0x40d   : > { %v8646_v46 = vld [vmem:[#allocation3 + $0xac] sm:$0xf]  ;;  %v8820_v33 = vrot.slane %v8641_v42, 5  ;;  %v13590_v0 = vrot.slane %v8636_v30, 9  ;;  %v8642_v8 = vld [vmem:[#allocation3 + $0x9c] sm:$0xe] }
 0x40e   : > { %v8814_v29 = vsel %vm16924_vm14, %v8812_v13, %v8813_v1  ;;  %v8831_v63 = vrot.slane %v8646_v46, 5  ;;  %v8644_v36 = vld [vmem:[#allocation3 + $0xa4] sm:$0x1]  ;;  %v8647_v38 = vld [vmem:[#allocation3 + $0xb0] sm:$0x1]  ;;  %v18100_v42 = vld [vmem:[#allocation10 + $0x140] sm:$0xff]  }
 0x40f   : > { %14843 = vmatmul.mubr.bf16.vlgmr.msra.gmra.mrb[0].mxu1 %v13596_v4  ;;  %v8786_v4 = vsel %vm16924_vm14, %v8784_v55, %v8785_v9  ;;  %v8645_v9 = vld [vmem:[#allocation3 + $0xa8] sm:$0xe]  ;;  %v8834_v15 = vrot.slane %v8647_v38, 5  ;;  %v15980_v44 = vld [vmem:[#allocation3 + $0xc] sm:$0xff]   ;;  %v15990_v54 = vld [vmem:[#allocation3 + $0x60] sm:$0xff]  }
 0x410   : > { %14846 = vmatprep.mubr.bf16.mxu1 %v13597_v25  ;;  %14875 = vmatpush3.bf16.msra.mxu1 %v18002_v12  ;;  %v13598_v12 = vcombine.low %v8755_v61, %v8758_v49  ;;  %v8803_v25 = vrot.slane %v8634_v19, 5  ;;  %v13602_v47 = vcombine.low %v8783_v18, %v8786_v4  ;;  %v8799_v49 = vrot.slane %v8632_v3, 5  ;;  %v8650_v3 = vld [vmem:[#allocation3 + $0xbc] sm:$0x1]  ;;  %v15992_v13 = vld [vmem:[#allocation3 + $0x6c] sm:$0xff]  }
 0x411   : > { %14876 = vmatprep.subr.bf16.mxu1 %v15973_v57  ;;  %v13588_v61 = vrot.slane %v8630_v24, 9  ;;  %v8833_v19 = vrot.slane %v8831_v63, 4  ;;  %v13592_v4 = vrot.slane %v8642_v8, 9  ;;  %v8841_v28 = vrot.slane %v8650_v3, 5  ;;  %v15993_v30 = vld [vmem:[#allocation3 + $0x78] sm:$0xff]  }
 0x412   : > { %v8804_v50 = vsel %vm16924_vm14, %v13589_v21, %v8803_v25  ;;  %v15991_v21 = vld [vmem:[#allocation10 + $0x118] sm:$0xff]   ;;  %v9654_v8 = vld [vmem:[#allocation3 + $0x28] sm:$0xf] }
 0x413   : > { %v8797_v59 = vsel %vm16924_vm14, %v13588_v61, %v8796_v6  ;;  %v15983_v61 = vld [vmem:[#allocation3 + $0x24] sm:$0xff]   ;;  %v9648_v1 = vld [vmem:[#allocation3 + $0x10] sm:$0xf]  ;;  %v9657_v38 = vld [vmem:[#allocation3 + $0x34] sm:$0xf] }
 0x414   : > { %14877 = vmatpush3.bf16.msra.mxu1 %v15973_v57  ;;  %v8793_v57 = vsel %vm16924_vm14, %v8791_v31, %v8792_v5  ;;  %v8649_v5 = vld [vmem:[#allocation3 + $0xb8] sm:$0xf] }
 0x415   : > { %14878 = vmatprep.subr.bf16.mxu1 %v15974_v48  ;;  %v13603_v17 = vcombine.low %v8790_v52, %v8793_v57  ;;  %v8838_v22 = vrot.slane %v8649_v5, 5  ;;  %v13593_v57 = vrot.slane %v8645_v9, 9 }
 0x417   : > { %14847 = vmatmul.mubr.bf16.gmra.mrb[4].mxu1 %v13598_v12  ;;  %v8800_v12 = vsel %vm16924_vm14, %v8798_v37, %v8799_v49  ;;  %v8832_v52 = vsel %vm16924_vm14, %v13593_v57, %v8831_v63  ;;  %v8648_v37 = vld [vmem:[#allocation3 + $0xb4] sm:$0xe]  ;;  %v9653_v63 = vld [vmem:[#allocation3 + $0x24] sm:$0xf]  ;;  %v9656_v57 = vld [vmem:[#allocation3 + $0x30] sm:$0xf] }
 0x418   : > { %14850 = vmatprep.mubr.bf16.mxu1 %v13599_v58  ;;  %14879 = vmatpush3.bf16.msra.mxu1 %v15974_v48  ;;  %v8805_v48 = vrot.slane %v8803_v25, 4  ;;  %v8817_v58 = vrot.slane %v8640_v11, 5  ;;  %v13604_v2 = vcombine.low %v8797_v59, %v8800_v12  ;;  %v8835_v25 = vsel %vm16924_vm14, %v8833_v19, %v8834_v15  ;;  %v15981_v11 = vld [vmem:[#allocation3 + $0x18] sm:$0xff]   ;;  %v15988_v12 = vld [vmem:[#allocation10 + $0x110] sm:$0xff]  }
 0x419   : > { %14880 = vmatprep.subr.bf16.mxu1 %v15975_v39  ;;  %v13594_v24 = vrot.slane %v8648_v37, 9  ;;  %v15987_v59 = vld [vmem:[#allocation3 + $0x48] sm:$0xff]   ;;  %v9779_v15 = vshll.u32 %v9653_v63, 16  ;;  %v9652_v37 = vld [vmem:[#allocation3 + $0x20] sm:$0x1] }
 0x41a   : > { %v8819_v10 = vrot.slane %v8817_v58, 4 }
 0x41b   : > { %v8839_v53 = vsel %vm16924_vm14, %v13594_v24, %v8838_v22 }
 0x41c   : > { %14881 = vmatpush3.bf16.msra.mxu1 %v15975_v39  ;;  %v8807_v39 = vsel %vm16924_vm14, %v8805_v48, %v8806_v45  ;;  %v8821_v34 = vsel %vm16924_vm14, %v8819_v10, %v8820_v33  ;;  %v15985_v45 = vld [vmem:[#allocation10 + $0x108] sm:$0xff]   ;;  %v9737_v33 = vshll.u32 %v9648_v1, 16 }
 0x41d   : > { %14882 = vmatprep.subr.bf16.mxu1 %v15976_v7  ;;  %v13605_v27 = vcombine.low %v8804_v50, %v8807_v39  ;;  %v15986_v39 = vld [vmem:[#allocation3 + $0x3c] sm:$0xff]   ;;  %v15989_v50 = vld [vmem:[#allocation3 + $0x54] sm:$0xff]   ;;  %v15995_v10 = vld [vmem:[#allocation3 + $0x84] sm:$0xff]  }
 0x41f   : > { %14851 = vmatmul.mubr.bf16.gmra.mrb[8].mxu1 %v13600_v56  ;;  %v13591_v56 = vrot.slane %v8639_v60, 9 }
 0x420   : > { %14854 = vmatprep.mubr.bf16.mxu1 %v13601_v14  ;;  %14883 = vmatpush3.bf16.msra.mxu1 %v15976_v7  ;;  %v8643_v7 = vld [vmem:[#allocation3 + $0xa0] sm:$0xf] }
 0x421   : > { %14884 = vmatprep.subr.bf16.mxu1 %v15977_v40  ;;  %v8824_v20 = vrot.slane %v8643_v7, 5  ;;  %v8818_v55 = vsel %vm16924_vm14, %v13591_v56, %v8817_v58  ;;  %v15994_v58 = vld [vmem:[#allocation10 + $0x120] sm:$0xff]   ;;  %v9647_v7 = vld [vmem:[#allocation3 + $0xc] sm:$0xf]  ;;  %v15996_v56 = vld [vmem:[#allocation3 + $0x90] sm:$0xff]  }
 0x422   : > { %v13607_v31 = vcombine.low %v8818_v55, %v8821_v34  ;;  %v9728_v60 = vshrl.u32 %v9647_v7, 16  ;;  %v9731_v46 = vshll.u32 %v9647_v7, 16  ;;  %v15998_v34 = vld [vmem:[#allocation3 + $0x9c] sm:$0xff]  }
 0x423   : > { %v8826_v62 = vrot.slane %v8824_v20, 4  ;;  %v8825_v18 = vsel %vm16924_vm14, %v13592_v4, %v8824_v20  ;;  %v9651_v20 = vld [vmem:[#allocation3 + $0x1c] sm:$0xf]  ;;  %v9785_v4 = vshll.u32 %v9654_v8, 16 }
 0x424   : > { %14885 = vmatpush3.bf16.msra.mxu1 %v15977_v40  ;;  %v8811_v40 = vsel %vm16924_vm14, %v13590_v0, %v8810_v32  ;;  %v15984_v32 = vld [vmem:[#allocation3 + $0x30] sm:$0xff]   ;;  %v9741_v0 = vshrl.u32 %v9648_v1, 16  ;;  %v9733_v55 = vrot.slane %v9731_v46, 5  ;;  %v9761_v9 = vshll.u32 %v9651_v20, 16 }
 0x425   : > { %14886 = vmatprep.subr.bf16.mxu1 %v15978_v41  ;;  %v13606_v14 = vcombine.low %v8811_v40, %v8814_v29  ;;  %v9650_v29 = vld [vmem:[#allocation3 + $0x18] sm:$0xf]  ;;  %v9649_v40 = vld [vmem:[#allocation3 + $0x14] sm:$0x1]  ;;  %v9765_v5 = vshrl.u32 %v9651_v20, 16 }
 0x426   : > { %v9743_v19 = vrot.slane %v9741_v0, 4 }
 0x427   : > { %14855 = vmatmul.mubr.bf16.gmra.mrb[12].mxu1 %v13602_v47 }
 0x428   : > { %14858 = vmatprep.mubr.bf16.mxu1 %v13603_v17  ;;  %14887 = vmatpush3.bf16.msra.mxu1 %v15978_v41  ;;  %v8827_v41 = vrot.slane %v8644_v36, 5  ;;  %v8840_v17 = vrot.slane %v8838_v22, 4  ;;  %v18103_v36 = vrot.slane %v9737_v33, 5  ;;  %v9747_v22 = vshll.u32 %v9649_v40, 16 }
 0x429   : > { %14888 = vmatprep.subr.bf16.mxu1 %v15979_v43 }
 0x42a   : > { %v8828_v6 = vsel %vm16924_vm14, %v8826_v62, %v8827_v41  ;;  %v8842_v48 = vsel %vm16924_vm14, %v8840_v17, %v8841_v28  ;;  %v9755_v62 = vshll.u32 %v9650_v29, 16  ;;  %v9776_v41 = vshrl.u32 %v9653_v63, 16 }
 0x42b   : > { %v13608_v47 = vcombine.low %v8825_v18, %v8828_v6  ;;  %v13610_v49 = vcombine.low %v8839_v53, %v8842_v48  ;;  %v9789_v6 = vshrl.u32 %v9654_v8, 16  ;;  %v9813_v18 = vshrl.u32 %v9657_v38, 16  ;;  %v9662_v8 = vld [vmem:[#allocation3 + $0x48] sm:$0xf] }
 0x42c   : > { %14889 = vmatpush3.bf16.msra.mxu1 %v15979_v43  ;;  %v13609_v43 = vcombine.low %v8832_v52, %v8835_v25  ;;  %v9809_v25 = vshll.u32 %v9657_v38, 16  ;;  %v9757_v3 = vrot.slane %v9755_v62, 5  ;;  %v9744_v17 = vor.u32 %v9743_v19, %v18103_v36 }
 0x42d   : > { %14922 = vmatprep.subr.bf16.mxu1 %v18068_v16  ;;  %v9767_v28 = vrot.slane %v9765_v5, 4  ;;  %v9778_v24 = vrot.slane %v9776_v41, 4  ;;  %v9781_v48 = vrot.slane %v9779_v15, 5  ;;  %v18108_v53 = vrot.slane %v9785_v4, 5  ;;  %v9663_v5 = vld [vmem:[#allocation3 + $0x4c] sm:$0xf] }
 0x42e   : > { %v9661_v15 = vld [vmem:[#allocation3 + $0x44] sm:$0x1] }
 0x42f   : > { %14859 = vmatmul.mubr.bf16.gmra.mrb[16].mxu1 %v13604_v2  ;;  %v15997_v2 = vld [vmem:[#allocation10 + $0x128] sm:$0xff]  }
 0x430   : > { %14862 = vmatprep.mubr.bf16.mxu1 %v13605_v27  ;;  %v16003_v27 = vld [vmem:[#allocation10 + $0x138] sm:$0xff]  }
 0x437   : > { %14863 = vmatmul.mubr.bf16.gmra.mrb[20].mxu1 %v13606_v14  ;;  %v9730_v14 = vrot.slane %v9728_v60, 4 }
 0x438   : > { %14866 = vmatprep.mubr.bf16.mxu1 %v13607_v31  ;;  %v9752_v31 = vshrl.u32 %v9650_v29, 16 }
 0x43a   : > { %v9754_v52 = vrot.slane %v9752_v31, 4  ;;  %v16002_v31 = vld [vmem:[#allocation3 + $0xc0] sm:$0xff]  }
 0x43f   : > { %14867 = vmatmul.mubr.bf16.gmra.mrb[24].mxu1 %v13608_v47  ;;  %v9734_v47 = vor.u32 %v9733_v55, %v9730_v14 }
 0x440   : > { %14870 = vmatprep.mubr.bf16.mxu1 %v13609_v43  ;;  %v18105_v43 = vrot.slane %v9761_v9, 5 }
 0x447   : > { %14871 = vmatmul.mubr.bf16.gmra.mrb[28].mxu1 %v13610_v49  ;;  %v9791_v49 = vrot.slane %v9789_v6, 4 }
 0x448   : > { %14890 = vmatprep.mubr.bf16.mxu1 %v15980_v44  ;;  %v9800_v44 = vshrl.u32 %v9656_v57, 16 }
 0x44a   : > { %v9802_v7 = vrot.slane %v9800_v44, 4  ;;  %v9666_v44 = vld [vmem:[#allocation3 + $0x58] sm:$0xf] }
 0x44f   : > { %14891 = vmatmul.mubr.bf16.vlgmr.msra.gmra.mrb[0].mxu1 %v15981_v11  ;;  %v9803_v11 = vshll.u32 %v9656_v57, 16 }
 0x450   : > { %14894 = vmatprep.mubr.bf16.mxu1 %v15983_v61  ;;  %14923 = vmatpush3.bf16.msra.mxu1 %v18068_v16  ;;  %v16000_v16 = vld [vmem:[#allocation10 + $0x130] sm:$0xff]   ;;  %v18110_v61 = vrot.slane %v9809_v25, 5  ;;  %v9848_v25 = vshrl.u32 %v9662_v8, 16 }
 0x451   : > { %14924 = vmatprep.subr.bf16.mxu1 %v15985_v45  ;;  %v9805_v1 = vrot.slane %v9803_v11, 5 }
 0x453   : > { %v9806_v38 = vor.u32 %v9805_v1, %v9802_v7  ;;  %v9669_v7 = vld [vmem:[#allocation3 + $0x64] sm:$0xf] }
 0x454   : > { %14925 = vmatpush3.bf16.msra.mxu1 %v15985_v45  ;;  %v15999_v45 = vld [vmem:[#allocation3 + $0xa8] sm:$0xff]  }
 0x455   : > { %14926 = vmatprep.subr.bf16.mxu1 %v15988_v12 }
 0x457   : > { %14895 = vmatmul.mubr.bf16.gmra.mrb[4].mxu1 %v15984_v32  ;;  %v9659_v32 = vld [vmem:[#allocation3 + $0x3c] sm:$0xf] }
 0x458   : > { %14898 = vmatprep.mubr.bf16.mxu1 %v15986_v39  ;;  %14927 = vmatpush3.bf16.msra.mxu1 %v15988_v12  ;;  %v9815_v12 = vrot.slane %v9813_v18, 4  ;;  %v9735_v39 = vrot.slane %v9734_v47, 4  ;;  %v9824_v60 = vshrl.u32 %v9659_v32, 16  ;;  %v9827_v33 = vshll.u32 %v9659_v32, 16  ;;  %v9664_v32 = vld [vmem:[#allocation3 + $0x50] sm:$0x1] }
 0x459   : > { %14928 = vmatprep.subr.bf16.mxu1 %v15991_v21  ;;  %v9851_v18 = vshll.u32 %v9662_v8, 16 }
 0x45a   : > { %v9816_v46 = vor.u32 %v9815_v12, %v18110_v61  ;;  %v9740_v20 = vsel %vm16683_vm11, %v9735_v39, %v18103_v36  ;;  %v9826_v19 = vrot.slane %v9824_v60, 4  ;;  %v9829_v4 = vrot.slane %v9827_v33, 5  ;;  %v16005_v60 = vld [vmem:[#allocation10 + $0x148] sm:$0xff]  }
 0x45b   : > { %v9853_v39 = vrot.slane %v9851_v18, 5  ;;  %v9675_v18 = vld [vmem:[#allocation3 + $0x7c] sm:$0xf] }
 0x45c   : > { %14929 = vmatpush3.bf16.msra.mxu1 %v15991_v21  ;;  %v16001_v21 = vld [vmem:[#allocation3 + $0xb4] sm:$0xff]   ;;  %v9817_v41 = vrot.slane %v9816_v46, 4 }
 0x45d   : > { %14930 = vmatprep.subr.bf16.mxu1 %v15994_v58 }
 0x45f   : > { %14899 = vmatmul.mubr.bf16.gmra.mrb[8].mxu1 %v15987_v59  ;;  %v9771_v59 = vshll.u32 %v9652_v37, 16  ;;  %v9665_v37 = vld [vmem:[#allocation3 + $0x54] sm:$0xf] }
 0x460   : > { %14902 = vmatprep.mubr.bf16.mxu1 %v15989_v50  ;;  %14931 = vmatpush3.bf16.msra.mxu1 %v15994_v58  ;;  %v9758_v58 = vor.u32 %v9757_v3, %v9754_v52  ;;  %v9745_v50 = vrot.slane %v9744_v17, 4  ;;  %v9857_v3 = vshll.u32 %v9663_v5, 16  ;;  %v9861_v17 = vshrl.u32 %v9663_v5, 16 }
 0x461   : > { %14932 = vmatprep.subr.bf16.mxu1 %v15997_v2 }
 0x464   : > { %14933 = vmatpush3.bf16.msra.mxu1 %v15997_v2  ;;  %v9660_v2 = vld [vmem:[#allocation3 + $0x40] sm:$0xf] }
 0x465   : > { %14934 = vmatprep.subr.bf16.mxu1 %v16000_v16  ;;  %v9833_v0 = vshll.u32 %v9660_v2, 16  ;;  %v9837_v29 = vshrl.u32 %v9660_v2, 16  ;;  %v18135_v2 = vrot.slane %v9857_v3, 5 }
 0x467   : > { %14903 = vmatmul.mubr.bf16.gmra.mrb[12].mxu1 %v15990_v54  ;;  %v9768_v54 = vor.u32 %v9767_v28, %v18105_v43  ;;  %v18120_v6 = vrot.slane %v9833_v0, 5  ;;  %v9839_v36 = vrot.slane %v9837_v29, 4  ;;  %v9867_v0 = vshll.u32 %v9664_v32, 16  ;;  %v9671_v29 = vld [vmem:[#allocation3 + $0x6c] sm:$0xf] }
 0x468   : > { %14906 = vmatprep.mubr.bf16.mxu1 %v15992_v13  ;;  %14935 = vmatpush3.bf16.msra.mxu1 %v16000_v16  ;;  %v9749_v16 = vrot.slane %v9747_v22, 5  ;;  %v9782_v13 = vor.u32 %v9781_v48, %v9778_v24  ;;  %v9807_v48 = vrot.slane %v9806_v38, 4  ;;  %v9920_v38 = vshrl.u32 %v9671_v29, 16 }
 0x469   : > { %14936 = vmatprep.subr.bf16.mxu1 %v16003_v27  ;;  %v9769_v40 = vrot.slane %v9768_v54, 4  ;;  %v9840_v12 = vor.u32 %v9839_v36, %v18120_v6  ;;  %v9668_v54 = vld [vmem:[#allocation3 + $0x60] sm:$0xf] }
 0x46a   : > { %v9750_v63 = vsel %vm16683_vm11, %v9745_v50, %v9749_v16  ;;  %v9783_v62 = vrot.slane %v9782_v13, 4  ;;  %v9881_v50 = vshll.u32 %v9666_v44, 16  ;;  %v9885_v16 = vshrl.u32 %v9666_v44, 16 }
 0x46b   : > { %v13643_v22 = vcombine.low %v9740_v20, %v9750_v63  ;;  %v9841_v33 = vrot.slane %v9840_v12, 4  ;;  %v9899_v63 = vshll.u32 %v9668_v54, 16 }
 0x46c   : > { %14937 = vmatpush3.bf16.msra.mxu1 %v16003_v27  ;;  %v9655_v27 = vld [vmem:[#allocation3 + $0x2c] sm:$0x1]  ;;  %v9788_v24 = vsel %vm16683_vm11, %v9783_v62, %v18108_v53  ;;  %v18141_v8 = vrot.slane %v9881_v50, 5  ;;  %v9905_v62 = vshll.u32 %v9669_v7, 16  ;;  %v9673_v50 = vld [vmem:[#allocation3 + $0x74] sm:$0x1] }
 0x46d   : > { %14970 = vmatprep.subr.bf16.mxu1 %v18100_v42  ;;  %v9795_v14 = vshll.u32 %v9655_v27, 16 }
 0x46f   : > { %14907 = vmatmul.mubr.bf16.gmra.mrb[16].mxu1 %v15993_v30  ;;  %v9792_v30 = vor.u32 %v9791_v49, %v18108_v53  ;;  %v9797_v47 = vrot.slane %v9795_v14, 5  ;;  %v9843_v49 = vshll.u32 %v9661_v15, 16  ;;  %v9863_v53 = vrot.slane %v9861_v17, 4  ;;  %v16006_v15 = vld [vmem:[#allocation10 + $0x150] sm:$0xff]  }
 0x470   : > { %14910 = vmatprep.mubr.bf16.mxu1 %v15995_v10  ;;  %v9658_v10 = vld [vmem:[#allocation3 + $0x38] sm:$0x1] }
 0x471   : > { %v9819_v55 = vshll.u32 %v9658_v10, 16  ;;  %v9793_v9 = vrot.slane %v9792_v30, 4  ;;  %v9812_v30 = vsel %vm16683_vm11, %v9807_v48, %v18110_v61  ;;  %v9845_v10 = vrot.slane %v9843_v49, 5  ;;  %v9674_v48 = vld [vmem:[#allocation3 + $0x78] sm:$0xf]  ;;  %v16007_v49 = vld [vmem:[#allocation10 + $0x158] sm:$0xff]  }
 0x472   : > { %v9887_v61 = vrot.slane %v9885_v16, 4 }
 0x473   : > { %v9821_v52 = vrot.slane %v9819_v55, 5  ;;  %v9864_v55 = vor.u32 %v9863_v53, %v18135_v2  ;;  %v9670_v53 = vld [vmem:[#allocation3 + $0x68] sm:$0x1] }
 0x474   : > { %v9888_v3 = vor.u32 %v9887_v61, %v18141_v8 }
 0x475   : > { %v9822_v11 = vsel %vm16683_vm11, %v9817_v41, %v9821_v52  ;;  %v9846_v41 = vsel %vm16683_vm11, %v9841_v33, %v9845_v10  ;;  %v9865_v52 = vrot.slane %v9864_v55, 4 }
 0x476   : > { %v13646_v1 = vcombine.low %v9812_v30, %v9822_v11  ;;  %v9953_v11 = vshll.u32 %v9675_v18, 16  ;;  %v9678_v30 = vld [vmem:[#allocation3 + $0x88] sm:$0xf] }
 0x477   : > { %14911 = vmatmul.mubr.bf16.gmra.mrb[20].mxu1 %v15996_v56  ;;  %v9759_v56 = vrot.slane %v9758_v58, 4  ;;  %v9872_v58 = vshrl.u32 %v9665_v37, 16 }
 0x478   : > { %14914 = vmatprep.mubr.bf16.mxu1 %v15998_v34  ;;  %v9773_v34 = vrot.slane %v9771_v59, 5  ;;  %v9875_v59 = vshll.u32 %v9665_v37, 16  ;;  %v18150_v37 = vrot.slane %v9905_v62, 5 }
 0x479   : > { %v9764_v57 = vsel %vm16683_vm11, %v9759_v56, %v18105_v43  ;;  %v9798_v43 = vsel %vm16683_vm11, %v9793_v9, %v9797_v47  ;;  %v9874_v20 = vrot.slane %v9872_v58, 4  ;;  %v9909_v9 = vshrl.u32 %v9669_v7, 16 }
 0x47a   : > { %v9774_v28 = vsel %vm16683_vm11, %v9769_v40, %v9773_v34  ;;  %v13645_v13 = vcombine.low %v9788_v24, %v9798_v43  ;;  %v9877_v56 = vrot.slane %v9875_v59, 5  ;;  %v9896_v34 = vshrl.u32 %v9668_v54, 16  ;;  %v9672_v40 = vld [vmem:[#allocation3 + $0x70] sm:$0xf] }
 0x47b   : > { %v13644_v27 = vcombine.low %v9764_v57, %v9774_v28  ;;  %v9933_v36 = vshrl.u32 %v9672_v40, 16  ;;  %v9922_v28 = vrot.slane %v9920_v38, 4  ;;  %v9889_v59 = vrot.slane %v9888_v3, 4 }
 0x47c   : > { %v9878_v57 = vor.u32 %v9877_v56, %v9874_v20  ;;  %v9915_v20 = vshll.u32 %v9670_v53, 16 }
 0x47d   : > { %v9935_v43 = vrot.slane %v9933_v36, 4 }
 0x47e   : > { %v9879_v32 = vrot.slane %v9878_v57, 4 }
 0x47f   : > { %14915 = vmatmul.mubr.bf16.gmra.mrb[24].mxu1 %v15999_v45  ;;  %v9830_v45 = vor.u32 %v9829_v4, %v9826_v19  ;;  %v9923_v19 = vshll.u32 %v9671_v29, 16  ;;  %v9929_v4 = vshll.u32 %v9672_v40, 16  ;;  %v9981_v40 = vshrl.u32 %v9678_v30, 16 }
 0x480   : > { %14918 = vmatprep.mubr.bf16.mxu1 %v16001_v21  ;;  %v9850_v21 = vrot.slane %v9848_v25, 4  ;;  %v9898_v25 = vrot.slane %v9896_v34, 4  ;;  %v9939_v34 = vshll.u32 %v9673_v50, 16 }
 0x481   : > { %v9831_v46 = vrot.slane %v9830_v45, 4  ;;  %v9925_v24 = vrot.slane %v9923_v19, 5  ;;  %v18152_v44 = vrot.slane %v9929_v4, 5  ;;  %v9957_v45 = vshrl.u32 %v9675_v18, 16  ;;  %v9680_v4 = vld [vmem:[#allocation3 + $0x90] sm:$0xf] }
 0x482   : > { %v9854_v14 = vor.u32 %v9853_v39, %v9850_v21  ;;  %v9941_v36 = vrot.slane %v9939_v34, 5 }
 0x483   : > { %v9836_v5 = vsel %vm16683_vm11, %v9831_v46, %v18120_v6  ;;  %v9911_v6 = vrot.slane %v9909_v9, 4  ;;  %v9926_v10 = vor.u32 %v9925_v24, %v9922_v28  ;;  %v9936_v7 = vor.u32 %v9935_v43, %v18152_v44  ;;  %v9677_v46 = vld [vmem:[#allocation3 + $0x84] sm:$0xf]  ;;  %v16010_v43 = vld [vmem:[#allocation10 + $0x170] sm:$0xff]  }
 0x484   : > { %v9855_v47 = vrot.slane %v9854_v14, 4  ;;  %v13647_v12 = vcombine.low %v9836_v5, %v9846_v41  ;;  %v9676_v14 = vld [vmem:[#allocation3 + $0x80] sm:$0x1]  ;;  %v9971_v62 = vshll.u32 %v9677_v46, 16 }
 0x485   : > { %v9912_v54 = vor.u32 %v9911_v6, %v18150_v37  ;;  %v9927_v38 = vrot.slane %v9926_v10, 4  ;;  %v9937_v19 = vrot.slane %v9936_v7, 4  ;;  %v16011_v10 = vld [vmem:[#allocation10 + $0x178] sm:$0xff]  }
 0x486   : > { %v9860_v39 = vsel %vm16683_vm11, %v9855_v47, %v18135_v2  ;;  %v9959_v2 = vrot.slane %v9957_v45, 4  ;;  %v9973_v3 = vrot.slane %v9971_v62, 5  ;;  %v9686_v62 = vld [vmem:[#allocation3 + $0xa8] sm:$0xf] }
 0x487   : > { %14919 = vmatmul.mubr.bf16.gmra.mrb[28].mxu1 %v16002_v31  ;;  %v9667_v31 = vld [vmem:[#allocation3 + $0x5c] sm:$0x1]  ;;  %v9913_v9 = vrot.slane %v9912_v54, 4  ;;  %v9932_v28 = vsel %vm16683_vm11, %v9927_v38, %v18152_v44  ;;  %v9942_v24 = vsel %vm16683_vm11, %v9937_v19, %v9941_v36 }
 0x488   : > { %14938 = vmatprep.mubr.bf16.mxu1 %v13643_v22  ;;  %v9869_v22 = vrot.slane %v9867_v0, 5  ;;  %v9891_v17 = vshll.u32 %v9667_v31, 16  ;;  %v9884_v0 = vsel %vm16683_vm11, %v9879_v32, %v18141_v8  ;;  %v9968_v31 = vshrl.u32 %v9677_v46, 16  ;;  %v16009_v8 = vld [vmem:[#allocation10 + $0x168] sm:$0xff]   ;;  %v9683_v32 = vld [vmem:[#allocation3 + $0x9c] sm:$0xf] }
 0x489   : > { %v13651_v50 = vcombine.low %v9932_v28, %v9942_v24 }
 0x48a   : > { %v9870_v58 = vsel %vm16683_vm11, %v9865_v52, %v9869_v22  ;;  %v9893_v16 = vrot.slane %v9891_v17, 5  ;;  %v9963_v22 = vshll.u32 %v9676_v14, 16  ;;  %v9970_v52 = vrot.slane %v9968_v31, 4  ;;  %v9684_v17 = vld [vmem:[#allocation3 + $0xa0] sm:$0xf] }
 0x48b   : > { %v13648_v33 = vcombine.low %v9860_v39, %v9870_v58  ;;  %v10025_v58 = vshll.u32 %v9684_v17, 16 }
 0x48c   : > { %v9894_v56 = vsel %vm16683_vm11, %v9889_v59, %v9893_v16  ;;  %v10029_v59 = vshrl.u32 %v9684_v17, 16  ;;  %v9974_v16 = vor.u32 %v9973_v3, %v9970_v52 }
 0x48d   : > { %v13649_v41 = vcombine.low %v9884_v0, %v9894_v56  ;;  %v18186_v0 = vrot.slane %v10025_v58, 5 }
 0x48e   : > { %v9975_v34 = vrot.slane %v9974_v16, 4 }
 0x48f   : > { %14939 = vmatmul.mubr.bf16.vlgmr.msra.gmra.mrb[0].mxu1 %v13644_v27  ;;  %v9944_v27 = vshrl.u32 %v9674_v48, 16 }
 0x490   : > { %14942 = vmatprep.mubr.bf16.mxu1 %v13645_v13  ;;  %14971 = vmatpush3.bf16.msra.mxu1 %v18100_v42  ;;  %v9901_v42 = vrot.slane %v9899_v63, 5  ;;  %v9947_v13 = vshll.u32 %v9674_v48, 16  ;;  %v9977_v63 = vshll.u32 %v9678_v30, 16  ;;  %v10019_v30 = vshll.u32 %v9683_v32, 16 }
 0x491   : > { %14972 = vmatprep.subr.bf16.mxu1 %v16005_v60  ;;  %v9946_v55 = vrot.slane %v9944_v27, 4 }
 0x492   : > { %v9902_v21 = vor.u32 %v9901_v42, %v9898_v25  ;;  %v9949_v61 = vrot.slane %v9947_v13, 5  ;;  %v18169_v57 = vrot.slane %v9977_v63, 5  ;;  %v9983_v25 = vrot.slane %v9981_v40, 4  ;;  %v9681_v42 = vld [vmem:[#allocation3 + $0x94] sm:$0xf] }
 0x493   : > { %v10001_v45 = vshll.u32 %v9681_v42, 16  ;;  %v10016_v13 = vshrl.u32 %v9683_v32, 16  ;;  %v9682_v63 = vld [vmem:[#allocation3 + $0x98] sm:$0x1]  ;;  %v10021_v31 = vrot.slane %v10019_v30, 5 }
 0x494   : > { %14973 = vmatpush3.bf16.msra.mxu1 %v16005_v60  ;;  %v16008_v60 = vld [vmem:[#allocation10 + $0x160] sm:$0xff]   ;;  %v9903_v29 = vrot.slane %v9902_v21, 4  ;;  %v9950_v47 = vor.u32 %v9949_v61, %v9946_v55  ;;  %v9965_v21 = vrot.slane %v9963_v22, 5  ;;  %v9984_v39 = vor.u32 %v9983_v25, %v18169_v57  ;;  %v9688_v32 = vld [vmem:[#allocation3 + $0xb0] sm:$0x1] }
 0x495   : > { %14974 = vmatprep.subr.bf16.mxu1 %v16006_v15  ;;  %v9690_v40 = vld [vmem:[#allocation3 + $0xb8] sm:$0xf]  ;;  %v10018_v61 = vrot.slane %v10016_v13, 4  ;;  %v9980_v25 = vsel %vm16683_vm11, %v9975_v34, %v18169_v57  ;;  %v9693_v57 = vld [vmem:[#allocation3 + $0xc4] sm:$0xf] }
 0x496   : > { %v9908_v18 = vsel %vm16683_vm11, %v9903_v29, %v18150_v37  ;;  %v9992_v37 = vshrl.u32 %v9680_v4, 16  ;;  %v9951_v44 = vrot.slane %v9950_v47, 4  ;;  %v10031_v29 = vrot.slane %v10029_v59, 4 }
 0x497   : > { %14943 = vmatmul.mubr.bf16.gmra.mrb[4].mxu1 %v13646_v1  ;;  %v18161_v1 = vrot.slane %v9953_v11, 5  ;;  %v9995_v11 = vshll.u32 %v9680_v4, 16  ;;  %v10073_v36 = vshll.u32 %v9690_v40, 16  ;;  %v10077_v22 = vshrl.u32 %v9690_v40, 16 }
 0x498   : > { %14946 = vmatprep.mubr.bf16.mxu1 %v13647_v12  ;;  %14975 = vmatpush3.bf16.msra.mxu1 %v16006_v15  ;;  %v9917_v15 = vrot.slane %v9915_v20, 5  ;;  %v10005_v12 = vshrl.u32 %v9681_v42, 16  ;;  %v9994_v7 = vrot.slane %v9992_v37, 4  ;;  %v9687_v20 = vld [vmem:[#allocation3 + $0xac] sm:$0xf]  ;;  %v10032_v4 = vor.u32 %v10031_v29, %v18186_v0 }
 0x499   : > { %14976 = vmatprep.subr.bf16.mxu1 %v16007_v49  ;;  %v9960_v5 = vor.u32 %v9959_v2, %v18161_v1  ;;  %v9997_v2 = vrot.slane %v9995_v11, 5  ;;  %v9956_v56 = vsel %vm16683_vm11, %v9951_v44, %v18161_v1  ;;  %v10011_v42 = vshll.u32 %v9682_v63, 16  ;;  %v9692_v44 = vld [vmem:[#allocation3 + $0xc0] sm:$0xf] }
 0x49a   : > { %v9918_v6 = vsel %vm16683_vm11, %v9913_v9, %v9917_v15  ;;  %v10007_v46 = vrot.slane %v10005_v12, 4  ;;  %v18191_v9 = vld [vmem:[#allocation10 + $0x180] sm:$0xff]   ;;  %v9689_v15 = vld [vmem:[#allocation3 + $0xb4] sm:$0xf]  ;;  %v10043_v47 = vshll.u32 %v9686_v62, 16  ;;  %v10022_v52 = vor.u32 %v10021_v31, %v10018_v61 }
 0x49b   : > { %v9961_v48 = vrot.slane %v9960_v5, 4  ;;  %v13650_v53 = vcombine.low %v9908_v18, %v9918_v6  ;;  %v9998_v38 = vor.u32 %v9997_v2, %v9994_v7  ;;  %v9685_v5 = vld [vmem:[#allocation3 + $0xa4] sm:$0x1]  ;;  %v10040_v18 = vshrl.u32 %v9686_v62, 16 }
 0x49c   : > { %14977 = vmatpush3.bf16.msra.mxu1 %v16007_v49  ;;  %v9679_v49 = vld [vmem:[#allocation3 + $0x8c] sm:$0x1]  ;;  %v10035_v3 = vshll.u32 %v9685_v5, 16  ;;  %v10064_v17 = vshrl.u32 %v9689_v15, 16  ;;  %v10067_v6 = vshll.u32 %v9689_v15, 16  ;;  %v10033_v37 = vrot.slane %v10032_v4, 4 }
 0x49d   : > { %14978 = vmatprep.subr.bf16.mxu1 %v16008_v60  ;;  %v9966_v54 = vsel %vm16683_vm11, %v9961_v48, %v9965_v21  ;;  %v9987_v27 = vshll.u32 %v9679_v49, 16  ;;  %v10075_v11 = vrot.slane %v10073_v36, 5  ;;  %v10013_v12 = vrot.slane %v10011_v42, 5 }
 0x49e   : > { %v13652_v14 = vcombine.low %v9956_v56, %v9966_v54  ;;  %v10042_v21 = vrot.slane %v10040_v18, 4  ;;  %v10023_v58 = vrot.slane %v10022_v52, 4  ;;  %v10037_v59 = vrot.slane %v10035_v3, 5 }
 0x49f   : > { %14947 = vmatmul.mubr.bf16.gmra.mrb[8].mxu1 %v13648_v33  ;;  %v9985_v33 = vrot.slane %v9984_v39, 4  ;;  %v9989_v55 = vrot.slane %v9987_v27, 5  ;;  %v10045_v39 = vrot.slane %v10043_v47, 5  ;;  %v9691_v27 = vld [vmem:[#allocation3 + $0xbc] sm:$0x1]  ;;  %v10097_v13 = vshll.u32 %v9693_v57, 16 }
 0x4a0   : > { %14950 = vmatprep.mubr.bf16.mxu1 %v13649_v41  ;;  %14979 = vmatpush3.bf16.msra.mxu1 %v16008_v60  ;;  %v18184_v60 = vrot.slane %v10001_v45, 5  ;;  %v10053_v41 = vshrl.u32 %v9687_v20, 16  ;;  %v10079_v45 = vrot.slane %v10077_v22, 4  ;;  %v10101_v30 = vshrl.u32 %v9693_v57, 16  ;;  %v451_v57 = vld [vmem:[#allocation3 + $0xcc] sm:$0x1] }
 0x4a1   : > { %14980 = vmatprep.subr.bf16.mxu1 %v16009_v8  ;;  %v9990_v1 = vsel %vm16683_vm11, %v9985_v33, %v9989_v55  ;;  %v10038_v7 = vsel %vm16683_vm11, %v10033_v37, %v10037_v59  ;;  %v10059_v33 = vshll.u32 %v9688_v32, 16  ;;  %v10088_v29 = vshrl.u32 %v9692_v44, 16 }
 0x4a2   : > { %v10008_v19 = vor.u32 %v10007_v46, %v18184_v60  ;;  %v13653_v28 = vcombine.low %v9980_v25, %v9990_v1  ;;  %v10055_v49 = vrot.slane %v10053_v41, 4  ;;  %v10080_v2 = vor.u32 %v10079_v45, %v10075_v11  ;;  %v9694_v1 = vld [vmem:[#allocation3 + $0xc8] sm:$0x1] }
 0x4a3   : > { %v10046_v46 = vor.u32 %v10045_v39, %v10042_v21  ;;  %v10028_v34 = vsel %vm16683_vm11, %v10023_v58, %v18186_v0  ;;  %v10083_v40 = vshll.u32 %v9691_v27, 16  ;;  %v10099_v61 = vrot.slane %v10097_v13, 5  ;;  %v10472_v45 = vld [vmem:[#allocation3 + $0x28] sm:$0xf]  ;;  %v10468_v27 = vld [vmem:[#allocation3 + $0x18] sm:$0xe] }
 0x4a4   : > { %14981 = vmatpush3.bf16.msra.mxu1 %v16009_v8  ;;  %v10049_v8 = vshll.u32 %v9687_v20, 16  ;;  %v10009_v24 = vrot.slane %v10008_v19, 4  ;;  %v10091_v20 = vshll.u32 %v9692_v44, 16  ;;  %v10103_v31 = vrot.slane %v10101_v30, 4  ;;  %v10470_v44 = vld [vmem:[#allocation3 + $0x20] sm:$0x1] }
 0x4a5   : > { %14982 = vmatprep.subr.bf16.mxu1 %v16010_v43  ;;  %v10047_v62 = vrot.slane %v10046_v46, 4  ;;  %v10090_v19 = vrot.slane %v10088_v29, 4  ;;  %v10085_v15 = vrot.slane %v10083_v40, 5  ;;  %v10107_v18 = vshll.u32 %v9694_v1, 16  ;;  %v10475_v30 = vld [vmem:[#allocation3 + $0x34] sm:$0xf] }
 0x4a6   : > { %v10051_v48 = vrot.slane %v10049_v8, 5  ;;  %v10014_v16 = vsel %vm16683_vm11, %v10009_v24, %v10013_v12  ;;  %v10093_v5 = vrot.slane %v10091_v20, 5  ;;  %v10466_v8 = vld [vmem:[#allocation3 + $0x10] sm:$0xf]  ;;  %v10104_v4 = vor.u32 %v10103_v31, %v10099_v61  ;;  %v16013_v31 = vld [vmem:[#allocation10 + $0x188] sm:$0xff]  }
 0x4a7   : > { %14951 = vmatmul.mubr.bf16.gmra.mrb[12].mxu1 %v13650_v53  ;;  %v10066_v53 = vrot.slane %v10064_v17, 4  ;;  %v10595_v22 = vrot.slane %v10466_v8, 5  ;;  %v10109_v37 = vrot.slane %v10107_v18, 5  ;;  %v10609_v58 = vrot.slane %v10472_v45, 5  ;;  %v10481_v8 = vld [vmem:[#allocation3 + $0x4c] sm:$0xf] }
 0x4a8   : > { %14954 = vmatprep.mubr.bf16.mxu1 %v13651_v50  ;;  %14983 = vmatpush3.bf16.msra.mxu1 %v16010_v43  ;;  %v9999_v43 = vrot.slane %v9998_v38, 4  ;;  %v10069_v50 = vrot.slane %v10067_v6, 5  ;;  %v10056_v54 = vor.u32 %v10055_v49, %v10051_v48  ;;  %v10061_v38 = vrot.slane %v10059_v33, 5  ;;  %v10467_v6 = vld [vmem:[#allocation3 + $0x14] sm:$0x1] }
 0x4a9   : > { %14984 = vmatprep.subr.bf16.mxu1 %v16011_v10  ;;  %v10052_v25 = vsel %vm16683_vm11, %v10047_v62, %v10051_v48  ;;  %v10094_v42 = vor.u32 %v10093_v5, %v10090_v19  ;;  %v10105_v17 = vrot.slane %v10104_v4, 4  ;;  %v10597_v24 = vrot.slane %v10595_v22, 4  ;;  %v10469_v49 = vld [vmem:[#allocation3 + $0x1c] sm:$0xf]  ;;  %v10474_v19 = vld [vmem:[#allocation3 + $0x30] sm:$0xe] }
 0x4aa   : > { %v10070_v63 = vor.u32 %v10069_v50, %v10066_v53  ;;  %v10057_v55 = vrot.slane %v10056_v54, 4  ;;  %v10598_v12 = vrot.slane %v10467_v6, 5  ;;  %v452_v48 = vsel %vm16440_vm2, 0, %v451_v57  ;;  %v10473_v54 = vld [vmem:[#allocation3 + $0x2c] sm:$0x1]  ;;  %v16015_v6 = vld [vmem:[#allocation10 + $0x198] sm:$0xff]  }
 0x4ab   : > { %v10110_v32 = vsel %vm16683_vm11, %v10105_v17, %v10109_v37  ;;  %453 = vst [vmem:[#allocation3 + $0xcc] sm:$0x1] %v452_v48  ;;  %v10611_v13 = vrot.slane %v10609_v58, 4  ;;  %v10612_v46 = vrot.slane %v10473_v54, 5  ;;  %v13668_v33 = vrot.slane %v10468_v27, 9  ;;  %v16014_v4 = vld [vmem:[#allocation10 + $0x190] sm:$0xff]  }
 0x4ac   : > { %14985 = vmatpush3.bf16.msra.mxu1 %v16011_v10  ;;  %v10004_v10 = vsel %vm16683_vm11, %v9999_v43, %v18184_v60  ;;  %v10081_v60 = vrot.slane %v10080_v2, 4  ;;  %v10071_v41 = vrot.slane %v10070_v63, 4  ;;  %v10062_v0 = vsel %vm16683_vm11, %v10057_v55, %v10061_v38  ;;  %v10478_v2 = vld [vmem:[#allocation3 + $0x40] sm:$0xf]  ;;  %v10479_v38 = vld [vmem:[#allocation3 + $0x44] sm:$0x1] }
 0x4ad   : > { %15018 = vmatprep.subr.bf16.mxu1 %v18191_v9  ;;  %v13654_v56 = vcombine.low %v10004_v10, %v10014_v16  ;;  %v13656_v47 = vcombine.low %v10052_v25, %v10062_v0  ;;  %v10095_v43 = vrot.slane %v10094_v42, 4  ;;  %v10599_v39 = vsel %vm16924_vm14, %v10597_v24, %v10598_v12  ;;  %v10484_v1 = vld [vmem:[#allocation3 + $0x58] sm:$0xf]  ;;  %v10482_v17 = vld [vmem:[#allocation3 + $0x50] sm:$0x1]  ;;  %v16017_v27 = vld [vmem:[#allocation10 + $0x1a8] sm:$0xff]  }
 0x4ae   : > { %v10086_v36 = vsel %vm16683_vm11, %v10081_v60, %v10085_v15  ;;  %v10076_v52 = vsel %vm16683_vm11, %v10071_v41, %v10075_v11  ;;  %v10602_v11 = vrot.slane %v10469_v49, 5  ;;  %v10605_v10 = vrot.slane %v10470_v44, 5  ;;  %v10477_v15 = vld [vmem:[#allocation3 + $0x3c] sm:$0xe]  ;;  %v10485_v49 = vld [vmem:[#allocation3 + $0x5c] sm:$0x1] }
 0x4af   : > { %14955 = vmatmul.mubr.bf16.gmra.mrb[16].mxu1 %v13652_v14  ;;  %v13655_v14 = vcombine.low %v10028_v34, %v10038_v7  ;;  %v13657_v3 = vcombine.low %v10076_v52, %v10086_v36  ;;  %v10100_v59 = vsel %vm16683_vm11, %v10095_v43, %v10099_v61  ;;  %v10471_v7 = vld [vmem:[#allocation3 + $0x24] sm:$0xe]  ;;  %v10616_v20 = vrot.slane %v10475_v30, 5  ;;  %v10476_v61 = vld [vmem:[#allocation3 + $0x38] sm:$0x1] }
 0x4b0   : > { %14958 = vmatprep.mubr.bf16.mxu1 %v13653_v28  ;;  %v10465_v28 = vld [vmem:[#allocation3 + $0xc] sm:$0xe]  ;;  %v13658_v53 = vcombine.low %v10100_v59, %v10110_v32  ;;  %v10604_v16 = vrot.slane %v10602_v11, 4  ;;  %v10613_v34 = vsel %vm16924_vm14, %v10611_v13, %v10612_v46  ;;  %v10623_v63 = vrot.slane %v10478_v2, 5  ;;  %v10480_v43 = vld [vmem:[#allocation3 + $0x48] sm:$0xe] }
 0x4b1   : > { %v13667_v21 = vrot.slane %v10465_v28, 9  ;;  %v10603_v40 = vsel %vm16924_vm14, %v13668_v33, %v10602_v11  ;;  %v10618_v62 = vrot.slane %v10616_v20, 4  ;;  %v10619_v41 = vrot.slane %v10476_v61, 5  ;;  %v10487_v45 = vld [vmem:[#allocation3 + $0x64] sm:$0xf]  ;;  %v16016_v11 = vld [vmem:[#allocation10 + $0x1a0] sm:$0xff]  }
 0x4b2   : > { %v10606_v29 = vsel %vm16924_vm14, %v10604_v16, %v10605_v10  ;;  %v10625_v5 = vrot.slane %v10623_v63, 4  ;;  %v10626_v0 = vrot.slane %v10479_v38, 5  ;;  %v13670_v36 = vrot.slane %v10474_v19, 9  ;;  %v10483_v12 = vld [vmem:[#allocation3 + $0x54] sm:$0xe] }
 0x4b3   : > { %v10596_v50 = vsel %vm16924_vm14, %v13667_v21, %v10595_v22  ;;  %v10620_v22 = vsel %vm16924_vm14, %v10618_v62, %v10619_v41  ;;  %v10630_v25 = vrot.slane %v10481_v8, 5  ;;  %v13671_v42 = vrot.slane %v10477_v15, 9  ;;  %v10490_v48 = vld [vmem:[#allocation3 + $0x70] sm:$0xf]  ;;  %v10488_v54 = vld [vmem:[#allocation3 + $0x68] sm:$0x1] }
 0x4b4   : > { %v13683_v51 = vcombine.low %v10596_v50, %v10599_v39  ;;  %v10627_v18 = vsel %vm16924_vm14, %v10625_v5, %v10626_v0  ;;  %v10617_v52 = vsel %vm16924_vm14, %v13670_v36, %v10616_v20  ;;  %v10633_v57 = vrot.slane %v10482_v17, 5  ;;  %v10491_v10 = vld [vmem:[#allocation3 + $0x74] sm:$0x1]  ;;  %v10493_v46 = vld [vmem:[#allocation3 + $0x7c] sm:$0xf] }
 0x4b5   : > { %v10632_v24 = vrot.slane %v10630_v25, 4  ;;  %v10640_v32 = vrot.slane %v10485_v49, 5  ;;  %v13672_v21 = vrot.slane %v10480_v43, 9  ;;  %v13673_v59 = vrot.slane %v10483_v12, 9  ;;  %v10496_v20 = vld [vmem:[#allocation3 + $0x88] sm:$0xf] }
 0x4b6   : > { %v10651_v50 = vrot.slane %v10490_v48, 5  ;;  %v10647_v33 = vrot.slane %v10488_v54, 5  ;;  %v10494_v19 = vld [vmem:[#allocation3 + $0x80] sm:$0x1]  ;;  %v16019_v5 = vld [vmem:[#allocation10 + $0x1b8] sm:$0xff]  }
 0x4b7   : > { %14959 = vmatmul.mubr.bf16.gmra.mrb[20].mxu1 %v13654_v56  ;;  %v13669_v56 = vrot.slane %v10471_v7, 9  ;;  %v10634_v39 = vsel %vm16924_vm14, %v10632_v24, %v10633_v57  ;;  %v10631_v44 = vsel %vm16924_vm14, %v13672_v21, %v10630_v25  ;;  %v10486_v7 = vld [vmem:[#allocation3 + $0x60] sm:$0xe]  ;;  %v10497_v15 = vld [vmem:[#allocation3 + $0x8c] sm:$0x1]  ;;  %v10661_v36 = vrot.slane %v10494_v19, 5 }
 0x4b8   : > { %14962 = vmatprep.mubr.bf16.mxu1 %v13655_v14  ;;  %v13684_v14 = vcombine.low %v10603_v40, %v10606_v29  ;;  %v10653_v2 = vrot.slane %v10651_v50, 4  ;;  %v10489_v29 = vld [vmem:[#allocation3 + $0x6c] sm:$0xe]  ;;  %v10502_v25 = vld [vmem:[#allocation3 + $0xa0] sm:$0xf] }
 0x4b9   : > { %v10610_v55 = vsel %vm16924_vm14, %v13669_v56, %v10609_v58  ;;  %v10644_v58 = vrot.slane %v10487_v45, 5  ;;  %v10654_v56 = vrot.slane %v10491_v10, 5  ;;  %v10500_v43 = vld [vmem:[#allocation3 + $0x98] sm:$0x1]  ;;  %v10503_v57 = vld [vmem:[#allocation3 + $0xa4] sm:$0x1] }
 0x4ba   : > { %v13685_v60 = vcombine.low %v10610_v55, %v10613_v34  ;;  %v16018_v34 = vld [vmem:[#allocation10 + $0x1b0] sm:$0xff]   ;;  %v13675_v55 = vrot.slane %v10489_v29, 9  ;;  %v10498_v12 = vld [vmem:[#allocation3 + $0x90] sm:$0xe]  ;;  %v10501_v21 = vld [vmem:[#allocation3 + $0x9c] sm:$0xe] }
 0x4bb   : > { %v10646_v30 = vrot.slane %v10644_v58, 4  ;;  %v10655_v61 = vsel %vm16924_vm14, %v10653_v2, %v10654_v56  ;;  %v10509_v2 = vld [vmem:[#allocation3 + $0xbc] sm:$0x1]  ;;  %v10511_v29 = vld [vmem:[#allocation3 + $0xc4] sm:$0xf] }
 0x4bc   : > { %v10652_v38 = vsel %vm16924_vm14, %v13675_v55, %v10651_v50  ;;  %v10507_v56 = vld [vmem:[#allocation3 + $0xb4] sm:$0xe] }
 0x4bd   : > { %v10648_v40 = vsel %vm16924_vm14, %v10646_v30, %v10647_v33  ;;  %v13691_v8 = vcombine.low %v10652_v38, %v10655_v61  ;;  %v10506_v30 = vld [vmem:[#allocation3 + $0xb0] sm:$0x1]  ;;  %v13681_v55 = vrot.slane %v10507_v56, 9  ;;  %v10512_v38 = vld [vmem:[#allocation3 + $0xc8] sm:$0x1] }
 0x4bf   : > { %14963 = vmatmul.mubr.bf16.gmra.mrb[24].mxu1 %v13656_v47  ;;  %v10637_v47 = vrot.slane %v10484_v1, 5  ;;  %v10492_v1 = vld [vmem:[#allocation3 + $0x78] sm:$0xe] }
 0x4c0   : > { %14966 = vmatprep.mubr.bf16.mxu1 %v13657_v3  ;;  %v10624_v3 = vsel %vm16924_vm14, %v13671_v42, %v10623_v63  ;;  %v13674_v63 = vrot.slane %v10486_v7, 9  ;;  %v10668_v42 = vrot.slane %v10497_v15, 5  ;;  %v505_v15 = vld [vmem:[#allocation3 + $0xd4] sm:$0x1] }
 0x4c1   : > { %v13687_v28 = vcombine.low %v10624_v3, %v10627_v18  ;;  %v10639_v37 = vrot.slane %v10637_v47, 4  ;;  %v10638_v16 = vsel %vm16924_vm14, %v13673_v59, %v10637_v47  ;;  %v18262_v18 = vld [vmem:[#allocation10 + $0x1c0] sm:$0xff]   ;;  %v13676_v47 = vrot.slane %v10492_v1, 9 }
 0x4c2   : > { %v13678_v59 = vrot.slane %v10498_v12, 9  ;;  %v506_v1 = vsel %vm16445_vm4, 0, %v505_v15  ;;  %v11511_v12 = vld [vmem:[#allocation3 + $0x1c] sm:$0xf] }
 0x4c3   : > { %507 = vst [vmem:[#allocation3 + $0xd4] sm:$0x1] %v506_v1 }
 0x4c7   : > { %14967 = vmatmul.mubr.bf16.gmra.mrb[28].mxu1 %v13658_v53  ;;  %v10641_v53 = vsel %vm16924_vm14, %v10639_v37, %v10640_v32  ;;  %v10505_v32 = vld [vmem:[#allocation3 + $0xac] sm:$0xf] }
 0x4c8   : > { %14986 = vmatprep.mubr.bf16.mxu1 %v13683_v51  ;;  %v13688_v51 = vcombine.low %v10631_v44, %v10634_v39  ;;  %v13689_v13 = vcombine.low %v10638_v16, %v10641_v53  ;;  %v10508_v39 = vld [vmem:[#allocation3 + $0xb8] sm:$0xf]  ;;  %v10686_v50 = vrot.slane %v10505_v32, 5  ;;  %v13679_v44 = vrot.slane %v10501_v21, 9 }
 0x4c9   : > { %v10693_v16 = vrot.slane %v10508_v39, 5  ;;  %v11510_v32 = vld [vmem:[#allocation3 + $0x18] sm:$0xf]  ;;  %v11600_v21 = vshll.u32 %v11511_v12, 16  ;;  %v11604_v39 = vshrl.u32 %v11511_v12, 16 }
 0x4ca   : > { %v10688_v7 = vrot.slane %v10686_v50, 4 }
 0x4cb   : > { %v10695_v33 = vrot.slane %v10693_v16, 4 }
 0x4cf   : > { %14987 = vmatmul.mubr.bf16.vlgmr.msra.gmra.mrb[0].mxu1 %v13684_v14  ;;  %v10658_v14 = vrot.slane %v10493_v46, 5  ;;  %v10504_v46 = vld [vmem:[#allocation3 + $0xa8] sm:$0xe] }
 0x4d0   : > { %14990 = vmatprep.mubr.bf16.mxu1 %v13685_v60  ;;  %15019 = vmatpush3.bf16.msra.mxu1 %v18191_v9  ;;  %v13686_v9 = vcombine.low %v10617_v52, %v10620_v22  ;;  %v10645_v60 = vsel %vm16924_vm14, %v13674_v63, %v10644_v58  ;;  %v10495_v22 = vld [vmem:[#allocation3 + $0x84] sm:$0xe]  ;;  %v10682_v58 = vrot.slane %v10503_v57, 5  ;;  %v13680_v63 = vrot.slane %v10504_v46, 9  ;;  %v18296_v57 = vld [vmem:[#allocation10 + $0x200] sm:$0xff]  }
 0x4d1   : > { %15020 = vmatprep.subr.bf16.mxu1 %v16013_v31  ;;  %v13690_v62 = vcombine.low %v10645_v60, %v10648_v40  ;;  %v10660_v41 = vrot.slane %v10658_v14, 4  ;;  %v13677_v3 = vrot.slane %v10495_v22, 9 }
 0x4d3   : > { %v10662_v52 = vsel %vm16924_vm14, %v10660_v41, %v10661_v36  ;;  %v10703_v41 = vrot.slane %v10512_v38, 5 }
 0x4d4   : > { %15021 = vmatpush3.bf16.msra.mxu1 %v16013_v31  ;;  %v10665_v31 = vrot.slane %v10496_v20, 5  ;;  %v10689_v20 = vrot.slane %v10506_v30, 5 }
 0x4d5   : > { %15022 = vmatprep.subr.bf16.mxu1 %v16014_v4 }
 0x4d6   : > { %v10667_v0 = vrot.slane %v10665_v31, 4  ;;  %v10666_v49 = vsel %vm16924_vm14, %v13677_v3, %v10665_v31  ;;  %v10690_v40 = vsel %vm16924_vm14, %v10688_v7, %v10689_v20  ;;  %v10687_v31 = vsel %vm16924_vm14, %v13680_v63, %v10686_v50  ;;  %v16031_v3 = vld [vmem:[#allocation10 + $0x1d8] sm:$0xff]  }
 0x4d7   : > { %14991 = vmatmul.mubr.bf16.gmra.mrb[4].mxu1 %v13686_v9  ;;  %v13696_v60 = vcombine.low %v10687_v31, %v10690_v40  ;;  %v11602_v50 = vrot.slane %v11600_v21, 5  ;;  %v11517_v7 = vld [vmem:[#allocation3 + $0x34] sm:$0xf] }
 0x4d8   : > { %14994 = vmatprep.mubr.bf16.mxu1 %v13687_v28  ;;  %15023 = vmatpush3.bf16.msra.mxu1 %v16014_v4  ;;  %v10499_v4 = vld [vmem:[#allocation3 + $0x94] sm:$0xf]  ;;  %v10669_v17 = vsel %vm16924_vm14, %v10667_v0, %v10668_v42  ;;  %v10659_v28 = vsel %vm16924_vm14, %v13676_v47, %v10658_v14  ;;  %v10700_v14 = vrot.slane %v10511_v29, 5  ;;  %v16021_v42 = vld [vmem:[#allocation3 + $0x24] sm:$0xff]   ;;  %v11516_v29 = vld [vmem:[#allocation3 + $0x30] sm:$0xf] }
 0x4d9   : > { %15024 = vmatprep.subr.bf16.mxu1 %v16015_v6  ;;  %v10672_v9 = vrot.slane %v10499_v4, 5  ;;  %v13692_v24 = vcombine.low %v10659_v28, %v10662_v52  ;;  %v13693_v37 = vcombine.low %v10666_v49, %v10669_v17  ;;  %v16025_v47 = vld [vmem:[#allocation10 + $0x1c8] sm:$0xff]   ;;  %v16023_v52 = vld [vmem:[#allocation3 + $0x30] sm:$0xff]   ;;  %v16026_v17 = vld [vmem:[#allocation3 + $0x48] sm:$0xff]   ;;  %v11648_v63 = vshll.u32 %v11517_v7, 16 }
 0x4da   : > { %v16027_v28 = vld [vmem:[#allocation3 + $0x54] sm:$0xff]   ;;  %v16029_v49 = vld [vmem:[#allocation3 + $0x60] sm:$0xff]   ;;  %v11652_v40 = vshrl.u32 %v11517_v7, 16  ;;  %v11639_v31 = vshrl.u32 %v11516_v29, 16 }
 0x4db   : > { %v10674_v45 = vrot.slane %v10672_v9, 4  ;;  %v10673_v54 = vsel %vm16924_vm14, %v13678_v59, %v10672_v9  ;;  %v16024_v9 = vld [vmem:[#allocation3 + $0x3c] sm:$0xff]   ;;  %v11594_v59 = vshll.u32 %v11510_v32, 16  ;;  %v18301_v15 = vrot.slane %v11648_v63, 5  ;;  %v11525_v21 = vld [vmem:[#allocation3 + $0x54] sm:$0xf] }
 0x4dc   : > { %15025 = vmatpush3.bf16.msra.mxu1 %v16015_v6  ;;  %v10679_v6 = vrot.slane %v10502_v25, 5  ;;  %v16020_v25 = vld [vmem:[#allocation3 + $0x18] sm:$0xff]   ;;  %v11654_v1 = vrot.slane %v11652_v40, 4  ;;  %v11714_v7 = vshll.u32 %v11525_v21, 16 }
 0x4dd   : > { %15026 = vmatprep.subr.bf16.mxu1 %v16016_v11 }
 0x4de   : > { %v10681_v48 = vrot.slane %v10679_v6, 4 }
 0x4df   : > { %14995 = vmatmul.mubr.bf16.gmra.mrb[8].mxu1 %v13688_v51 }
 0x4e0   : > { %14998 = vmatprep.mubr.bf16.mxu1 %v13689_v13  ;;  %15027 = vmatpush3.bf16.msra.mxu1 %v16016_v11  ;;  %v10675_v11 = vrot.slane %v10500_v43, 5  ;;  %v10683_v51 = vsel %vm16924_vm14, %v10681_v48, %v10682_v58  ;;  %v10680_v13 = vsel %vm16924_vm14, %v13679_v44, %v10679_v6  ;;  %v16034_v6 = vld [vmem:[#allocation10 + $0x1e0] sm:$0xff]   ;;  %v16030_v43 = vld [vmem:[#allocation3 + $0x6c] sm:$0xff]   ;;  %v16033_v48 = vld [vmem:[#allocation3 + $0x84] sm:$0xff]   ;;  %v11591_v58 = vshrl.u32 %v11510_v32, 16 }
 0x4e1   : > { %15028 = vmatprep.subr.bf16.mxu1 %v16017_v27  ;;  %v13695_v10 = vcombine.low %v10680_v13, %v10683_v51  ;;  %v11606_v44 = vrot.slane %v11604_v39, 4  ;;  %v11514_v51 = vld [vmem:[#allocation3 + $0x28] sm:$0xf]  ;;  %v11512_v13 = vld [vmem:[#allocation3 + $0x20] sm:$0x1] }
 0x4e2   : > { %v10676_v53 = vsel %vm16924_vm14, %v10674_v45, %v10675_v11  ;;  %v16032_v45 = vld [vmem:[#allocation3 + $0x78] sm:$0xff]   ;;  %v16035_v11 = vld [vmem:[#allocation3 + $0x90] sm:$0xff]   ;;  %v11624_v46 = vshll.u32 %v11514_v51, 16 }
 0x4e3   : > { %v11607_v20 = vor.u32 %v11606_v44, %v11602_v50  ;;  %v11526_v44 = vld [vmem:[#allocation3 + $0x58] sm:$0xf] }
 0x4e4   : > { %15029 = vmatpush3.bf16.msra.mxu1 %v16017_v27  ;;  %v13694_v27 = vcombine.low %v10673_v54, %v10676_v53  ;;  %v11513_v53 = vld [vmem:[#allocation3 + $0x24] sm:$0xf]  ;;  %v11593_v54 = vrot.slane %v11591_v58, 4 }
 0x4e5   : > { %15030 = vmatprep.subr.bf16.mxu1 %v16018_v34  ;;  %v11615_v30 = vshrl.u32 %v11513_v53, 16 }
 0x4e7   : > { %14999 = vmatmul.mubr.bf16.gmra.mrb[12].mxu1 %v13690_v62  ;;  %v10694_v62 = vsel %vm16924_vm14, %v13681_v55, %v10693_v16  ;;  %v16036_v16 = vld [vmem:[#allocation3 + $0x9c] sm:$0xff]   ;;  %v11617_v55 = vrot.slane %v11615_v30, 4 }
 0x4e8   : > { %15002 = vmatprep.mubr.bf16.mxu1 %v13691_v8  ;;  %15031 = vmatpush3.bf16.msra.mxu1 %v16018_v34  ;;  %v10696_v34 = vrot.slane %v10509_v2, 5  ;;  %v10510_v8 = vld [vmem:[#allocation3 + $0xc0] sm:$0xe]  ;;  %v16038_v2 = vld [vmem:[#allocation3 + $0xa8] sm:$0xff]  }
 0x4e9   : > { %15032 = vmatprep.subr.bf16.mxu1 %v16019_v5  ;;  %v13682_v0 = vrot.slane %v10510_v8, 9 }
 0x4ea   : > { %v10697_v61 = vsel %vm16924_vm14, %v10695_v33, %v10696_v34  ;;  %v11628_v33 = vshrl.u32 %v11514_v51, 16  ;;  %v11610_v34 = vshll.u32 %v11512_v13, 16  ;;  %v16042_v51 = vld [vmem:[#allocation3 + $0xcc] sm:$0xff]  }
 0x4eb   : > { %v13697_v19 = vcombine.low %v10694_v62, %v10697_v61  ;;  %v10701_v36 = vsel %vm16924_vm14, %v13682_v0, %v10700_v14  ;;  %v18299_v62 = vrot.slane %v11624_v46, 5  ;;  %v11520_v0 = vld [vmem:[#allocation3 + $0x40] sm:$0xf] }
 0x4ec   : > { %15033 = vmatpush3.bf16.msra.mxu1 %v16019_v5  ;;  %v10702_v5 = vrot.slane %v10700_v14, 4  ;;  %v11515_v14 = vld [vmem:[#allocation3 + $0x2c] sm:$0x1]  ;;  %v11630_v38 = vrot.slane %v11628_v33, 4  ;;  %v11720_v33 = vshll.u32 %v11526_v44, 16 }
 0x4ed   : > { %15066 = vmatprep.subr.bf16.mxu1 %v18262_v18 }
 0x4ee   : > { %v10704_v4 = vsel %vm16924_vm14, %v10702_v5, %v10703_v41  ;;  %v11519_v5 = vld [vmem:[#allocation3 + $0x3c] sm:$0xf]  ;;  %v11634_v41 = vshll.u32 %v11515_v14, 16 }
 0x4ef   : > { %15003 = vmatmul.mubr.bf16.gmra.mrb[16].mxu1 %v13692_v24  ;;  %v13698_v22 = vcombine.low %v10701_v36, %v10704_v4  ;;  %v16037_v24 = vld [vmem:[#allocation10 + $0x1e8] sm:$0xff]   ;;  %v16039_v4 = vld [vmem:[#allocation3 + $0xb4] sm:$0xff]   ;;  %v11612_v36 = vrot.slane %v11610_v34, 5 }
 0x4f0   : > { %15006 = vmatprep.mubr.bf16.mxu1 %v13693_v37  ;;  %v16043_v37 = vld [vmem:[#allocation10 + $0x1f8] sm:$0xff]  }
 0x4f7   : > { %15007 = vmatmul.mubr.bf16.gmra.mrb[20].mxu1 %v13694_v27  ;;  %v11596_v27 = vrot.slane %v11594_v59, 5 }
 0x4f8   : > { %15010 = vmatprep.mubr.bf16.mxu1 %v13695_v10  ;;  %v11618_v10 = vshll.u32 %v11513_v53, 16 }
 0x4f9   : > { %v11597_v56 = vor.u32 %v11596_v27, %v11593_v54 }
 0x4fa   : > { %v11620_v61 = vrot.slane %v11618_v10, 5  ;;  %v11711_v10 = vshrl.u32 %v11525_v21, 16 }
 0x4fb   : > { %v11598_v8 = vrot.slane %v11597_v56, 4 }
 0x4ff   : > { %15011 = vmatmul.mubr.bf16.gmra.mrb[24].mxu1 %v13696_v60  ;;  %v11642_v60 = vshll.u32 %v11516_v29, 16  ;;  %v11724_v29 = vshrl.u32 %v11526_v44, 16 }
 0x500   : > { %15014 = vmatprep.mubr.bf16.mxu1 %v13697_v19  ;;  %v11608_v19 = vrot.slane %v11607_v20, 4 }
 0x507   : > { %15015 = vmatmul.mubr.bf16.gmra.mrb[28].mxu1 %v13698_v22  ;;  %v11621_v22 = vor.u32 %v11620_v61, %v11617_v55 }
 0x508   : > { %15034 = vmatprep.mubr.bf16.mxu1 %v16020_v25  ;;  %v11641_v25 = vrot.slane %v11639_v31, 4  ;;  %v11529_v31 = vld [vmem:[#allocation3 + $0x64] sm:$0xf] }
 0x50f   : > { %15035 = vmatmul.mubr.bf16.vlgmr.msra.gmra.mrb[0].mxu1 %v16021_v42  ;;  %v11644_v42 = vrot.slane %v11642_v60, 5 }
 0x510   : > { %15038 = vmatprep.mubr.bf16.mxu1 %v16023_v52  ;;  %15067 = vmatpush3.bf16.msra.mxu1 %v18262_v18  ;;  %v16040_v18 = vld [vmem:[#allocation10 + $0x1f0] sm:$0xff]   ;;  %v11631_v52 = vor.u32 %v11630_v38, %v18299_v62 }
 0x511   : > { %15068 = vmatprep.subr.bf16.mxu1 %v16025_v47  ;;  %v11645_v12 = vor.u32 %v11644_v42, %v11641_v25  ;;  %v11744_v25 = vshll.u32 %v11529_v31, 16  ;;  %v11748_v42 = vshrl.u32 %v11529_v31, 16 }
 0x512   : > { %v11632_v58 = vrot.slane %v11631_v52, 4 }
 0x513   : > { %v11646_v56 = vrot.slane %v11645_v12, 4 }
 0x514   : > { %15069 = vmatpush3.bf16.msra.mxu1 %v16025_v47  ;;  %v16041_v47 = vld [vmem:[#allocation3 + $0xc0] sm:$0xff]  }
 0x515   : > { %15070 = vmatprep.subr.bf16.mxu1 %v16028_v26 }
 0x517   : > { %15039 = vmatmul.mubr.bf16.gmra.mrb[4].mxu1 %v16024_v9  ;;  %v11523_v9 = vld [vmem:[#allocation3 + $0x4c] sm:$0xf] }
 0x518   : > { %15042 = vmatprep.mubr.bf16.mxu1 %v16026_v17  ;;  %15071 = vmatpush3.bf16.msra.mxu1 %v16028_v26  ;;  %v11663_v26 = vshrl.u32 %v11519_v5, 16  ;;  %v11518_v17 = vld [vmem:[#allocation3 + $0x38] sm:$0x1]  ;;  %v11696_v32 = vshll.u32 %v11523_v9, 16 }
 0x519   : > { %15072 = vmatprep.subr.bf16.mxu1 %v16031_v3  ;;  %v11658_v59 = vshll.u32 %v11518_v17, 16  ;;  %v11532_v17 = vld [vmem:[#allocation3 + $0x70] sm:$0xf] }
 0x51a   : > { %v11665_v53 = vrot.slane %v11663_v26, 4  ;;  %v11772_v21 = vshrl.u32 %v11532_v17, 16 }
 0x51b   : > { %v11660_v34 = vrot.slane %v11658_v59, 5 }
 0x51c   : > { %15073 = vmatpush3.bf16.msra.mxu1 %v16031_v3  ;;  %v11613_v3 = vsel %vm16683_vm11, %v11608_v19, %v11612_v36  ;;  %v11524_v19 = vld [vmem:[#allocation3 + $0x50] sm:$0x1]  ;;  %v11651_v36 = vsel %vm16683_vm11, %v11646_v56, %v18301_v15  ;;  %v11774_v56 = vrot.slane %v11772_v21, 4 }
 0x51d   : > { %15074 = vmatprep.subr.bf16.mxu1 %v16034_v6 }
 0x51f   : > { %15043 = vmatmul.mubr.bf16.gmra.mrb[8].mxu1 %v16027_v28  ;;  %v11676_v28 = vshrl.u32 %v11520_v0, 16 }
 0x520   : > { %15046 = vmatprep.mubr.bf16.mxu1 %v16029_v49  ;;  %15075 = vmatpush3.bf16.msra.mxu1 %v16034_v6  ;;  %v11672_v6 = vshll.u32 %v11520_v0, 16  ;;  %v11636_v49 = vrot.slane %v11634_v41, 5  ;;  %v18322_v0 = vrot.slane %v11720_v33, 5 }
 0x521   : > { %15076 = vmatprep.subr.bf16.mxu1 %v16037_v24 }
 0x522   : > { %v11637_v20 = vsel %vm16683_vm11, %v11632_v58, %v11636_v49 }
 0x524   : > { %15077 = vmatpush3.bf16.msra.mxu1 %v16037_v24  ;;  %v11603_v24 = vsel %vm16683_vm11, %v11598_v8, %v11602_v50  ;;  %v11678_v50 = vrot.slane %v11676_v28, 4  ;;  %v11716_v8 = vrot.slane %v11714_v7, 5  ;;  %v11527_v28 = vld [vmem:[#allocation3 + $0x5c] sm:$0x1]  ;;  %v11530_v7 = vld [vmem:[#allocation3 + $0x68] sm:$0x1] }
 0x525   : > { %15078 = vmatprep.subr.bf16.mxu1 %v16040_v18  ;;  %v13731_v39 = vcombine.low %v11603_v24, %v11613_v3  ;;  %v11706_v3 = vshll.u32 %v11524_v19, 16  ;;  %v11537_v19 = vld [vmem:[#allocation3 + $0x84] sm:$0xf] }
 0x527   : > { %15047 = vmatmul.mubr.bf16.gmra.mrb[12].mxu1 %v16030_v43  ;;  %v11666_v43 = vshll.u32 %v11519_v5, 16  ;;  %v11713_v5 = vrot.slane %v11711_v10, 4  ;;  %v11708_v59 = vrot.slane %v11706_v3, 5  ;;  %v16046_v10 = vld [vmem:[#allocation10 + $0x210] sm:$0xff]  }
 0x528   : > { %15050 = vmatprep.mubr.bf16.mxu1 %v16032_v45  ;;  %15079 = vmatpush3.bf16.msra.mxu1 %v16040_v18  ;;  %v11655_v18 = vor.u32 %v11654_v1, %v18301_v15  ;;  %v11622_v45 = vrot.slane %v11621_v22, 4 }
 0x529   : > { %15080 = vmatprep.subr.bf16.mxu1 %v16043_v37  ;;  %v11668_v30 = vrot.slane %v11666_v43, 5  ;;  %v11717_v24 = vor.u32 %v11716_v8, %v11713_v5  ;;  %v16045_v43 = vld [vmem:[#allocation10 + $0x208] sm:$0xff]   ;;  %v11533_v8 = vld [vmem:[#allocation3 + $0x74] sm:$0x1] }
 0x52a   : > { %v11656_v13 = vrot.slane %v11655_v18, 4  ;;  %v11627_v40 = vsel %vm16683_vm11, %v11622_v45, %v18299_v62  ;;  %v11528_v62 = vld [vmem:[#allocation3 + $0x60] sm:$0xf] }
 0x52b   : > { %v11669_v38 = vor.u32 %v11668_v30, %v11665_v53  ;;  %v13732_v41 = vcombine.low %v11627_v40, %v11637_v20  ;;  %v11735_v49 = vshrl.u32 %v11528_v62, 16  ;;  %v11738_v18 = vshll.u32 %v11528_v62, 16 }
 0x52c   : > { %15081 = vmatpush3.bf16.msra.mxu1 %v16043_v37  ;;  %v11522_v37 = vld [vmem:[#allocation3 + $0x48] sm:$0xf]  ;;  %v11661_v60 = vsel %vm16683_vm11, %v11656_v13, %v11660_v34  ;;  %v11730_v53 = vshll.u32 %v11527_v28, 16  ;;  %v11540_v28 = vld [vmem:[#allocation3 + $0x90] sm:$0xf] }
 0x52d   : > { %15114 = vmatprep.subr.bf16.mxu1 %v18296_v57  ;;  %v11687_v54 = vshrl.u32 %v11522_v37, 16  ;;  %v11690_v27 = vshll.u32 %v11522_v37, 16  ;;  %v13733_v52 = vcombine.low %v11651_v36, %v11661_v60 }
 0x52f   : > { %15051 = vmatmul.mubr.bf16.gmra.mrb[16].mxu1 %v16033_v48  ;;  %v11521_v48 = vld [vmem:[#allocation3 + $0x44] sm:$0x1]  ;;  %v11689_v55 = vrot.slane %v11687_v54, 4  ;;  %v11692_v61 = vrot.slane %v11690_v27, 5  ;;  %v11740_v54 = vrot.slane %v11738_v18, 5  ;;  %v16048_v18 = vld [vmem:[#allocation10 + $0x220] sm:$0xff]  }
 0x530   : > { %15054 = vmatprep.mubr.bf16.mxu1 %v16035_v11  ;;  %v11700_v11 = vshrl.u32 %v11523_v9, 16  ;;  %v11682_v63 = vshll.u32 %v11521_v48, 16  ;;  %v18328_v48 = vrot.slane %v11744_v25, 5  ;;  %v11535_v27 = vld [vmem:[#allocation3 + $0x7c] sm:$0xf] }
 0x531   : > { %v11693_v9 = vor.u32 %v11692_v61, %v11689_v55  ;;  %v11792_v40 = vshll.u32 %v11535_v27, 16  ;;  %v11538_v55 = vld [vmem:[#allocation3 + $0x88] sm:$0xf] }
 0x532   : > { %v11702_v46 = vrot.slane %v11700_v11, 4  ;;  %v11684_v22 = vrot.slane %v11682_v63, 5  ;;  %v11768_v11 = vshll.u32 %v11532_v17, 16  ;;  %v11732_v63 = vrot.slane %v11730_v53, 5 }
 0x533   : > { %v11694_v58 = vrot.slane %v11693_v9, 4  ;;  %v11820_v25 = vshrl.u32 %v11538_v55, 16 }
 0x534   : > { %v18339_v20 = vrot.slane %v11768_v11, 5 }
 0x535   : > { %v11822_v11 = vrot.slane %v11820_v25, 4 }
 0x536   : > { %v11775_v36 = vor.u32 %v11774_v56, %v18339_v20 }
 0x537   : > { %15055 = vmatmul.mubr.bf16.gmra.mrb[20].mxu1 %v16036_v16  ;;  %v18309_v16 = vrot.slane %v11672_v6, 5  ;;  %v11670_v6 = vrot.slane %v11669_v38, 4  ;;  %v11754_v38 = vshll.u32 %v11530_v7, 16  ;;  %v11543_v7 = vld [vmem:[#allocation3 + $0x9c] sm:$0xf] }
 0x538   : > { %15058 = vmatprep.mubr.bf16.mxu1 %v16038_v2  ;;  %v18311_v2 = vrot.slane %v11696_v32, 5  ;;  %v11750_v32 = vrot.slane %v11748_v42, 4  ;;  %v11541_v42 = vld [vmem:[#allocation3 + $0x94] sm:$0xf] }
 0x539   : > { %v11679_v14 = vor.u32 %v11678_v50, %v18309_v16  ;;  %v11675_v44 = vsel %vm16683_vm11, %v11670_v6, %v18309_v16  ;;  %v11737_v50 = vrot.slane %v11735_v49, 4  ;;  %v11534_v16 = vld [vmem:[#allocation3 + $0x78] sm:$0xf]  ;;  %v11756_v17 = vrot.slane %v11754_v38, 5 }
 0x53a   : > { %v11703_v1 = vor.u32 %v11702_v46, %v18311_v2  ;;  %v11699_v34 = vsel %vm16683_vm11, %v11694_v58, %v18311_v2  ;;  %v16047_v2 = vld [vmem:[#allocation10 + $0x218] sm:$0xff]   ;;  %v11778_v6 = vshll.u32 %v11533_v8, 16  ;;  %v11539_v58 = vld [vmem:[#allocation3 + $0x8c] sm:$0x1] }
 0x53b   : > { %v11680_v26 = vrot.slane %v11679_v14, 4  ;;  %v11796_v14 = vshrl.u32 %v11535_v27, 16  ;;  %v11741_v60 = vor.u32 %v11740_v54, %v11737_v50  ;;  %v11831_v50 = vshrl.u32 %v11540_v28, 16 }
 0x53c   : > { %v11704_v37 = vrot.slane %v11703_v1, 4  ;;  %v11783_v1 = vshrl.u32 %v11534_v16, 16  ;;  %v11834_v54 = vshll.u32 %v11540_v28, 16  ;;  %v11826_v56 = vshll.u32 %v11539_v58, 16 }
 0x53d   : > { %v11742_v3 = vrot.slane %v11741_v60, 4  ;;  %v11547_v60 = vld [vmem:[#allocation3 + $0xac] sm:$0xf] }
 0x53e   : > { %v11709_v13 = vsel %vm16683_vm11, %v11704_v37, %v11708_v59  ;;  %v11844_v37 = vshrl.u32 %v11541_v42, 16  ;;  %v11888_v25 = vshll.u32 %v11547_v60, 16 }
 0x53f   : > { %15059 = vmatmul.mubr.bf16.gmra.mrb[24].mxu1 %v16039_v4  ;;  %v11726_v4 = vrot.slane %v11724_v29, 4  ;;  %v13735_v61 = vcombine.low %v11699_v34, %v11709_v13 }
 0x540   : > { %15062 = vmatprep.mubr.bf16.mxu1 %v16041_v47  ;;  %v11531_v47 = vld [vmem:[#allocation3 + $0x6c] sm:$0xf] }
 0x541   : > { %v11727_v45 = vor.u32 %v11726_v4, %v18322_v0  ;;  %v11759_v12 = vshrl.u32 %v11531_v47, 16  ;;  %v11762_v15 = vshll.u32 %v11531_v47, 16  ;;  %v11786_v4 = vshll.u32 %v11534_v16, 16 }
 0x542   : > { %v11798_v47 = vrot.slane %v11796_v14, 4  ;;  %v11833_v14 = vrot.slane %v11831_v50, 4 }
 0x543   : > { %v11728_v30 = vrot.slane %v11727_v45, 4  ;;  %v11761_v46 = vrot.slane %v11759_v12, 4  ;;  %v11764_v33 = vrot.slane %v11762_v15, 5  ;;  %v11788_v49 = vrot.slane %v11786_v4, 5  ;;  %v11536_v15 = vld [vmem:[#allocation3 + $0x80] sm:$0x1] }
 0x544   : > { %v11776_v12 = vrot.slane %v11775_v36, 4  ;;  %v11802_v13 = vshll.u32 %v11536_v15, 16 }
 0x545   : > { %v11733_v5 = vsel %vm16683_vm11, %v11728_v30, %v11732_v63  ;;  %v11542_v63 = vld [vmem:[#allocation3 + $0x98] sm:$0x1] }
 0x547   : > { %15063 = vmatmul.mubr.bf16.gmra.mrb[28].mxu1 %v16042_v51  ;;  %v11718_v51 = vrot.slane %v11717_v24, 4  ;;  %v11785_v24 = vrot.slane %v11783_v1, 4 }
 0x548   : > { %15082 = vmatprep.mubr.bf16.mxu1 %v13731_v39  ;;  %v11685_v39 = vsel %vm16683_vm11, %v11680_v26, %v11684_v22  ;;  %v11816_v22 = vshll.u32 %v11538_v55, 16  ;;  %v11810_v26 = vshll.u32 %v11537_v19, 16  ;;  %v11836_v55 = vrot.slane %v11834_v54, 5  ;;  %v11548_v54 = vld [vmem:[#allocation3 + $0xb0] sm:$0x1] }
 0x549   : > { %v13734_v29 = vcombine.low %v11675_v44, %v11685_v39  ;;  %v11723_v31 = vsel %vm16683_vm11, %v11718_v51, %v18322_v0  ;;  %v18350_v0 = vrot.slane %v11792_v40, 5  ;;  %v11747_v44 = vsel %vm16683_vm11, %v11742_v3, %v18328_v48  ;;  %v11544_v40 = vld [vmem:[#allocation3 + $0xa0] sm:$0xf] }
 0x54a   : > { %v13736_v9 = vcombine.low %v11723_v31, %v11733_v5  ;;  %v11812_v53 = vrot.slane %v11810_v26, 5  ;;  %v11780_v51 = vrot.slane %v11778_v6, 5  ;;  %v11789_v27 = vor.u32 %v11788_v49, %v11785_v24  ;;  %v11545_v6 = vld [vmem:[#allocation3 + $0xa4] sm:$0x1]  ;;  %v16051_v49 = vld [vmem:[#allocation10 + $0x238] sm:$0xff]  }
 0x54b   : > { %v11799_v39 = vor.u32 %v11798_v47, %v18350_v0  ;;  %v11858_v31 = vshll.u32 %v11543_v7, 16  ;;  %v11804_v5 = vrot.slane %v11802_v13, 5  ;;  %v11864_v1 = vshll.u32 %v11544_v40, 16 }
 0x54c   : > { %v11868_v4 = vshrl.u32 %v11544_v40, 16  ;;  %v11898_v40 = vshll.u32 %v11548_v54, 16 }
 0x54d   : > { %v11800_v16 = vrot.slane %v11799_v39, 4 }
 0x54f   : > { %15083 = vmatmul.mubr.bf16.vlgmr.msra.gmra.mrb[0].mxu1 %v13732_v41  ;;  %v11765_v41 = vor.u32 %v11764_v33, %v11761_v46  ;;  %v16049_v46 = vld [vmem:[#allocation10 + $0x228] sm:$0xff]   ;;  %v11805_v36 = vsel %vm16683_vm11, %v11800_v16, %v11804_v5 }
 0x550   : > { %15086 = vmatprep.mubr.bf16.mxu1 %v13733_v52  ;;  %15115 = vmatpush3.bf16.msra.mxu1 %v18296_v57  ;;  %v11751_v57 = vor.u32 %v11750_v32, %v18328_v48  ;;  %v11807_v52 = vshrl.u32 %v11537_v19, 16  ;;  %v18352_v32 = vrot.slane %v11816_v22, 5  ;;  %v11790_v19 = vrot.slane %v11789_v27, 4 }
 0x551   : > { %15116 = vmatprep.subr.bf16.mxu1 %v16045_v43  ;;  %v11766_v45 = vrot.slane %v11765_v41, 4  ;;  %v16050_v41 = vld [vmem:[#allocation10 + $0x230] sm:$0xff]   ;;  %v11850_v22 = vshll.u32 %v11542_v63, 16 }
 0x552   : > { %v11752_v62 = vrot.slane %v11751_v57, 4  ;;  %v11809_v59 = vrot.slane %v11807_v52, 4  ;;  %v11823_v57 = vor.u32 %v11822_v11, %v18352_v32  ;;  %v11837_v52 = vor.u32 %v11836_v55, %v11833_v14 }
 0x553   : > { %v11771_v48 = vsel %vm16683_vm11, %v11766_v45, %v18339_v20  ;;  %v11828_v20 = vrot.slane %v11826_v56, 5  ;;  %v11795_v3 = vsel %vm16683_vm11, %v11790_v19, %v18350_v0  ;;  %v11870_v45 = vrot.slane %v11868_v4, 4  ;;  %v11550_v0 = vld [vmem:[#allocation3 + $0xb8] sm:$0xf] }
 0x554   : > { %15117 = vmatpush3.bf16.msra.mxu1 %v16045_v43  ;;  %v11840_v43 = vshll.u32 %v11541_v42, 16  ;;  %v11757_v21 = vsel %vm16683_vm11, %v11752_v62, %v11756_v17  ;;  %v11813_v34 = vor.u32 %v11812_v53, %v11809_v59  ;;  %v11546_v62 = vld [vmem:[#allocation3 + $0xa8] sm:$0xf]  ;;  %v11892_v42 = vshrl.u32 %v11547_v60, 16  ;;  %v11555_v60 = vld [vmem:[#allocation3 + $0xcc] sm:$0xf] }
 0x555   : > { %15118 = vmatprep.subr.bf16.mxu1 %v16046_v10  ;;  %v13737_v33 = vcombine.low %v11747_v44, %v11757_v21  ;;  %v11879_v28 = vshrl.u32 %v11546_v62, 16  ;;  %v11882_v24 = vshll.u32 %v11546_v62, 16  ;;  %v11852_v15 = vrot.slane %v11850_v22, 5  ;;  %v11553_v44 = vld [vmem:[#allocation3 + $0xc4] sm:$0xf] }
 0x556   : > { %v18360_v30 = vrot.slane %v11840_v43, 5  ;;  %v11814_v47 = vrot.slane %v11813_v34, 4  ;;  %v18378_v11 = vrot.slane %v11888_v25, 5  ;;  %v11894_v21 = vrot.slane %v11892_v42, 4 }
 0x557   : > { %15087 = vmatmul.mubr.bf16.gmra.mrb[4].mxu1 %v13734_v29  ;;  %v11781_v29 = vsel %vm16683_vm11, %v11776_v12, %v11780_v51  ;;  %v11549_v12 = vld [vmem:[#allocation3 + $0xb4] sm:$0xf]  ;;  %v11838_v58 = vrot.slane %v11837_v52, 4  ;;  %v11874_v53 = vshll.u32 %v11545_v6, 16  ;;  %v11881_v27 = vrot.slane %v11879_v28, 4 }
 0x558   : > { %15090 = vmatprep.mubr.bf16.mxu1 %v13735_v61  ;;  %15119 = vmatpush3.bf16.msra.mxu1 %v16046_v10  ;;  %v11846_v10 = vrot.slane %v11844_v37, 4  ;;  %v11855_v61 = vshrl.u32 %v11543_v7, 16  ;;  %v13738_v38 = vcombine.low %v11771_v48, %v11781_v29  ;;  %v18376_v37 = vrot.slane %v11864_v1, 5  ;;  %v11552_v29 = vld [vmem:[#allocation3 + $0xc0] sm:$0xf] }
 0x559   : > { %15120 = vmatprep.subr.bf16.mxu1 %v16047_v2  ;;  %v11819_v39 = vsel %vm16683_vm11, %v11814_v47, %v18352_v32  ;;  %v11884_v13 = vrot.slane %v11882_v24, 5  ;;  %v11903_v7 = vshrl.u32 %v11549_v12, 16  ;;  %v11895_v32 = vor.u32 %v11894_v21, %v18378_v11  ;;  %v11554_v6 = vld [vmem:[#allocation3 + $0xc8] sm:$0x1] }
 0x55a   : > { %v11847_v8 = vor.u32 %v11846_v10, %v18360_v30  ;;  %v11857_v26 = vrot.slane %v11855_v61, 4  ;;  %v11871_v10 = vor.u32 %v11870_v45, %v18376_v37  ;;  %v11936_v56 = vshll.u32 %v11553_v44, 16 }
 0x55b   : > { %v11940_v48 = vshrl.u32 %v11553_v44, 16  ;;  %v11843_v16 = vsel %vm16683_vm11, %v11838_v58, %v18360_v30  ;;  %v11876_v63 = vrot.slane %v11874_v53, 5  ;;  %v11885_v55 = vor.u32 %v11884_v13, %v11881_v27  ;;  %v11551_v30 = vld [vmem:[#allocation3 + $0xbc] sm:$0x1]  ;;  %v11557_v58 = vld [vmem:[#allocation3 + $0xd4] sm:$0x1] }
 0x55c   : > { %15121 = vmatpush3.bf16.msra.mxu1 %v16047_v2  ;;  %v11824_v2 = vrot.slane %v11823_v57, 4  ;;  %v11848_v17 = vrot.slane %v11847_v8, 4  ;;  %v11906_v57 = vshll.u32 %v11549_v12, 16  ;;  %v11927_v61 = vshrl.u32 %v11552_v29, 16 }
 0x55d   : > { %15122 = vmatprep.subr.bf16.mxu1 %v16048_v18  ;;  %v11872_v19 = vrot.slane %v11871_v10, 4  ;;  %v11905_v5 = vrot.slane %v11903_v7, 4  ;;  %v11938_v1 = vrot.slane %v11936_v56, 5  ;;  %v11942_v4 = vrot.slane %v11940_v48, 4  ;;  %v12329_v10 = vld [vmem:[#allocation3 + $0x1c] sm:$0xf] }
 0x55e   : > { %v11829_v43 = vsel %vm16683_vm11, %v11824_v2, %v11828_v20  ;;  %v11853_v50 = vsel %vm16683_vm11, %v11848_v17, %v11852_v15  ;;  %v11896_v2 = vrot.slane %v11895_v32, 4  ;;  %v11908_v20 = vrot.slane %v11906_v57, 5 }
 0x55f   : > { %15091 = vmatmul.mubr.bf16.gmra.mrb[8].mxu1 %v13736_v9  ;;  %v11860_v9 = vrot.slane %v11858_v31, 5  ;;  %v13740_v51 = vcombine.low %v11819_v39, %v11829_v43  ;;  %v13741_v14 = vcombine.low %v11843_v16, %v11853_v50  ;;  %v11930_v31 = vshll.u32 %v11552_v29, 16 }
 0x560   : > { %15094 = vmatprep.mubr.bf16.mxu1 %v13737_v33  ;;  %15123 = vmatpush3.bf16.msra.mxu1 %v16048_v18  ;;  %v13739_v18 = vcombine.low %v11795_v3, %v11805_v36  ;;  %v11916_v33 = vshrl.u32 %v11550_v0, 16  ;;  %v11951_v62 = vshrl.u32 %v11555_v60, 16  ;;  %v11954_v36 = vshll.u32 %v11555_v60, 16  ;;  %v12328_v60 = vld [vmem:[#allocation3 + $0x18] sm:$0xe] }
 0x561   : > { %15124 = vmatprep.subr.bf16.mxu1 %v16049_v46  ;;  %v11861_v59 = vor.u32 %v11860_v9, %v11857_v26  ;;  %v11886_v42 = vrot.slane %v11885_v55, 4  ;;  %v11900_v47 = vrot.slane %v11898_v40, 5  ;;  %v11929_v52 = vrot.slane %v11927_v61, 4  ;;  %v12330_v40 = vld [vmem:[#allocation3 + $0x20] sm:$0x1] }
 0x562   : > { %v11932_v26 = vrot.slane %v11930_v31, 5  ;;  %v11877_v3 = vsel %vm16683_vm11, %v11872_v19, %v11876_v63  ;;  %v11909_v24 = vor.u32 %v11908_v20, %v11905_v5  ;;  %v11953_v43 = vrot.slane %v11951_v62, 4  ;;  %v12332_v55 = vld [vmem:[#allocation3 + $0x28] sm:$0xf] }
 0x563   : > { %v11862_v34 = vrot.slane %v11861_v59, 4  ;;  %v11901_v28 = vsel %vm16683_vm11, %v11896_v2, %v11900_v47  ;;  %v11956_v45 = vrot.slane %v11954_v36, 5  ;;  %v11946_v39 = vshll.u32 %v11554_v6, 16  ;;  %v12336_v36 = vld [vmem:[#allocation3 + $0x38] sm:$0x1] }
 0x564   : > { %15125 = vmatpush3.bf16.msra.mxu1 %v16049_v46  ;;  %v11912_v46 = vshll.u32 %v11550_v0, 16  ;;  %v11933_v0 = vor.u32 %v11932_v26, %v11929_v52  ;;  %v11910_v50 = vrot.slane %v11909_v24, 4  ;;  %v11970_v13 = vshll.u32 %v11557_v58, 16  ;;  %v12334_v47 = vld [vmem:[#allocation3 + $0x30] sm:$0xe] }
 0x565   : > { %15126 = vmatprep.subr.bf16.mxu1 %v16050_v41  ;;  %v11867_v9 = vsel %vm16683_vm11, %v11862_v34, %v18376_v37  ;;  %v11891_v37 = vsel %vm16683_vm11, %v11886_v42, %v18378_v11  ;;  %v11957_v54 = vor.u32 %v11956_v45, %v11953_v43  ;;  %v12458_v29 = vrot.slane %v12329_v10, 5  ;;  %v12341_v52 = vld [vmem:[#allocation3 + $0x4c] sm:$0xf]  ;;  %v12339_v45 = vld [vmem:[#allocation3 + $0x44] sm:$0x1] }
 0x566   : > { %v11914_v8 = vrot.slane %v11912_v46, 5  ;;  %v13742_v21 = vcombine.low %v11867_v9, %v11877_v3  ;;  %v13743_v59 = vcombine.low %v11891_v37, %v11901_v28  ;;  %v11934_v7 = vrot.slane %v11933_v0, 4  ;;  %v12337_v37 = vld [vmem:[#allocation3 + $0x3c] sm:$0xe] }
 0x567   : > { %15095 = vmatmul.mubr.bf16.gmra.mrb[12].mxu1 %v13738_v38  ;;  %v11556_v38 = vld [vmem:[#allocation3 + $0xd0] sm:$0xf]  ;;  %v11948_v46 = vrot.slane %v11946_v39, 5  ;;  %v11958_v57 = vrot.slane %v11957_v54, 4  ;;  %v11972_v48 = vrot.slane %v11970_v13, 5  ;;  %v12461_v19 = vrot.slane %v12330_v40, 5 }
 0x568   : > { %15098 = vmatprep.mubr.bf16.mxu1 %v13739_v18  ;;  %15127 = vmatpush3.bf16.msra.mxu1 %v16050_v41  ;;  %v11918_v41 = vrot.slane %v11916_v33, 4  ;;  %v11960_v22 = vshll.u32 %v11556_v38, 16  ;;  %v11964_v25 = vshrl.u32 %v11556_v38, 16  ;;  %v11943_v18 = vor.u32 %v11942_v4, %v11938_v1  ;;  %v12335_v38 = vld [vmem:[#allocation3 + $0x34] sm:$0xf] }
 0x569   : > { %15128 = vmatprep.subr.bf16.mxu1 %v16051_v49  ;;  %v11915_v32 = vsel %vm16683_vm11, %v11910_v50, %v11914_v8  ;;  %v11939_v34 = vsel %vm16683_vm11, %v11934_v7, %v11938_v1  ;;  %v12465_v5 = vrot.slane %v12332_v55, 5  ;;  %v12472_v20 = vrot.slane %v12335_v38, 5  ;;  %v12333_v4 = vld [vmem:[#allocation3 + $0x2c] sm:$0x1]  ;;  %v12344_v39 = vld [vmem:[#allocation3 + $0x58] sm:$0xf] }
 0x56a   : > { %v11919_v17 = vor.u32 %v11918_v41, %v11914_v8  ;;  %v11962_v12 = vrot.slane %v11960_v22, 5  ;;  %v11966_v15 = vrot.slane %v11964_v25, 4  ;;  %v13755_v41 = vrot.slane %v12328_v60, 9  ;;  %v12338_v25 = vld [vmem:[#allocation3 + $0x40] sm:$0xf] }
 0x56b   : > { %v12467_v62 = vrot.slane %v12465_v5, 4  ;;  %v12474_v22 = vrot.slane %v12472_v20, 4  ;;  %v12468_v42 = vrot.slane %v12333_v4, 5  ;;  %v12475_v26 = vrot.slane %v12336_v36, 5  ;;  %v12353_v40 = vld [vmem:[#allocation3 + $0x7c] sm:$0xf] }
 0x56c   : > { %15129 = vmatpush3.bf16.msra.mxu1 %v16051_v49  ;;  %v11922_v49 = vshll.u32 %v11551_v30, 16  ;;  %v11920_v53 = vrot.slane %v11919_v17, 4  ;;  %v11967_v27 = vor.u32 %v11966_v15, %v11962_v12  ;;  %v11963_v61 = vsel %vm16683_vm11, %v11958_v57, %v11962_v12  ;;  %v12348_v57 = vld [vmem:[#allocation3 + $0x68] sm:$0x1]  ;;  %v12354_v4 = vld [vmem:[#allocation3 + $0x80] sm:$0x1] }
 0x56d   : > { %v12459_v1 = vsel %vm16924_vm14, %v13755_v41, %v12458_v29  ;;  %v13756_v9 = vrot.slane %v12331_v23, 9  ;;  %v12469_v3 = vsel %vm16924_vm14, %v12467_v62, %v12468_v42  ;;  %v12479_v17 = vrot.slane %v12338_v25, 5  ;;  %v12356_v36 = vld [vmem:[#allocation3 + $0x88] sm:$0xf]  ;;  %v12359_v25 = vld [vmem:[#allocation3 + $0x94] sm:$0xf] }
 0x56e   : > { %v11924_v44 = vrot.slane %v11922_v49, 5  ;;  %v11968_v56 = vrot.slane %v11967_v27, 4  ;;  %v13757_v6 = vrot.slane %v12334_v47, 9  ;;  %v12476_v28 = vsel %vm16924_vm14, %v12474_v22, %v12475_v26  ;;  %v12352_v22 = vld [vmem:[#allocation3 + $0x78] sm:$0xe] }
 0x56f   : > { %15099 = vmatmul.mubr.bf16.gmra.mrb[16].mxu1 %v13740_v51  ;;  %v11944_v51 = vrot.slane %v11943_v18, 4  ;;  %v12486_v24 = vrot.slane %v12341_v52, 5  ;;  %v12466_v49 = vsel %vm16924_vm14, %v13756_v9, %v12465_v5  ;;  %v12481_v15 = vrot.slane %v12479_v17, 4 }
 0x570   : > { %15102 = vmatprep.mubr.bf16.mxu1 %v13741_v14  ;;  %v11925_v33 = vsel %vm16683_vm11, %v11920_v53, %v11924_v44  ;;  %v12460_v14 = vrot.slane %v12458_v29, 4  ;;  %v11973_v31 = vsel %vm16683_vm11, %v11968_v56, %v11972_v48  ;;  %v13772_v18 = vcombine.low %v12466_v49, %v12469_v3  ;;  %v12347_v53 = vld [vmem:[#allocation3 + $0x64] sm:$0xf]  ;;  %v12343_v56 = vld [vmem:[#allocation3 + $0x54] sm:$0xe] }
 0x571   : > { %v11949_v11 = vsel %vm16683_vm11, %v11944_v51, %v11948_v46  ;;  %v13744_v16 = vcombine.low %v11915_v32, %v11925_v33  ;;  %v13746_v8 = vcombine.low %v11963_v61, %v11973_v31  ;;  %v12473_v43 = vsel %vm16924_vm14, %v13757_v6, %v12472_v20  ;;  %v12357_v49 = vld [vmem:[#allocation3 + $0x8c] sm:$0x1] }
 0x572   : > { %v13745_v63 = vcombine.low %v11939_v34, %v11949_v11  ;;  %v12462_v2 = vsel %vm16924_vm14, %v12460_v14, %v12461_v19  ;;  %v13773_v12 = vcombine.low %v12473_v43, %v12476_v28  ;;  %v12488_v0 = vrot.slane %v12486_v24, 4  ;;  %v12345_v11 = vld [vmem:[#allocation3 + $0x5c] sm:$0x1] }
 0x573   : > { %v13771_v30 = vcombine.low %v12459_v1, %v12462_v2  ;;  %v12482_v58 = vrot.slane %v12339_v45, 5  ;;  %v13758_v51 = vrot.slane %v12337_v37, 9  ;;  %v12493_v54 = vrot.slane %v12344_v39, 5  ;;  %v12351_v2 = vld [vmem:[#allocation3 + $0x74] sm:$0x1] }
 0x574   : > { %v12500_v10 = vrot.slane %v12347_v53, 5  ;;  %v12496_v34 = vrot.slane %v12345_v11, 5  ;;  %v12503_v14 = vrot.slane %v12348_v57, 5  ;;  %v13760_v55 = vrot.slane %v12343_v56, 9  ;;  %v12360_v45 = vld [vmem:[#allocation3 + $0x98] sm:$0x1] }
 0x575   : > { %v12483_v50 = vsel %vm16924_vm14, %v12481_v15, %v12482_v58  ;;  %v12480_v7 = vsel %vm16924_vm14, %v13758_v51, %v12479_v17  ;;  %v12495_v32 = vrot.slane %v12493_v54, 4  ;;  %v12514_v19 = vrot.slane %v12353_v40, 5  ;;  %v12365_v39 = vld [vmem:[#allocation3 + $0xac] sm:$0xf]  ;;  %v12366_v11 = vld [vmem:[#allocation3 + $0xb0] sm:$0x1] }
 0x576   : > { %v13774_v46 = vcombine.low %v12480_v7, %v12483_v50  ;;  %v12502_v48 = vrot.slane %v12500_v10, 4  ;;  %v12494_v5 = vsel %vm16924_vm14, %v13760_v55, %v12493_v54  ;;  %v12510_v23 = vrot.slane %v12351_v2, 5  ;;  %v12363_v7 = vld [vmem:[#allocation3 + $0xa4] sm:$0x1]  ;;  %v12368_v57 = vld [vmem:[#allocation3 + $0xb8] sm:$0xf] }
 0x577   : > { %15103 = vmatmul.mubr.bf16.gmra.mrb[20].mxu1 %v13742_v21  ;;  %v12342_v21 = vld [vmem:[#allocation3 + $0x50] sm:$0x1]  ;;  %v12497_v61 = vsel %vm16924_vm14, %v12495_v32, %v12496_v34  ;;  %v12516_v62 = vrot.slane %v12514_v19, 4  ;;  %v12517_v42 = vrot.slane %v12354_v4, 5  ;;  %v12521_v26 = vrot.slane %v12356_v36, 5 }
 0x578   : > { %15106 = vmatprep.mubr.bf16.mxu1 %v13743_v59  ;;  %v12340_v59 = vld [vmem:[#allocation3 + $0x48] sm:$0xe]  ;;  %v12489_v44 = vrot.slane %v12342_v21, 5  ;;  %v12504_v38 = vsel %vm16924_vm14, %v12502_v48, %v12503_v14  ;;  %v13763_v9 = vrot.slane %v12352_v22, 9  ;;  %v12528_v17 = vrot.slane %v12359_v25, 5 }
 0x579   : > { %v13759_v27 = vrot.slane %v12340_v59, 9  ;;  %v12518_v3 = vsel %vm16924_vm14, %v12516_v62, %v12517_v42  ;;  %v12523_v43 = vrot.slane %v12521_v26, 4  ;;  %v12362_v21 = vld [vmem:[#allocation3 + $0xa0] sm:$0xf]  ;;  %v12524_v37 = vrot.slane %v12357_v49, 5 }
 0x57a   : > { %v12490_v13 = vsel %vm16924_vm14, %v12488_v0, %v12489_v44  ;;  %v12530_v15 = vrot.slane %v12528_v17, 4  ;;  %v12358_v0 = vld [vmem:[#allocation3 + $0x90] sm:$0xe]  ;;  %v12531_v58 = vrot.slane %v12360_v45, 5  ;;  %v12535_v44 = vrot.slane %v12362_v21, 5  ;;  %v12956_v21 = vld [vmem:[%s16429_s6 + $0x10] sm:$0xff] }
 0x57b   : > { %v12487_v33 = vsel %vm16924_vm14, %v13759_v27, %v12486_v24  ;;  %v12515_v24 = vsel %vm16924_vm14, %v13763_v9, %v12514_v19  ;;  %v12525_v53 = vsel %vm16924_vm14, %v12523_v43, %v12524_v37  ;;  %v13765_v51 = vrot.slane %v12358_v0, 9  ;;  %v12364_v48 = vld [vmem:[#allocation3 + $0xa8] sm:$0xe]  ;;  %v12370_v62 = vld [vmem:[#allocation3 + $0xc0] sm:$0xe] }
 0x57c   : > { %v13775_v29 = vcombine.low %v12487_v33, %v12490_v13  ;;  %v12532_v50 = vsel %vm16924_vm14, %v12530_v15, %v12531_v58  ;;  %v12542_v54 = vrot.slane %v12365_v39, 5  ;;  %v12537_v33 = vrot.slane %v12535_v44, 4  ;;  %v12373_v22 = vld [vmem:[#allocation3 + $0xcc] sm:$0xe]  ;;  %v12375_v25 = vld [vmem:[#allocation3 + $0xd4] sm:$0x1] }
 0x57d   : > { %v12538_v56 = vrot.slane %v12363_v7, 5  ;;  %v12545_v34 = vrot.slane %v12366_v11, 5  ;;  %v12549_v14 = vrot.slane %v12368_v57, 5  ;;  %v13767_v55 = vrot.slane %v12364_v48, 9  ;;  %v12954_v39 = vld [vmem:[%s16429_s6] sm:$0xff] }
 0x57e   : > { %v12544_v32 = vrot.slane %v12542_v54, 4  ;;  %v12958_v48 = vld [vmem:[%s16429_s6 + $0x20] sm:$0xff] }
 0x57f   : > { %15107 = vmatmul.mubr.bf16.gmra.mrb[24].mxu1 %v13744_v16  ;;  %v12350_v16 = vld [vmem:[#allocation3 + $0x70] sm:$0xf]  ;;  %v12539_v40 = vsel %vm16924_vm14, %v12537_v33, %v12538_v56  ;;  %v12543_v19 = vsel %vm16924_vm14, %v13767_v55, %v12542_v54  ;;  %v12551_v2 = vrot.slane %v12549_v14, 4 }
 0x580   : > { %15110 = vmatprep.mubr.bf16.mxu1 %v13745_v63  ;;  %v12346_v63 = vld [vmem:[#allocation3 + $0x60] sm:$0xe]  ;;  %v12507_v31 = vrot.slane %v12350_v16, 5  ;;  %v12371_v16 = vld [vmem:[#allocation3 + $0xc4] sm:$0xf] }
 0x581   : > { %v13761_v60 = vrot.slane %v12346_v63, 9 }
 0x582   : > { %v12509_v1 = vrot.slane %v12507_v31, 4 }
 0x583   : > { %v12501_v41 = vsel %vm16924_vm14, %v13761_v60, %v12500_v10  ;;  %v12529_v10 = vsel %vm16924_vm14, %v13765_v51, %v12528_v17 }
 0x584   : > { %v13777_v20 = vcombine.low %v12501_v41, %v12504_v38  ;;  %v12511_v52 = vsel %vm16924_vm14, %v12509_v1, %v12510_v23  ;;  %v12367_v1 = vld [vmem:[#allocation3 + $0xb4] sm:$0xe] }
 0x585   : > { %v13768_v42 = vrot.slane %v12367_v1, 9  ;;  %v12964_v1 = vld [vmem:[%s16429_s6 + $0x50] sm:$0xff] }
 0x587   : > { %15111 = vmatmul.mubr.bf16.gmra.mrb[28].mxu1 %v13746_v8  ;;  %v13776_v8 = vcombine.low %v12494_v5, %v12497_v61  ;;  %v12546_v61 = vsel %vm16924_vm14, %v12544_v32, %v12545_v34  ;;  %v12369_v5 = vld [vmem:[#allocation3 + $0xbc] sm:$0x1]  ;;  %v12550_v9 = vsel %vm16924_vm14, %v13768_v42, %v12549_v14  ;;  %v12960_v32 = vld [vmem:[%s16429_s6 + $0x30] sm:$0xff] }
 0x588   : > { %15130 = vmatprep.mubr.bf16.mxu1 %v13771_v30  ;;  %v12349_v30 = vld [vmem:[#allocation3 + $0x6c] sm:$0xe]  ;;  %v13783_v41 = vcombine.low %v12543_v19, %v12546_v61  ;;  %v12959_v61 = vld [vmem:[%s16429_s6 + $0x28] sm:$0xff] }
 0x589   : > { %v13762_v47 = vrot.slane %v12349_v30, 9  ;;  %v12552_v30 = vrot.slane %v12369_v5, 5 }
 0x58b   : > { %v12508_v6 = vsel %vm16924_vm14, %v13762_v47, %v12507_v31  ;;  %v12556_v31 = vrot.slane %v12371_v16, 5  ;;  %v12553_v47 = vsel %vm16924_vm14, %v12551_v2, %v12552_v30 }
 0x58c   : > { %v13778_v28 = vcombine.low %v12508_v6, %v12511_v52  ;;  %v13769_v52 = vrot.slane %v12370_v62, 9  ;;  %v12566_v6 = vrot.slane %v12375_v25, 5  ;;  %v12962_v62 = vld [vmem:[%s16429_s6 + $0x40] sm:$0xff] }
 0x58d   : > { %v12558_v4 = vrot.slane %v12556_v31, 4 }
 0x58f   : > { %15131 = vmatmul.mubr.bf16.vlgmr.msra.gmra.mrb[0].mxu1 %v13772_v18  ;;  %v13779_v18 = vcombine.low %v12515_v24, %v12518_v3  ;;  %v13770_v3 = vrot.slane %v12373_v22, 9  ;;  %v12557_v24 = vsel %vm16924_vm14, %v13769_v52, %v12556_v31  ;;  %v12965_v22 = vld [vmem:[%s16429_s6 + $0x58] sm:$0xff]  ;;  %v12963_v52 = vld [vmem:[%s16429_s6 + $0x48] sm:$0xff] }
 0x590   : > { %15134 = vmatprep.mubr.bf16.mxu1 %v13773_v12  ;;  %v12355_v12 = vld [vmem:[#allocation3 + $0x84] sm:$0xe] }
 0x591   : > { %v13764_v59 = vrot.slane %v12355_v12, 9  ;;  %v18479_v12 = vld [vmem:[%s18636_s4] ss:$0 sm:$0xff] }
 0x593   : > { %v12522_v27 = vsel %vm16924_vm14, %v13764_v59, %v12521_v26 }
 0x594   : > { %v13780_v13 = vcombine.low %v12522_v27, %v12525_v53 }
 0x597   : > { %15135 = vmatmul.mubr.bf16.gmra.mrb[4].mxu1 %v13774_v46  ;;  %v13781_v46 = vcombine.low %v12529_v10, %v12532_v50  ;;  %v12955_v50 = vld [vmem:[%s16429_s6 + $0x8] sm:$0xff] }
 0x598   : > { %15138 = vmatprep.mubr.bf16.mxu1 %v13775_v29  ;;  %v12361_v29 = vld [vmem:[#allocation3 + $0x9c] sm:$0xe] }
 0x599   : > { %v13766_v63 = vrot.slane %v12361_v29, 9 }
 0x59b   : > { %v12536_v60 = vsel %vm16924_vm14, %v13766_v63, %v12535_v44  ;;  %v12961_v63 = vld [vmem:[%s16429_s6 + $0x38] sm:$0xff] }
 0x59c   : > { %v13782_v38 = vcombine.low %v12536_v60, %v12539_v40 }
 0x59f   : > { %15139 = vmatmul.mubr.bf16.gmra.mrb[8].mxu1 %v13776_v8  ;;  %v12374_v8 = vld [vmem:[#allocation3 + $0xd0] sm:$0xf] }
 0x5a0   : > { %15142 = vmatprep.mubr.bf16.mxu1 %v13777_v20  ;;  %v12372_v20 = vld [vmem:[#allocation3 + $0xc8] sm:$0x1]  ;;  %v12563_v36 = vrot.slane %v12374_v8, 5 }
 0x5a1   : > { %v12559_v23 = vrot.slane %v12372_v20, 5 }
 0x5a2   : > { %v12565_v17 = vrot.slane %v12563_v36, 4 }
 0x5a3   : > { %v12560_v26 = vsel %vm16924_vm14, %v12558_v4, %v12559_v23 }
 0x5a4   : > { %v13785_v49 = vcombine.low %v12557_v24, %v12560_v26  ;;  %v12567_v43 = vsel %vm16924_vm14, %v12565_v17, %v12566_v6 }
 0x5a7   : > { %15143 = vmatmul.mubr.bf16.gmra.mrb[12].mxu1 %v13778_v28  ;;  %v13784_v28 = vcombine.low %v12550_v9, %v12553_v47 }
 0x5a8   : > { %15146 = vmatprep.mubr.bf16.mxu1 %v13779_v18  ;;  %v12564_v18 = vsel %vm16924_vm14, %v13770_v3, %v12563_v36 }
 0x5a9   : > { %v13786_v45 = vcombine.low %v12564_v18, %v12567_v43  ;;  %v12968_v43 = vld [vmem:[%s16429_s6 + $0x70] sm:$0xff] }
 0x5af   : > { %15147 = vmatmul.mubr.bf16.gmra.mrb[16].mxu1 %v13780_v13 }
 0x5b0   : > { %15150 = vmatprep.mubr.bf16.mxu1 %v13781_v46 }
 0x5b7   : > { %15151 = vmatmul.mubr.bf16.gmra.mrb[20].mxu1 %v13782_v38 }
 0x5b8   : > { %15154 = vmatprep.mubr.bf16.mxu1 %v13783_v41 }
 0x5bf   : > { %15155 = vmatmul.mubr.bf16.gmra.mrb[24].mxu1 %v13784_v28 }
 0x5c0   : > { %15158 = vmatprep.mubr.bf16.mxu1 %v13785_v49 }
 0x5c7   : > { %15159 = vmatmul.mubr.bf16.gmra.mrb[28].mxu1 %v13786_v45 }
 0x662   : > { %v15132_v15 = vpop.f32.mrb[0].mxu1 }
 0x663   : > { %v15194_v37 = vadd.f32 %v15132_v15, %v18479_v12  ;;  %v12731_v0 = vpop.f32.mrb[1].mxu1 }
 0x664   : > { %v15195_v58 = vadd.f32 %v18479_v12, %v12731_v0  ;;  %v15133_v59 = vpop.f32.mrb[2].mxu1 }
 0x665   : > { %v12988_v53 = vadd.f32 %v15194_v37, %v12956_v21  ;;  %v15196_v44 = vadd.f32 %v15133_v59, %v18479_v12  ;;  %v12734_v51 = vpop.f32.mrb[3].mxu1  ;;  %v12966_v21 = vld [vmem:[%s16429_s6 + $0x60] sm:$0xff] }
 0x666   : > { %v12986_v54 = vadd.f32 %v15195_v58, %v12954_v39  ;;  %v15197_v27 = vadd.f32 %v18479_v12, %v12734_v51  ;;  %v12969_v39 = vld [vmem:[%s16429_s6 + $0x78] sm:$0xff] }
 0x667   : > { %v13020_v13 = vmax.f32 %v12988_v53, 0.0  ;;  %v12989_v10 = vadd.f32 %v15196_v44, %v12957_v35  ;;  %v12967_v53 = vld [vmem:[%s16429_s6 + $0x68] sm:$0xff] }
 0x668   : > { %v13018_v7 = vmax.f32 %v12986_v54, 0.0  ;;  %v12987_v46 = vadd.f32 %v15197_v27, %v12955_v50 }
 0x669   : > { %13052 = vst [vmem:[%s18491_s11 + $0x10] sm:$0xff] %v13020_v13  ;;  %v13021_v33 = vmax.f32 %v12989_v10, 0.0 }
 0x66a   : > { %13050 = vst [vmem:[%s18491_s11] sm:$0xff] %v13018_v7  ;;  %v13019_v11 = vmax.f32 %v12987_v46, 0.0  ;;  %v15136_v29 = vpop.f32.mrb[4].mxu1 }
 0x66b   : > { %13053 = vst [vmem:[%s18491_s11 + $0x18] sm:$0xff] %v13021_v33  ;;  %v15198_v57 = vadd.f32 %v15136_v29, %v18479_v12  ;;  %v12747_v56 = vpop.f32.mrb[5].mxu1  ;;  %v12972_v33 = vld [vmem:[%s16429_s6 + $0x90] sm:$0xff] }
 0x66c   : > { %13051 = vst [vmem:[%s18491_s11 + $0x8] sm:$0xff] %v13019_v11  ;;  %v15199_v16 = vadd.f32 %v18479_v12, %v12747_v56  ;;  %v15137_v34 = vpop.f32.mrb[6].mxu1 }
 0x66d   : > { %v12992_v40 = vadd.f32 %v15198_v57, %v12960_v32  ;;  %v15200_v14 = vadd.f32 %v15137_v34, %v18479_v12  ;;  %v12750_v55 = vpop.f32.mrb[7].mxu1  ;;  %v12970_v32 = vld [vmem:[%s16429_s6 + $0x80] sm:$0xff] }
 0x66e   : > { %v12990_v31 = vadd.f32 %v15199_v16, %v12958_v48  ;;  %v15201_v60 = vadd.f32 %v18479_v12, %v12750_v55  ;;  %v12973_v48 = vld [vmem:[%s16429_s6 + $0x98] sm:$0xff] }
 0x66f   : > { %v13024_v38 = vmax.f32 %v12992_v40, 0.0  ;;  %v12993_v19 = vadd.f32 %v15200_v14, %v12961_v63  ;;  %v12971_v40 = vld [vmem:[%s16429_s6 + $0x88] sm:$0xff] }
 0x670   : > { %v13022_v5 = vmax.f32 %v12990_v31, 0.0  ;;  %v12991_v8 = vadd.f32 %v15201_v60, %v12959_v61 }
 0x671   : > { %13056 = vst [vmem:[%s18491_s11 + $0x30] sm:$0xff] %v13024_v38  ;;  %v13025_v41 = vmax.f32 %v12993_v19, 0.0 }
 0x672   : > { %13054 = vst [vmem:[%s18491_s11 + $0x20] sm:$0xff] %v13022_v5  ;;  %v13023_v2 = vmax.f32 %v12991_v8, 0.0  ;;  %v15140_v20 = vpop.f32.mrb[8].mxu1 }
 0x673   : > { %13057 = vst [vmem:[%s18491_s11 + $0x38] sm:$0xff] %v13025_v41  ;;  %v15202_v4 = vadd.f32 %v15140_v20, %v18479_v12  ;;  %v12763_v30 = vpop.f32.mrb[9].mxu1  ;;  %v12976_v41 = vld [vmem:[%s16429_s6 + $0xb0] sm:$0xff] }
 0x674   : > { %13055 = vst [vmem:[%s18491_s11 + $0x28] sm:$0xff] %v13023_v2  ;;  %v15203_v36 = vadd.f32 %v18479_v12, %v12763_v30  ;;  %v15141_v23 = vpop.f32.mrb[10].mxu1 }
 0x675   : > { %v12996_v25 = vadd.f32 %v15202_v4, %v12964_v1  ;;  %v15204_v42 = vadd.f32 %v15141_v23, %v18479_v12  ;;  %v12766_v47 = vpop.f32.mrb[11].mxu1  ;;  %v12974_v1 = vld [vmem:[%s16429_s6 + $0xa0] sm:$0xff] }
 0x676   : > { %v12994_v26 = vadd.f32 %v15203_v36, %v12962_v62  ;;  %v15205_v9 = vadd.f32 %v18479_v12, %v12766_v47  ;;  %v12977_v62 = vld [vmem:[%s16429_s6 + $0xb8] sm:$0xff] }
 0x677   : > { %v13028_v3 = vmax.f32 %v12996_v25, 0.0  ;;  %v12997_v17 = vadd.f32 %v15204_v42, %v12965_v22  ;;  %v12975_v25 = vld [vmem:[%s16429_s6 + $0xa8] sm:$0xff] }
 0x678   : > { %v13026_v6 = vmax.f32 %v12994_v26, 0.0  ;;  %v12995_v28 = vadd.f32 %v15205_v9, %v12963_v52 }
 0x679   : > { %13060 = vst [vmem:[%s18491_s11 + $0x50] sm:$0xff] %v13028_v3  ;;  %v13029_v24 = vmax.f32 %v12997_v17, 0.0 }
 0x67a   : > { %13058 = vst [vmem:[%s18491_s11 + $0x40] sm:$0xff] %v13026_v6  ;;  %v13027_v49 = vmax.f32 %v12995_v28, 0.0  ;;  %v15144_v18 = vpop.f32.mrb[12].mxu1 }
 0x67b   : > { %13061 = vst [vmem:[%s18491_s11 + $0x58] sm:$0xff] %v13029_v24  ;;  %v15206_v45 = vadd.f32 %v15144_v18, %v18479_v12  ;;  %v12779_v15 = vpop.f32.mrb[13].mxu1  ;;  %v12980_v24 = vld [vmem:[%s16429_s6 + $0xd0] sm:$0xff] }
 0x67c   : > { %13059 = vst [vmem:[%s18491_s11 + $0x48] sm:$0xff] %v13027_v49  ;;  %v15207_v37 = vadd.f32 %v18479_v12, %v12779_v15  ;;  %v15145_v0 = vpop.f32.mrb[14].mxu1 }
 0x67d   : > { %v13000_v58 = vadd.f32 %v15206_v45, %v12968_v43  ;;  %v15208_v59 = vadd.f32 %v15145_v0, %v18479_v12  ;;  %v12782_v35 = vpop.f32.mrb[15].mxu1  ;;  %v12978_v43 = vld [vmem:[%s16429_s6 + $0xc0] sm:$0xff] }
 0x67e   : > { %v12998_v44 = vadd.f32 %v15207_v37, %v12966_v21  ;;  %v15209_v51 = vadd.f32 %v18479_v12, %v12782_v35  ;;  %v12981_v21 = vld [vmem:[%s16429_s6 + $0xd8] sm:$0xff] }
 0x67f   : > { %v13032_v50 = vmax.f32 %v13000_v58, 0.0  ;;  %v13001_v54 = vadd.f32 %v15208_v59, %v12969_v39  ;;  %v12979_v58 = vld [vmem:[%s16429_s6 + $0xc8] sm:$0xff] }
 0x680   : > { %v13030_v27 = vmax.f32 %v12998_v44, 0.0  ;;  %v12999_v13 = vadd.f32 %v15209_v51, %v12967_v53 }
 0x681   : > { %13064 = vst [vmem:[%s18491_s11 + $0x70] sm:$0xff] %v13032_v50  ;;  %v13033_v10 = vmax.f32 %v13001_v54, 0.0 }
 0x682   : > { %13062 = vst [vmem:[%s18491_s11 + $0x60] sm:$0xff] %v13030_v27  ;;  %v13031_v7 = vmax.f32 %v12999_v13, 0.0  ;;  %v15148_v46 = vpop.f32.mrb[16].mxu1 }
 0x683   : > { %13065 = vst [vmem:[%s18491_s11 + $0x78] sm:$0xff] %v13033_v10  ;;  %v15210_v11 = vadd.f32 %v15148_v46, %v18479_v12  ;;  %v12795_v29 = vpop.f32.mrb[17].mxu1  ;;  %v12984_v10 = vld [vmem:[%s16429_s6 + $0xf0] sm:$0xff] }
 0x684   : > { %13063 = vst [vmem:[%s18491_s11 + $0x68] sm:$0xff] %v13031_v7  ;;  %v15211_v57 = vadd.f32 %v18479_v12, %v12795_v29  ;;  %v15149_v56 = vpop.f32.mrb[18].mxu1 }
 0x685   : > { %v13004_v16 = vadd.f32 %v15210_v11, %v12972_v33  ;;  %v15212_v34 = vadd.f32 %v15149_v56, %v18479_v12  ;;  %v12798_v63 = vpop.f32.mrb[19].mxu1  ;;  %v12982_v33 = vld [vmem:[%s16429_s6 + $0xe0] sm:$0xff] }
 0x686   : > { %v13002_v14 = vadd.f32 %v15211_v57, %v12970_v32  ;;  %v15213_v55 = vadd.f32 %v18479_v12, %v12798_v63  ;;  %v12985_v32 = vld [vmem:[%s16429_s6 + $0xf8] sm:$0xff] }
 0x687   : > { %v13036_v61 = vmax.f32 %v13004_v16, 0.0  ;;  %v13005_v31 = vadd.f32 %v15212_v34, %v12973_v48  ;;  %v12983_v16 = vld [vmem:[%s16429_s6 + $0xe8] sm:$0xff] }
 0x688   : > { %v13034_v60 = vmax.f32 %v13002_v14, 0.0  ;;  %v13003_v38 = vadd.f32 %v15213_v55, %v12971_v40 }
 0x689   : > { %13068 = vst [vmem:[%s18491_s11 + $0x90] sm:$0xff] %v13036_v61  ;;  %v13037_v19 = vmax.f32 %v13005_v31, 0.0 }
 0x68a   : > { %13066 = vst [vmem:[%s18491_s11 + $0x80] sm:$0xff] %v13034_v60  ;;  %v13035_v5 = vmax.f32 %v13003_v38, 0.0  ;;  %v15152_v8 = vpop.f32.mrb[20].mxu1 }
 0x68b   : > { %13069 = vst [vmem:[%s18491_s11 + $0x98] sm:$0xff] %v13037_v19  ;;  %v15214_v2 = vadd.f32 %v15152_v8, %v18479_v12  ;;  %v12811_v20 = vpop.f32.mrb[21].mxu1 }
 0x68c   : > { %13067 = vst [vmem:[%s18491_s11 + $0x88] sm:$0xff] %v13035_v5  ;;  %v15215_v4 = vadd.f32 %v18479_v12, %v12811_v20  ;;  %v15153_v30 = vpop.f32.mrb[22].mxu1 }
 0x68d   : > { %v13008_v36 = vadd.f32 %v15214_v2, %v12976_v41  ;;  %v15216_v23 = vadd.f32 %v15153_v30, %v18479_v12  ;;  %v12814_v22 = vpop.f32.mrb[23].mxu1 }
 0x68e   : > { %v13006_v42 = vadd.f32 %v15215_v4, %v12974_v1  ;;  %v15217_v47 = vadd.f32 %v18479_v12, %v12814_v22 }
 0x68f   : > { %v13040_v52 = vmax.f32 %v13008_v36, 0.0  ;;  %v13009_v26 = vadd.f32 %v15216_v23, %v12977_v62 }
 0x690   : > { %v13038_v9 = vmax.f32 %v13006_v42, 0.0  ;;  %v13007_v3 = vadd.f32 %v15217_v47, %v12975_v25 }
 0x691   : > { %13072 = vst [vmem:[%s18491_s11 + $0xb0] sm:$0xff] %v13040_v52  ;;  %v13041_v17 = vmax.f32 %v13009_v26, 0.0 }
 0x692   : > { %13070 = vst [vmem:[%s18491_s11 + $0xa0] sm:$0xff] %v13038_v9  ;;  %v13039_v6 = vmax.f32 %v13007_v3, 0.0  ;;  %v15156_v28 = vpop.f32.mrb[24].mxu1 }
 0x693   : > { %13073 = vst [vmem:[%s18491_s11 + $0xb8] sm:$0xff] %v13041_v17  ;;  %v15218_v49 = vadd.f32 %v15156_v28, %v18479_v12  ;;  %v12827_v18 = vpop.f32.mrb[25].mxu1 }
 0x694   : > { %13071 = vst [vmem:[%s18491_s11 + $0xa8] sm:$0xff] %v13039_v6  ;;  %v15219_v45 = vadd.f32 %v18479_v12, %v12827_v18  ;;  %v15157_v15 = vpop.f32.mrb[26].mxu1 }
 0x695   : > { %v13012_v37 = vadd.f32 %v15218_v49, %v12980_v24  ;;  %v15220_v0 = vadd.f32 %v15157_v15, %v18479_v12  ;;  %v12830_v39 = vpop.f32.mrb[27].mxu1 }
 0x696   : > { %v13010_v59 = vadd.f32 %v15219_v45, %v12978_v43  ;;  %v15221_v35 = vadd.f32 %v18479_v12, %v12830_v39 }
 0x697   : > { %v13044_v53 = vmax.f32 %v13012_v37, 0.0  ;;  %v13013_v44 = vadd.f32 %v15220_v0, %v12981_v21 }
 0x698   : > { %v13042_v51 = vmax.f32 %v13010_v59, 0.0  ;;  %v13011_v50 = vadd.f32 %v15221_v35, %v12979_v58 }
 0x699   : > { %13076 = vst [vmem:[%s18491_s11 + $0xd0] sm:$0xff] %v13044_v53  ;;  %v13045_v54 = vmax.f32 %v13013_v44, 0.0 }
 0x69a   : > { %13074 = vst [vmem:[%s18491_s11 + $0xc0] sm:$0xff] %v13042_v51  ;;  %v13043_v27 = vmax.f32 %v13011_v50, 0.0  ;;  %v15160_v13 = vpop.f32.mrb[28].mxu1 }
 0x69b   : > { %13077 = vst [vmem:[%s18491_s11 + $0xd8] sm:$0xff] %v13045_v54  ;;  %v15222_v7 = vadd.f32 %v15160_v13, %v18479_v12  ;;  %v12843_v46 = vpop.f32.mrb[29].mxu1 }
 0x69c   : > { %13075 = vst [vmem:[%s18491_s11 + $0xc8] sm:$0xff] %v13043_v27  ;;  %v15223_v11 = vadd.f32 %v18479_v12, %v12843_v46  ;;  %v15161_v29 = vpop.f32.mrb[30].mxu1 }
 0x69d   : > { %v13016_v57 = vadd.f32 %v15222_v7, %v12984_v10  ;;  %v15224_v56 = vadd.f32 %v15161_v29, %v18479_v12  ;;  %v12846_v48 = vpop.f32.mrb[31].mxu1 }
 0x69e   : > { %v13014_v34 = vadd.f32 %v15223_v11, %v12982_v33  ;;  %v15225_v63 = vadd.f32 %v18479_v12, %v12846_v48 }
 0x69f   : > { %v13048_v40 = vmax.f32 %v13016_v57, 0.0  ;;  %v13017_v14 = vadd.f32 %v15224_v56, %v12985_v32 }
 0x6a0   : > { %v13046_v55 = vmax.f32 %v13014_v34, 0.0  ;;  %v13015_v61 = vadd.f32 %v15225_v63, %v12983_v16 }
 0x6a1   : > { %13080 = vst [vmem:[%s18491_s11 + $0xf0] sm:$0xff] %v13048_v40  ;;  %v13049_v31 = vmax.f32 %v13017_v14, 0.0 }
 0x6a2   : > { %13078 = vst [vmem:[%s18491_s11 + $0xe0] sm:$0xff] %v13046_v55  ;;  %v13047_v12 = vmax.f32 %v13015_v61, 0.0 }
 0x6a3   : > { %13081 = vst [vmem:[%s18491_s11 + $0xf8] sm:$0xff] %v13049_v31 }
 0x6a4   : > { %13079 = vst [vmem:[%s18491_s11 + $0xe8] sm:$0xff] %v13047_v12 }
 0x6a5   : > { %16151 = shalt.err (!%p16148_p2)
}
 0x6a6   : > { %s16152_s6 = scalar_lea.hbm %s18583_s9, 4096  ;;  %s16156_s8 = scalar_lea.hbm %s18637_s5, 8192 }
 0x6a7   : > { %p16153_p13 = scmp.ne.s32.totalorder %s18583_s9, %s16152_s6  ;;  %p16157_p4 = scmp.lt.u32.totalorder %s18583_s9, %s18637_s5 }
 0x6a8   : > { %p16158_p5 = scmp.lt.u32.totalorder %s16156_s8, %s16152_s6  ;;  %p16160_p11 = scmp.lt.u32.totalorder %s16152_s6, %s18583_s9 }
 0x6a9   : > { %p16154_p6 = pnand %p16153_p13, %p18699_p0 }
 0x6aa   : > { %p16159_p8 = por %p16158_p5, %p16157_p4 }
 0x6ab   : > { %p16155_p10 = pneg %p16154_p6 }
 0x6ac   : > { %p16161_p1 = por %p16160_p11, %p16159_p8 }
 0x6ae   : > { %p16162_p3 = pnand %p16161_p1, %p16155_p10 }
 0x6b0   : > { %16165 = shalt.err (!%p16162_p3)
}
 0x6b1   : > { %s16219_s28 = smov 128   ;;  %s16220_s15 = smov 8  }
 0x6b2   : > { %15748 = dma.vmem_to_hbm [thread:$0]  (%p18699_p0), %s18585_s30, 4096, %s18583_s9, %s13083_s22, %s16219_s28, %s16219_s28, %s16220_s15  }
 0x6b3 PF: > { %s13111_s16 = sand.u32 1, %s16196_s18   ;;  %p18700_p7 = scmp.ne.s32.totalorder %s18654_s25, 0 }
 0x6b4   : > { %p18701_p9 = scmp.ge.s32.totalorder %s16208_s21, 2  ;;  %s13112_s12 = scalar_lea.sflag [#allocation7], %s13111_s16 }
 0x6b6   : > { %p15762_p12 = pnand %p18701_p9, %p18700_p7 }
 0x6b8   : > { %16191 = dma.done.wait (!%p15762_p12), %s13112_s12, 4096  }
 0x6b9   : > { %16193 = vsyncadd (!%p15762_p12), %s13112_s12, 4294963200  ;;  %p19_p2 = scmp.ge.s32.totalorder %s16361_s14, 4   ;;  %s18702_s18 = smov %s16200_s19 }
 0x6ba   : > { %s18703_s19 = smov %s16204_s20  ;;  %s18704_s20 = smov %s16377_s27 }
 0x6bb   : > { %s18705_s21 = smov %s16361_s14  ;;  %21 = sbr.rel (!%p19_p2) target bundleno = 6 (0x6), region = 115 }
 0x6c2   :  { %13117 = vsyncpa [#allocation6], 1 }
 0x6c3   :  { %13119 = vsyncpa [#allocation6 + $0x1], 1 }
 0x6c4   :  { %13120 = vsyncpa [#allocation9], 1 }
 0x6c5   :  { %13121 = vsyncpa [#allocation7], 1 }
 0x6c6   :  { %13123 = vsyncpa [#allocation7 + $0x1], 1 }

</bundles_post_ra>
